<compile_context>
chip_gen: v7x
topology: tpu7x:2x2x1
jax: 0.10.0
libtpu: 0.0.40
codegen_flags: <defaults>
</compile_context>

<pallas_src>
import jax
import jax.numpy as jnp
from jax.experimental import pallas as pl
from jax.experimental.pallas import tpu as pltpu


# ---------------------------------------------------------------------------
# Static bookkeeping for the stride-2 ConvTranspose2d sub-pixel decomposition.
# ---------------------------------------------------------------------------
def _convT_s2_meta(k, p):
    oy_min, q_min, a_max = [], [], []
    for r in (0, 1):
        om = 0 if (p % 2) == r else 1
        oy_min.append(om)
        q_min.append((om + p - r) // 2)
        a_max.append((k - 1 - r) // 2)
    pad_b = max(0, max(a_max[r] - q_min[r] for r in (0, 1)))
    K2 = 1 + max(q_min[r] + pad_b for r in (0, 1))
    return oy_min, q_min, pad_b, K2


_META_DEC2 = _convT_s2_meta(5, 1)   # ConvTranspose2d(64, 32, 5, s=2, p=1, op=1)
_META_DEC3 = _convT_s2_meta(3, 1)   # ConvTranspose2d(32,  3, 3, s=2, p=1, op=1)


# ---------------------------------------------------------------------------
# Weight packing (done ONCE at init -- never in the forward path).
# Every layer's weight becomes a tap-major 2D matrix (k*k*Cin, Cout) so the
# in-kernel conv is a single MXU matmul with the taps packed into K.
# ---------------------------------------------------------------------------
def _pack_conv_s1_weight(w):
    """(Cout, Cin, kh, kw) -> (kh*kw*Cin, Cout) bf16, tap-major (row, col)."""
    cout, cin, kh, kw = w.shape
    wt = jnp.transpose(w, (2, 3, 1, 0)).reshape(kh * kw * cin, cout)
    return wt.astype(jnp.bfloat16)


def _pack_convT_s1_weight(w):
    """(Cin, Cout, k, k) ConvTranspose weight -> equivalent stride-1 conv pack."""
    w_eq = jnp.transpose(jnp.flip(w, axis=(2, 3)), (1, 0, 2, 3))   # (Cout, Cin, k, k)
    return _pack_conv_s1_weight(w_eq)


def _pack_conv_s2_weight(w):
    """Stride-2 Conv2d weight -> (K2*K2*4*Cin, Cout) bf16 for the in-kernel
    space-to-depth stride-1 formulation.  Parity blocks ordered (u, v)."""
    cout, cin, k, k2_ = w.shape
    assert k == k2_, "square kernels only"
    K2 = (k + 1) // 2
    taps = []
    for a in range(K2):
        for b in range(K2):
            blocks = []
            for u in (0, 1):
                for v in (0, 1):
                    i, j = 2 * a + u, 2 * b + v
                    if i < k and j < k:
                        blocks.append(jnp.transpose(w[:, :, i, j]))   # (Cin, Cout)
                    else:
                        blocks.append(jnp.zeros((cin, cout), w.dtype))
            taps.append(jnp.concatenate(blocks, axis=0))              # (4*Cin, Cout)
    out = jnp.stack(taps, axis=0)                                     # (T, 4Cin, Cout)
    return out.reshape(out.shape[0] * out.shape[1], cout).astype(jnp.bfloat16)


def _pack_convT_s2_weight(w, pad):
    """Stride-2 ConvTranspose weight (Cin, Cout, k, k) -> (K2*K2*Cin, 4*Cout) bf16.
    Output-channel blocks ordered by output parity class (r, s)."""
    cin, cout, k, k2_ = w.shape
    assert k == k2_, "square kernels only"
    _, q_min, pad_b, K2 = _convT_s2_meta(k, pad)
    taps = []
    for ap in range(K2):
        for bp in range(K2):
            blocks = []
            for r in (0, 1):
                for s in (0, 1):
                    i = 2 * (q_min[r] + pad_b - ap) + r
                    j = 2 * (q_min[s] + pad_b - bp) + s
                    if 0 <= i < k and 0 <= j < k:
                        blocks.append(w[:, :, i, j])                  # (Cin, Cout)
                    else:
                        blocks.append(jnp.zeros((cin, cout), w.dtype))
            taps.append(jnp.concatenate(blocks, axis=1))              # (Cin, 4*Cout)
    out = jnp.stack(taps, axis=0)                                     # (T, Cin, 4Cout)
    return out.reshape(out.shape[0] * out.shape[1], 4 * cout).astype(jnp.bfloat16)


# ---------------------------------------------------------------------------
# In-kernel helpers.  Only ops with robust Mosaic lowering are used:
# static slices, concatenation, leading-dim / canonical (B,T,D)<->(BT,D)
# reshapes, stacks, 2D dots and elementwise math.
# ---------------------------------------------------------------------------
def _pad_hw(x, before, after):
    """Zero-pad the two spatial dims of a (H, W, C) value by (before, after)."""
    H, W, C = x.shape
    dt = x.dtype
    rows = []
    if before:
        rows.append(jnp.zeros((before, W, C), dt))
    rows.append(x)
    if after:
        rows.append(jnp.zeros((after, W, C), dt))
    x = jnp.concatenate(rows, axis=0) if len(rows) > 1 else x
    Hp = H + before + after
    cols = []
    if before:
        cols.append(jnp.zeros((Hp, before, C), dt))
    cols.append(x)
    if after:
        cols.append(jnp.zeros((Hp, after, C), dt))
    return jnp.concatenate(cols, axis=1) if len(cols) > 1 else x


def _space_to_depth2(xp):
    """(Hp, Wp, C) (Hp, Wp even) -> (Hp//2, Wp//2, 4*C), parity planes (u, v)."""
    Hp, Wp, C = xp.shape
    assert Hp % 2 == 0 and Wp % 2 == 0
    # Column parity de-interleave via static slices + concat (VMEM-resident).
    rows = {}
    for v in (0, 1):
        pieces = [xp[:, c:c + 1, :] for c in range(v, Wp, 2)]
        cv = jnp.concatenate(pieces, axis=1)                  # (Hp, Wp//2, C)
        cv = cv.reshape(Hp // 2, 2, Wp // 2, C)               # row-parity split
        rows[v] = (cv[:, 0], cv[:, 1])
    planes = [rows[v][u] for u in (0, 1) for v in (0, 1)]     # order (u, v)
    return jnp.concatenate(planes, axis=-1)                   # (Hp/2, Wp/2, 4C)


def _conv_s1_block(x, w2d, b, kh, kw, act):
    """Stride-1 'valid' conv + bias + activation as ONE MXU matmul.
    x: (H, W, Cin) bf16; w2d: (kh*kw*Cin, Cout) bf16 tap-major; b: (1, Cout) f32.
    Returns (Ho, Wo, Cout) f32."""
    H, W, Cin = x.shape
    Ho, Wo = H - kh + 1, W - kw + 1
    assert Ho >= 1 and Wo >= 1
    assert w2d.shape[0] == kh * kw * Cin
    taps = [x[i:i + Ho, j:j + Wo, :] for i in range(kh) for j in range(kw)]
    patch = jnp.concatenate(taps, axis=-1)                    # (Ho, Wo, kh*kw*Cin)
    patch = patch.reshape(Ho * Wo, kh * kw * Cin)             # M = Ho*Wo, K packed
    y = jnp.dot(patch, w2d, preferred_element_type=jnp.float32) + b
    if act == "relu":
        y = jnp.maximum(y, 0.0)
    elif act == "sigmoid":
        y = jax.nn.sigmoid(y)
    return y.reshape(Ho, Wo, w2d.shape[1])


def _interleave_subpixel(sub, cout, oy_min):
    """Depth-to-space for the sub-pixel ConvTranspose decomposition.
    sub: (t, t, 4*cout), channel blocks ordered (r, s); plane (r, s) provides
    output rows oy_min[r]::2 and cols oy_min[s]::2.  Returns (2t, 2t, cout)."""
    t = sub.shape[0]
    assert sub.shape[1] == t and sub.shape[2] == 4 * cout
    blk = {}
    for r in (0, 1):
        for s in (0, 1):
            i = r * 2 + s
            blk[(r, s)] = sub[:, :, i * cout:(i + 1) * cout]   # (t, t, cout)
    even_cls = 0 if oy_min[0] == 0 else 1                      # class at offset 0
    odd_cls = 1 - even_cls

    def class_rows(r):
        rows = []
        for a in range(t):
            e = blk[(r, even_cls)][a]                          # even cols (t, cout)
            o = blk[(r, odd_cls)][a]                           # odd  cols (t, cout)
            rows.append(jnp.stack([e, o], axis=1).reshape(2 * t, cout))
        return jnp.stack(rows, axis=0)                         # (t, 2t, cout)

    r_even = class_rows(even_cls)
    r_odd = class_rows(odd_cls)
    return jnp.stack([r_even, r_odd], axis=1).reshape(2 * t, 2 * t, cout)


# ---------------------------------------------------------------------------
# The fused whole-network kernel: one grid step = one batch image.
# ---------------------------------------------------------------------------
def _newnorm2b_kernel(x_ref, w1, w2, w3, w4, w5, w6,
                      b1, b2, b3, b4, b5, b6, o_ref):
    bf16 = jnp.bfloat16
    x = x_ref[0]                                               # (16,16,3) bf16

    # ---- encoder ---------------------------------------------------------
    # Conv2d(3,32,3,s=2,p=1) + ReLU                 (16,16,3) -> (8,8,32)
    e1 = _conv_s1_block(_space_to_depth2(_pad_hw(x, 1, 1)),
                        w1[...], b1[...], 2, 2, "relu").astype(bf16)
    # Conv2d(32,64,5,s=2,p=1) + Dropout2d + ReLU    (8,8,32) -> (3,3,64)
    e2 = _conv_s1_block(_space_to_depth2(_pad_hw(e1, 1, 1)),
                        w2[...], b2[...], 3, 3, "relu").astype(bf16)
    # Conv2d(64,128,3) + Dropout2d                  (3,3,64) -> (1,1,128)
    e3 = _conv_s1_block(e2, w3[...], b3[...], 3, 3, None).astype(bf16)

    # ---- decoder ---------------------------------------------------------
    # ConvTranspose2d(128,64,3) + Dropout2d + ReLU  (1,1,128) -> (3,3,64)
    d1 = _conv_s1_block(_pad_hw(e3, 2, 2),
                        w4[...], b4[...], 3, 3, "relu").astype(bf16)
    # ConvTranspose2d(64,32,5,s=2,p=1,op=1) + ReLU  (3,3,64) -> (8,8,32)
    oy2, _, padb2, k22 = _META_DEC2
    h2 = d1.shape[0]
    ho2 = (h2 - 1) * 2 - 2 * 1 + 5 + 1
    pa2 = ho2 // 2 + k22 - 1 - h2 - padb2
    sub2 = _conv_s1_block(_pad_hw(d1, padb2, pa2),
                          w5[...], b5[...], k22, k22, "relu")  # (4,4,128) f32
    d2 = _interleave_subpixel(sub2, 32, oy2).astype(bf16)      # (8,8,32)
    # ConvTranspose2d(32,3,3,s=2,p=1,op=1) + Sigmoid (8,8,32) -> (16,16,3)
    oy3, _, padb3, k23 = _META_DEC3
    h3 = d2.shape[0]
    ho3 = (h3 - 1) * 2 - 2 * 1 + 3 + 1
    pa3 = ho3 // 2 + k23 - 1 - h3 - padb3
    sub3 = _conv_s1_block(_pad_hw(d2, padb3, pa3),
                          w6[...], b6[...], k23, k23, "sigmoid")   # (8,8,12) f32
    y = _interleave_subpixel(sub3, 3, oy3)                         # (16,16,3) f32

    o_ref[0] = y.astype(o_ref.dtype)


# ---------------------------------------------------------------------------
# Parameters.
# ---------------------------------------------------------------------------
def init_params(key):
    """PyTorch-layout (raw) parameters."""
    def conv_w(k, cout, cin, kh, kw):
        return jax.random.normal(k, (cout, cin, kh, kw), jnp.float32) / jnp.sqrt(cin * kh * kw)

    def convt_w(k, cin, cout, kh, kw):
        return jax.random.normal(k, (cin, cout, kh, kw), jnp.float32) / jnp.sqrt(cin * kh * kw)

    ks = jax.random.split(key, 12)
    return {
        "enc1_w": conv_w(ks[0], 32, 3, 3, 3),    "enc1_b": 0.01 * jax.random.normal(ks[1], (32,)),
        "enc2_w": conv_w(ks[2], 64, 32, 5, 5),   "enc2_b": 0.01 * jax.random.normal(ks[3], (64,)),
        "enc3_w": conv_w(ks[4], 128, 64, 3, 3),  "enc3_b": 0.01 * jax.random.normal(ks[5], (128,)),
        "dec1_w": convt_w(ks[6], 128, 64, 3, 3), "dec1_b": 0.01 * jax.random.normal(ks[7], (64,)),
        "dec2_w": convt_w(ks[8], 64, 32, 5, 5),  "dec2_b": 0.01 * jax.random.normal(ks[9], (32,)),
        "dec3_w": convt_w(ks[10], 32, 3, 3, 3),  "dec3_b": 0.01 * jax.random.normal(ks[11], (3,)),
    }


def pack_params(raw):
    """Hoisted out of the forward: all flips/transposes/parity packing/bf16 casts."""
    def b32(b):
        return b.reshape(1, -1).astype(jnp.float32)
    return {
        "w1": _pack_conv_s2_weight(raw["enc1_w"]),        "b1": b32(raw["enc1_b"]),
        "w2": _pack_conv_s2_weight(raw["enc2_w"]),        "b2": b32(raw["enc2_b"]),
        "w3": _pack_conv_s1_weight(raw["enc3_w"]),        "b3": b32(raw["enc3_b"]),
        "w4": _pack_convT_s1_weight(raw["dec1_w"]),       "b4": b32(raw["dec1_b"]),
        "w5": _pack_convT_s2_weight(raw["dec2_w"], 1),    "b5": b32(jnp.tile(raw["dec2_b"], 4)),
        "w6": _pack_convT_s2_weight(raw["dec3_w"], 1),    "b6": b32(jnp.tile(raw["dec3_b"], 4)),
    }


# ---------------------------------------------------------------------------
# NewNorm2b forward (NCHW in / NCHW out, like PyTorch).  Dropout2d = identity.
# ---------------------------------------------------------------------------
def new_norm2b_forward(x_nchw, pk):
    B, C, H, W = x_nchw.shape
    assert C == 3 and H == 16 and W == 16, "fused kernel is specialized to 3x16x16"
    x = jnp.transpose(x_nchw, (0, 2, 3, 1)).astype(jnp.bfloat16)    # NHWC bf16

    weights = [pk[f"w{i}"] for i in range(1, 7)]
    biases = [pk[f"b{i}"] for i in range(1, 7)]

    out = pl.pallas_call(
        _newnorm2b_kernel,
        out_shape=jax.ShapeDtypeStruct((B, H, W, 3), jnp.float32),
        grid=(B,),
        in_specs=(
            [pl.BlockSpec((1, H, W, 3), lambda b: (b, 0, 0, 0))]
            # Constant-index weight/bias blocks are DMA'd once and revisited.
            + [pl.BlockSpec(w.shape, lambda b: (0, 0)) for w in weights]
            + [pl.BlockSpec(bb.shape, lambda b: (0, 0)) for bb in biases]
        ),
        out_specs=pl.BlockSpec((1, H, W, 3), lambda b: (b, 0, 0, 0)),
        compiler_params=pltpu.CompilerParams(
            dimension_semantics=("parallel",),
            vmem_limit_bytes=32 * 1024 * 1024,
        ),
    )(x, *weights, *biases)

    return jnp.transpose(out, (0, 3, 1, 2))                          # NCHW f32


# ---------------------------------------------------------------------------
# Pure-XLA f32 reference (correctness check only).
# ---------------------------------------------------------------------------
def _ref_conv(x, w, b, stride, padding):
    y = jax.lax.conv_general_dilated(
        x, w, (stride, stride), [(padding, padding)] * 2,
        dimension_numbers=("NCHW", "OIHW", "NCHW"), precision="highest")
    return y + b.reshape(1, -1, 1, 1)


def _ref_convT(x, w, b, stride, padding, output_padding):
    k = w.shape[2]
    w_eq = jnp.flip(jnp.transpose(w, (1, 0, 2, 3)), axis=(2, 3))
    y = jax.lax.conv_general_dilated(
        x, w_eq, (1, 1),
        [(k - 1 - padding, k - 1 - padding + output_padding)] * 2,
        lhs_dilation=(stride, stride),
        dimension_numbers=("NCHW", "OIHW", "NCHW"), precision="highest")
    return y + b.reshape(1, -1, 1, 1)


def reference_forward(x, p):
    x = jax.nn.relu(_ref_conv(x, p["enc1_w"], p["enc1_b"], 2, 1))
    x = jax.nn.relu(_ref_conv(x, p["enc2_w"], p["enc2_b"], 2, 1))
    x = _ref_conv(x, p["enc3_w"], p["enc3_b"], 1, 0)
    x = jax.nn.relu(_ref_convT(x, p["dec1_w"], p["dec1_b"], 1, 0, 0))
    x = jax.nn.relu(_ref_convT(x, p["dec2_w"], p["dec2_b"], 2, 1, 1))
    x = jax.nn.sigmoid(_ref_convT(x, p["dec3_w"], p["dec3_b"], 2, 1, 1))
    return x


if __name__ == "__main__":
    key = jax.random.PRNGKey(0)
    k_params, k_x = jax.random.split(key)
    raw_params = init_params(k_params)
    packed = pack_params(raw_params)              # one-time weight packing

    x = jax.random.normal(k_x, (2, 3, 16, 16), jnp.float32)   # NCHW

    fwd = jax.jit(new_norm2b_forward)
    y = jax.block_until_ready(fwd(x, packed))

    assert y.shape == (2, 3, 16, 16), y.shape
    assert bool(jnp.all(jnp.isfinite(y)))
    assert bool(jnp.all((y >= 0.0) & (y <= 1.0)))             # sigmoid range

    y_ref = jax.block_until_ready(reference_forward(x, raw_params))
    max_err = float(jnp.max(jnp.abs(y - y_ref)))
    assert max_err < 5e-2, f"mismatch vs f32 reference: {max_err}"

    print("KERNEL_OK")
</pallas_src>

<mosaic_0001>
module attributes {stable_mosaic.version = 11 : i64} {
  func.func @_newnorm2b_kernel(%arg0: i32, %arg1: memref<1x16x16x3xbf16, #tpu.memory_space<vmem>>, %arg2: memref<48x32xbf16, #tpu.memory_space<vmem>>, %arg3: memref<1152x64xbf16, #tpu.memory_space<vmem>>, %arg4: memref<576x128xbf16, #tpu.memory_space<vmem>>, %arg5: memref<1152x64xbf16, #tpu.memory_space<vmem>>, %arg6: memref<576x128xbf16, #tpu.memory_space<vmem>>, %arg7: memref<128x12xbf16, #tpu.memory_space<vmem>>, %arg8: memref<1x32xf32, #tpu.memory_space<vmem>>, %arg9: memref<1x64xf32, #tpu.memory_space<vmem>>, %arg10: memref<1x128xf32, #tpu.memory_space<vmem>>, %arg11: memref<1x64xf32, #tpu.memory_space<vmem>>, %arg12: memref<1x128xf32, #tpu.memory_space<vmem>>, %arg13: memref<1x12xf32, #tpu.memory_space<vmem>>, %arg14: memref<1x16x16x3xf32, #tpu.memory_space<vmem>>) attributes {dimension_semantics = [#tpu.dimension_semantics<parallel>], iteration_bounds = array<i64: 2>, scalar_prefetch = 0 : i64, scratch_operands = 0 : i64, tpu.core_type = #tpu.core_type<tc>, window_params = [{transform_indices = @transform_0, window_bounds = array<i64: 1, 16, 16, 3>}, {pipeline_mode = #tpu.pipeline_mode<synchronous>, transform_indices = @transform_1, window_bounds = array<i64: 48, 32>}, {pipeline_mode = #tpu.pipeline_mode<synchronous>, transform_indices = @transform_2, window_bounds = array<i64: 1152, 64>}, {pipeline_mode = #tpu.pipeline_mode<synchronous>, transform_indices = @transform_3, window_bounds = array<i64: 576, 128>}, {pipeline_mode = #tpu.pipeline_mode<synchronous>, transform_indices = @transform_4, window_bounds = array<i64: 1152, 64>}, {pipeline_mode = #tpu.pipeline_mode<synchronous>, transform_indices = @transform_5, window_bounds = array<i64: 576, 128>}, {pipeline_mode = #tpu.pipeline_mode<synchronous>, transform_indices = @transform_6, window_bounds = array<i64: 128, 12>}, {pipeline_mode = #tpu.pipeline_mode<synchronous>, transform_indices = @transform_7, window_bounds = array<i64: 1, 32>}, {pipeline_mode = #tpu.pipeline_mode<synchronous>, transform_indices = @transform_8, window_bounds = array<i64: 1, 64>}, {pipeline_mode = #tpu.pipeline_mode<synchronous>, transform_indices = @transform_9, window_bounds = array<i64: 1, 128>}, {pipeline_mode = #tpu.pipeline_mode<synchronous>, transform_indices = @transform_10, window_bounds = array<i64: 1, 64>}, {pipeline_mode = #tpu.pipeline_mode<synchronous>, transform_indices = @transform_11, window_bounds = array<i64: 1, 128>}, {pipeline_mode = #tpu.pipeline_mode<synchronous>, transform_indices = @transform_12, window_bounds = array<i64: 1, 12>}, {transform_indices = @transform_13, window_bounds = array<i64: 1, 16, 16, 3>}]} {
    %c0 = arith.constant 0 : index
    %c0_0 = arith.constant 0 : index
    %c0_1 = arith.constant 0 : index
    %c0_2 = arith.constant 0 : index
    %0 = vector.load %arg1[%c0, %c0_0, %c0_1, %c0_2] : memref<1x16x16x3xbf16, #tpu.memory_space<vmem>>, vector<1x16x16x3xbf16>
    %1 = vector.shape_cast %0 : vector<1x16x16x3xbf16> to vector<16x16x3xbf16>
    %cst = arith.constant 0.000000e+00 : bf16
    %2 = vector.broadcast %cst : bf16 to vector<1x16x3xbf16>
    %cst_3 = arith.constant 0.000000e+00 : bf16
    %3 = vector.broadcast %cst_3 : bf16 to vector<1x16x3xbf16>
    %4 = tpu.concatenate %2, %1, %3 in 0 : vector<1x16x3xbf16>, vector<16x16x3xbf16>, vector<1x16x3xbf16> -> vector<18x16x3xbf16>
    %cst_4 = arith.constant 0.000000e+00 : bf16
    %5 = vector.broadcast %cst_4 : bf16 to vector<18x1x3xbf16>
    %cst_5 = arith.constant 0.000000e+00 : bf16
    %6 = vector.broadcast %cst_5 : bf16 to vector<18x1x3xbf16>
    %7 = tpu.concatenate %5, %4, %6 in 1 : vector<18x1x3xbf16>, vector<18x16x3xbf16>, vector<18x1x3xbf16> -> vector<18x18x3xbf16>
    %8 = vector.extract_strided_slice %7 {offsets = [0, 0, 0], sizes = [18, 1, 3], strides = [1, 1, 1]} : vector<18x18x3xbf16> to vector<18x1x3xbf16>
    %9 = vector.extract_strided_slice %7 {offsets = [0, 2, 0], sizes = [18, 1, 3], strides = [1, 1, 1]} : vector<18x18x3xbf16> to vector<18x1x3xbf16>
    %10 = vector.extract_strided_slice %7 {offsets = [0, 4, 0], sizes = [18, 1, 3], strides = [1, 1, 1]} : vector<18x18x3xbf16> to vector<18x1x3xbf16>
    %11 = vector.extract_strided_slice %7 {offsets = [0, 6, 0], sizes = [18, 1, 3], strides = [1, 1, 1]} : vector<18x18x3xbf16> to vector<18x1x3xbf16>
    %12 = vector.extract_strided_slice %7 {offsets = [0, 8, 0], sizes = [18, 1, 3], strides = [1, 1, 1]} : vector<18x18x3xbf16> to vector<18x1x3xbf16>
    %13 = vector.extract_strided_slice %7 {offsets = [0, 10, 0], sizes = [18, 1, 3], strides = [1, 1, 1]} : vector<18x18x3xbf16> to vector<18x1x3xbf16>
    %14 = vector.extract_strided_slice %7 {offsets = [0, 12, 0], sizes = [18, 1, 3], strides = [1, 1, 1]} : vector<18x18x3xbf16> to vector<18x1x3xbf16>
    %15 = vector.extract_strided_slice %7 {offsets = [0, 14, 0], sizes = [18, 1, 3], strides = [1, 1, 1]} : vector<18x18x3xbf16> to vector<18x1x3xbf16>
    %16 = vector.extract_strided_slice %7 {offsets = [0, 16, 0], sizes = [18, 1, 3], strides = [1, 1, 1]} : vector<18x18x3xbf16> to vector<18x1x3xbf16>
    %17 = tpu.concatenate %8, %9, %10, %11, %12, %13, %14, %15, %16 in 1 : vector<18x1x3xbf16>, vector<18x1x3xbf16>, vector<18x1x3xbf16>, vector<18x1x3xbf16>, vector<18x1x3xbf16>, vector<18x1x3xbf16>, vector<18x1x3xbf16>, vector<18x1x3xbf16>, vector<18x1x3xbf16> -> vector<18x9x3xbf16>
    %18 = vector.shape_cast %17 : vector<18x9x3xbf16> to vector<9x2x9x3xbf16>
    %19 = vector.extract_strided_slice %18 {offsets = [0, 0, 0, 0], sizes = [9, 1, 9, 3], strides = [1, 1, 1, 1]} : vector<9x2x9x3xbf16> to vector<9x1x9x3xbf16>
    %20 = vector.shape_cast %19 : vector<9x1x9x3xbf16> to vector<9x9x3xbf16>
    %21 = vector.extract_strided_slice %18 {offsets = [0, 1, 0, 0], sizes = [9, 1, 9, 3], strides = [1, 1, 1, 1]} : vector<9x2x9x3xbf16> to vector<9x1x9x3xbf16>
    %22 = vector.shape_cast %21 : vector<9x1x9x3xbf16> to vector<9x9x3xbf16>
    %23 = vector.extract_strided_slice %7 {offsets = [0, 1, 0], sizes = [18, 1, 3], strides = [1, 1, 1]} : vector<18x18x3xbf16> to vector<18x1x3xbf16>
    %24 = vector.extract_strided_slice %7 {offsets = [0, 3, 0], sizes = [18, 1, 3], strides = [1, 1, 1]} : vector<18x18x3xbf16> to vector<18x1x3xbf16>
    %25 = vector.extract_strided_slice %7 {offsets = [0, 5, 0], sizes = [18, 1, 3], strides = [1, 1, 1]} : vector<18x18x3xbf16> to vector<18x1x3xbf16>
    %26 = vector.extract_strided_slice %7 {offsets = [0, 7, 0], sizes = [18, 1, 3], strides = [1, 1, 1]} : vector<18x18x3xbf16> to vector<18x1x3xbf16>
    %27 = vector.extract_strided_slice %7 {offsets = [0, 9, 0], sizes = [18, 1, 3], strides = [1, 1, 1]} : vector<18x18x3xbf16> to vector<18x1x3xbf16>
    %28 = vector.extract_strided_slice %7 {offsets = [0, 11, 0], sizes = [18, 1, 3], strides = [1, 1, 1]} : vector<18x18x3xbf16> to vector<18x1x3xbf16>
    %29 = vector.extract_strided_slice %7 {offsets = [0, 13, 0], sizes = [18, 1, 3], strides = [1, 1, 1]} : vector<18x18x3xbf16> to vector<18x1x3xbf16>
    %30 = vector.extract_strided_slice %7 {offsets = [0, 15, 0], sizes = [18, 1, 3], strides = [1, 1, 1]} : vector<18x18x3xbf16> to vector<18x1x3xbf16>
    %31 = vector.extract_strided_slice %7 {offsets = [0, 17, 0], sizes = [18, 1, 3], strides = [1, 1, 1]} : vector<18x18x3xbf16> to vector<18x1x3xbf16>
    %32 = tpu.concatenate %23, %24, %25, %26, %27, %28, %29, %30, %31 in 1 : vector<18x1x3xbf16>, vector<18x1x3xbf16>, vector<18x1x3xbf16>, vector<18x1x3xbf16>, vector<18x1x3xbf16>, vector<18x1x3xbf16>, vector<18x1x3xbf16>, vector<18x1x3xbf16>, vector<18x1x3xbf16> -> vector<18x9x3xbf16>
    %33 = vector.shape_cast %32 : vector<18x9x3xbf16> to vector<9x2x9x3xbf16>
    %34 = vector.extract_strided_slice %33 {offsets = [0, 0, 0, 0], sizes = [9, 1, 9, 3], strides = [1, 1, 1, 1]} : vector<9x2x9x3xbf16> to vector<9x1x9x3xbf16>
    %35 = vector.shape_cast %34 : vector<9x1x9x3xbf16> to vector<9x9x3xbf16>
    %36 = vector.extract_strided_slice %33 {offsets = [0, 1, 0, 0], sizes = [9, 1, 9, 3], strides = [1, 1, 1, 1]} : vector<9x2x9x3xbf16> to vector<9x1x9x3xbf16>
    %37 = vector.shape_cast %36 : vector<9x1x9x3xbf16> to vector<9x9x3xbf16>
    %38 = tpu.concatenate %20, %35, %22, %37 in 2 : vector<9x9x3xbf16>, vector<9x9x3xbf16>, vector<9x9x3xbf16>, vector<9x9x3xbf16> -> vector<9x9x12xbf16>
    %c0_6 = arith.constant 0 : index
    %c0_7 = arith.constant 0 : index
    %39 = vector.load %arg2[%c0_6, %c0_7] : memref<48x32xbf16, #tpu.memory_space<vmem>>, vector<48x32xbf16>
    %c0_8 = arith.constant 0 : index
    %c0_9 = arith.constant 0 : index
    %40 = vector.load %arg8[%c0_8, %c0_9] : memref<1x32xf32, #tpu.memory_space<vmem>>, vector<1x32xf32>
    %41 = vector.extract_strided_slice %38 {offsets = [0, 0, 0], sizes = [8, 8, 12], strides = [1, 1, 1]} : vector<9x9x12xbf16> to vector<8x8x12xbf16>
    %42 = vector.extract_strided_slice %38 {offsets = [0, 1, 0], sizes = [8, 8, 12], strides = [1, 1, 1]} : vector<9x9x12xbf16> to vector<8x8x12xbf16>
    %43 = vector.extract_strided_slice %38 {offsets = [1, 0, 0], sizes = [8, 8, 12], strides = [1, 1, 1]} : vector<9x9x12xbf16> to vector<8x8x12xbf16>
    %44 = vector.extract_strided_slice %38 {offsets = [1, 1, 0], sizes = [8, 8, 12], strides = [1, 1, 1]} : vector<9x9x12xbf16> to vector<8x8x12xbf16>
    %45 = tpu.concatenate %41, %42, %43, %44 in 2 : vector<8x8x12xbf16>, vector<8x8x12xbf16>, vector<8x8x12xbf16>, vector<8x8x12xbf16> -> vector<8x8x48xbf16>
    %46 = vector.shape_cast %45 : vector<8x8x48xbf16> to vector<64x48xbf16>
    %cst_10 = arith.constant dense<0.000000e+00> : vector<64x32xf32>
    %47 = tpu.matmul %46, %39, %cst_10 {dimension_numbers = #tpu.dot_dimension_numbers<[1], [0], [0], [1], [0, 0, 1, 1], [], []>} : vector<64x48xbf16>, vector<48x32xbf16>, vector<64x32xf32> -> vector<64x32xf32>
    %48 = vector.broadcast %40 : vector<1x32xf32> to vector<64x32xf32>
    %49 = arith.addf %47, %48 : vector<64x32xf32>
    %cst_11 = arith.constant 0.000000e+00 : f32
    %50 = vector.broadcast %cst_11 : f32 to vector<64x32xf32>
    %51 = arith.maximumf %49, %50 : vector<64x32xf32>
    %52 = vector.shape_cast %51 : vector<64x32xf32> to vector<8x8x32xf32>
    %53 = arith.truncf %52 : vector<8x8x32xf32> to vector<8x8x32xbf16>
    %cst_12 = arith.constant 0.000000e+00 : bf16
    %54 = vector.broadcast %cst_12 : bf16 to vector<1x8x32xbf16>
    %cst_13 = arith.constant 0.000000e+00 : bf16
    %55 = vector.broadcast %cst_13 : bf16 to vector<1x8x32xbf16>
    %56 = tpu.concatenate %54, %53, %55 in 0 : vector<1x8x32xbf16>, vector<8x8x32xbf16>, vector<1x8x32xbf16> -> vector<10x8x32xbf16>
    %cst_14 = arith.constant 0.000000e+00 : bf16
    %57 = vector.broadcast %cst_14 : bf16 to vector<10x1x32xbf16>
    %cst_15 = arith.constant 0.000000e+00 : bf16
    %58 = vector.broadcast %cst_15 : bf16 to vector<10x1x32xbf16>
    %59 = tpu.concatenate %57, %56, %58 in 1 : vector<10x1x32xbf16>, vector<10x8x32xbf16>, vector<10x1x32xbf16> -> vector<10x10x32xbf16>
    %60 = vector.extract_strided_slice %59 {offsets = [0, 0, 0], sizes = [10, 1, 32], strides = [1, 1, 1]} : vector<10x10x32xbf16> to vector<10x1x32xbf16>
    %61 = vector.extract_strided_slice %59 {offsets = [0, 2, 0], sizes = [10, 1, 32], strides = [1, 1, 1]} : vector<10x10x32xbf16> to vector<10x1x32xbf16>
    %62 = vector.extract_strided_slice %59 {offsets = [0, 4, 0], sizes = [10, 1, 32], strides = [1, 1, 1]} : vector<10x10x32xbf16> to vector<10x1x32xbf16>
    %63 = vector.extract_strided_slice %59 {offsets = [0, 6, 0], sizes = [10, 1, 32], strides = [1, 1, 1]} : vector<10x10x32xbf16> to vector<10x1x32xbf16>
    %64 = vector.extract_strided_slice %59 {offsets = [0, 8, 0], sizes = [10, 1, 32], strides = [1, 1, 1]} : vector<10x10x32xbf16> to vector<10x1x32xbf16>
    %65 = tpu.concatenate %60, %61, %62, %63, %64 in 1 : vector<10x1x32xbf16>, vector<10x1x32xbf16>, vector<10x1x32xbf16>, vector<10x1x32xbf16>, vector<10x1x32xbf16> -> vector<10x5x32xbf16>
    %66 = vector.shape_cast %65 : vector<10x5x32xbf16> to vector<5x2x5x32xbf16>
    %67 = vector.extract_strided_slice %66 {offsets = [0, 0, 0, 0], sizes = [5, 1, 5, 32], strides = [1, 1, 1, 1]} : vector<5x2x5x32xbf16> to vector<5x1x5x32xbf16>
    %68 = vector.shape_cast %67 : vector<5x1x5x32xbf16> to vector<5x5x32xbf16>
    %69 = vector.extract_strided_slice %66 {offsets = [0, 1, 0, 0], sizes = [5, 1, 5, 32], strides = [1, 1, 1, 1]} : vector<5x2x5x32xbf16> to vector<5x1x5x32xbf16>
    %70 = vector.shape_cast %69 : vector<5x1x5x32xbf16> to vector<5x5x32xbf16>
    %71 = vector.extract_strided_slice %59 {offsets = [0, 1, 0], sizes = [10, 1, 32], strides = [1, 1, 1]} : vector<10x10x32xbf16> to vector<10x1x32xbf16>
    %72 = vector.extract_strided_slice %59 {offsets = [0, 3, 0], sizes = [10, 1, 32], strides = [1, 1, 1]} : vector<10x10x32xbf16> to vector<10x1x32xbf16>
    %73 = vector.extract_strided_slice %59 {offsets = [0, 5, 0], sizes = [10, 1, 32], strides = [1, 1, 1]} : vector<10x10x32xbf16> to vector<10x1x32xbf16>
    %74 = vector.extract_strided_slice %59 {offsets = [0, 7, 0], sizes = [10, 1, 32], strides = [1, 1, 1]} : vector<10x10x32xbf16> to vector<10x1x32xbf16>
    %75 = vector.extract_strided_slice %59 {offsets = [0, 9, 0], sizes = [10, 1, 32], strides = [1, 1, 1]} : vector<10x10x32xbf16> to vector<10x1x32xbf16>
    %76 = tpu.concatenate %71, %72, %73, %74, %75 in 1 : vector<10x1x32xbf16>, vector<10x1x32xbf16>, vector<10x1x32xbf16>, vector<10x1x32xbf16>, vector<10x1x32xbf16> -> vector<10x5x32xbf16>
    %77 = vector.shape_cast %76 : vector<10x5x32xbf16> to vector<5x2x5x32xbf16>
    %78 = vector.extract_strided_slice %77 {offsets = [0, 0, 0, 0], sizes = [5, 1, 5, 32], strides = [1, 1, 1, 1]} : vector<5x2x5x32xbf16> to vector<5x1x5x32xbf16>
    %79 = vector.shape_cast %78 : vector<5x1x5x32xbf16> to vector<5x5x32xbf16>
    %80 = vector.extract_strided_slice %77 {offsets = [0, 1, 0, 0], sizes = [5, 1, 5, 32], strides = [1, 1, 1, 1]} : vector<5x2x5x32xbf16> to vector<5x1x5x32xbf16>
    %81 = vector.shape_cast %80 : vector<5x1x5x32xbf16> to vector<5x5x32xbf16>
    %82 = tpu.concatenate %68, %79, %70, %81 in 2 : vector<5x5x32xbf16>, vector<5x5x32xbf16>, vector<5x5x32xbf16>, vector<5x5x32xbf16> -> vector<5x5x128xbf16>
    %c0_16 = arith.constant 0 : index
    %c0_17 = arith.constant 0 : index
    %83 = vector.load %arg3[%c0_16, %c0_17] : memref<1152x64xbf16, #tpu.memory_space<vmem>>, vector<1152x64xbf16>
    %c0_18 = arith.constant 0 : index
    %c0_19 = arith.constant 0 : index
    %84 = vector.load %arg9[%c0_18, %c0_19] : memref<1x64xf32, #tpu.memory_space<vmem>>, vector<1x64xf32>
    %85 = vector.extract_strided_slice %82 {offsets = [0, 0, 0], sizes = [3, 3, 128], strides = [1, 1, 1]} : vector<5x5x128xbf16> to vector<3x3x128xbf16>
    %86 = vector.extract_strided_slice %82 {offsets = [0, 1, 0], sizes = [3, 3, 128], strides = [1, 1, 1]} : vector<5x5x128xbf16> to vector<3x3x128xbf16>
    %87 = vector.extract_strided_slice %82 {offsets = [0, 2, 0], sizes = [3, 3, 128], strides = [1, 1, 1]} : vector<5x5x128xbf16> to vector<3x3x128xbf16>
    %88 = vector.extract_strided_slice %82 {offsets = [1, 0, 0], sizes = [3, 3, 128], strides = [1, 1, 1]} : vector<5x5x128xbf16> to vector<3x3x128xbf16>
    %89 = vector.extract_strided_slice %82 {offsets = [1, 1, 0], sizes = [3, 3, 128], strides = [1, 1, 1]} : vector<5x5x128xbf16> to vector<3x3x128xbf16>
    %90 = vector.extract_strided_slice %82 {offsets = [1, 2, 0], sizes = [3, 3, 128], strides = [1, 1, 1]} : vector<5x5x128xbf16> to vector<3x3x128xbf16>
    %91 = vector.extract_strided_slice %82 {offsets = [2, 0, 0], sizes = [3, 3, 128], strides = [1, 1, 1]} : vector<5x5x128xbf16> to vector<3x3x128xbf16>
    %92 = vector.extract_strided_slice %82 {offsets = [2, 1, 0], sizes = [3, 3, 128], strides = [1, 1, 1]} : vector<5x5x128xbf16> to vector<3x3x128xbf16>
    %93 = vector.extract_strided_slice %82 {offsets = [2, 2, 0], sizes = [3, 3, 128], strides = [1, 1, 1]} : vector<5x5x128xbf16> to vector<3x3x128xbf16>
    %94 = tpu.concatenate %85, %86, %87, %88, %89, %90, %91, %92, %93 in 2 : vector<3x3x128xbf16>, vector<3x3x128xbf16>, vector<3x3x128xbf16>, vector<3x3x128xbf16>, vector<3x3x128xbf16>, vector<3x3x128xbf16>, vector<3x3x128xbf16>, vector<3x3x128xbf16>, vector<3x3x128xbf16> -> vector<3x3x1152xbf16>
    %95 = vector.shape_cast %94 : vector<3x3x1152xbf16> to vector<9x1152xbf16>
    %cst_20 = arith.constant dense<0.000000e+00> : vector<9x64xf32>
    %96 = tpu.matmul %95, %83, %cst_20 {dimension_numbers = #tpu.dot_dimension_numbers<[1], [0], [0], [1], [0, 0, 1, 1], [], []>} : vector<9x1152xbf16>, vector<1152x64xbf16>, vector<9x64xf32> -> vector<9x64xf32>
    %97 = vector.broadcast %84 : vector<1x64xf32> to vector<9x64xf32>
    %98 = arith.addf %96, %97 : vector<9x64xf32>
    %cst_21 = arith.constant 0.000000e+00 : f32
    %99 = vector.broadcast %cst_21 : f32 to vector<9x64xf32>
    %100 = arith.maximumf %98, %99 : vector<9x64xf32>
    %101 = vector.shape_cast %100 : vector<9x64xf32> to vector<3x3x64xf32>
    %102 = arith.truncf %101 : vector<3x3x64xf32> to vector<3x3x64xbf16>
    %c0_22 = arith.constant 0 : index
    %c0_23 = arith.constant 0 : index
    %103 = vector.load %arg4[%c0_22, %c0_23] : memref<576x128xbf16, #tpu.memory_space<vmem>>, vector<576x128xbf16>
    %c0_24 = arith.constant 0 : index
    %c0_25 = arith.constant 0 : index
    %104 = vector.load %arg10[%c0_24, %c0_25] : memref<1x128xf32, #tpu.memory_space<vmem>>, vector<1x128xf32>
    %105 = vector.extract_strided_slice %102 {offsets = [0, 0, 0], sizes = [1, 1, 64], strides = [1, 1, 1]} : vector<3x3x64xbf16> to vector<1x1x64xbf16>
    %106 = vector.extract_strided_slice %102 {offsets = [0, 1, 0], sizes = [1, 1, 64], strides = [1, 1, 1]} : vector<3x3x64xbf16> to vector<1x1x64xbf16>
    %107 = vector.extract_strided_slice %102 {offsets = [0, 2, 0], sizes = [1, 1, 64], strides = [1, 1, 1]} : vector<3x3x64xbf16> to vector<1x1x64xbf16>
    %108 = vector.extract_strided_slice %102 {offsets = [1, 0, 0], sizes = [1, 1, 64], strides = [1, 1, 1]} : vector<3x3x64xbf16> to vector<1x1x64xbf16>
    %109 = vector.extract_strided_slice %102 {offsets = [1, 1, 0], sizes = [1, 1, 64], strides = [1, 1, 1]} : vector<3x3x64xbf16> to vector<1x1x64xbf16>
    %110 = vector.extract_strided_slice %102 {offsets = [1, 2, 0], sizes = [1, 1, 64], strides = [1, 1, 1]} : vector<3x3x64xbf16> to vector<1x1x64xbf16>
    %111 = vector.extract_strided_slice %102 {offsets = [2, 0, 0], sizes = [1, 1, 64], strides = [1, 1, 1]} : vector<3x3x64xbf16> to vector<1x1x64xbf16>
    %112 = vector.extract_strided_slice %102 {offsets = [2, 1, 0], sizes = [1, 1, 64], strides = [1, 1, 1]} : vector<3x3x64xbf16> to vector<1x1x64xbf16>
    %113 = vector.extract_strided_slice %102 {offsets = [2, 2, 0], sizes = [1, 1, 64], strides = [1, 1, 1]} : vector<3x3x64xbf16> to vector<1x1x64xbf16>
    %114 = tpu.concatenate %105, %106, %107, %108, %109, %110, %111, %112, %113 in 2 : vector<1x1x64xbf16>, vector<1x1x64xbf16>, vector<1x1x64xbf16>, vector<1x1x64xbf16>, vector<1x1x64xbf16>, vector<1x1x64xbf16>, vector<1x1x64xbf16>, vector<1x1x64xbf16>, vector<1x1x64xbf16> -> vector<1x1x576xbf16>
    %115 = vector.shape_cast %114 : vector<1x1x576xbf16> to vector<1x576xbf16>
    %cst_26 = arith.constant dense<0.000000e+00> : vector<1x128xf32>
    %116 = tpu.matmul %115, %103, %cst_26 {dimension_numbers = #tpu.dot_dimension_numbers<[1], [0], [0], [1], [0, 0, 1, 1], [], []>} : vector<1x576xbf16>, vector<576x128xbf16>, vector<1x128xf32> -> vector<1x128xf32>
    %117 = arith.addf %116, %104 : vector<1x128xf32>
    %118 = vector.shape_cast %117 : vector<1x128xf32> to vector<1x1x128xf32>
    %119 = arith.truncf %118 : vector<1x1x128xf32> to vector<1x1x128xbf16>
    %cst_27 = arith.constant 0.000000e+00 : bf16
    %120 = vector.broadcast %cst_27 : bf16 to vector<2x1x128xbf16>
    %cst_28 = arith.constant 0.000000e+00 : bf16
    %121 = vector.broadcast %cst_28 : bf16 to vector<2x1x128xbf16>
    %122 = tpu.concatenate %120, %119, %121 in 0 : vector<2x1x128xbf16>, vector<1x1x128xbf16>, vector<2x1x128xbf16> -> vector<5x1x128xbf16>
    %cst_29 = arith.constant 0.000000e+00 : bf16
    %123 = vector.broadcast %cst_29 : bf16 to vector<5x2x128xbf16>
    %cst_30 = arith.constant 0.000000e+00 : bf16
    %124 = vector.broadcast %cst_30 : bf16 to vector<5x2x128xbf16>
    %125 = tpu.concatenate %123, %122, %124 in 1 : vector<5x2x128xbf16>, vector<5x1x128xbf16>, vector<5x2x128xbf16> -> vector<5x5x128xbf16>
    %c0_31 = arith.constant 0 : index
    %c0_32 = arith.constant 0 : index
    %126 = vector.load %arg5[%c0_31, %c0_32] : memref<1152x64xbf16, #tpu.memory_space<vmem>>, vector<1152x64xbf16>
    %c0_33 = arith.constant 0 : index
    %c0_34 = arith.constant 0 : index
    %127 = vector.load %arg11[%c0_33, %c0_34] : memref<1x64xf32, #tpu.memory_space<vmem>>, vector<1x64xf32>
    %128 = vector.extract_strided_slice %125 {offsets = [0, 0, 0], sizes = [3, 3, 128], strides = [1, 1, 1]} : vector<5x5x128xbf16> to vector<3x3x128xbf16>
    %129 = vector.extract_strided_slice %125 {offsets = [0, 1, 0], sizes = [3, 3, 128], strides = [1, 1, 1]} : vector<5x5x128xbf16> to vector<3x3x128xbf16>
    %130 = vector.extract_strided_slice %125 {offsets = [0, 2, 0], sizes = [3, 3, 128], strides = [1, 1, 1]} : vector<5x5x128xbf16> to vector<3x3x128xbf16>
    %131 = vector.extract_strided_slice %125 {offsets = [1, 0, 0], sizes = [3, 3, 128], strides = [1, 1, 1]} : vector<5x5x128xbf16> to vector<3x3x128xbf16>
    %132 = vector.extract_strided_slice %125 {offsets = [1, 1, 0], sizes = [3, 3, 128], strides = [1, 1, 1]} : vector<5x5x128xbf16> to vector<3x3x128xbf16>
    %133 = vector.extract_strided_slice %125 {offsets = [1, 2, 0], sizes = [3, 3, 128], strides = [1, 1, 1]} : vector<5x5x128xbf16> to vector<3x3x128xbf16>
    %134 = vector.extract_strided_slice %125 {offsets = [2, 0, 0], sizes = [3, 3, 128], strides = [1, 1, 1]} : vector<5x5x128xbf16> to vector<3x3x128xbf16>
    %135 = vector.extract_strided_slice %125 {offsets = [2, 1, 0], sizes = [3, 3, 128], strides = [1, 1, 1]} : vector<5x5x128xbf16> to vector<3x3x128xbf16>
    %136 = vector.extract_strided_slice %125 {offsets = [2, 2, 0], sizes = [3, 3, 128], strides = [1, 1, 1]} : vector<5x5x128xbf16> to vector<3x3x128xbf16>
    %137 = tpu.concatenate %128, %129, %130, %131, %132, %133, %134, %135, %136 in 2 : vector<3x3x128xbf16>, vector<3x3x128xbf16>, vector<3x3x128xbf16>, vector<3x3x128xbf16>, vector<3x3x128xbf16>, vector<3x3x128xbf16>, vector<3x3x128xbf16>, vector<3x3x128xbf16>, vector<3x3x128xbf16> -> vector<3x3x1152xbf16>
    %138 = vector.shape_cast %137 : vector<3x3x1152xbf16> to vector<9x1152xbf16>
    %cst_35 = arith.constant dense<0.000000e+00> : vector<9x64xf32>
    %139 = tpu.matmul %138, %126, %cst_35 {dimension_numbers = #tpu.dot_dimension_numbers<[1], [0], [0], [1], [0, 0, 1, 1], [], []>} : vector<9x1152xbf16>, vector<1152x64xbf16>, vector<9x64xf32> -> vector<9x64xf32>
    %140 = vector.broadcast %127 : vector<1x64xf32> to vector<9x64xf32>
    %141 = arith.addf %139, %140 : vector<9x64xf32>
    %cst_36 = arith.constant 0.000000e+00 : f32
    %142 = vector.broadcast %cst_36 : f32 to vector<9x64xf32>
    %143 = arith.maximumf %141, %142 : vector<9x64xf32>
    %144 = vector.shape_cast %143 : vector<9x64xf32> to vector<3x3x64xf32>
    %145 = arith.truncf %144 : vector<3x3x64xf32> to vector<3x3x64xbf16>
    %cst_37 = arith.constant 0.000000e+00 : bf16
    %146 = vector.broadcast %cst_37 : bf16 to vector<1x3x64xbf16>
    %cst_38 = arith.constant 0.000000e+00 : bf16
    %147 = vector.broadcast %cst_38 : bf16 to vector<2x3x64xbf16>
    %148 = tpu.concatenate %146, %145, %147 in 0 : vector<1x3x64xbf16>, vector<3x3x64xbf16>, vector<2x3x64xbf16> -> vector<6x3x64xbf16>
    %cst_39 = arith.constant 0.000000e+00 : bf16
    %149 = vector.broadcast %cst_39 : bf16 to vector<6x1x64xbf16>
    %cst_40 = arith.constant 0.000000e+00 : bf16
    %150 = vector.broadcast %cst_40 : bf16 to vector<6x2x64xbf16>
    %151 = tpu.concatenate %149, %148, %150 in 1 : vector<6x1x64xbf16>, vector<6x3x64xbf16>, vector<6x2x64xbf16> -> vector<6x6x64xbf16>
    %c0_41 = arith.constant 0 : index
    %c0_42 = arith.constant 0 : index
    %152 = vector.load %arg6[%c0_41, %c0_42] : memref<576x128xbf16, #tpu.memory_space<vmem>>, vector<576x128xbf16>
    %c0_43 = arith.constant 0 : index
    %c0_44 = arith.constant 0 : index
    %153 = vector.load %arg12[%c0_43, %c0_44] : memref<1x128xf32, #tpu.memory_space<vmem>>, vector<1x128xf32>
    %154 = vector.extract_strided_slice %151 {offsets = [0, 0, 0], sizes = [4, 4, 64], strides = [1, 1, 1]} : vector<6x6x64xbf16> to vector<4x4x64xbf16>
    %155 = vector.extract_strided_slice %151 {offsets = [0, 1, 0], sizes = [4, 4, 64], strides = [1, 1, 1]} : vector<6x6x64xbf16> to vector<4x4x64xbf16>
    %156 = vector.extract_strided_slice %151 {offsets = [0, 2, 0], sizes = [4, 4, 64], strides = [1, 1, 1]} : vector<6x6x64xbf16> to vector<4x4x64xbf16>
    %157 = vector.extract_strided_slice %151 {offsets = [1, 0, 0], sizes = [4, 4, 64], strides = [1, 1, 1]} : vector<6x6x64xbf16> to vector<4x4x64xbf16>
    %158 = vector.extract_strided_slice %151 {offsets = [1, 1, 0], sizes = [4, 4, 64], strides = [1, 1, 1]} : vector<6x6x64xbf16> to vector<4x4x64xbf16>
    %159 = vector.extract_strided_slice %151 {offsets = [1, 2, 0], sizes = [4, 4, 64], strides = [1, 1, 1]} : vector<6x6x64xbf16> to vector<4x4x64xbf16>
    %160 = vector.extract_strided_slice %151 {offsets = [2, 0, 0], sizes = [4, 4, 64], strides = [1, 1, 1]} : vector<6x6x64xbf16> to vector<4x4x64xbf16>
    %161 = vector.extract_strided_slice %151 {offsets = [2, 1, 0], sizes = [4, 4, 64], strides = [1, 1, 1]} : vector<6x6x64xbf16> to vector<4x4x64xbf16>
    %162 = vector.extract_strided_slice %151 {offsets = [2, 2, 0], sizes = [4, 4, 64], strides = [1, 1, 1]} : vector<6x6x64xbf16> to vector<4x4x64xbf16>
    %163 = tpu.concatenate %154, %155, %156, %157, %158, %159, %160, %161, %162 in 2 : vector<4x4x64xbf16>, vector<4x4x64xbf16>, vector<4x4x64xbf16>, vector<4x4x64xbf16>, vector<4x4x64xbf16>, vector<4x4x64xbf16>, vector<4x4x64xbf16>, vector<4x4x64xbf16>, vector<4x4x64xbf16> -> vector<4x4x576xbf16>
    %164 = vector.shape_cast %163 : vector<4x4x576xbf16> to vector<16x576xbf16>
    %cst_45 = arith.constant dense<0.000000e+00> : vector<16x128xf32>
    %165 = tpu.matmul %164, %152, %cst_45 {dimension_numbers = #tpu.dot_dimension_numbers<[1], [0], [0], [1], [0, 0, 1, 1], [], []>} : vector<16x576xbf16>, vector<576x128xbf16>, vector<16x128xf32> -> vector<16x128xf32>
    %166 = vector.broadcast %153 : vector<1x128xf32> to vector<16x128xf32>
    %167 = arith.addf %165, %166 : vector<16x128xf32>
    %cst_46 = arith.constant 0.000000e+00 : f32
    %168 = vector.broadcast %cst_46 : f32 to vector<16x128xf32>
    %169 = arith.maximumf %167, %168 : vector<16x128xf32>
    %170 = vector.shape_cast %169 : vector<16x128xf32> to vector<4x4x128xf32>
    %171 = vector.extract_strided_slice %170 {offsets = [0, 0, 0], sizes = [4, 4, 32], strides = [1, 1, 1]} : vector<4x4x128xf32> to vector<4x4x32xf32>
    %172 = vector.extract_strided_slice %170 {offsets = [0, 0, 32], sizes = [4, 4, 32], strides = [1, 1, 1]} : vector<4x4x128xf32> to vector<4x4x32xf32>
    %173 = vector.extract_strided_slice %170 {offsets = [0, 0, 64], sizes = [4, 4, 32], strides = [1, 1, 1]} : vector<4x4x128xf32> to vector<4x4x32xf32>
    %174 = vector.extract_strided_slice %170 {offsets = [0, 0, 96], sizes = [4, 4, 32], strides = [1, 1, 1]} : vector<4x4x128xf32> to vector<4x4x32xf32>
    %175 = vector.extract_strided_slice %174 {offsets = [0, 0, 0], sizes = [1, 4, 32], strides = [1, 1, 1]} : vector<4x4x32xf32> to vector<1x4x32xf32>
    %176 = vector.shape_cast %175 : vector<1x4x32xf32> to vector<4x32xf32>
    %177 = vector.extract_strided_slice %173 {offsets = [0, 0, 0], sizes = [1, 4, 32], strides = [1, 1, 1]} : vector<4x4x32xf32> to vector<1x4x32xf32>
    %178 = vector.shape_cast %177 : vector<1x4x32xf32> to vector<4x32xf32>
    %179 = vector.shape_cast %176 : vector<4x32xf32> to vector<4x1x32xf32>
    %180 = vector.shape_cast %178 : vector<4x32xf32> to vector<4x1x32xf32>
    %181 = tpu.concatenate %179, %180 in 1 : vector<4x1x32xf32>, vector<4x1x32xf32> -> vector<4x2x32xf32>
    %182 = vector.shape_cast %181 : vector<4x2x32xf32> to vector<8x32xf32>
    %183 = vector.extract_strided_slice %174 {offsets = [1, 0, 0], sizes = [1, 4, 32], strides = [1, 1, 1]} : vector<4x4x32xf32> to vector<1x4x32xf32>
    %184 = vector.shape_cast %183 : vector<1x4x32xf32> to vector<4x32xf32>
    %185 = vector.extract_strided_slice %173 {offsets = [1, 0, 0], sizes = [1, 4, 32], strides = [1, 1, 1]} : vector<4x4x32xf32> to vector<1x4x32xf32>
    %186 = vector.shape_cast %185 : vector<1x4x32xf32> to vector<4x32xf32>
    %187 = vector.shape_cast %184 : vector<4x32xf32> to vector<4x1x32xf32>
    %188 = vector.shape_cast %186 : vector<4x32xf32> to vector<4x1x32xf32>
    %189 = tpu.concatenate %187, %188 in 1 : vector<4x1x32xf32>, vector<4x1x32xf32> -> vector<4x2x32xf32>
    %190 = vector.shape_cast %189 : vector<4x2x32xf32> to vector<8x32xf32>
    %191 = vector.extract_strided_slice %174 {offsets = [2, 0, 0], sizes = [1, 4, 32], strides = [1, 1, 1]} : vector<4x4x32xf32> to vector<1x4x32xf32>
    %192 = vector.shape_cast %191 : vector<1x4x32xf32> to vector<4x32xf32>
    %193 = vector.extract_strided_slice %173 {offsets = [2, 0, 0], sizes = [1, 4, 32], strides = [1, 1, 1]} : vector<4x4x32xf32> to vector<1x4x32xf32>
    %194 = vector.shape_cast %193 : vector<1x4x32xf32> to vector<4x32xf32>
    %195 = vector.shape_cast %192 : vector<4x32xf32> to vector<4x1x32xf32>
    %196 = vector.shape_cast %194 : vector<4x32xf32> to vector<4x1x32xf32>
    %197 = tpu.concatenate %195, %196 in 1 : vector<4x1x32xf32>, vector<4x1x32xf32> -> vector<4x2x32xf32>
    %198 = vector.shape_cast %197 : vector<4x2x32xf32> to vector<8x32xf32>
    %199 = vector.extract_strided_slice %174 {offsets = [3, 0, 0], sizes = [1, 4, 32], strides = [1, 1, 1]} : vector<4x4x32xf32> to vector<1x4x32xf32>
    %200 = vector.shape_cast %199 : vector<1x4x32xf32> to vector<4x32xf32>
    %201 = vector.extract_strided_slice %173 {offsets = [3, 0, 0], sizes = [1, 4, 32], strides = [1, 1, 1]} : vector<4x4x32xf32> to vector<1x4x32xf32>
    %202 = vector.shape_cast %201 : vector<1x4x32xf32> to vector<4x32xf32>
    %203 = vector.shape_cast %200 : vector<4x32xf32> to vector<4x1x32xf32>
    %204 = vector.shape_cast %202 : vector<4x32xf32> to vector<4x1x32xf32>
    %205 = tpu.concatenate %203, %204 in 1 : vector<4x1x32xf32>, vector<4x1x32xf32> -> vector<4x2x32xf32>
    %206 = vector.shape_cast %205 : vector<4x2x32xf32> to vector<8x32xf32>
    %207 = vector.shape_cast %182 : vector<8x32xf32> to vector<1x8x32xf32>
    %208 = vector.shape_cast %190 : vector<8x32xf32> to vector<1x8x32xf32>
    %209 = vector.shape_cast %198 : vector<8x32xf32> to vector<1x8x32xf32>
    %210 = vector.shape_cast %206 : vector<8x32xf32> to vector<1x8x32xf32>
    %211 = tpu.concatenate %207, %208, %209, %210 in 0 : vector<1x8x32xf32>, vector<1x8x32xf32>, vector<1x8x32xf32>, vector<1x8x32xf32> -> vector<4x8x32xf32>
    %212 = vector.extract_strided_slice %172 {offsets = [0, 0, 0], sizes = [1, 4, 32], strides = [1, 1, 1]} : vector<4x4x32xf32> to vector<1x4x32xf32>
    %213 = vector.shape_cast %212 : vector<1x4x32xf32> to vector<4x32xf32>
    %214 = vector.extract_strided_slice %171 {offsets = [0, 0, 0], sizes = [1, 4, 32], strides = [1, 1, 1]} : vector<4x4x32xf32> to vector<1x4x32xf32>
    %215 = vector.shape_cast %214 : vector<1x4x32xf32> to vector<4x32xf32>
    %216 = vector.shape_cast %213 : vector<4x32xf32> to vector<4x1x32xf32>
    %217 = vector.shape_cast %215 : vector<4x32xf32> to vector<4x1x32xf32>
    %218 = tpu.concatenate %216, %217 in 1 : vector<4x1x32xf32>, vector<4x1x32xf32> -> vector<4x2x32xf32>
    %219 = vector.shape_cast %218 : vector<4x2x32xf32> to vector<8x32xf32>
    %220 = vector.extract_strided_slice %172 {offsets = [1, 0, 0], sizes = [1, 4, 32], strides = [1, 1, 1]} : vector<4x4x32xf32> to vector<1x4x32xf32>
    %221 = vector.shape_cast %220 : vector<1x4x32xf32> to vector<4x32xf32>
    %222 = vector.extract_strided_slice %171 {offsets = [1, 0, 0], sizes = [1, 4, 32], strides = [1, 1, 1]} : vector<4x4x32xf32> to vector<1x4x32xf32>
    %223 = vector.shape_cast %222 : vector<1x4x32xf32> to vector<4x32xf32>
    %224 = vector.shape_cast %221 : vector<4x32xf32> to vector<4x1x32xf32>
    %225 = vector.shape_cast %223 : vector<4x32xf32> to vector<4x1x32xf32>
    %226 = tpu.concatenate %224, %225 in 1 : vector<4x1x32xf32>, vector<4x1x32xf32> -> vector<4x2x32xf32>
    %227 = vector.shape_cast %226 : vector<4x2x32xf32> to vector<8x32xf32>
    %228 = vector.extract_strided_slice %172 {offsets = [2, 0, 0], sizes = [1, 4, 32], strides = [1, 1, 1]} : vector<4x4x32xf32> to vector<1x4x32xf32>
    %229 = vector.shape_cast %228 : vector<1x4x32xf32> to vector<4x32xf32>
    %230 = vector.extract_strided_slice %171 {offsets = [2, 0, 0], sizes = [1, 4, 32], strides = [1, 1, 1]} : vector<4x4x32xf32> to vector<1x4x32xf32>
    %231 = vector.shape_cast %230 : vector<1x4x32xf32> to vector<4x32xf32>
    %232 = vector.shape_cast %229 : vector<4x32xf32> to vector<4x1x32xf32>
    %233 = vector.shape_cast %231 : vector<4x32xf32> to vector<4x1x32xf32>
    %234 = tpu.concatenate %232, %233 in 1 : vector<4x1x32xf32>, vector<4x1x32xf32> -> vector<4x2x32xf32>
    %235 = vector.shape_cast %234 : vector<4x2x32xf32> to vector<8x32xf32>
    %236 = vector.extract_strided_slice %172 {offsets = [3, 0, 0], sizes = [1, 4, 32], strides = [1, 1, 1]} : vector<4x4x32xf32> to vector<1x4x32xf32>
    %237 = vector.shape_cast %236 : vector<1x4x32xf32> to vector<4x32xf32>
    %238 = vector.extract_strided_slice %171 {offsets = [3, 0, 0], sizes = [1, 4, 32], strides = [1, 1, 1]} : vector<4x4x32xf32> to vector<1x4x32xf32>
    %239 = vector.shape_cast %238 : vector<1x4x32xf32> to vector<4x32xf32>
    %240 = vector.shape_cast %237 : vector<4x32xf32> to vector<4x1x32xf32>
    %241 = vector.shape_cast %239 : vector<4x32xf32> to vector<4x1x32xf32>
    %242 = tpu.concatenate %240, %241 in 1 : vector<4x1x32xf32>, vector<4x1x32xf32> -> vector<4x2x32xf32>
    %243 = vector.shape_cast %242 : vector<4x2x32xf32> to vector<8x32xf32>
    %244 = vector.shape_cast %219 : vector<8x32xf32> to vector<1x8x32xf32>
    %245 = vector.shape_cast %227 : vector<8x32xf32> to vector<1x8x32xf32>
    %246 = vector.shape_cast %235 : vector<8x32xf32> to vector<1x8x32xf32>
    %247 = vector.shape_cast %243 : vector<8x32xf32> to vector<1x8x32xf32>
    %248 = tpu.concatenate %244, %245, %246, %247 in 0 : vector<1x8x32xf32>, vector<1x8x32xf32>, vector<1x8x32xf32>, vector<1x8x32xf32> -> vector<4x8x32xf32>
    %249 = vector.shape_cast %211 : vector<4x8x32xf32> to vector<4x1x8x32xf32>
    %250 = vector.shape_cast %248 : vector<4x8x32xf32> to vector<4x1x8x32xf32>
    %251 = tpu.concatenate %249, %250 in 1 : vector<4x1x8x32xf32>, vector<4x1x8x32xf32> -> vector<4x2x8x32xf32>
    %252 = vector.shape_cast %251 : vector<4x2x8x32xf32> to vector<8x8x32xf32>
    %253 = arith.truncf %252 : vector<8x8x32xf32> to vector<8x8x32xbf16>
    %cst_47 = arith.constant 0.000000e+00 : bf16
    %254 = vector.broadcast %cst_47 : bf16 to vector<1x8x32xbf16>
    %255 = tpu.concatenate %253, %254 in 0 : vector<8x8x32xbf16>, vector<1x8x32xbf16> -> vector<9x8x32xbf16>
    %cst_48 = arith.constant 0.000000e+00 : bf16
    %256 = vector.broadcast %cst_48 : bf16 to vector<9x1x32xbf16>
    %257 = tpu.concatenate %255, %256 in 1 : vector<9x8x32xbf16>, vector<9x1x32xbf16> -> vector<9x9x32xbf16>
    %c0_49 = arith.constant 0 : index
    %c0_50 = arith.constant 0 : index
    %258 = vector.load %arg7[%c0_49, %c0_50] : memref<128x12xbf16, #tpu.memory_space<vmem>>, vector<128x12xbf16>
    %c0_51 = arith.constant 0 : index
    %c0_52 = arith.constant 0 : index
    %259 = vector.load %arg13[%c0_51, %c0_52] : memref<1x12xf32, #tpu.memory_space<vmem>>, vector<1x12xf32>
    %260 = vector.extract_strided_slice %257 {offsets = [0, 0, 0], sizes = [8, 8, 32], strides = [1, 1, 1]} : vector<9x9x32xbf16> to vector<8x8x32xbf16>
    %261 = vector.extract_strided_slice %257 {offsets = [0, 1, 0], sizes = [8, 8, 32], strides = [1, 1, 1]} : vector<9x9x32xbf16> to vector<8x8x32xbf16>
    %262 = vector.extract_strided_slice %257 {offsets = [1, 0, 0], sizes = [8, 8, 32], strides = [1, 1, 1]} : vector<9x9x32xbf16> to vector<8x8x32xbf16>
    %263 = vector.extract_strided_slice %257 {offsets = [1, 1, 0], sizes = [8, 8, 32], strides = [1, 1, 1]} : vector<9x9x32xbf16> to vector<8x8x32xbf16>
    %264 = tpu.concatenate %260, %261, %262, %263 in 2 : vector<8x8x32xbf16>, vector<8x8x32xbf16>, vector<8x8x32xbf16>, vector<8x8x32xbf16> -> vector<8x8x128xbf16>
    %265 = vector.shape_cast %264 : vector<8x8x128xbf16> to vector<64x128xbf16>
    %cst_53 = arith.constant dense<0.000000e+00> : vector<64x12xf32>
    %266 = tpu.matmul %265, %258, %cst_53 {dimension_numbers = #tpu.dot_dimension_numbers<[1], [0], [0], [1], [0, 0, 1, 1], [], []>} : vector<64x128xbf16>, vector<128x12xbf16>, vector<64x12xf32> -> vector<64x12xf32>
    %267 = vector.broadcast %259 : vector<1x12xf32> to vector<64x12xf32>
    %268 = arith.addf %266, %267 : vector<64x12xf32>
    %269 = arith.negf %268 : vector<64x12xf32>
    %270 = math.exp %269 : vector<64x12xf32>
    %cst_54 = arith.constant 1.000000e+00 : f32
    %271 = vector.broadcast %cst_54 : f32 to vector<64x12xf32>
    %272 = arith.addf %271, %270 : vector<64x12xf32>
    %273 = arith.divf %271, %272 : vector<64x12xf32>
    %274 = vector.shape_cast %273 : vector<64x12xf32> to vector<8x8x12xf32>
    %275 = vector.extract_strided_slice %274 {offsets = [0, 0, 0], sizes = [8, 8, 3], strides = [1, 1, 1]} : vector<8x8x12xf32> to vector<8x8x3xf32>
    %276 = vector.extract_strided_slice %274 {offsets = [0, 0, 3], sizes = [8, 8, 3], strides = [1, 1, 1]} : vector<8x8x12xf32> to vector<8x8x3xf32>
    %277 = vector.extract_strided_slice %274 {offsets = [0, 0, 6], sizes = [8, 8, 3], strides = [1, 1, 1]} : vector<8x8x12xf32> to vector<8x8x3xf32>
    %278 = vector.extract_strided_slice %274 {offsets = [0, 0, 9], sizes = [8, 8, 3], strides = [1, 1, 1]} : vector<8x8x12xf32> to vector<8x8x3xf32>
    %279 = vector.extract_strided_slice %278 {offsets = [0, 0, 0], sizes = [1, 8, 3], strides = [1, 1, 1]} : vector<8x8x3xf32> to vector<1x8x3xf32>
    %280 = vector.shape_cast %279 : vector<1x8x3xf32> to vector<8x3xf32>
    %281 = vector.extract_strided_slice %277 {offsets = [0, 0, 0], sizes = [1, 8, 3], strides = [1, 1, 1]} : vector<8x8x3xf32> to vector<1x8x3xf32>
    %282 = vector.shape_cast %281 : vector<1x8x3xf32> to vector<8x3xf32>
    %283 = vector.shape_cast %280 : vector<8x3xf32> to vector<8x1x3xf32>
    %284 = vector.shape_cast %282 : vector<8x3xf32> to vector<8x1x3xf32>
    %285 = tpu.concatenate %283, %284 in 1 : vector<8x1x3xf32>, vector<8x1x3xf32> -> vector<8x2x3xf32>
    %286 = vector.shape_cast %285 : vector<8x2x3xf32> to vector<16x3xf32>
    %287 = vector.extract_strided_slice %278 {offsets = [1, 0, 0], sizes = [1, 8, 3], strides = [1, 1, 1]} : vector<8x8x3xf32> to vector<1x8x3xf32>
    %288 = vector.shape_cast %287 : vector<1x8x3xf32> to vector<8x3xf32>
    %289 = vector.extract_strided_slice %277 {offsets = [1, 0, 0], sizes = [1, 8, 3], strides = [1, 1, 1]} : vector<8x8x3xf32> to vector<1x8x3xf32>
    %290 = vector.shape_cast %289 : vector<1x8x3xf32> to vector<8x3xf32>
    %291 = vector.shape_cast %288 : vector<8x3xf32> to vector<8x1x3xf32>
    %292 = vector.shape_cast %290 : vector<8x3xf32> to vector<8x1x3xf32>
    %293 = tpu.concatenate %291, %292 in 1 : vector<8x1x3xf32>, vector<8x1x3xf32> -> vector<8x2x3xf32>
    %294 = vector.shape_cast %293 : vector<8x2x3xf32> to vector<16x3xf32>
    %295 = vector.extract_strided_slice %278 {offsets = [2, 0, 0], sizes = [1, 8, 3], strides = [1, 1, 1]} : vector<8x8x3xf32> to vector<1x8x3xf32>
    %296 = vector.shape_cast %295 : vector<1x8x3xf32> to vector<8x3xf32>
    %297 = vector.extract_strided_slice %277 {offsets = [2, 0, 0], sizes = [1, 8, 3], strides = [1, 1, 1]} : vector<8x8x3xf32> to vector<1x8x3xf32>
    %298 = vector.shape_cast %297 : vector<1x8x3xf32> to vector<8x3xf32>
    %299 = vector.shape_cast %296 : vector<8x3xf32> to vector<8x1x3xf32>
    %300 = vector.shape_cast %298 : vector<8x3xf32> to vector<8x1x3xf32>
    %301 = tpu.concatenate %299, %300 in 1 : vector<8x1x3xf32>, vector<8x1x3xf32> -> vector<8x2x3xf32>
    %302 = vector.shape_cast %301 : vector<8x2x3xf32> to vector<16x3xf32>
    %303 = vector.extract_strided_slice %278 {offsets = [3, 0, 0], sizes = [1, 8, 3], strides = [1, 1, 1]} : vector<8x8x3xf32> to vector<1x8x3xf32>
    %304 = vector.shape_cast %303 : vector<1x8x3xf32> to vector<8x3xf32>
    %305 = vector.extract_strided_slice %277 {offsets = [3, 0, 0], sizes = [1, 8, 3], strides = [1, 1, 1]} : vector<8x8x3xf32> to vector<1x8x3xf32>
    %306 = vector.shape_cast %305 : vector<1x8x3xf32> to vector<8x3xf32>
    %307 = vector.shape_cast %304 : vector<8x3xf32> to vector<8x1x3xf32>
    %308 = vector.shape_cast %306 : vector<8x3xf32> to vector<8x1x3xf32>
    %309 = tpu.concatenate %307, %308 in 1 : vector<8x1x3xf32>, vector<8x1x3xf32> -> vector<8x2x3xf32>
    %310 = vector.shape_cast %309 : vector<8x2x3xf32> to vector<16x3xf32>
    %311 = vector.extract_strided_slice %278 {offsets = [4, 0, 0], sizes = [1, 8, 3], strides = [1, 1, 1]} : vector<8x8x3xf32> to vector<1x8x3xf32>
    %312 = vector.shape_cast %311 : vector<1x8x3xf32> to vector<8x3xf32>
    %313 = vector.extract_strided_slice %277 {offsets = [4, 0, 0], sizes = [1, 8, 3], strides = [1, 1, 1]} : vector<8x8x3xf32> to vector<1x8x3xf32>
    %314 = vector.shape_cast %313 : vector<1x8x3xf32> to vector<8x3xf32>
    %315 = vector.shape_cast %312 : vector<8x3xf32> to vector<8x1x3xf32>
    %316 = vector.shape_cast %314 : vector<8x3xf32> to vector<8x1x3xf32>
    %317 = tpu.concatenate %315, %316 in 1 : vector<8x1x3xf32>, vector<8x1x3xf32> -> vector<8x2x3xf32>
    %318 = vector.shape_cast %317 : vector<8x2x3xf32> to vector<16x3xf32>
    %319 = vector.extract_strided_slice %278 {offsets = [5, 0, 0], sizes = [1, 8, 3], strides = [1, 1, 1]} : vector<8x8x3xf32> to vector<1x8x3xf32>
    %320 = vector.shape_cast %319 : vector<1x8x3xf32> to vector<8x3xf32>
    %321 = vector.extract_strided_slice %277 {offsets = [5, 0, 0], sizes = [1, 8, 3], strides = [1, 1, 1]} : vector<8x8x3xf32> to vector<1x8x3xf32>
    %322 = vector.shape_cast %321 : vector<1x8x3xf32> to vector<8x3xf32>
    %323 = vector.shape_cast %320 : vector<8x3xf32> to vector<8x1x3xf32>
    %324 = vector.shape_cast %322 : vector<8x3xf32> to vector<8x1x3xf32>
    %325 = tpu.concatenate %323, %324 in 1 : vector<8x1x3xf32>, vector<8x1x3xf32> -> vector<8x2x3xf32>
    %326 = vector.shape_cast %325 : vector<8x2x3xf32> to vector<16x3xf32>
    %327 = vector.extract_strided_slice %278 {offsets = [6, 0, 0], sizes = [1, 8, 3], strides = [1, 1, 1]} : vector<8x8x3xf32> to vector<1x8x3xf32>
    %328 = vector.shape_cast %327 : vector<1x8x3xf32> to vector<8x3xf32>
    %329 = vector.extract_strided_slice %277 {offsets = [6, 0, 0], sizes = [1, 8, 3], strides = [1, 1, 1]} : vector<8x8x3xf32> to vector<1x8x3xf32>
    %330 = vector.shape_cast %329 : vector<1x8x3xf32> to vector<8x3xf32>
    %331 = vector.shape_cast %328 : vector<8x3xf32> to vector<8x1x3xf32>
    %332 = vector.shape_cast %330 : vector<8x3xf32> to vector<8x1x3xf32>
    %333 = tpu.concatenate %331, %332 in 1 : vector<8x1x3xf32>, vector<8x1x3xf32> -> vector<8x2x3xf32>
    %334 = vector.shape_cast %333 : vector<8x2x3xf32> to vector<16x3xf32>
    %335 = vector.extract_strided_slice %278 {offsets = [7, 0, 0], sizes = [1, 8, 3], strides = [1, 1, 1]} : vector<8x8x3xf32> to vector<1x8x3xf32>
    %336 = vector.shape_cast %335 : vector<1x8x3xf32> to vector<8x3xf32>
    %337 = vector.extract_strided_slice %277 {offsets = [7, 0, 0], sizes = [1, 8, 3], strides = [1, 1, 1]} : vector<8x8x3xf32> to vector<1x8x3xf32>
    %338 = vector.shape_cast %337 : vector<1x8x3xf32> to vector<8x3xf32>
    %339 = vector.shape_cast %336 : vector<8x3xf32> to vector<8x1x3xf32>
    %340 = vector.shape_cast %338 : vector<8x3xf32> to vector<8x1x3xf32>
    %341 = tpu.concatenate %339, %340 in 1 : vector<8x1x3xf32>, vector<8x1x3xf32> -> vector<8x2x3xf32>
    %342 = vector.shape_cast %341 : vector<8x2x3xf32> to vector<16x3xf32>
    %343 = vector.shape_cast %286 : vector<16x3xf32> to vector<1x16x3xf32>
    %344 = vector.shape_cast %294 : vector<16x3xf32> to vector<1x16x3xf32>
    %345 = vector.shape_cast %302 : vector<16x3xf32> to vector<1x16x3xf32>
    %346 = vector.shape_cast %310 : vector<16x3xf32> to vector<1x16x3xf32>
    %347 = vector.shape_cast %318 : vector<16x3xf32> to vector<1x16x3xf32>
    %348 = vector.shape_cast %326 : vector<16x3xf32> to vector<1x16x3xf32>
    %349 = vector.shape_cast %334 : vector<16x3xf32> to vector<1x16x3xf32>
    %350 = vector.shape_cast %342 : vector<16x3xf32> to vector<1x16x3xf32>
    %351 = tpu.concatenate %343, %344, %345, %346, %347, %348, %349, %350 in 0 : vector<1x16x3xf32>, vector<1x16x3xf32>, vector<1x16x3xf32>, vector<1x16x3xf32>, vector<1x16x3xf32>, vector<1x16x3xf32>, vector<1x16x3xf32>, vector<1x16x3xf32> -> vector<8x16x3xf32>
    %352 = vector.extract_strided_slice %276 {offsets = [0, 0, 0], sizes = [1, 8, 3], strides = [1, 1, 1]} : vector<8x8x3xf32> to vector<1x8x3xf32>
    %353 = vector.shape_cast %352 : vector<1x8x3xf32> to vector<8x3xf32>
    %354 = vector.extract_strided_slice %275 {offsets = [0, 0, 0], sizes = [1, 8, 3], strides = [1, 1, 1]} : vector<8x8x3xf32> to vector<1x8x3xf32>
    %355 = vector.shape_cast %354 : vector<1x8x3xf32> to vector<8x3xf32>
    %356 = vector.shape_cast %353 : vector<8x3xf32> to vector<8x1x3xf32>
    %357 = vector.shape_cast %355 : vector<8x3xf32> to vector<8x1x3xf32>
    %358 = tpu.concatenate %356, %357 in 1 : vector<8x1x3xf32>, vector<8x1x3xf32> -> vector<8x2x3xf32>
    %359 = vector.shape_cast %358 : vector<8x2x3xf32> to vector<16x3xf32>
    %360 = vector.extract_strided_slice %276 {offsets = [1, 0, 0], sizes = [1, 8, 3], strides = [1, 1, 1]} : vector<8x8x3xf32> to vector<1x8x3xf32>
    %361 = vector.shape_cast %360 : vector<1x8x3xf32> to vector<8x3xf32>
    %362 = vector.extract_strided_slice %275 {offsets = [1, 0, 0], sizes = [1, 8, 3], strides = [1, 1, 1]} : vector<8x8x3xf32> to vector<1x8x3xf32>
    %363 = vector.shape_cast %362 : vector<1x8x3xf32> to vector<8x3xf32>
    %364 = vector.shape_cast %361 : vector<8x3xf32> to vector<8x1x3xf32>
    %365 = vector.shape_cast %363 : vector<8x3xf32> to vector<8x1x3xf32>
    %366 = tpu.concatenate %364, %365 in 1 : vector<8x1x3xf32>, vector<8x1x3xf32> -> vector<8x2x3xf32>
    %367 = vector.shape_cast %366 : vector<8x2x3xf32> to vector<16x3xf32>
    %368 = vector.extract_strided_slice %276 {offsets = [2, 0, 0], sizes = [1, 8, 3], strides = [1, 1, 1]} : vector<8x8x3xf32> to vector<1x8x3xf32>
    %369 = vector.shape_cast %368 : vector<1x8x3xf32> to vector<8x3xf32>
    %370 = vector.extract_strided_slice %275 {offsets = [2, 0, 0], sizes = [1, 8, 3], strides = [1, 1, 1]} : vector<8x8x3xf32> to vector<1x8x3xf32>
    %371 = vector.shape_cast %370 : vector<1x8x3xf32> to vector<8x3xf32>
    %372 = vector.shape_cast %369 : vector<8x3xf32> to vector<8x1x3xf32>
    %373 = vector.shape_cast %371 : vector<8x3xf32> to vector<8x1x3xf32>
    %374 = tpu.concatenate %372, %373 in 1 : vector<8x1x3xf32>, vector<8x1x3xf32> -> vector<8x2x3xf32>
    %375 = vector.shape_cast %374 : vector<8x2x3xf32> to vector<16x3xf32>
    %376 = vector.extract_strided_slice %276 {offsets = [3, 0, 0], sizes = [1, 8, 3], strides = [1, 1, 1]} : vector<8x8x3xf32> to vector<1x8x3xf32>
    %377 = vector.shape_cast %376 : vector<1x8x3xf32> to vector<8x3xf32>
    %378 = vector.extract_strided_slice %275 {offsets = [3, 0, 0], sizes = [1, 8, 3], strides = [1, 1, 1]} : vector<8x8x3xf32> to vector<1x8x3xf32>
    %379 = vector.shape_cast %378 : vector<1x8x3xf32> to vector<8x3xf32>
    %380 = vector.shape_cast %377 : vector<8x3xf32> to vector<8x1x3xf32>
    %381 = vector.shape_cast %379 : vector<8x3xf32> to vector<8x1x3xf32>
    %382 = tpu.concatenate %380, %381 in 1 : vector<8x1x3xf32>, vector<8x1x3xf32> -> vector<8x2x3xf32>
    %383 = vector.shape_cast %382 : vector<8x2x3xf32> to vector<16x3xf32>
    %384 = vector.extract_strided_slice %276 {offsets = [4, 0, 0], sizes = [1, 8, 3], strides = [1, 1, 1]} : vector<8x8x3xf32> to vector<1x8x3xf32>
    %385 = vector.shape_cast %384 : vector<1x8x3xf32> to vector<8x3xf32>
    %386 = vector.extract_strided_slice %275 {offsets = [4, 0, 0], sizes = [1, 8, 3], strides = [1, 1, 1]} : vector<8x8x3xf32> to vector<1x8x3xf32>
    %387 = vector.shape_cast %386 : vector<1x8x3xf32> to vector<8x3xf32>
    %388 = vector.shape_cast %385 : vector<8x3xf32> to vector<8x1x3xf32>
    %389 = vector.shape_cast %387 : vector<8x3xf32> to vector<8x1x3xf32>
    %390 = tpu.concatenate %388, %389 in 1 : vector<8x1x3xf32>, vector<8x1x3xf32> -> vector<8x2x3xf32>
    %391 = vector.shape_cast %390 : vector<8x2x3xf32> to vector<16x3xf32>
    %392 = vector.extract_strided_slice %276 {offsets = [5, 0, 0], sizes = [1, 8, 3], strides = [1, 1, 1]} : vector<8x8x3xf32> to vector<1x8x3xf32>
    %393 = vector.shape_cast %392 : vector<1x8x3xf32> to vector<8x3xf32>
    %394 = vector.extract_strided_slice %275 {offsets = [5, 0, 0], sizes = [1, 8, 3], strides = [1, 1, 1]} : vector<8x8x3xf32> to vector<1x8x3xf32>
    %395 = vector.shape_cast %394 : vector<1x8x3xf32> to vector<8x3xf32>
    %396 = vector.shape_cast %393 : vector<8x3xf32> to vector<8x1x3xf32>
    %397 = vector.shape_cast %395 : vector<8x3xf32> to vector<8x1x3xf32>
    %398 = tpu.concatenate %396, %397 in 1 : vector<8x1x3xf32>, vector<8x1x3xf32> -> vector<8x2x3xf32>
    %399 = vector.shape_cast %398 : vector<8x2x3xf32> to vector<16x3xf32>
    %400 = vector.extract_strided_slice %276 {offsets = [6, 0, 0], sizes = [1, 8, 3], strides = [1, 1, 1]} : vector<8x8x3xf32> to vector<1x8x3xf32>
    %401 = vector.shape_cast %400 : vector<1x8x3xf32> to vector<8x3xf32>
    %402 = vector.extract_strided_slice %275 {offsets = [6, 0, 0], sizes = [1, 8, 3], strides = [1, 1, 1]} : vector<8x8x3xf32> to vector<1x8x3xf32>
    %403 = vector.shape_cast %402 : vector<1x8x3xf32> to vector<8x3xf32>
    %404 = vector.shape_cast %401 : vector<8x3xf32> to vector<8x1x3xf32>
    %405 = vector.shape_cast %403 : vector<8x3xf32> to vector<8x1x3xf32>
    %406 = tpu.concatenate %404, %405 in 1 : vector<8x1x3xf32>, vector<8x1x3xf32> -> vector<8x2x3xf32>
    %407 = vector.shape_cast %406 : vector<8x2x3xf32> to vector<16x3xf32>
    %408 = vector.extract_strided_slice %276 {offsets = [7, 0, 0], sizes = [1, 8, 3], strides = [1, 1, 1]} : vector<8x8x3xf32> to vector<1x8x3xf32>
    %409 = vector.shape_cast %408 : vector<1x8x3xf32> to vector<8x3xf32>
    %410 = vector.extract_strided_slice %275 {offsets = [7, 0, 0], sizes = [1, 8, 3], strides = [1, 1, 1]} : vector<8x8x3xf32> to vector<1x8x3xf32>
    %411 = vector.shape_cast %410 : vector<1x8x3xf32> to vector<8x3xf32>
    %412 = vector.shape_cast %409 : vector<8x3xf32> to vector<8x1x3xf32>
    %413 = vector.shape_cast %411 : vector<8x3xf32> to vector<8x1x3xf32>
    %414 = tpu.concatenate %412, %413 in 1 : vector<8x1x3xf32>, vector<8x1x3xf32> -> vector<8x2x3xf32>
    %415 = vector.shape_cast %414 : vector<8x2x3xf32> to vector<16x3xf32>
    %416 = vector.shape_cast %359 : vector<16x3xf32> to vector<1x16x3xf32>
    %417 = vector.shape_cast %367 : vector<16x3xf32> to vector<1x16x3xf32>
    %418 = vector.shape_cast %375 : vector<16x3xf32> to vector<1x16x3xf32>
    %419 = vector.shape_cast %383 : vector<16x3xf32> to vector<1x16x3xf32>
    %420 = vector.shape_cast %391 : vector<16x3xf32> to vector<1x16x3xf32>
    %421 = vector.shape_cast %399 : vector<16x3xf32> to vector<1x16x3xf32>
    %422 = vector.shape_cast %407 : vector<16x3xf32> to vector<1x16x3xf32>
    %423 = vector.shape_cast %415 : vector<16x3xf32> to vector<1x16x3xf32>
    %424 = tpu.concatenate %416, %417, %418, %419, %420, %421, %422, %423 in 0 : vector<1x16x3xf32>, vector<1x16x3xf32>, vector<1x16x3xf32>, vector<1x16x3xf32>, vector<1x16x3xf32>, vector<1x16x3xf32>, vector<1x16x3xf32>, vector<1x16x3xf32> -> vector<8x16x3xf32>
    %425 = vector.shape_cast %351 : vector<8x16x3xf32> to vector<8x1x16x3xf32>
    %426 = vector.shape_cast %424 : vector<8x16x3xf32> to vector<8x1x16x3xf32>
    %427 = tpu.concatenate %425, %426 in 1 : vector<8x1x16x3xf32>, vector<8x1x16x3xf32> -> vector<8x2x16x3xf32>
    %428 = vector.shape_cast %427 : vector<8x2x16x3xf32> to vector<16x16x3xf32>
    %c0_55 = arith.constant 0 : index
    %c0_56 = arith.constant 0 : index
    %c0_57 = arith.constant 0 : index
    %c0_58 = arith.constant 0 : index
    %429 = vector.load %arg14[%c0_55, %c0_56, %c0_57, %c0_58] : memref<1x16x16x3xf32, #tpu.memory_space<vmem>>, vector<1x16x16x3xf32>
    %430 = vector.shape_cast %429 : vector<1x16x16x3xf32> to vector<16x16x3xf32>
    %431 = vector.shape_cast %428 : vector<16x16x3xf32> to vector<1x16x16x3xf32>
    tpu.vector_store %arg14[%c0_55, %c0_56, %c0_57, %c0_58], %431 {strides = array<i32>} : memref<1x16x16x3xf32, #tpu.memory_space<vmem>>, vector<1x16x16x3xf32>,
    return
  }
  func.func @transform_0(%arg0: i32) -> (i32, i32, i32, i32) {
    %c0_i32 = arith.constant 0 : i32
    %c0_i32_0 = arith.constant 0 : i32
    %c0_i32_1 = arith.constant 0 : i32
    %c0_i32_2 = arith.constant 0 : i32
    return %arg0, %c0_i32, %c0_i32_0, %c0_i32_1 : i32, i32, i32, i32
  }
  func.func @transform_1(%arg0: i32) -> (i32, i32) {
    %c0_i32 = arith.constant 0 : i32
    %c0_i32_0 = arith.constant 0 : i32
    %c0_i32_1 = arith.constant 0 : i32
    return %c0_i32, %c0_i32_0 : i32, i32
  }
  func.func @transform_2(%arg0: i32) -> (i32, i32) {
    %c0_i32 = arith.constant 0 : i32
    %c0_i32_0 = arith.constant 0 : i32
    %c0_i32_1 = arith.constant 0 : i32
    return %c0_i32, %c0_i32_0 : i32, i32
  }
  func.func @transform_3(%arg0: i32) -> (i32, i32) {
    %c0_i32 = arith.constant 0 : i32
    %c0_i32_0 = arith.constant 0 : i32
    %c0_i32_1 = arith.constant 0 : i32
    return %c0_i32, %c0_i32_0 : i32, i32
  }
  func.func @transform_4(%arg0: i32) -> (i32, i32) {
    %c0_i32 = arith.constant 0 : i32
    %c0_i32_0 = arith.constant 0 : i32
    %c0_i32_1 = arith.constant 0 : i32
    return %c0_i32, %c0_i32_0 : i32, i32
  }
  func.func @transform_5(%arg0: i32) -> (i32, i32) {
    %c0_i32 = arith.constant 0 : i32
    %c0_i32_0 = arith.constant 0 : i32
    %c0_i32_1 = arith.constant 0 : i32
    return %c0_i32, %c0_i32_0 : i32, i32
  }
  func.func @transform_6(%arg0: i32) -> (i32, i32) {
    %c0_i32 = arith.constant 0 : i32
    %c0_i32_0 = arith.constant 0 : i32
    %c0_i32_1 = arith.constant 0 : i32
    return %c0_i32, %c0_i32_0 : i32, i32
  }
  func.func @transform_7(%arg0: i32) -> (i32, i32) {
    %c0_i32 = arith.constant 0 : i32
    %c0_i32_0 = arith.constant 0 : i32
    %c0_i32_1 = arith.constant 0 : i32
    return %c0_i32, %c0_i32_0 : i32, i32
  }
  func.func @transform_8(%arg0: i32) -> (i32, i32) {
    %c0_i32 = arith.constant 0 : i32
    %c0_i32_0 = arith.constant 0 : i32
    %c0_i32_1 = arith.constant 0 : i32
    return %c0_i32, %c0_i32_0 : i32, i32
  }
  func.func @transform_9(%arg0: i32) -> (i32, i32) {
    %c0_i32 = arith.constant 0 : i32
    %c0_i32_0 = arith.constant 0 : i32
    %c0_i32_1 = arith.constant 0 : i32
    return %c0_i32, %c0_i32_0 : i32, i32
  }
  func.func @transform_10(%arg0: i32) -> (i32, i32) {
    %c0_i32 = arith.constant 0 : i32
    %c0_i32_0 = arith.constant 0 : i32
    %c0_i32_1 = arith.constant 0 : i32
    return %c0_i32, %c0_i32_0 : i32, i32
  }
  func.func @transform_11(%arg0: i32) -> (i32, i32) {
    %c0_i32 = arith.constant 0 : i32
    %c0_i32_0 = arith.constant 0 : i32
    %c0_i32_1 = arith.constant 0 : i32
    return %c0_i32, %c0_i32_0 : i32, i32
  }
  func.func @transform_12(%arg0: i32) -> (i32, i32) {
    %c0_i32 = arith.constant 0 : i32
    %c0_i32_0 = arith.constant 0 : i32
    %c0_i32_1 = arith.constant 0 : i32
    return %c0_i32, %c0_i32_0 : i32, i32
  }
  func.func @transform_13(%arg0: i32) -> (i32, i32, i32, i32) {
    %c0_i32 = arith.constant 0 : i32
    %c0_i32_0 = arith.constant 0 : i32
    %c0_i32_1 = arith.constant 0 : i32
    %c0_i32_2 = arith.constant 0 : i32
    return %arg0, %c0_i32, %c0_i32_0, %c0_i32_1 : i32, i32, i32, i32
  }
}

</mosaic_0001>

<bundles_post_ra>
// kernel: new_norm2b_forward.1
= control target key start
LH: loop header
LB: loop body
LE: loop exit
PB: predicated region body
PF: predicated region fallthrough
CT: control target
= control target key end

     0   :  { %s10621_s25 = smov 0   ;;  %s14409_s0 = inlined_call_operand.vmem [shape: bf16[2,16,16,3], index: 0, kind: input, shape index: {}]   ;;  %s14410_s1 = inlined_call_operand.vmem [shape: bf16[48,32], index: 1, kind: input, shape index: {}]   ;;  %s14411_s2 = inlined_call_operand.vmem [shape: bf16[1152,64], index: 2, kind: input, shape index: {}]   ;;  %s14412_s3 = inlined_call_operand.vmem [shape: bf16[576,128], index: 3, kind: input, shape index: {}]   ;;  %s14413_s4 = inlined_call_operand.vmem [shape: bf16[1152,64], index: 4, kind: input, shape index: {}]   ;;  %s14414_s5 = inlined_call_operand.vmem [shape: bf16[576,128], index: 5, kind: input, shape index: {}]   ;;  %s14415_s6 = inlined_call_operand.vmem [shape: bf16[128,12], index: 6, kind: input, shape index: {}]   ;;  %s14416_s7 = inlined_call_operand.vmem [shape: f32[1,32], index: 7, kind: input, shape index: {}]   ;;  %s14417_s8 = inlined_call_operand.vmem [shape: f32[1,64], index: 8, kind: input, shape index: {}]   ;;  %s14418_s9 = inlined_call_operand.vmem [shape: f32[1,128], index: 9, kind: input, shape index: {}]   ;;  %s14419_s10 = inlined_call_operand.vmem [shape: f32[1,64], index: 10, kind: input, shape index: {}]   ;;  %s14420_s11 = inlined_call_operand.vmem [shape: f32[1,128], index: 11, kind: input, shape index: {}]   ;;  %s14421_s12 = inlined_call_operand.vmem [shape: f32[1,12], index: 12, kind: input, shape index: {}]   ;;  %s14422_s13 = inlined_call_operand.vmem [shape: f32[2,16,16,3], index: 13, kind: output, shape index: {}]  }
   0x1 LB: > { %s9516_s26 = sadd.s32 4294967295, %s10534_s25   ;;  %p9520_p0 = scmp.ge.s32.totalorder %s10534_s25, 1  ;;  %s10534_s25 = sphi %s10621_s25, %s23_s25  }
   0x2   : > { %p387_p1 = scmp.lt.s32.totalorder %s10534_s25, 3 }
   0x4   : > { %p388_p2 = pnand %p9520_p0, %p387_p1 }
   0x6   : > { %391 = sbr.rel (%p388_p2) target bundleno = 3325 (0xcfd), region = 72 }
   0xd   : > { %vm707_vm0 = vcmask 1040384   ;;  %vm708_vm1 = vsmask.f32 256  ;;  %v14423_v0 = vmov 0   ;;  %vm1119_vm3 = vcmask 1041408   ;;  %p431_p3 = scmp.lt.s32.totalorder %s9516_s26, 1 }
   0xe   : > { %v10630_v1 = vrot.slane %v14423_v0, 7  ;;  %vm10633_vm2 = vmand %vm707_vm0, %vm708_vm1  ;;  %vm1120_vm4 = vsmask.f32 1280  ;;  %vm1208_vm5 = vcmask 1042432   ;;  %vm1209_vm6 = vsmask.f32 2304 }
   0xf   : > { %vm1297_vm7 = vcmask 1043456   ;;  %s14537_s26 = smov (!%p431_p3, %s9516_s26), 1  ;;  %vm1298_vm8 = vsmask.f32 3328  ;;  %vm10654_vm9 = vmand %vm1119_vm3, %vm1120_vm4  ;;  %s14447_s14 = smov 3   ;;  %vm2046_vm12 = vcmask 48128  }
  0x10   : > { %v10640_v3 = vsel %vm10633_vm2, 0, %v10630_v1  ;;  %v10645_v4 = vsel %vm10633_vm2, %v10630_v1, 0  ;;  %s9815_s27 = sshll.u32 %s14537_s26, 7  ;;  %vm10665_vm10 = vmand %vm1208_vm5, %vm1209_vm6  ;;  %s10538_s15 = smov 9   ;;  %vm2027_vm13 = vcmask 23552   ;;  %vm2065_vm14 = vcmask 72704  }
  0x11   : > { %v14441_v5 = vrot.slane %v10640_v3, 1  ;;  %v1369_v6 = vshrl.u32 %v10640_v3, 16  ;;  %v14438_v7 = vrot.slane %v10640_v3, 2  ;;  %v1557_v8 = vshrl.u32 %v10645_v4, 16  ;;  %s10672_s30 = scalar_lea.vmem %s14409_s0, %s9815_s27  ;;  %vm10675_vm11 = vmand %vm1297_vm7, %vm1298_vm8  ;;  %s14445_s16 = smov 6   ;;  %v10467_v2 = vld [vmem:[%s14414_s5 + $0x10] sm:$0xff]  }
  0x12   : > { %v14437_v13 = vrot.slane %v10640_v3, 3  ;;  %v1522_v17 = vrot.slane %v10640_v3, 4  ;;  %v10253_v21 = vld [vmem:[%s10672_s30 + $0x18] sm:$0xff]   ;;  %v10254_v23 = vld [vmem:[%s10672_s30 + $0x8] sm:$0xff]   ;;  %v10689_v24 = vshll.u32 %v10640_v3, 16  ;;  %v10697_v29 = vld [vmem:[%s10672_s30] sm:$0xff]  }
  0x13   : > { %v1437_v10 = vrot.slane %v1369_v6, 1  ;;  %v1471_v11 = vrot.slane %v1369_v6, 2  ;;  %v1624_v12 = vsel %vm10633_vm2, %v1369_v6, %v14441_v5  ;;  %v1505_v16 = vrot.slane %v1369_v6, 3  ;;  %v10255_v28 = vld [vmem:[%s10672_s30 + $0x28] sm:$0xff]   ;;  %s10540_s17 = smov 24   ;;  %s10541_s22 = smov 12  }
  0x14   : > { %v1559_v19 = vrot.slane %v1557_v8, 4  ;;  %v583_v26 = vshrl.u32 %v10253_v21, 16  ;;  %v586_v27 = vshll.u32 %v10253_v21, 16  ;;  %v569_v31 = vshrl.u32 %v10254_v23, 16  ;;  %s10542_s27 = smov 36   ;;  %s10543_s28 = smov 32  }
  0x15   : > { %v1643_v18 = vsel %vm707_vm0, %v1624_v12, %v1437_v10  ;;  %v572_v32 = vshll.u32 %v10254_v23, 16  ;;  %v597_v35 = vshrl.u32 %v10255_v28, 16  ;;  %v600_v36 = vshll.u32 %v10255_v28, 16  ;;  %s14514_s18 = smov 6   ;;  %s10550_s19 = smov 119  }
  0x16   : > { %v1709_v20 = vsel %vm10654_vm9, %v1643_v18, %v14438_v7  ;;  %v585_v34 = vrot.slane %v583_v26, 7  ;;  %v571_v38 = vrot.slane %v569_v31, 7  ;;  %v562_v45 = vshrl.u32 %v10697_v29, 16 }
  0x17   : > { %v1728_v22 = vsel %vm1119_vm3, %v1709_v20, %v1471_v11  ;;  %v599_v41 = vrot.slane %v597_v35, 7  ;;  %v565_v46 = vshll.u32 %v10697_v29, 16  ;;  %vm2201_vm15 = vcmask 97280  }
  0x18   : > { %v1794_v25 = vsel %vm10665_vm10, %v1728_v22, %v14437_v13  ;;  %v588_v39 = vor.u32 %v586_v27, %v585_v34  ;;  %v10709_v40 = vsel %vm10633_vm2, %v585_v34, 0  ;;  %v574_v44 = vor.u32 %v572_v32, %v571_v38  ;;  %v10257_v22 = vld [vmem:[%s10672_s30 + $0x10] sm:$0xff]  }
  0x19   : > { %v1813_v30 = vsel %vm1208_vm5, %v1794_v25, %v1505_v16  ;;  %v1573_v43 = vshrl.u32 %v10709_v40, 16  ;;  %v10721_v48 = vsel %vm10633_vm2, %v571_v38, 0  ;;  %v602_v49 = vor.u32 %v600_v36, %v599_v41  ;;  %v10258_v38 = vld [vmem:[%s10672_s30 + $0x38] sm:$0xff]  }
  0x1a   : > { %v1879_v33 = vsel %vm10675_vm11, %v1813_v30, %v1522_v17  ;;  %v10717_v47 = vsel %vm10633_vm2, 0, %v588_v39  ;;  %v10725_v50 = vsel %vm10633_vm2, %v599_v41, 0  ;;  %v10734_v57 = vsel %vm10633_vm2, 0, %v574_v44 }
  0x1b   : > { %v10703_v37 = vsel %vm1297_vm7, %v1879_v33, %v1559_v19  ;;  %v14433_v51 = vrot.slane %v10717_v47, 1  ;;  %v14427_v52 = vrot.slane %v10717_v47, 2  ;;  %v14425_v53 = vrot.slane %v10717_v47, 3 }
  0x1c   : > { %1956 = vrot.lane.b32.xlu0 %v10703_v37, %s14447_s14  ;;  %v1377_v54 = vshrl.u32 %v10717_v47, 16  ;;  %v1526_v55 = vrot.slane %v10717_v47, 4  ;;  %v1575_v56 = vrot.slane %v1573_v43, 4  ;;  %v1565_v58 = vshrl.u32 %v10721_v48, 16 }
  0x1d   : > { %v14436_v63 = vrot.slane %v10734_v57, 1  ;;  %v14435_v6 = vrot.slane %v10734_v57, 2  ;;  %v14432_v8 = vrot.slane %v10734_v57, 3  ;;  %v1373_v10 = vshrl.u32 %v10734_v57, 16 }
  0x1e   : > { %v1441_v59 = vrot.slane %v1377_v54, 1  ;;  %v1475_v60 = vrot.slane %v1377_v54, 2  ;;  %v1509_v61 = vrot.slane %v1377_v54, 3  ;;  %v1628_v62 = vsel %vm10633_vm2, %v1377_v54, %v14433_v51 }
  0x1f   : > { %v1524_v12 = vrot.slane %v10734_v57, 4  ;;  %v1567_v16 = vrot.slane %v1565_v58, 4  ;;  %v10749_v17 = vsel %vm10633_vm2, 0, %v602_v49  ;;  %v1439_v19 = vrot.slane %v1373_v10, 1 }
  0x20   : > { %v1659_v11 = vsel %vm707_vm0, %v1628_v62, %v1441_v59  ;;  %v1473_v20 = vrot.slane %v1373_v10, 2  ;;  %v1507_v21 = vrot.slane %v1373_v10, 3  ;;  %v1626_v25 = vsel %vm10633_vm2, %v1373_v10, %v14436_v63  ;;  %v10793_v10 = vld [vmem:[%s10672_s30 + $0x20] sm:$0xff]  }
  0x21   : > { %v1713_v18 = vsel %vm10654_vm9, %v1659_v11, %v14427_v52  ;;  %v14434_v26 = vrot.slane %v10749_v17, 1  ;;  %v14431_v27 = vrot.slane %v10749_v17, 2  ;;  %v1651_v30 = vsel %vm707_vm0, %v1626_v25, %v1439_v19 }
  0x22   : > { %v1744_v23 = vsel %vm1119_vm3, %v1713_v18, %v1475_v60  ;;  %v14426_v31 = vrot.slane %v10749_v17, 3  ;;  %v1381_v32 = vshrl.u32 %v10749_v17, 16  ;;  %v1711_v34 = vsel %vm10654_vm9, %v1651_v30, %v14435_v6 }
  0x23   : > { %v1798_v28 = vsel %vm10665_vm10, %v1744_v23, %v14425_v53  ;;  %v1528_v35 = vrot.slane %v10749_v17, 4  ;;  %v1581_v36 = vshrl.u32 %v10725_v50, 16  ;;  %v1736_v41 = vsel %vm1119_vm3, %v1711_v34, %v1473_v20 }
  0x24   : > { %v1829_v33 = vsel %vm1208_vm5, %v1798_v28, %v1509_v61  ;;  %v1443_v43 = vrot.slane %v1381_v32, 1  ;;  %v1477_v44 = vrot.slane %v1381_v32, 2  ;;  %v1796_v54 = vsel %vm10665_vm10, %v1736_v41, %v14432_v8 }
  0x25   : > { %v1883_v39 = vsel %vm10675_vm11, %v1829_v33, %v1526_v55  ;;  %v1511_v58 = vrot.slane %v1381_v32, 3  ;;  %v1583_v59 = vrot.slane %v1581_v36, 4  ;;  %v1821_v60 = vsel %vm1208_vm5, %v1796_v54, %v1507_v21 }
  0x26   : > { %v1910_v49 = vsel %vm1297_vm7, %v1883_v39, %v1575_v56  ;;  %v1630_v55 = vsel %vm10633_vm2, %v1381_v32, %v14434_v26  ;;  %v564_v61 = vrot.slane %v562_v45, 7  ;;  %v576_v62 = vshrl.u32 %v10257_v22, 16 }
  0x27   : > { %1960 = vrot.lane.b32.xlu1 %v1910_v49, %s14447_s14  ;;  %v1881_v56 = vsel %vm10675_vm11, %v1821_v60, %v1524_v12  ;;  %v1667_v11 = vsel %vm707_vm0, %v1630_v55, %v1443_v43  ;;  %v579_v18 = vshll.u32 %v10257_v22, 16  ;;  %v611_v19 = vshrl.u32 %v10258_v38, 16 }
  0x28   : > { %v1904_v20 = vsel %vm1297_vm7, %v1881_v56, %v1567_v16  ;;  %v1715_v21 = vsel %vm10654_vm9, %v1667_v11, %v14431_v27  ;;  %v567_v45 = vor.u32 %v565_v46, %v564_v61  ;;  %v10807_v23 = vsel %vm10633_vm2, %v564_v61, 0 }
  0x29   : > { %1958 = vrot.lane.b32.xlu0 %v1904_v20, %s14447_s14  ;;  %v1752_v12 = vsel %vm1119_vm3, %v1715_v21, %v1477_v44  ;;  %v1561_v22 = vshrl.u32 %v10807_v23, 16  ;;  %v578_v25 = vrot.slane %v576_v62, 7  ;;  %v613_v16 = vrot.slane %v611_v19, 7 }
  0x2a   : > { %v1800_v28 = vsel %vm10665_vm10, %v1752_v12, %v14426_v31  ;;  %v10818_v29 = vsel %vm10633_vm2, 0, %v567_v45  ;;  %v614_v46 = vshll.u32 %v10258_v38, 16  ;;  %v590_v30 = vshrl.u32 %v10793_v10, 16  ;;  %v10261_v31 = vld [vmem:[%s10672_s30 + $0x48] sm:$0xff]  }
  0x2b   : > { %v1837_v32 = vsel %vm1208_vm5, %v1800_v28, %v1511_v58  ;;  %v847_v33 = vrot.slane %v10818_v29, 1  ;;  %v898_v34 = vrot.slane %v10818_v29, 2  ;;  %v949_v36 = vrot.slane %v10818_v29, 3 }
  0x2c   : > { %v1885_v39 = vsel %vm10675_vm11, %v1837_v32, %v1528_v35  ;;  %v1371_v41 = vshrl.u32 %v10818_v29, 16  ;;  %v1523_v43 = vrot.slane %v10818_v29, 4  ;;  %v1563_v44 = vrot.slane %v1561_v22, 4 }
  0x2d   : > { %v1916_v38 = vsel %vm1297_vm7, %v1885_v39, %v1583_v59  ;;  %v581_v49 = vor.u32 %v579_v18, %v578_v25  ;;  %v10832_v54 = vsel %vm10633_vm2, %v578_v25, 0  ;;  %v616_v58 = vor.u32 %v614_v46, %v613_v16 }
  0x2e   : > { %1962 = vrot.lane.b32.xlu1 %v1916_v38, %s14447_s14  ;;  %v1438_v60 = vrot.slane %v1371_v41, 1  ;;  %v1472_v55 = vrot.slane %v1371_v41, 2  ;;  %v1506_v61 = vrot.slane %v1371_v41, 3  ;;  %v1625_v35 = vsel %vm10633_vm2, %v1371_v41, %v847_v33 }
  0x2f   : > { %v10841_v62 = vsel %vm10633_vm2, 0, %v581_v49  ;;  %v1569_v59 = vshrl.u32 %v10832_v54, 16  ;;  %v10846_v56 = vsel %vm10633_vm2, 0, %v616_v58  ;;  %v10850_v11 = vsel %vm10633_vm2, %v613_v16, 0  ;;  %v10260_v58 = vld [vmem:[%s10672_s30 + $0x30] sm:$0xff]  }
  0x30   : > { %v1647_v18 = vsel %vm707_vm0, %v1625_v35, %v1438_v60  ;;  %v849_v19 = vrot.slane %v10841_v62, 1  ;;  %v900_v20 = vrot.slane %v10841_v62, 2  ;;  %v951_v21 = vrot.slane %v10841_v62, 3 }
  0x31   : > { %v1710_v45 = vsel %vm10654_vm9, %v1647_v18, %v898_v34  ;;  %v1375_v12 = vshrl.u32 %v10841_v62, 16  ;;  %v1525_v22 = vrot.slane %v10841_v62, 4  ;;  %v1571_v25 = vrot.slane %v1569_v59, 4 }
  0x32   : > { %v1732_v16 = vsel %vm1119_vm3, %v1710_v45, %v1472_v55  ;;  %v14430_v28 = vrot.slane %v10846_v56, 1  ;;  %v14428_v46 = vrot.slane %v10846_v56, 2  ;;  %v14429_v32 = vrot.slane %v10846_v56, 3 }
  0x33   : > { %v1795_v39 = vsel %vm10665_vm10, %v1732_v16, %v949_v36  ;;  %v1440_v41 = vrot.slane %v1375_v12, 1  ;;  %v1474_v38 = vrot.slane %v1375_v12, 2  ;;  %v1508_v49 = vrot.slane %v1375_v12, 3 }
  0x34   : > { %v1817_v60 = vsel %vm1208_vm5, %v1795_v39, %v1506_v61  ;;  %v1627_v55 = vsel %vm10633_vm2, %v1375_v12, %v849_v19  ;;  %v1385_v35 = vshrl.u32 %v10846_v56, 16  ;;  %v1530_v59 = vrot.slane %v10846_v56, 4 }
  0x35   : > { %v1880_v18 = vsel %vm10675_vm11, %v1817_v60, %v1523_v43  ;;  %v1655_v45 = vsel %vm707_vm0, %v1627_v55, %v1440_v41  ;;  %v1589_v16 = vshrl.u32 %v10850_v11, 16  ;;  %v592_v0 = vrot.slane %v590_v30, 7 }
  0x36   : > { %v1901_v53 = vsel %vm1297_vm7, %v1880_v18, %v1563_v44  ;;  %v1712_v61 = vsel %vm10654_vm9, %v1655_v45, %v900_v20  ;;  %v1445_v12 = vrot.slane %v1385_v35, 1  ;;  %v1479_v39 = vrot.slane %v1385_v35, 2 }
  0x37   : > { %2009 = vrot.lane.b32.xlu0 %v1901_v53, %s10538_s15  ;;  %v1740_v43 = vsel %vm1119_vm3, %v1712_v61, %v1474_v38  ;;  %v1513_v41 = vrot.slane %v1385_v35, 3  ;;  %v1591_v60 = vrot.slane %v1589_v16, 4  ;;  %v1632_v30 = vsel %vm10633_vm2, %v1385_v35, %v14430_v28 }
  0x38   : > { %v1797_v44 = vsel %vm10665_vm10, %v1740_v43, %v951_v21  ;;  %v1675_v55 = vsel %vm707_vm0, %v1632_v30, %v1445_v12  ;;  %v593_v18 = vshll.u32 %v10793_v10, 16  ;;  %v10902_v53 = vsel %vm10633_vm2, %v592_v0, 0  ;;  %v10914_v30 = vld [vmem:[%s10672_s30 + $0x40] sm:$0xff]  }
  0x39   : > { %v1825_v38 = vsel %vm1208_vm5, %v1797_v44, %v1508_v49  ;;  %v1717_v35 = vsel %vm10654_vm9, %v1675_v55, %v14428_v46  ;;  %v1577_v45 = vshrl.u32 %v10902_v53, 16  ;;  %v604_v16 = vshrl.u32 %v10260_v58, 16 }
  0x3a   : > { %v1882_v61 = vsel %vm10675_vm11, %v1825_v38, %v1525_v22  ;;  %v1760_v12 = vsel %vm1119_vm3, %v1717_v35, %v1479_v39  ;;  %v595_v10 = vor.u32 %v593_v18, %v592_v0  ;;  %v607_v43 = vshll.u32 %v10260_v58, 16 }
  0x3b   : > { %v1907_v52 = vsel %vm1297_vm7, %v1882_v61, %v1571_v25  ;;  %v1802_v49 = vsel %vm10665_vm10, %v1760_v12, %v14429_v32  ;;  %v1579_v44 = vrot.slane %v1577_v45, 4  ;;  %v606_v55 = vrot.slane %v604_v16, 7 }
  0x3c   : > { %2011 = vrot.lane.b32.xlu1 %v1907_v52, %s10538_s15  ;;  %v1845_v46 = vsel %vm1208_vm5, %v1802_v49, %v1513_v41  ;;  %v10925_v22 = vsel %vm10633_vm2, 0, %v595_v10  ;;  %v625_v0 = vshrl.u32 %v10261_v31, 16  ;;  %v628_v58 = vshll.u32 %v10261_v31, 16 }
  0x3d   : > { %v1887_v25 = vsel %vm10675_vm11, %v1845_v46, %v1530_v59  ;;  %v851_v39 = vrot.slane %v10925_v22, 1  ;;  %v902_v18 = vrot.slane %v10925_v22, 2  ;;  %v953_v38 = vrot.slane %v10925_v22, 3 }
  0x3e   : > { %v1922_v35 = vsel %vm1297_vm7, %v1887_v25, %v1591_v60  ;;  %v1379_v52 = vshrl.u32 %v10925_v22, 16  ;;  %v1527_v41 = vrot.slane %v10925_v22, 4  ;;  %v609_v45 = vor.u32 %v607_v43, %v606_v55 }
  0x3f   : > { %1964 = vrot.lane.b32.xlu0 %v1922_v35, %s14447_s14  ;;  %v10938_v31 = vsel %vm10633_vm2, %v606_v55, 0  ;;  %v627_v46 = vrot.slane %v625_v0, 7  ;;  %v618_v59 = vshrl.u32 %v10914_v30, 16  ;;  %v621_v16 = vshll.u32 %v10914_v30, 16 }
  0x40   : > { %v1442_v61 = vrot.slane %v1379_v52, 1  ;;  %v1476_v12 = vrot.slane %v1379_v52, 2  ;;  %v1510_v10 = vrot.slane %v1379_v52, 3  ;;  %v1629_v60 = vsel %vm10633_vm2, %v1379_v52, %v851_v39 }
  0x41   : > { %v10948_v43 = vsel %vm10633_vm2, 0, %v609_v45  ;;  %v1585_v49 = vshrl.u32 %v10938_v31, 16  ;;  %v630_v55 = vor.u32 %v628_v58, %v627_v46  ;;  %v10953_v0 = vsel %vm10633_vm2, %v627_v46, 0 }
  0x42   : > { %v1663_v30 = vsel %vm707_vm0, %v1629_v60, %v1442_v61  ;;  %v853_v25 = vrot.slane %v10948_v43, 1  ;;  %v904_v35 = vrot.slane %v10948_v43, 2  ;;  %v955_v32 = vrot.slane %v10948_v43, 3 }
  0x43   : > { %v1714_v52 = vsel %vm10654_vm9, %v1663_v30, %v902_v18  ;;  %v1383_v45 = vshrl.u32 %v10948_v43, 16  ;;  %v1529_v58 = vrot.slane %v10948_v43, 4  ;;  %v1587_v28 = vrot.slane %v1585_v49, 4 }
  0x44   : > { %v1748_v46 = vsel %vm1119_vm3, %v1714_v52, %v1476_v12  ;;  %v10968_v61 = vsel %vm10633_vm2, 0, %v630_v55  ;;  %v1597_v60 = vshrl.u32 %v10953_v0, 16  ;;  %v620_v27 = vrot.slane %v618_v59, 7 }
  0x45   : > { %v1799_v8 = vsel %vm10665_vm10, %v1748_v46, %v953_v38  ;;  %v1444_v30 = vrot.slane %v1383_v45, 1  ;;  %v1478_v51 = vrot.slane %v1383_v45, 2  ;;  %v1512_v26 = vrot.slane %v1383_v45, 3 }
  0x46   : > { %v1833_v6 = vsel %vm1208_vm5, %v1799_v8, %v1510_v10  ;;  %v1631_v12 = vsel %vm10633_vm2, %v1383_v45, %v853_v25  ;;  %v14440_v49 = vrot.slane %v10968_v61, 1  ;;  %v14439_v55 = vrot.slane %v10968_v61, 2 }
  0x47   : > { %v1884_v59 = vsel %vm10675_vm11, %v1833_v6, %v1527_v41  ;;  %v1671_v52 = vsel %vm707_vm0, %v1631_v12, %v1444_v30  ;;  %v14442_v46 = vrot.slane %v10968_v61, 3  ;;  %v1389_v63 = vshrl.u32 %v10968_v61, 16 }
  0x48   : > { %v1913_v8 = vsel %vm1297_vm7, %v1884_v59, %v1579_v44  ;;  %v1716_v10 = vsel %vm10654_vm9, %v1671_v52, %v904_v35  ;;  %v1532_v45 = vrot.slane %v10968_v61, 4  ;;  %v1599_v13 = vrot.slane %v1597_v60, 4 }
  0x49   : > { %2013 = vrot.lane.b32.xlu1 %v1913_v8, %s10538_s15  ;;  %v1756_v6 = vsel %vm1119_vm3, %v1716_v10, %v1478_v51  ;;  %v1447_v41 = vrot.slane %v1389_v63, 1  ;;  %v1481_v30 = vrot.slane %v1389_v63, 2  ;;  %v1515_v12 = vrot.slane %v1389_v63, 3 }
  0x4a   : > { %v1801_v44 = vsel %vm10665_vm10, %v1756_v6, %v955_v32  ;;  %v1634_v59 = vsel %vm10633_vm2, %v1389_v63, %v14440_v49  ;;  %v623_v52 = vor.u32 %v621_v16, %v620_v27  ;;  %v11005_v60 = vsel %vm10633_vm2, %v620_v27, 0 }
  0x4b   : > { %v1841_v51 = vsel %vm1208_vm5, %v1801_v44, %v1512_v26  ;;  %v1683_v8 = vsel %vm707_vm0, %v1634_v59, %v1447_v41  ;;  %v1593_v10 = vshrl.u32 %v11005_v60, 16  ;;  %v757_v7 = vshll.u32 %v10841_v62, 16 }
  0x4c   : > { %v1886_v6 = vsel %vm10675_vm11, %v1841_v51, %v1529_v58  ;;  %v1719_v63 = vsel %vm10654_vm9, %v1683_v8, %v14439_v55  ;;  %v11019_v27 = vsel %vm10633_vm2, 0, %v623_v52  ;;  %v1019_v26 = vrot.slane %v10832_v54, 4 }
  0x4d   : > { %v1919_v16 = vsel %vm1297_vm7, %v1886_v6, %v1587_v28  ;;  %v1768_v41 = vsel %vm1119_vm3, %v1719_v63, %v1481_v30  ;;  %v855_v44 = vrot.slane %v11019_v27, 1  ;;  %v906_v59 = vrot.slane %v11019_v27, 2 }
  0x4e   : > { %2015 = vrot.lane.b32.xlu0 %v1919_v16, %s10538_s15  ;;  %v1804_v58 = vsel %vm10665_vm10, %v1768_v41, %v14442_v46  ;;  %v957_v52 = vrot.slane %v11019_v27, 3  ;;  %v1387_v51 = vshrl.u32 %v11019_v27, 16  ;;  %v1531_v54 = vrot.slane %v11019_v27, 4 }
  0x4f   : > { %v1853_v28 = vsel %vm1208_vm5, %v1804_v58, %v1515_v12  ;;  %v1595_v30 = vrot.slane %v1593_v10, 4  ;;  %v759_v8 = vrot.slane %v757_v7, 1  ;;  %v866_v6 = vrot.slane %v757_v7, 2 }
  0x50   : > { %v1889_v63 = vsel %vm10675_vm11, %v1853_v28, %v1532_v45  ;;  %v1446_v16 = vrot.slane %v1387_v51, 1  ;;  %v1480_v55 = vrot.slane %v1387_v51, 2  ;;  %v1514_v49 = vrot.slane %v1387_v51, 3 }
  0x51   : > { %v1928_v5 = vsel %vm1297_vm7, %v1889_v63, %v1599_v13  ;;  %v1633_v41 = vsel %vm10633_vm2, %v1387_v51, %v855_v44  ;;  %v917_v46 = vrot.slane %v757_v7, 3  ;;  %v968_v42 = vrot.slane %v757_v7, 4 }
  0x52   : > { %1966 = vrot.lane.b32.xlu1 %v1928_v5, %s14447_s14  ;;  %v1679_v12 = vsel %vm707_vm0, %v1633_v41, %v1446_v16  ;;  %v1036_v45 = vsel %vm10633_vm2, %v10841_v62, %v759_v8  ;;  %v749_v10 = vshll.u32 %v10818_v29, 16  ;;  %v1017_v58 = vrot.slane %v10807_v23, 4 }
  0x53   : > { %v1718_v13 = vsel %vm10654_vm9, %v1679_v12, %v906_v59  ;;  %v1065_v7 = vsel %vm707_vm0, %v1036_v45, %v849_v19  ;;  %v773_v5 = vshll.u32 %v10948_v43, 16  ;;  %v1023_v51 = vrot.slane %v10938_v31, 4 }
  0x54   : > { %v1764_v28 = vsel %vm1119_vm3, %v1718_v13, %v1480_v55  ;;  %v1125_v8 = vsel %vm10654_vm9, %v1065_v7, %v866_v6  ;;  %v751_v63 = vrot.slane %v749_v10, 1  ;;  %v864_v23 = vrot.slane %v749_v10, 2 }
  0x55   : > { %v1803_v16 = vsel %vm10665_vm10, %v1764_v28, %v957_v52  ;;  %v1154_v19 = vsel %vm1119_vm3, %v1125_v8, %v900_v20  ;;  %v915_v41 = vrot.slane %v749_v10, 3  ;;  %v966_v12 = vrot.slane %v749_v10, 4 }
  0x56   : > { %v1849_v31 = vsel %vm1208_vm5, %v1803_v16, %v1514_v49  ;;  %v1214_v55 = vsel %vm10665_vm10, %v1154_v19, %v917_v46  ;;  %v1034_v6 = vsel %vm10633_vm2, %v10818_v29, %v751_v63  ;;  %v775_v45 = vrot.slane %v773_v5, 1 }
  0x57   : > { %v1888_v13 = vsel %vm10675_vm11, %v1849_v31, %v1531_v54  ;;  %v1243_v7 = vsel %vm1208_vm5, %v1214_v55, %v951_v21  ;;  %v1057_v20 = vsel %vm707_vm0, %v1034_v6, %v847_v33  ;;  %v870_v49 = vrot.slane %v773_v5, 2 }
  0x58   : > { %v1925_v46 = vsel %vm1297_vm7, %v1888_v13, %v1595_v30  ;;  %v1303_v10 = vsel %vm10675_vm11, %v1243_v7, %v968_v42  ;;  %v1123_v28 = vsel %vm10654_vm9, %v1057_v20, %v864_v23  ;;  %v921_v8 = vrot.slane %v773_v5, 3  ;;  %v11121_v13 = vld [vmem:[%s10672_s30 + $0x50] sm:$0xff]  }
  0x59   : > { %2017 = vrot.lane.b32.xlu0 %v1925_v46, %s10538_s15  ;;  %v1329_v62 = vsel %vm1297_vm7, %v1303_v10, %v1019_v26  ;;  %v1146_v33 = vsel %vm1119_vm3, %v1123_v28, %v898_v34  ;;  %v972_v21 = vrot.slane %v773_v5, 4  ;;  %v1040_v54 = vsel %vm10633_vm2, %v10948_v43, %v775_v45  ;;  %v10263_v5 = vld [vmem:[%s10672_s30 + $0x58] sm:$0xff]  }
  0x5a   : > { %1985 = vrot.lane.b32.xlu1 %v1329_v62, %s14445_s16  ;;  %v1212_v42 = vsel %vm10665_vm10, %v1146_v33, %v915_v41  ;;  %v1081_v30 = vsel %vm707_vm0, %v1040_v54, %v853_v25  ;;  %v765_v26 = vshll.u32 %v10925_v22, 16  ;;  %v1021_v34 = vrot.slane %v10902_v53, 4  ;;  %v10264_v41 = vld [vmem:[%s10672_s30 + $0x68] sm:$0xff]  }
  0x5b   : > { %v1235_v63 = vsel %vm1208_vm5, %v1212_v42, %v949_v36  ;;  %v1129_v23 = vsel %vm10654_vm9, %v1081_v30, %v870_v49  ;;  %v781_v16 = vshll.u32 %v11019_v27, 16  ;;  %v1025_v19 = vrot.slane %v11005_v60, 4 }
  0x5c   : > { %v1301_v25 = vsel %vm10675_vm11, %v1235_v63, %v966_v12  ;;  %v1170_v53 = vsel %vm1119_vm3, %v1129_v23, %v904_v35  ;;  %v767_v31 = vrot.slane %v765_v26, 1  ;;  %v868_v55 = vrot.slane %v765_v26, 2 }
  0x5d   : > { %v1323_v29 = vsel %vm1297_vm7, %v1301_v25, %v1017_v58  ;;  %v1218_v36 = vsel %vm10665_vm10, %v1170_v53, %v921_v8  ;;  %v919_v6 = vrot.slane %v765_v26, 3  ;;  %v970_v45 = vrot.slane %v765_v26, 4 }
  0x5e   : > { %1983 = vrot.lane.b32.xlu0 %v1323_v29, %s14445_s16  ;;  %v1259_v60 = vsel %vm1208_vm5, %v1218_v36, %v955_v32  ;;  %v1038_v35 = vsel %vm10633_vm2, %v10925_v22, %v767_v31  ;;  %v783_v12 = vrot.slane %v781_v16, 1  ;;  %v872_v7 = vrot.slane %v781_v16, 2  ;;  %v10266_v36 = vld [vmem:[%s10672_s30 + $0x60] sm:$0xff]  }
  0x5f   : > { %v1307_v58 = vsel %vm10675_vm11, %v1259_v60, %v972_v21  ;;  %v1073_v20 = vsel %vm707_vm0, %v1038_v35, %v851_v39  ;;  %v923_v49 = vrot.slane %v781_v16, 3  ;;  %v974_v46 = vrot.slane %v781_v16, 4 }
  0x60   : > { %v1341_v10 = vsel %vm1297_vm7, %v1307_v58, %v1023_v51  ;;  %v1127_v32 = vsel %vm10654_vm9, %v1073_v20, %v868_v55  ;;  %v1042_v43 = vsel %vm10633_vm2, %v11019_v27, %v783_v12  ;;  %v639_v28 = vshrl.u32 %v10263_v5, 16 }
  0x61   : > { %1989 = vrot.lane.b32.xlu1 %v1341_v10, %s14445_s16  ;;  %v1162_v8 = vsel %vm1119_vm3, %v1127_v32, %v902_v18  ;;  %v1089_v39 = vsel %vm707_vm0, %v1042_v43, %v855_v44  ;;  %v642_v62 = vshll.u32 %v10263_v5, 16  ;;  %v653_v51 = vshrl.u32 %v10264_v41, 16 }
  0x62   : > { %v1216_v33 = vsel %vm10665_vm10, %v1162_v8, %v919_v6  ;;  %v1131_v21 = vsel %vm10654_vm9, %v1089_v39, %v872_v7  ;;  %v641_v54 = vrot.slane %v639_v28, 7  ;;  %v656_v42 = vshll.u32 %v10264_v41, 16 }
  0x63   : > { %v1251_v30 = vsel %vm1208_vm5, %v1216_v33, %v953_v38  ;;  %v1178_v18 = vsel %vm1119_vm3, %v1131_v21, %v906_v59  ;;  %v655_v26 = vrot.slane %v653_v51, 7  ;;  %v632_v44 = vshrl.u32 %v11121_v13, 16 }
  0x64   : > { %v1305_v5 = vsel %vm10675_vm11, %v1251_v30, %v970_v45  ;;  %v1220_v63 = vsel %vm10665_vm10, %v1178_v18, %v923_v49  ;;  %v644_v23 = vor.u32 %v642_v62, %v641_v54  ;;  %v11165_v22 = vsel %vm10633_vm2, %v641_v54, 0 }
  0x65   : > { %v1335_v38 = vsel %vm1297_vm7, %v1305_v5, %v1021_v34  ;;  %v1267_v59 = vsel %vm1208_vm5, %v1220_v63, %v957_v52  ;;  %v1605_v16 = vshrl.u32 %v11165_v22, 16  ;;  %v658_v41 = vor.u32 %v656_v42, %v655_v26  ;;  %v10267_v5 = vld [vmem:[%s10672_s30 + $0x70] sm:$0xff]  }
  0x66   : > { %1987 = vrot.lane.b32.xlu0 %v1335_v38, %s14445_s16  ;;  %v1309_v25 = vsel %vm10675_vm11, %v1267_v59, %v974_v46  ;;  %v11177_v53 = vsel %vm10633_vm2, 0, %v644_v23  ;;  %v11181_v31 = vsel %vm10633_vm2, %v655_v26, 0  ;;  %v634_v34 = vrot.slane %v632_v44, 7 }
  0x67   : > { %v1347_v27 = vsel %vm1297_vm7, %v1309_v25, %v1025_v19  ;;  %v858_v52 = vrot.slane %v11177_v53, 1  ;;  %v909_v55 = vrot.slane %v11177_v53, 2  ;;  %v960_v29 = vrot.slane %v11177_v53, 3 }
  0x68   : > { %1991 = vrot.lane.b32.xlu1 %v1347_v27, %s14445_s16  ;;  %v1393_v6 = vshrl.u32 %v11177_v53, 16  ;;  %v1534_v45 = vrot.slane %v11177_v53, 4  ;;  %v1607_v60 = vrot.slane %v1605_v16, 4  ;;  %v11193_v35 = vsel %vm10633_vm2, 0, %v658_v41 }
  0x69   : > { %v860_v19 = vrot.slane %v11193_v35, 1  ;;  %v14444_v12 = vrot.slane %v11193_v35, 2  ;;  %v14443_v7 = vrot.slane %v11193_v35, 3  ;;  %v1397_v58 = vshrl.u32 %v11193_v35, 16 }
  0x6a   : > { %v1449_v20 = vrot.slane %v1393_v6, 1  ;;  %v1483_v49 = vrot.slane %v1393_v6, 2  ;;  %v1517_v46 = vrot.slane %v1393_v6, 3  ;;  %v1636_v10 = vsel %vm10633_vm2, %v1393_v6, %v858_v52 }
  0x6b   : > { %v1451_v32 = vrot.slane %v1397_v58, 1  ;;  %v1485_v43 = vrot.slane %v1397_v58, 2  ;;  %v1519_v28 = vrot.slane %v1397_v58, 3  ;;  %v1536_v8 = vrot.slane %v11193_v35, 4 }
  0x6c   : > { %v1691_v39 = vsel %vm707_vm0, %v1636_v10, %v1449_v20  ;;  %v1613_v62 = vshrl.u32 %v11181_v31, 16  ;;  %v1638_v51 = vsel %vm10633_vm2, %v1397_v58, %v860_v19  ;;  %v635_v33 = vshll.u32 %v11121_v13, 16 }
  0x6d   : > { %v1721_v21 = vsel %vm10654_vm9, %v1691_v39, %v909_v55  ;;  %v1699_v54 = vsel %vm707_vm0, %v1638_v51, %v1451_v32  ;;  %v11218_v42 = vsel %vm10633_vm2, %v634_v34, 0  ;;  %v646_v30 = vshrl.u32 %v10266_v36, 16 }
  0x6e   : > { %v1776_v18 = vsel %vm1119_vm3, %v1721_v21, %v1483_v49  ;;  %v1615_v26 = vrot.slane %v1613_v62, 4  ;;  %v1723_v13 = vsel %vm10654_vm9, %v1699_v54, %v14444_v12  ;;  %v637_v44 = vor.u32 %v635_v33, %v634_v34 }
  0x6f   : > { %v1806_v63 = vsel %vm10665_vm10, %v1776_v18, %v960_v29  ;;  %v1784_v23 = vsel %vm1119_vm3, %v1723_v13, %v1485_v43  ;;  %v1027_v38 = vrot.slane %v11218_v42, 4  ;;  %v648_v59 = vrot.slane %v646_v30, 7 }
  0x70   : > { %v1861_v16 = vsel %vm1208_vm5, %v1806_v63, %v1517_v46  ;;  %v1808_v41 = vsel %vm10665_vm10, %v1784_v23, %v14443_v7  ;;  %v11239_v25 = vsel %vm10633_vm2, 0, %v637_v44  ;;  %v649_v34 = vshll.u32 %v10266_v36, 16 }
  0x71   : > { %v1891_v27 = vsel %vm10675_vm11, %v1861_v16, %v1534_v45  ;;  %v1869_v6 = vsel %vm1208_vm5, %v1808_v41, %v1519_v28  ;;  %v789_v58 = vshll.u32 %v11239_v25, 16  ;;  %v857_v20 = vrot.slane %v11239_v25, 1 }
  0x72   : > { %v1934_v49 = vsel %vm1297_vm7, %v1891_v27, %v1607_v60  ;;  %v1893_v46 = vsel %vm10675_vm11, %v1869_v6, %v1536_v8  ;;  %v908_v10 = vrot.slane %v11239_v25, 2  ;;  %v959_v32 = vrot.slane %v11239_v25, 3 }
  0x73   : > { %1968 = vrot.lane.b32.xlu0 %v1934_v49, %s14447_s14  ;;  %v1940_v36 = vsel %vm1297_vm7, %v1893_v46, %v1615_v26  ;;  %v791_v45 = vrot.slane %v789_v58, 1  ;;  %v874_v43 = vrot.slane %v789_v58, 2  ;;  %v925_v28 = vrot.slane %v789_v58, 3 }
  0x74   : > { %1970 = vrot.lane.b32.xlu1 %v1940_v36, %s14447_s14  ;;  %v976_v39 = vrot.slane %v789_v58, 4  ;;  %v651_v62 = vor.u32 %v649_v34, %v648_v59  ;;  %v11256_v60 = vsel %vm10633_vm2, %v648_v59, 0  ;;  %v660_v8 = vshrl.u32 %v10267_v5, 16 }
  0x75   : > { %v1044_v51 = vsel %vm10633_vm2, %v11239_v25, %v791_v45  ;;  %v1029_v33 = vrot.slane %v11256_v60, 4  ;;  %v663_v21 = vshll.u32 %v10267_v5, 16  ;;  %v11263_v54 = vshrl.u32 %v11239_v25, 16 }
  0x76   : > { %v1097_v30 = vsel %vm707_vm0, %v1044_v51, %v857_v20  ;;  %v11270_v18 = vsel %vm10633_vm2, 0, %v651_v62  ;;  %v662_v26 = vrot.slane %v660_v8, 7  ;;  %v1533_v13 = vrot.slane %v11239_v25, 4  ;;  %v10268_v62 = vld [vmem:[%s10672_s30 + $0x78] sm:$0xff]  }
  0x77   : > { %v1133_v44 = vsel %vm10654_vm9, %v1097_v30, %v874_v43  ;;  %v797_v5 = vshll.u32 %v11270_v18, 16  ;;  %v859_v63 = vrot.slane %v11270_v18, 1  ;;  %v910_v23 = vrot.slane %v11270_v18, 2 }
  0x78   : > { %v1186_v59 = vsel %vm1119_vm3, %v1133_v44, %v908_v10  ;;  %v961_v16 = vrot.slane %v11270_v18, 3  ;;  %v665_v41 = vor.u32 %v663_v21, %v662_v26  ;;  %v11284_v34 = vsel %vm10633_vm2, %v662_v26, 0 }
  0x79   : > { %v1222_v27 = vsel %vm10665_vm10, %v1186_v59, %v925_v28  ;;  %v799_v6 = vrot.slane %v797_v5, 1  ;;  %v876_v58 = vrot.slane %v797_v5, 2  ;;  %v927_v49 = vrot.slane %v797_v5, 3 }
  0x7a   : > { %v1275_v46 = vsel %vm1208_vm5, %v1222_v27, %v959_v32  ;;  %v978_v36 = vrot.slane %v797_v5, 4  ;;  %v11293_v45 = vsel %vm10633_vm2, 0, %v665_v41  ;;  %v1031_v43 = vrot.slane %v11284_v34, 4 }
  0x7b   : > { %v1311_v8 = vsel %vm10675_vm11, %v1275_v46, %v976_v39  ;;  %v1046_v28 = vsel %vm10633_vm2, %v11270_v18, %v799_v6  ;;  %v805_v51 = vshll.u32 %v11293_v45, 16  ;;  %v861_v21 = vrot.slane %v11293_v45, 1 }
  0x7c   : > { %v1353_v30 = vsel %vm1297_vm7, %v1311_v8, %v1027_v38  ;;  %v1105_v26 = vsel %vm707_vm0, %v1046_v28, %v859_v63  ;;  %v912_v44 = vrot.slane %v11293_v45, 2  ;;  %v963_v5 = vrot.slane %v11293_v45, 3 }
  0x7d   : > { %1993 = vrot.lane.b32.xlu0 %v1353_v30, %s14445_s16  ;;  %v1135_v39 = vsel %vm10654_vm9, %v1105_v26, %v876_v58  ;;  %v807_v59 = vrot.slane %v805_v51, 1  ;;  %v878_v41 = vrot.slane %v805_v51, 2  ;;  %v929_v27 = vrot.slane %v805_v51, 3 }
  0x7e   : > { %v1194_v38 = vsel %vm1119_vm3, %v1135_v39, %v910_v23  ;;  %v980_v6 = vrot.slane %v805_v51, 4  ;;  %v1448_v46 = vrot.slane %v11263_v54, 1  ;;  %v1482_v8 = vrot.slane %v11263_v54, 2 }
  0x7f   : > { %v1224_v28 = vsel %vm10665_vm10, %v1194_v38, %v927_v49  ;;  %v1048_v30 = vsel %vm10633_vm2, %v11293_v45, %v807_v59  ;;  %v1516_v58 = vrot.slane %v11263_v54, 3  ;;  %v1601_v26 = vshrl.u32 %v11218_v42, 16 }
  0x80   : > { %v1283_v39 = vsel %vm1208_vm5, %v1224_v28, %v961_v16  ;;  %v1113_v51 = vsel %vm707_vm0, %v1048_v30, %v861_v21  ;;  %v1635_v49 = vsel %vm10633_vm2, %v11263_v54, %v857_v20  ;;  %v667_v38 = vshrl.u32 %v10268_v62, 16 }
  0x81   : > { %v1313_v59 = vsel %vm10675_vm11, %v1283_v39, %v978_v36  ;;  %v1137_v42 = vsel %vm10654_vm9, %v1113_v51, %v878_v41  ;;  %v1603_v7 = vrot.slane %v1601_v26, 4  ;;  %v1687_v28 = vsel %vm707_vm0, %v1635_v49, %v1448_v46 }
  0x82   : > { %v1359_v12 = vsel %vm1297_vm7, %v1313_v59, %v1029_v33  ;;  %v1202_v30 = vsel %vm1119_vm3, %v1137_v42, %v912_v44  ;;  %v1720_v20 = vsel %vm10654_vm9, %v1687_v28, %v908_v10  ;;  %v669_v54 = vrot.slane %v667_v38, 7 }
  0x83   : > { %1995 = vrot.lane.b32.xlu1 %v1359_v12, %s14445_s16  ;;  %v1226_v36 = vsel %vm10665_vm10, %v1202_v30, %v929_v27  ;;  %v1772_v41 = vsel %vm1119_vm3, %v1720_v20, %v1482_v8  ;;  %v670_v46 = vshll.u32 %v10268_v62, 16  ;;  %v1395_v33 = vshrl.u32 %v11270_v18, 16 }
  0x84   : > { %v1291_v26 = vsel %vm1208_vm5, %v1226_v36, %v963_v5  ;;  %v1805_v10 = vsel %vm10665_vm10, %v1772_v41, %v959_v32  ;;  %v11363_v12 = vsel %vm10633_vm2, %v669_v54, 0  ;;  %v14471_v27 = vrot.slane %v10689_v24, 1 }
  0x85   : > { %v1315_v8 = vsel %vm10675_vm11, %v1291_v26, %v980_v6  ;;  %v1857_v39 = vsel %vm1208_vm5, %v1805_v10, %v1516_v58  ;;  %v672_v51 = vor.u32 %v670_v46, %v669_v54  ;;  %v1621_v49 = vshrl.u32 %v11363_v12, 16 }
  0x86   : > { %v1033_v62 = vsel %vm10633_vm2, %v10640_v3, %v14471_v27  ;;  %v1365_v32 = vsel %vm1297_vm7, %v1315_v8, %v1031_v43  ;;  %v1890_v38 = vsel %vm10675_vm11, %v1857_v39, %v1533_v13  ;;  %v1450_v59 = vrot.slane %v1395_v33, 1 }
  0x87   : > { %v1535_v42 = vrot.slane %v11270_v18, 4  ;;  %1997 = vrot.lane.b32.xlu0 %v1365_v32, %s14445_s16  ;;  %v1931_v28 = vsel %vm1297_vm7, %v1890_v38, %v1603_v7  ;;  %v11384_v6 = vsel %vm10633_vm2, 0, %v672_v51  ;;  %v1623_v58 = vrot.slane %v1621_v49, 4 }
  0x88   : > { %v1484_v30 = vrot.slane %v1395_v33, 2  ;;  %2019 = vrot.lane.b32.xlu1 %v1931_v28, %s10538_s15  ;;  %v862_v25 = vrot.slane %v11384_v6, 1  ;;  %v913_v43 = vrot.slane %v11384_v6, 2  ;;  %v1401_v13 = vshrl.u32 %v11384_v6, 16 }
  0x89   : > { %v1518_v20 = vrot.slane %v1395_v33, 3  ;;  %v964_v54 = vrot.slane %v11384_v6, 3  ;;  %v1609_v36 = vshrl.u32 %v11256_v60, 16  ;;  %v1637_v7 = vsel %vm10633_vm2, %v1395_v33, %v859_v63 }
  0x8a   : > { %v1399_v41 = vshrl.u32 %v11293_v45, 16  ;;  %v1453_v46 = vrot.slane %v1401_v13, 1  ;;  %v1487_v26 = vrot.slane %v1401_v13, 2  ;;  %v1538_v10 = vrot.slane %v11384_v6, 4 }
  0x8b   : > { %v1640_v27 = vsel %vm10633_vm2, %v1401_v13, %v862_v25  ;;  %v1521_v8 = vrot.slane %v1401_v13, 3  ;;  %v1611_v39 = vrot.slane %v1609_v36, 4  ;;  %v1695_v60 = vsel %vm707_vm0, %v1637_v7, %v1450_v59 }
  0x8c   : > { %v1452_v51 = vrot.slane %v1399_v41, 1  ;;  %v1707_v49 = vsel %vm707_vm0, %v1640_v27, %v1453_v46  ;;  %v1722_v63 = vsel %vm10654_vm9, %v1695_v60, %v910_v23  ;;  %v1486_v33 = vrot.slane %v1399_v41, 2 }
  0x8d   : > { %v1520_v32 = vrot.slane %v1399_v41, 3  ;;  %v1725_v38 = vsel %vm10654_vm9, %v1707_v49, %v913_v43  ;;  %v1780_v28 = vsel %vm1119_vm3, %v1722_v63, %v1484_v30  ;;  %v1617_v13 = vshrl.u32 %v11284_v34, 16 }
  0x8e   : > { %v1639_v59 = vsel %vm10633_vm2, %v1399_v41, %v861_v21  ;;  %v1792_v36 = vsel %vm1119_vm3, %v1725_v38, %v1487_v26  ;;  %v1807_v23 = vsel %vm10665_vm10, %v1780_v28, %v961_v16  ;;  %v1537_v7 = vrot.slane %v11293_v45, 4 }
  0x8f   : > { %v1703_v46 = vsel %vm707_vm0, %v1639_v59, %v1452_v51  ;;  %v1810_v34 = vsel %vm10665_vm10, %v1792_v36, %v964_v54  ;;  %v1865_v30 = vsel %vm1208_vm5, %v1807_v23, %v1518_v20  ;;  %v863_v18 = vrot.slane %v10689_v24, 2 }
  0x90   : > { %v1724_v21 = vsel %vm10654_vm9, %v1703_v46, %v912_v44  ;;  %v1877_v16 = vsel %vm1208_vm5, %v1810_v34, %v1521_v8  ;;  %v1892_v41 = vsel %vm10675_vm11, %v1865_v30, %v1535_v42  ;;  %v1619_v26 = vrot.slane %v1617_v13, 4 }
  0x91   : > { %v1788_v27 = vsel %vm1119_vm3, %v1724_v21, %v1486_v33  ;;  %v1895_v60 = vsel %vm10675_vm11, %v1877_v16, %v1538_v10  ;;  %v1937_v20 = vsel %vm1297_vm7, %v1892_v41, %v1611_v39  ;;  %v914_v51 = vrot.slane %v10689_v24, 3 }
  0x92   : > { %v1809_v44 = vsel %vm10665_vm10, %v1788_v27, %v963_v5  ;;  %v1946_v8 = vsel %vm1297_vm7, %v1895_v60, %v1623_v58  ;;  %2021 = vrot.lane.b32.xlu1 %v1937_v20, %s10538_s15  ;;  %v14472_v49 = vrot.slane %v10640_v3, 1  ;;  %v965_v10 = vrot.slane %v10689_v24, 4 }
  0x93   : > { %v1873_v42 = vsel %vm1208_vm5, %v1809_v44, %v1520_v32  ;;  %1972 = vrot.lane.b32.xlu0 %v1946_v8, %s14447_s14  ;;  %v1016_v39 = vrot.slane %v10645_v4, 4  ;;  %v14473_v33 = vrot.slane %v10640_v3, 2  ;;  %v14474_v38 = vrot.slane %v10640_v3, 3 }
  0x94   : > { %v1053_v63 = vsel %vm707_vm0, %v1033_v62, %v14472_v49  ;;  %v1894_v45 = vsel %vm10675_vm11, %v1873_v42, %v1537_v7  ;;  %v11478_v4 = vshll.u32 %v10717_v47, 16  ;;  %v11483_v59 = vshll.u32 %v10734_v57, 16  ;;  %v11535_v49 = vpop.permute.xlu0 %1956 }
  0x95   : > { %v1122_v5 = vsel %vm10654_vm9, %v1053_v63, %v863_v18  ;;  %v1943_v58 = vsel %vm1297_vm7, %v1894_v45, %v1619_v26  ;;  %v1018_v36 = vrot.slane %v10721_v48, 4  ;;  %v11490_v34 = vshll.u32 %v10749_v17, 16 }
  0x96   : > { %v1142_v32 = vsel %vm1119_vm3, %v1122_v5, %v14473_v33  ;;  %v763_v23 = vrot.slane %v11478_v4, 1  ;;  %v867_v7 = vrot.slane %v11478_v4, 2  ;;  %v918_v46 = vrot.slane %v11478_v4, 3 }
  0x97   : > { %v1211_v62 = vsel %vm10665_vm10, %v1142_v32, %v914_v51  ;;  %2023 = vrot.lane.b32.xlu0 %v1943_v58, %s10538_s15  ;;  %v755_v21 = vrot.slane %v11483_v59, 1  ;;  %v11496_v18 = vshll.u32 %v10846_v56, 16  ;;  %v916_v16 = vrot.slane %v11483_v59, 3 }
  0x98   : > { %v1231_v28 = vsel %vm1208_vm5, %v1211_v62, %v14474_v38  ;;  %v967_v41 = vrot.slane %v11483_v59, 4  ;;  %v771_v26 = vrot.slane %v11490_v34, 1  ;;  %v869_v60 = vrot.slane %v11490_v34, 2 }
  0x99   : > { %v1300_v24 = vsel %vm10675_vm11, %v1231_v28, %v965_v10  ;;  %v920_v20 = vrot.slane %v11490_v34, 3  ;;  %v779_v51 = vrot.slane %v11496_v18, 1  ;;  %v871_v8 = vrot.slane %v11496_v18, 2  ;;  %v11537_v44 = vpop.permute.xlu1 %1960 }
  0x9a   : > { %v11473_v13 = vsel %vm1297_vm7, %v1300_v24, %v1016_v39  ;;  %v793_v42 = vshll.u32 %v11177_v53, 16  ;;  %v801_v63 = vshll.u32 %v11193_v35, 16  ;;  %v1028_v58 = vrot.slane %v11165_v22, 4 }
  0x9b   : > { %1999 = vrot.lane.b32.xlu1 %v11473_v13, %s14445_s16  ;;  %2025 = vrot.lane.b32.xlu0 %v10703_v37, %s10538_s15  ;;  %v865_v37 = vrot.slane %v11483_v59, 2  ;;  %v1030_v28 = vrot.slane %v11181_v31, 4  ;;  %v809_v27 = vshll.u32 %v11384_v6, 16  ;;  %v1032_v31 = vrot.slane %v11363_v12, 4  ;;  %s10544_s15 = smov 96   ;;  %s9816_s16 = sshll.u32 %s14537_s26, 8 }
  0x9c   : > { %v795_v45 = vrot.slane %v793_v42, 1  ;;  %v875_v10 = vrot.slane %v793_v42, 2  ;;  %v926_v5 = vrot.slane %v793_v42, 3  ;;  %v803_v33 = vrot.slane %v801_v63, 1 }
  0x9d   : > { %v877_v32 = vrot.slane %v801_v63, 2  ;;  %v977_v62 = vrot.slane %v793_v42, 4  ;;  %v928_v30 = vrot.slane %v801_v63, 3  ;;  %v14487_v48 = vrot.slane %v11490_v34, 4 }
  0x9e   : > { %v1045_v39 = vsel %vm10633_vm2, %v11177_v53, %v795_v45  ;;  %v1047_v22 = vsel %vm10633_vm2, %v11193_v35, %v803_v33  ;;  %v979_v45 = vrot.slane %v801_v63, 4  ;;  %v811_v33 = vrot.slane %v809_v27, 1 }
  0x9f   : > { %v1101_v38 = vsel %vm707_vm0, %v1045_v39, %v858_v52  ;;  %v1109_v52 = vsel %vm707_vm0, %v1047_v22, %v860_v19  ;;  %v14475_v19 = vrot.slane %v11193_v35, 2  ;;  %v930_v63 = vrot.slane %v809_v27, 3 }
  0xa0   : > { %v1134_v24 = vsel %vm10654_vm9, %v1101_v38, %v875_v10  ;;  %v1136_v39 = vsel %vm10654_vm9, %v1109_v52, %v877_v32  ;;  %v879_v38 = vrot.slane %v809_v27, 2  ;;  %v1049_v22 = vsel %vm10633_vm2, %v11384_v6, %v811_v33 }
  0xa1   : > { %v1190_v42 = vsel %vm1119_vm3, %v1134_v24, %v909_v55  ;;  %v1198_v12 = vsel %vm1119_vm3, %v1136_v39, %v14475_v19  ;;  %v981_v24 = vrot.slane %v809_v27, 4  ;;  %v1117_v27 = vsel %vm707_vm0, %v1049_v22, %v862_v25  ;;  %v1963_v39 = vpop.permute.xlu1 %1962 }
  0xa2   : > { %v1223_v10 = vsel %vm10665_vm10, %v1190_v42, %v926_v5  ;;  %v1225_v32 = vsel %vm10665_vm10, %v1198_v12, %v928_v30  ;;  %v1138_v30 = vsel %vm10654_vm9, %v1117_v27, %v879_v38  ;;  %v1035_v25 = vsel %vm10633_vm2, %v10734_v57, %v755_v21 }
  0xa3   : > { %v1279_v55 = vsel %vm1208_vm5, %v1223_v10, %v960_v29  ;;  %v14476_v29 = vrot.slane %v11193_v35, 3  ;;  %v1959_v10 = vpop.permute.xlu0 %1958  ;;  %v1039_v6 = vsel %vm10633_vm2, %v10749_v17, %v771_v26  ;;  %v1041_v22 = vsel %vm10633_vm2, %v10846_v56, %v779_v51 }
  0xa4   : > { %v1312_v5 = vsel %vm10675_vm11, %v1279_v55, %v977_v62  ;;  %v14482_v27 = vrot.slane %v10749_v17, 2  ;;  %v14490_v34 = vrot.slane %v10725_v50, 4  ;;  %v2029_v15 = vsel %vm2027_vm13, %v11473_v13, %v11535_v49  ;;  %v10269_v49 = vld [vmem:[%s14410_s1] sm:$0xff]  }
  0xa5   : > { %v11553_v53 = vsel %vm1297_vm7, %v1312_v5, %v1028_v58  ;;  %v1287_v42 = vsel %vm1208_vm5, %v1225_v32, %v14476_v29  ;;  %v1206_v58 = vsel %vm1119_vm3, %v1138_v30, %v913_v43  ;;  %v14477_v43 = vrot.slane %v10734_v57, 1  ;;  %10128 = vmatprep.subr.bf16.mxu0 %v10269_v49 }
  0xa6   : > { %v1314_v62 = vsel %vm10675_vm11, %v1287_v42, %v979_v45  ;;  %v1227_v35 = vsel %vm10665_vm10, %v1206_v58, %v930_v63  ;;  %10129 = vmatpush3.bf16.msra.mxu0 %v10269_v49  ;;  %vm2218_vm1 = vcmask 195584   ;;  %vm2235_vm4 = vcmask 293888  }
  0xa7   : > { %v11566_v52 = vsel %vm1297_vm7, %v1314_v62, %v1030_v28  ;;  %v1295_v45 = vsel %vm1208_vm5, %v1227_v35, %v964_v54  ;;  %v1061_v38 = vsel %vm707_vm0, %v1035_v25, %v14477_v43  ;;  %v14478_v54 = vrot.slane %v10734_v57, 2 }
  0xa8   : > { %v1316_v28 = vsel %vm10675_vm11, %v1295_v45, %v981_v24  ;;  %v1124_v55 = vsel %vm10654_vm9, %v1061_v38, %v865_v37  ;;  %v1037_v37 = vsel %vm10633_vm2, %v10717_v47, %v763_v23  ;;  %v14480_v23 = vrot.slane %v10717_v47, 1 }
  0xa9   : > { %v11582_v33 = vsel %vm1297_vm7, %v1316_v28, %v1032_v31  ;;  %v11589_v19 = vpop.permute.xlu0 %2009  ;;  %v1150_v12 = vsel %vm1119_vm3, %v1124_v55, %v14478_v54  ;;  %v14479_v31 = vrot.slane %v10749_v17, 1  ;;  %v14483_v62 = vrot.slane %v10846_v56, 1 }
  0xaa   : > { %v1213_v24 = vsel %vm10665_vm10, %v1150_v12, %v916_v16  ;;  %v1069_v29 = vsel %vm707_vm0, %v1037_v37, %v14480_v23  ;;  %v14481_v16 = vrot.slane %v10734_v57, 3  ;;  %v14484_v28 = vrot.slane %v10717_v47, 2 }
  0xab   : > { %v1077_v63 = vsel %vm707_vm0, %v1039_v6, %v14479_v31  ;;  %v1085_v30 = vsel %vm707_vm0, %v1041_v22, %v14483_v62  ;;  %v1126_v51 = vsel %vm10654_vm9, %v1069_v29, %v867_v7  ;;  %v14486_v38 = vrot.slane %v10846_v56, 2 }
  0xac   : > { %v1128_v32 = vsel %vm10654_vm9, %v1077_v63, %v869_v60  ;;  %v1239_v42 = vsel %vm1208_vm5, %v1213_v24, %v14481_v16  ;;  %v1130_v45 = vsel %vm10654_vm9, %v1085_v30, %v871_v8  ;;  %v1158_v7 = vsel %vm1119_vm3, %v1126_v51, %v14484_v28 }
  0xad   : > { %v1166_v60 = vsel %vm1119_vm3, %v1128_v32, %v14482_v27  ;;  %v1302_v57 = vsel %vm10675_vm11, %v1239_v42, %v967_v41  ;;  %v14485_v41 = vrot.slane %v10749_v17, 3  ;;  %v1215_v8 = vsel %vm10665_vm10, %v1158_v7, %v918_v46 }
  0xae   : > { %v2012_v21 = vpop.permute.xlu1 %2011  ;;  %v1217_v25 = vsel %vm10665_vm10, %v1166_v60, %v920_v20  ;;  %v1326_v59 = vsel %vm1297_vm7, %v1302_v57, %v1018_v36  ;;  %v1174_v20 = vsel %vm1119_vm3, %v1130_v45, %v14486_v38  ;;  %v14488_v12 = vrot.slane %v11496_v18, 3 }
  0xaf   : > { %v1255_v43 = vsel %vm1208_vm5, %v1217_v25, %v14485_v41  ;;  %v2031_v55 = vsel %vm2027_vm13, %v1326_v59, %v1959_v10  ;;  %v14489_v46 = vrot.slane %v10717_v47, 3  ;;  %v973_v37 = vrot.slane %v11496_v18, 4 }
  0xb0   : > { %v1306_v17 = vsel %vm10675_vm11, %v1255_v43, %v14487_v48  ;;  %v1219_v31 = vsel %vm10665_vm10, %v1174_v20, %v14488_v12  ;;  %v1020_v32 = vrot.slane %v10709_v40, 4  ;;  %v14491_v22 = vrot.slane %v10846_v56, 3 }
  0xb1   : > { %v1965_v26 = vpop.permute.xlu0 %1964  ;;  %v1247_v10 = vsel %vm1208_vm5, %v1215_v8, %v14489_v46  ;;  %v1338_v24 = vsel %vm1297_vm7, %v1306_v17, %v14490_v34  ;;  %v14492_v47 = vrot.slane %v11478_v4, 4  ;;  %v1024_v16 = vrot.slane %v10850_v11, 4 }
  0xb2   : > { %v2035_v29 = vsel %vm2027_vm13, %v1338_v24, %v1963_v39  ;;  %v785_v11 = vshll.u32 %v10968_v61, 16  ;;  %v1026_v28 = vrot.slane %v10953_v0, 4  ;;  %v14494_v38 = vrot.slane %v10968_v61, 2 }
  0xb3   : > { %v1304_v23 = vsel %vm10675_vm11, %v1247_v10, %v14492_v47  ;;  %vm2462_vm6 = vcmask 1044480   ;;  %vm2463_vm8 = vsmask.f32 4352 }
  0xb4   : > { %v1332_v56 = vsel %vm1297_vm7, %v1304_v23, %v1020_v32  ;;  %v873_v45 = vrot.slane %v785_v11, 2  ;;  %v924_v7 = vrot.slane %v785_v11, 3  ;;  %v975_v59 = vrot.slane %v785_v11, 4 }
  0xb5   : > { %v2033_v39 = vsel %vm2027_vm13, %v1332_v56, %v11537_v44  ;;  %v787_v44 = vrot.slane %v785_v11, 1  ;;  %v10270_v56 = vld [vmem:[%s14410_s1 + $0x8] sm:$0xff]  }
  0xb6   : > { %10130 = vmatprep.subr.bf16.mxu0 %v10270_v56 }
  0xb7   : > { %10131 = vmatpush3.bf16.msra.mxu0 %v10270_v56 }
  0xbb   : > { %v2014_v5 = vpop.permute.xlu1 %2013 }
  0xc0   : > { %v2016_v58 = vpop.permute.xlu0 %2015 }
  0xc4   : > { %v1967_v35 = vpop.permute.xlu1 %1966 }
  0xcb   : > { %v2018_v6 = vpop.permute.xlu0 %2017 }
  0xcc   : > { %v1986_v54 = vpop.permute.xlu1 %1985 }
  0xcd   : > { %v2050_v36 = vsel %vm2046_vm12, %v2031_v55, %v1986_v54  ;;  %v14495_v55 = vrot.slane %v10968_v61, 3 }
  0xce   : > { %v11673_v63 = vsel %vm2065_vm14, %v2050_v36, %v2012_v21  ;;  %v1263_v21 = vsel %vm1208_vm5, %v1219_v31, %v14491_v22 }
  0xcf   : > { %2163 = vrot.lane.b32.xlu1 %v11673_v63, %s10540_s17  ;;  %v1308_v50 = vsel %vm10675_vm11, %v1263_v21, %v973_v37 }
  0xd0   : > { %v1984_v18 = vpop.permute.xlu0 %1983  ;;  %v1344_v4 = vsel %vm1297_vm7, %v1308_v50, %v1024_v16 }
  0xd1   : > { %v2037_v30 = vsel %vm2027_vm13, %v1344_v4, %v1965_v26  ;;  %v1043_v26 = vsel %vm10633_vm2, %v10968_v61, %v787_v44 }
  0xd3   : > { %v1990_v42 = vpop.permute.xlu1 %1989 }
  0xd4   : > { %v2054_v40 = vsel %vm2046_vm12, %v2035_v29, %v1990_v42  ;;  %v2099_v29 = vshll.u32 %v11673_v63, 16 }
  0xd5   : > { %v11699_v27 = vsel %vm2065_vm14, %v2054_v40, %v2016_v58 }
  0xd6   : > { %2167 = vrot.lane.b32.xlu1 %v11699_v27, %s10540_s17 }
  0xd8   : > { %v1988_v60 = vpop.permute.xlu0 %1987 }
  0xd9   : > { %v2052_v62 = vsel %vm2046_vm12, %v2033_v39, %v1988_v60  ;;  %v2101_v60 = vrot.slane %v2099_v29, 1 }
  0xda   : > { %v11710_v51 = vsel %vm2065_vm14, %v2052_v62, %v2014_v5  ;;  %v1992_v57 = vpop.permute.xlu1 %1991  ;;  %v14493_v5 = vrot.slane %v10968_v61, 1  ;;  %v2048_v61 = vsel %vm2046_vm12, %v2029_v15, %v1984_v18  ;;  %v2111_v62 = vshll.u32 %v11699_v27, 16 }
  0xdb   : > { %2165 = vrot.lane.b32.xlu0 %v11710_v51, %s10540_s17  ;;  %v2056_v58 = vsel %vm2046_vm12, %v2037_v30, %v1992_v57  ;;  %v11753_v34 = vsel %vm2065_vm14, %v2048_v61, %v11589_v19  ;;  %v2105_v18 = vshll.u32 %v11710_v51, 16  ;;  %v2103_v30 = vshrl.u32 %v11710_v51, 16 }
  0xdc   : > { %v11716_v25 = vsel %vm2065_vm14, %v2056_v58, %v2018_v6  ;;  %v1093_v41 = vsel %vm707_vm0, %v1043_v26, %v14493_v5  ;;  %v2093_v22 = vshll.u32 %v11753_v34, 16  ;;  %v2091_v50 = vshrl.u32 %v11753_v34, 16  ;;  %v10271_v58 = vld [vmem:[%s14410_s1 + $0x10] sm:$0xff]  }
  0xdd   : > { %v1132_v43 = vsel %vm10654_vm9, %v1093_v41, %v873_v45  ;;  %v2107_v11 = vrot.slane %v2105_v18, 1  ;;  %v2097_v57 = vshrl.u32 %v11673_v63, 16  ;;  %10132 = vmatprep.subr.bf16.mxu0 %v10271_v58  ;;  %v2117_v26 = vshll.u32 %v11716_v25, 16 }
  0xde   : > { %v1182_v0 = vsel %vm1119_vm3, %v1132_v43, %v14494_v38  ;;  %v2095_v23 = vrot.slane %v2093_v22, 1  ;;  %10133 = vmatpush3.bf16.msra.mxu0 %v10271_v58  ;;  %v2115_v38 = vshrl.u32 %v11716_v25, 16 }
  0xdf   : > { %2169 = vrot.lane.b32.xlu0 %v11716_v25, %s10540_s17  ;;  %v1221_v20 = vsel %vm10665_vm10, %v1182_v0, %v924_v7  ;;  %v2108_v44 = vor.u32 %v2107_v11, %v2103_v30  ;;  %v2102_v45 = vor.u32 %v2101_v60, %v2097_v57  ;;  %v2109_v7 = vshrl.u32 %v11699_v27, 16  ;;  %vm11853_vm10 = vmand %vm2462_vm6, %vm2463_vm8 }
  0xe0   : > { %v1271_v6 = vsel %vm1208_vm5, %v1221_v20, %v14495_v55  ;;  %v2096_v39 = vor.u32 %v2095_v23, %v2091_v50  ;;  %v2119_v43 = vrot.slane %v2117_v26, 1  ;;  %vm2296_vm5 = vcmask 392192  }
  0xe1   : > { %v1310_v48 = vsel %vm10675_vm11, %v1271_v6, %v975_v59  ;;  %vm2833_vm11 = vcmask 261120  }
  0xe2   : > { %v1350_v36 = vsel %vm1297_vm7, %v1310_v48, %v1026_v28  ;;  %v2113_v28 = vrot.slane %v2111_v62, 1  ;;  %v2120_v20 = vor.u32 %v2119_v43, %v2115_v38 }
  0xe3   : > { %v2039_v31 = vsel %vm2027_vm13, %v1350_v36, %v1967_v35 }
  0xe4   : > { %v2114_v59 = vor.u32 %v2113_v28, %v2109_v7 }
  0xe5   : > { %v1969_v54 = vpop.permute.xlu0 %1968 }
  0xe6   : > { %v1971_v8 = vpop.permute.xlu1 %1970  ;;  %v2041_v35 = vsel %vm2027_vm13, %v11553_v53, %v1969_v54 }
  0xe7   : > { %v2043_v13 = vsel %vm2027_vm13, %v11566_v52, %v1971_v8 }
  0xef   : > { %v1994_v12 = vpop.permute.xlu0 %1993 }
  0xf0   : > { %v2058_v46 = vsel %vm2046_vm12, %v2039_v31, %v1994_v12 }
  0xf5   : > { %v1996_v17 = vpop.permute.xlu1 %1995 }
  0xf6   : > { %v2060_v24 = vsel %vm2046_vm12, %v2041_v35, %v1996_v17 }
  0xf9   : > { %v1998_v37 = vpop.permute.xlu0 %1997 }
  0xfa   : > { %v2020_v10 = vpop.permute.xlu1 %2019  ;;  %v2062_v53 = vsel %vm2046_vm12, %v2043_v13, %v1998_v37 }
  0xfb   : > { %v11743_v14 = vsel %vm2065_vm14, %v2058_v46, %v2020_v10 }
  0xfc   : > { %2171 = vrot.lane.b32.xlu1 %v11743_v14, %s10540_s17  ;;  %v2123_v5 = vshll.u32 %v11743_v14, 16  ;;  %v2121_v6 = vshrl.u32 %v11743_v14, 16 }
  0xfe   : > { %v2125_v55 = vrot.slane %v2123_v5, 1 }
 0x100   : > { %v2126_v17 = vor.u32 %v2125_v55, %v2121_v6 }
 0x104   : > { %v2022_v32 = vpop.permute.xlu1 %2021 }
 0x105   : > { %v1973_v21 = vpop.permute.xlu0 %1972  ;;  %v11760_v47 = vsel %vm2065_vm14, %v2060_v24, %v2022_v32 }
 0x106   : > { %2173 = vrot.lane.b32.xlu0 %v11760_v47, %s10540_s17  ;;  %v2045_v42 = vsel %vm2027_vm13, %v11582_v33, %v1973_v21  ;;  %v2129_v41 = vshll.u32 %v11760_v47, 16  ;;  %v2127_v54 = vshrl.u32 %v11760_v47, 16 }
 0x108   : > { %v2131_v8 = vrot.slane %v2129_v41, 1 }
 0x109   : > { %v2024_v19 = vpop.permute.xlu0 %2023 }
 0x10a   : > { %v11773_v16 = vsel %vm2065_vm14, %v2062_v53, %v2024_v19  ;;  %v2132_v48 = vor.u32 %v2131_v8, %v2127_v54 }
 0x10b   : > { %2175 = vrot.lane.b32.xlu1 %v11773_v16, %s10540_s17  ;;  %v2135_v0 = vshll.u32 %v11773_v16, 16  ;;  %v2133_v12 = vshrl.u32 %v11773_v16, 16 }
 0x10d   : > { %v2000_v52 = vpop.permute.xlu1 %1999  ;;  %v2026_v4 = vpop.permute.xlu0 %2025  ;;  %v2137_v36 = vrot.slane %v2135_v0, 1 }
 0x10e   : > { %v2064_v40 = vsel %vm2046_vm12, %v2045_v42, %v2000_v52  ;;  %vm2855_vm12 = vcmask 785408  }
 0x10f   : > { %v2083_v33 = vsel %vm2065_vm14, %v2064_v40, %v2026_v4  ;;  %2139 = vrot.lane.b32.xlu1 %v2096_v39, %s10541_s22  ;;  %v2138_v46 = vor.u32 %v2137_v36, %v2133_v12  ;;  %v2465_v36 = vsel %vm11853_vm10, %v10640_v3, 0  ;;  %vm2844_vm14 = vcmask 523264  }
 0x110   : > { %2177 = vrot.lane.b32.xlu0 %v2083_v33, %s10540_s17  ;;  %v2181_v31 = vshll.u32 %v2083_v33, 16  ;;  %v2179_v15 = vshrl.u32 %v2083_v33, 16  ;;  %v2645_v12 = vshrl.u32 %v2465_v36, 16  ;;  %s10545_s17 = smov 64  }
 0x112   : > { %v2183_v10 = vrot.slane %v2181_v31, 1  ;;  %v2528_v31 = vrot.slane %v2465_v36, 1 }
 0x113   : > { %2143 = vrot.lane.b32.xlu1 %v2108_v44, %s10541_s22 }
 0x114   : > { %2141 = vrot.lane.b32.xlu0 %v2102_v45, %s10541_s22  ;;  %v2184_v61 = vor.u32 %v2183_v10, %v2179_v15  ;;  %v2555_v10 = vrot.slane %v2465_v36, 2  ;;  %v2708_v15 = vsel %vm10633_vm2, %v2645_v12, %v2528_v31 }
 0x117   : > { %2185 = vrot.lane.b32.xlu1 %v2102_v45, %s10542_s27 }
 0x118   : > { %2145 = vrot.lane.b32.xlu0 %v2114_v59, %s10541_s22 }
 0x11b   : > { %2189 = vrot.lane.b32.xlu1 %v2114_v59, %s10542_s27 }
 0x11c   : > { %2187 = vrot.lane.b32.xlu0 %v2108_v44, %s10542_s27 }
 0x11f   : > { %2147 = vrot.lane.b32.xlu1 %v2120_v20, %s10541_s22 }
 0x120   : > { %2191 = vrot.lane.b32.xlu0 %v2120_v20, %s10542_s27 }
 0x123   : > { %2151 = vrot.lane.b32.xlu1 %v2132_v48, %s10541_s22 }
 0x124   : > { %2149 = vrot.lane.b32.xlu0 %v2126_v17, %s10541_s22 }
 0x127   : > { %2193 = vrot.lane.b32.xlu1 %v2126_v17, %s10542_s27 }
 0x128   : > { %2153 = vrot.lane.b32.xlu0 %v2138_v46, %s10541_s22  ;;  %s14334_s22 = scalar_lea.vmem %s14422_s13, %s9816_s16 }
 0x12b   : > { %2197 = vrot.lane.b32.xlu1 %v2138_v46, %s10542_s27  ;;  %v2681_v46 = vrot.slane %v2645_v12, 1 }
 0x12c   : > { %2195 = vrot.lane.b32.xlu0 %v2132_v48, %s10542_s27 }
 0x130   : > { %2199 = vrot.lane.b32.xlu0 %v2184_v61, %s10542_s27  ;;  %v2699_v61 = vrot.slane %v2645_v12, 2 }
 0x141   : > { %v2164_v37 = vpop.permute.xlu1 %2163 }
 0x148   : > { %v2168_v24 = vpop.permute.xlu1 %2167 }
 0x14d   : > { %v2166_v35 = vpop.permute.xlu0 %2165 }
 0x151   : > { %v2170_v32 = vpop.permute.xlu0 %2169 }
 0x16e   : > { %v2172_v22 = vpop.permute.xlu1 %2171 }
 0x178   : > { %v2174_v21 = vpop.permute.xlu0 %2173 }
 0x17d   : > { %v2176_v13 = vpop.permute.xlu1 %2175 }
 0x181   : > { %v2140_v49 = vpop.permute.xlu1 %2139 }
 0x182   : > { %v2178_v53 = vpop.permute.xlu0 %2177  ;;  %v2203_v42 = vsel %vm2201_vm15, %v11753_v34, %v2140_v49 }
 0x183   : > { %v2220_v50 = vsel %vm2218_vm1, %v2203_v42, %v2164_v37  ;;  %v2719_v37 = vsel %vm707_vm0, %v2708_v15, %v2681_v46 }
 0x185   : > { %v2144_v19 = vpop.permute.xlu1 %2143 }
 0x186   : > { %v2142_v23 = vpop.permute.xlu0 %2141  ;;  %v2207_v39 = vsel %vm2201_vm15, %v11710_v51, %v2144_v19 }
 0x187   : > { %v2205_v52 = vsel %vm2201_vm15, %v11673_v63, %v2142_v23  ;;  %v2224_v62 = vsel %vm2218_vm1, %v2207_v39, %v2168_v24  ;;  %v9541_v23 = vld [vmem:[%s14416_s7] ss:$0 sm:$0xff] }
 0x188   : > { %v2222_v56 = vsel %vm2218_vm1, %v2205_v52, %v2166_v35  ;;  %v2753_v35 = vsel %vm10654_vm9, %v2719_v37, %v2555_v10 }
 0x189   : > { %v2186_v18 = vpop.permute.xlu1 %2185  ;;  %v11866_v24 = vsel %vm1119_vm3, %v2753_v35, %v2699_v61 }
 0x18a   : > { %v2146_v29 = vpop.permute.xlu0 %2145  ;;  %v2237_v11 = vsel %vm2235_vm4, %v2220_v50, %v2186_v18  ;;  %2794 = vrot.lane.b32.xlu1 %v11866_v24, %s10543_s28 }
 0x18b   : > { %v2209_v34 = vsel %vm2201_vm15, %v11699_v27, %v2146_v29 }
 0x18c   : > { %v2226_v30 = vsel %vm2218_vm1, %v2209_v34, %v2170_v32  ;;  %v2475_v32 = vshll.u32 %v2465_v36, 16 }
 0x18d   : > { %v2190_v40 = vpop.permute.xlu1 %2189 }
 0x18e   : > { %v2188_v4 = vpop.permute.xlu0 %2187  ;;  %v2241_v58 = vsel %vm2235_vm4, %v2224_v62, %v2190_v40 }
 0x18f   : > { %v2239_v60 = vsel %vm2235_vm4, %v2222_v56, %v2188_v4 }
 0x190   : > { %v9542_v63 = vcombine.low %v2237_v11, %v2239_v60 }
 0x191   : > { %v2148_v33 = vpop.permute.xlu1 %2147 }
 0x192   : > { %10134 = vmatprep.mubr.msk.bf16.mxu0 %vm2296_vm5, %v9542_v63  ;;  %v2192_v57 = vpop.permute.xlu0 %2191  ;;  %v2211_v59 = vsel %vm2201_vm15, %v11716_v25, %v2148_v33 }
 0x193   : > { %v2243_v51 = vsel %vm2235_vm4, %v2226_v30, %v2192_v57  ;;  %v2228_v5 = vsel %vm2218_vm1, %v2211_v59, %v2172_v22  ;;  %v2477_v22 = vrot.slane %v2475_v32, 1 }
 0x194   : > { %v9543_v44 = vcombine.low %v2241_v58, %v2243_v51 }
 0x195   : > { %v2152_v45 = vpop.permute.xlu1 %2151 }
 0x196   : > { %10135 = vmatmul.mubr.msk.bf16.vlgmr.msra.gmra.mrb[0].mxu0 %vm2296_vm5, %v9543_v44  ;;  %v2150_v27 = vpop.permute.xlu0 %2149  ;;  %v2215_v38 = vsel %vm2201_vm15, %v11760_v47, %v2152_v45 }
 0x197   : > { %v2213_v26 = vsel %vm2201_vm15, %v11743_v14, %v2150_v27  ;;  %v2232_v6 = vsel %vm2218_vm1, %v2215_v38, %v2176_v13  ;;  %v2564_v13 = vsel %vm10633_vm2, %v2465_v36, %v2477_v22 }
 0x198   : > { %v2230_v41 = vsel %vm2218_vm1, %v2213_v26, %v2174_v21  ;;  %v2537_v21 = vrot.slane %v2475_v32, 2  ;;  %v2575_v49 = vsel %vm707_vm0, %v2564_v13, %v2528_v31 }
 0x199   : > { %v2194_v28 = vpop.permute.xlu1 %2193 }
 0x19a   : > { %v2154_v7 = vpop.permute.xlu0 %2153  ;;  %v2245_v0 = vsel %vm2235_vm4, %v2228_v5, %v2194_v28 }
 0x19b   : > { %v2217_v20 = vsel %vm2201_vm15, %v11773_v16, %v2154_v7  ;;  %vm10548_vm15 = vmmov 0  }
 0x19c   : > { %v2234_v14 = vsel %vm2218_vm1, %v2217_v20, %v2178_v53  ;;  %v2609_v53 = vsel %vm10654_vm9, %v2575_v49, %v2537_v21 }
 0x19d   : > { %v2198_v55 = vpop.permute.xlu1 %2197  ;;  %v11876_v19 = vsel %vm1119_vm3, %v2609_v53, %v2555_v10 }
 0x19e   : > { %v2196_v43 = vpop.permute.xlu0 %2195  ;;  %v2249_v48 = vsel %vm2235_vm4, %v2232_v6, %v2198_v55 }
 0x19f   : > { %v2247_v8 = vsel %vm2235_vm4, %v2230_v41, %v2196_v43 }
 0x1a0   : > { %v9544_v25 = vcombine.low %v2245_v0, %v2247_v8 }
 0x1a2   : > { %10138 = vmatprep.mubr.msk.bf16.mxu0 %vm2296_vm5, %v9544_v25  ;;  %v2200_v54 = vpop.permute.xlu0 %2199 }
 0x1a3   : > { %v2251_v47 = vsel %vm2235_vm4, %v2234_v14, %v2200_v54 }
 0x1a4   : > { %v9545_v17 = vcombine.low %v2249_v48, %v2251_v47 }
 0x1a6   : > { %10139 = vmatmul.mubr.msk.bf16.gmra.mrb[4].mxu0 %vm2296_vm5, %v9545_v17 }
 0x269   : > { %v10136_v18 = vpop.f32.mrb[0].mxu0 }
 0x26a   : > { %v2352_v29 = vadd.f32 %v10136_v18, %v9541_v23  ;;  %v2343_v42 = vpop.f32.mrb[1].mxu0 }
 0x26b   : > { %v2344_v52 = vadd.f32 %v9541_v23, %v2343_v42  ;;  %v10137_v50 = vpop.f32.mrb[2].mxu0 }
 0x26c   : > { %v2376_v40 = vmax.f32 %v2352_v29, 0.0  ;;  %v2355_v56 = vadd.f32 %v10137_v50, %v9541_v23  ;;  %v2346_v4 = vpop.f32.mrb[3].mxu0 }
 0x26d   : > { %v2374_v39 = vmax.f32 %v2344_v52, 0.0  ;;  %v2347_v11 = vadd.f32 %v9541_v23, %v2346_v4 }
 0x26e   : > { %v2384_v34 = vpack.c.bf16 %v2376_v40, %v2376_v40  ;;  %v2377_v60 = vmax.f32 %v2355_v56, 0.0 }
 0x26f   : > { %v2382_v63 = vpack.c.bf16 %v2374_v39, %v2374_v39  ;;  %v2375_v62 = vmax.f32 %v2347_v11, 0.0 }
 0x270   : > { %v2405_v33 = vshrl.u32 %v2384_v34, 16  ;;  %v2385_v30 = vpack.c.bf16 %v2377_v60, %v2377_v60  ;;  %v2408_v44 = vshll.u32 %v2384_v34, 16 }
 0x271   : > { %v2391_v57 = vshrl.u32 %v2382_v63, 16  ;;  %v2383_v58 = vpack.c.bf16 %v2375_v62, %v2375_v62  ;;  %v2394_v28 = vshll.u32 %v2382_v63, 16 }
 0x272   : > { %v2407_v51 = vrot.slane %v2405_v33, 7  ;;  %v2412_v45 = vshrl.u32 %v2385_v30, 16  ;;  %v2415_v5 = vshll.u32 %v2385_v30, 16 }
 0x273   : > { %v2393_v27 = vrot.slane %v2391_v57, 7  ;;  %v2398_v7 = vshrl.u32 %v2383_v58, 16  ;;  %v2401_v38 = vshll.u32 %v2383_v58, 16 }
 0x274   : > { %v2410_v59 = vor.u32 %v2408_v44, %v2407_v51  ;;  %v2414_v26 = vrot.slane %v2412_v45, 7 }
 0x275   : > { %v2396_v41 = vor.u32 %v2394_v28, %v2393_v27  ;;  %v2400_v43 = vrot.slane %v2398_v7, 7 }
 0x276   : > { %v2456_v0 = vsel %vm10633_vm2, 0, %v2410_v59  ;;  %v2417_v20 = vor.u32 %v2415_v5, %v2414_v26 }
 0x277   : > { %v11885_v8 = vsel %vm11853_vm10, %v2456_v0, 0  ;;  %v2454_v55 = vsel %vm10633_vm2, 0, %v2396_v41  ;;  %v2403_v25 = vor.u32 %v2401_v38, %v2400_v43 }
 0x278   : > { %v11891_v6 = vsel %vm11853_vm10, %v2454_v55, 0  ;;  %v2457_v14 = vsel %vm10633_vm2, 0, %v2417_v20  ;;  %v2531_v54 = vrot.slane %v11885_v8, 1  ;;  %v2558_v17 = vrot.slane %v11885_v8, 2 }
 0x279   : > { %v11898_v48 = vsel %vm11853_vm10, %v2457_v14, 0  ;;  %v10140_v47 = vpop.f32.mrb[4].mxu0  ;;  %v2651_v36 = vshrl.u32 %v11885_v8, 16  ;;  %v2479_v12 = vshll.u32 %v11891_v6, 16  ;;  %v2455_v31 = vsel %vm10633_vm2, 0, %v2403_v25 }
 0x27a   : > { %v2368_v46 = vadd.f32 %v10140_v47, %v9541_v23  ;;  %v2359_v10 = vpop.f32.mrb[5].mxu0  ;;  %v2529_v15 = vrot.slane %v11891_v6, 1  ;;  %v2556_v61 = vrot.slane %v11891_v6, 2  ;;  %v2487_v40 = vshll.u32 %v11885_v8, 16 }
 0x27b   : > { %v2360_v37 = vadd.f32 %v9541_v23, %v2359_v10  ;;  %v10141_v35 = vpop.f32.mrb[6].mxu0  ;;  %v2684_v32 = vrot.slane %v2651_v36, 1  ;;  %v2702_v22 = vrot.slane %v2651_v36, 2  ;;  %v2711_v21 = vsel %vm10633_vm2, %v2651_v36, %v2531_v54 }
 0x27c   : > { %v2380_v13 = vmax.f32 %v2368_v46, 0.0  ;;  %v2371_v49 = vadd.f32 %v10141_v35, %v9541_v23  ;;  %v2362_v53 = vpop.f32.mrb[7].mxu0  ;;  %v2481_v18 = vrot.slane %v2479_v12, 1  ;;  %v2538_v29 = vrot.slane %v2479_v12, 2 }
 0x27d   : > { %v2378_v42 = vmax.f32 %v2360_v37, 0.0  ;;  %v2363_v52 = vadd.f32 %v9541_v23, %v2362_v53  ;;  %v2731_v50 = vsel %vm707_vm0, %v2711_v21, %v2684_v32  ;;  %v11924_v62 = vsel %vm11853_vm10, %v2455_v31, 0 }
 0x27e   : > { %v2388_v56 = vpack.c.bf16 %v2380_v13, %v2380_v13  ;;  %v2381_v4 = vmax.f32 %v2371_v49, 0.0  ;;  %v2756_v39 = vsel %vm10654_vm9, %v2731_v50, %v2558_v17  ;;  %v2565_v11 = vsel %vm10633_vm2, %v11891_v6, %v2481_v18 }
 0x27f   : > { %v2386_v34 = vpack.c.bf16 %v2378_v42, %v2378_v42  ;;  %v2379_v60 = vmax.f32 %v2363_v52, 0.0  ;;  %v2773_v63 = vsel %vm1119_vm3, %v2756_v39, %v2702_v22  ;;  %v2579_v23 = vsel %vm707_vm0, %v2565_v11, %v2529_v15 }
 0x280   : > { %v2433_v33 = vshrl.u32 %v2388_v56, 16  ;;  %v2389_v30 = vpack.c.bf16 %v2381_v4, %v2381_v4  ;;  %2825 = vrot.lane.b32.xlu0 %v2773_v63, %s10544_s15  ;;  %v2610_v57 = vsel %vm10654_vm9, %v2579_v23, %v2538_v29  ;;  %v2436_v58 = vshll.u32 %v2388_v56, 16 }
 0x281   : > { %v2419_v51 = vshrl.u32 %v2386_v34, 16  ;;  %v2387_v44 = vpack.c.bf16 %v2379_v60, %v2379_v60  ;;  %v2623_v45 = vsel %vm1119_vm3, %v2610_v57, %v2556_v61  ;;  %v2422_v28 = vshll.u32 %v2386_v34, 16 }
 0x282   : > { %v2435_v27 = vrot.slane %v2433_v33, 7  ;;  %v2440_v7 = vshrl.u32 %v2389_v30, 16  ;;  %2809 = vrot.lane.b32.xlu1 %v2623_v45, %s10545_s17  ;;  %v2489_v59 = vrot.slane %v2487_v40, 1  ;;  %v2443_v5 = vshll.u32 %v2389_v30, 16 }
 0x283   : > { %v2421_v26 = vrot.slane %v2419_v51, 7  ;;  %v2426_v41 = vshrl.u32 %v2387_v44, 16  ;;  %v2429_v43 = vshll.u32 %v2387_v44, 16  ;;  %v2540_v20 = vrot.slane %v2487_v40, 2 }
 0x284   : > { %v2438_v38 = vor.u32 %v2436_v58, %v2435_v27  ;;  %v2442_v0 = vrot.slane %v2440_v7, 7  ;;  %v2567_v55 = vsel %vm10633_vm2, %v11885_v8, %v2489_v59  ;;  %v2530_v36 = vrot.slane %v11924_v62, 1 }
 0x285   : > { %v2424_v25 = vor.u32 %v2422_v28, %v2421_v26  ;;  %v2428_v14 = vrot.slane %v2426_v41, 7  ;;  %v2587_v47 = vsel %vm707_vm0, %v2567_v55, %v2531_v54  ;;  %v2649_v10 = vshrl.u32 %v11924_v62, 16 }
 0x286   : > { %v2460_v12 = vsel %vm10633_vm2, 0, %v2438_v38  ;;  %v2445_v31 = vor.u32 %v2443_v5, %v2442_v0  ;;  %v2612_v46 = vsel %vm10654_vm9, %v2587_v47, %v2540_v20  ;;  %v2557_v54 = vrot.slane %v11924_v62, 2 }
 0x287   : > { %v2458_v37 = vsel %vm10633_vm2, 0, %v2424_v25  ;;  %v2431_v35 = vor.u32 %v2429_v43, %v2428_v14  ;;  %v2629_v32 = vsel %vm1119_vm3, %v2612_v46, %v2558_v17  ;;  %v11951_v22 = vsel %vm11853_vm10, %v2460_v12, 0 }
 0x288   : > { %v11955_v21 = vsel %vm11853_vm10, %v2458_v37, 0  ;;  %v2461_v13 = vsel %vm10633_vm2, 0, %v2445_v31  ;;  %2811 = vrot.lane.b32.xlu0 %v2629_v32, %s10545_s17  ;;  %v2683_v49 = vrot.slane %v2649_v10, 1  ;;  %v2701_v17 = vrot.slane %v2649_v10, 2 }
 0x289   : > { %v2459_v8 = vsel %vm10633_vm2, 0, %v2431_v35  ;;  %v2710_v53 = vsel %vm10633_vm2, %v2649_v10, %v2530_v36  ;;  %v2532_v18 = vrot.slane %v11898_v48, 1  ;;  %v11969_v29 = vsel %vm11853_vm10, %v2461_v13, 0 }
 0x28a   : > { %v11973_v42 = vsel %vm11853_vm10, %v2459_v8, 0  ;;  %v2727_v52 = vsel %vm707_vm0, %v2710_v53, %v2683_v49  ;;  %v2653_v50 = vshrl.u32 %v11898_v48, 16  ;;  %v2559_v56 = vrot.slane %v11898_v48, 2 }
 0x28b   : > { %v2755_v40 = vsel %vm10654_vm9, %v2727_v52, %v2557_v54  ;;  %v2535_v4 = vrot.slane %v11951_v22, 1  ;;  %v2659_v39 = vshrl.u32 %v11951_v22, 16  ;;  %v2562_v60 = vrot.slane %v11951_v22, 2 }
 0x28c   : > { %v2770_v11 = vsel %vm1119_vm3, %v2755_v40, %v2701_v17  ;;  %v2685_v16 = vrot.slane %v2653_v50, 1  ;;  %v2712_v34 = vsel %vm10633_vm2, %v2653_v50, %v2532_v18  ;;  %v2703_v63 = vrot.slane %v2653_v50, 2 }
 0x28d   : > { %2796 = vrot.lane.b32.xlu1 %v2770_v11, %s10543_s28  ;;  %v2688_v23 = vrot.slane %v2659_v39, 1  ;;  %v2715_v33 = vsel %vm10633_vm2, %v2659_v39, %v2535_v4  ;;  %v2533_v30 = vrot.slane %v11955_v21, 1  ;;  %v2706_v58 = vrot.slane %v2659_v39, 2 }
 0x28e   : > { %v2735_v57 = vsel %vm707_vm0, %v2712_v34, %v2685_v16  ;;  %v2655_v51 = vshrl.u32 %v11955_v21, 16  ;;  %v2503_v44 = vshll.u32 %v11951_v22, 16  ;;  %v2560_v28 = vrot.slane %v11955_v21, 2 }
 0x28f   : > { %v2757_v45 = vsel %vm10654_vm9, %v2735_v57, %v2559_v56  ;;  %v2747_v27 = vsel %vm707_vm0, %v2715_v33, %v2688_v23  ;;  %v2495_v7 = vshll.u32 %v11955_v21, 16  ;;  %v2536_v41 = vrot.slane %v11969_v29, 1 }
 0x290   : > { %v2776_v59 = vsel %vm1119_vm3, %v2757_v45, %v2703_v63  ;;  %v2760_v26 = vsel %vm10654_vm9, %v2747_v27, %v2562_v60  ;;  %v2686_v5 = vrot.slane %v2655_v51, 1  ;;  %v2704_v38 = vrot.slane %v2655_v51, 2 }
 0x291   : > { %2798 = vrot.lane.b32.xlu0 %v2776_v59, %s10543_s28  ;;  %v2785_v43 = vsel %vm1119_vm3, %v2760_v26, %v2706_v58  ;;  %v2713_v0 = vsel %vm10633_vm2, %v2655_v51, %v2533_v30  ;;  %v2505_v20 = vrot.slane %v2503_v44, 1  ;;  %v2544_v25 = vrot.slane %v2503_v44, 2 }
 0x292   : > { %v2739_v55 = vsel %vm707_vm0, %v2713_v0, %v2686_v5  ;;  %v2497_v14 = vrot.slane %v2495_v7, 1  ;;  %v2542_v47 = vrot.slane %v2495_v7, 2  ;;  %v2563_v46 = vrot.slane %v11969_v29, 2 }
 0x293   : > { %v2758_v12 = vsel %vm10654_vm9, %v2739_v55, %v2560_v28  ;;  %v2571_v31 = vsel %vm10633_vm2, %v11951_v22, %v2505_v20  ;;  %v2661_v10 = vshrl.u32 %v11969_v29, 16  ;;  %v2534_v13 = vrot.slane %v11973_v42, 1 }
 0x294   : > { %v2779_v37 = vsel %vm1119_vm3, %v2758_v12, %v2704_v38  ;;  %v2603_v35 = vsel %vm707_vm0, %v2571_v31, %v2535_v4  ;;  %v2569_v32 = vsel %vm10633_vm2, %v11955_v21, %v2497_v14  ;;  %v2561_v17 = vrot.slane %v11973_v42, 2 }
 0x295   : > { %2829 = vrot.lane.b32.xlu0 %v2785_v43, %s10544_s15  ;;  %2827 = vrot.lane.b32.xlu1 %v2779_v37, %s10544_s15  ;;  %v2616_v22 = vsel %vm10654_vm9, %v2603_v35, %v2544_v25  ;;  %v2595_v49 = vsel %vm707_vm0, %v2569_v32, %v2533_v30  ;;  %v2689_v8 = vrot.slane %v2661_v10, 1  ;;  %v2707_v52 = vrot.slane %v2661_v10, 2 }
 0x296   : > { %v2614_v53 = vsel %vm10654_vm9, %v2595_v49, %v2542_v47  ;;  %v2716_v21 = vsel %vm10633_vm2, %v2661_v10, %v2536_v41  ;;  %v2657_v50 = vshrl.u32 %v11973_v42, 16  ;;  %v2641_v40 = vsel %vm1119_vm3, %v2616_v22, %v2562_v60 }
 0x297   : > { %v2751_v4 = vsel %vm707_vm0, %v2716_v21, %v2689_v8  ;;  %v2647_v39 = vshrl.u32 %v11891_v6, 16  ;;  %v2483_v11 = vshll.u32 %v11924_v62, 16  ;;  %v2635_v16 = vsel %vm1119_vm3, %v2614_v53, %v2560_v28  ;;  %v10272_v6 = vld [vmem:[%s14411_s2 + $0x40] sm:$0xff]   ;;  %v10280_v53 = vld [vmem:[%s14411_s2 + $0x50] sm:$0xff]  }
 0x298   : > { %v2761_v34 = vsel %vm10654_vm9, %v2751_v4, %v2563_v46  ;;  %v2687_v63 = vrot.slane %v2657_v50, 1  ;;  %v2714_v23 = vsel %vm10633_vm2, %v2657_v50, %v2534_v13  ;;  %v2705_v33 = vrot.slane %v2657_v50, 2  ;;  %9824 = vmatprep.subr.bf16.mxu1 %v10272_v6  ;;  %v10283_v21 = vld [vmem:[%s14411_s2 + $0x90] sm:$0xff]   ;;  %v10284_v50 = vld [vmem:[%s14411_s2 + $0x58] sm:$0xff]  }
 0x299   : > { %2815 = vrot.lane.b32.xlu0 %v2641_v40, %s10545_s17  ;;  %2813 = vrot.lane.b32.xlu1 %v2635_v16, %s10545_s17  ;;  %v2788_v60 = vsel %vm1119_vm3, %v2761_v34, %v2707_v52  ;;  %v2682_v30 = vrot.slane %v2647_v39, 1  ;;  %v2709_v57 = vsel %vm10633_vm2, %v2647_v39, %v2529_v15  ;;  %v2700_v51 = vrot.slane %v2647_v39, 2  ;;  %v10282_v52 = vld [vmem:[%s14411_s2 + $0x10] sm:$0xff]   ;;  %v10285_v40 = vld [vmem:[%s14411_s2 + $0xd8] sm:$0xff]  }
 0x29a   : > { %v2743_v58 = vsel %vm707_vm0, %v2714_v23, %v2687_v63  ;;  %v2485_v44 = vrot.slane %v2483_v11, 1  ;;  %v2539_v45 = vrot.slane %v2483_v11, 2  ;;  %v2491_v7 = vshll.u32 %v11898_v48, 16  ;;  %v10286_v4 = vld [vmem:[%s14411_s2 + $0x18] sm:$0xff]   ;;  %v10288_v11 = vld [vmem:[%s14411_s2 + $0x60] sm:$0xff]   ;;  %v10292_v23 = vld [vmem:[%s14411_s2 + $0x68] sm:$0xff]  }
 0x29b   : > { %v2759_v27 = vsel %vm10654_vm9, %v2743_v58, %v2561_v17  ;;  %v2723_v28 = vsel %vm707_vm0, %v2709_v57, %v2682_v30  ;;  %v2507_v59 = vshll.u32 %v11969_v29, 16  ;;  %v2499_v43 = vshll.u32 %v11973_v42, 16  ;;  %v10287_v39 = vld [vmem:[%s14411_s2 + $0x98] sm:$0xff]   ;;  %v10289_v16 = vld [vmem:[%s14411_s2 + $0xe0] sm:$0xff]   ;;  %v10295_v30 = vld [vmem:[%s14411_s2 + $0xa8] sm:$0xff]  }
 0x29c   : > { %v2782_v26 = vsel %vm1119_vm3, %v2759_v27, %v2705_v33  ;;  %v2754_v15 = vsel %vm10654_vm9, %v2723_v28, %v2556_v61  ;;  %v2566_v5 = vsel %vm10633_vm2, %v11924_v62, %v2485_v44  ;;  %v2493_v0 = vrot.slane %v2491_v7, 1  ;;  %v10273_v61 = vld [vmem:[%s14411_s2 + $0xc0] sm:$0xff]   ;;  %v10294_v33 = vld [vmem:[%s14411_s2 + $0x28] sm:$0xff]   ;;  %v10296_v57 = vld [vmem:[%s14411_s2 + $0x70] sm:$0xff]  }
 0x29d   : > { %2802 = vrot.lane.b32.xlu0 %v2788_v60, %s10543_s28  ;;  %2800 = vrot.lane.b32.xlu1 %v2782_v26, %s10543_s28  ;;  %v2583_v38 = vsel %vm707_vm0, %v2566_v5, %v2530_v36  ;;  %v2767_v20 = vsel %vm1119_vm3, %v2754_v15, %v2700_v51  ;;  %v2509_v25 = vrot.slane %v2507_v59, 1  ;;  %v2501_v14 = vrot.slane %v2499_v43, 1  ;;  %v10290_v34 = vld [vmem:[%s14411_s2 + $0x20] sm:$0xff]   ;;  %v10293_v60 = vld [vmem:[%s14411_s2 + $0xe8] sm:$0xff]   ;;  %v2795_v15 = vpop.permute.xlu1 %2794 }
 0x29e   : > { %v2611_v55 = vsel %vm10654_vm9, %v2583_v38, %v2539_v45  ;;  %v2541_v47 = vrot.slane %v2491_v7, 2  ;;  %v2568_v12 = vsel %vm10633_vm2, %v11898_v48, %v2493_v0  ;;  %v2545_v31 = vrot.slane %v2507_v59, 2  ;;  %9846 = vmatprep.subr.bf16.mxu0 %v10273_v61  ;;  %v10274_v48 = vld [vmem:[%s14411_s2] sm:$0xff]   ;;  %v10297_v58 = vld [vmem:[%s14411_s2 + $0xf0] sm:$0xff]   ;;  %v10300_v45 = vld [vmem:[%s14411_s2 + $0x78] sm:$0xff]  }
 0x29f   : > { %v12089_v36 = vsel %vm1119_vm3, %v2611_v55, %v2557_v54  ;;  %v2591_v10 = vsel %vm707_vm0, %v2568_v12, %v2532_v18  ;;  %v2572_v37 = vsel %vm10633_vm2, %v11969_v29, %v2509_v25  ;;  %v2543_v62 = vrot.slane %v2499_v43, 2  ;;  %v10277_v29 = vld [vmem:[%s14411_s2 + $0xc8] sm:$0xff]   ;;  %9825 = vmatpush3.bf16.msra.mxu1 %v10274_v48  ;;  %v10291_v63 = vld [vmem:[%s14411_s2 + $0xa0] sm:$0xff]   ;;  %v10298_v51 = vld [vmem:[%s14411_s2 + $0x30] sm:$0xff]  }
 0x2a0   : > { %v2570_v54 = vsel %vm10633_vm2, %v11973_v42, %v2501_v14  ;;  %v2613_v35 = vsel %vm10654_vm9, %v2591_v10, %v2541_v47  ;;  %v2607_v18 = vsel %vm707_vm0, %v2572_v37, %v2536_v41  ;;  %v10299_v44 = vld [vmem:[%s14411_s2 + $0xb0] sm:$0xff]   ;;  %v10301_v27 = vld [vmem:[%s14411_s2 + $0xf8] sm:$0xff]   ;;  %v10304_v59 = vld [vmem:[%s14411_s2 + $0x140] sm:$0xff]   ;;  %v10546_v55 = vmov 1966171168  }
 0x2a1   : > { %2817 = vrot.lane.b32.xlu0 %v11876_v19, %s10545_s17  ;;  %2823 = vrot.lane.b32.xlu1 %v2767_v20, %s10544_s15  ;;  %v2599_v32 = vsel %vm707_vm0, %v2570_v54, %v2534_v13  ;;  %v12115_v22 = vsel %vm1119_vm3, %v2613_v35, %v2559_v56  ;;  %v2617_v42 = vsel %vm10654_vm9, %v2607_v18, %v2545_v31  ;;  %v10275_v56 = vld [vmem:[%s14411_s2 + $0x80] sm:$0xff]   ;;  %v10276_v13 = vld [vmem:[%s14411_s2 + $0x48] sm:$0xff]   ;;  %v3056_v25 = vunpack.c.l.s4 %v10546_v55 }
 0x2a2   : > { %v2615_v49 = vsel %vm10654_vm9, %v2599_v32, %v2543_v62  ;;  %v12124_v8 = vsel %vm1119_vm3, %v2617_v42, %v2563_v46  ;;  %9847 = vmatpush3.bf16.msra.mxu0 %v10275_v56  ;;  %9826 = vmatprep.subr.bf16.mxu1 %v10276_v13  ;;  %v10278_v46 = vld [vmem:[%s14411_s2 + $0x8] sm:$0xff]   ;;  %v10302_v28 = vld [vmem:[%s14411_s2 + $0x38] sm:$0xff]   ;;  %v10305_v26 = vld [vmem:[%s14411_s2 + $0x1c0] sm:$0xff]   ;;  %v3058_v14 = vlaneseq }
 0x2a3   : > { %v12127_v41 = vsel %vm1119_vm3, %v2615_v49, %v2561_v17  ;;  %v10279_v17 = vld [vmem:[%s14411_s2 + $0x88] sm:$0xff]   ;;  %9848 = vmatprep.subr.bf16.mxu0 %v10277_v29  ;;  %9827 = vmatpush3.bf16.msra.mxu1 %v10278_v46  ;;  %v10303_v7 = vld [vmem:[%s14411_s2 + $0xb8] sm:$0xff]   ;;  %v3057_v37 = vunpack.c.0.s8 %v3056_v25  ;;  %v2835_v29 = vsel %vm2833_vm11, %v11876_v19, %v2795_v15 }
 0x2a4   : > { %9828 = vmatprep.subr.bf16.mxu1 %v10280_v53  ;;  %v12235_v62 = vshrl.u32 %v3058_v14, 7 }
 0x2a5   : > { %2831 = vrot.lane.b32.xlu1 %v11866_v24, %s10544_s15  ;;  %v10281_v24 = vld [vmem:[%s14411_s2 + $0xd0] sm:$0xff]  }
 0x2a6   : > { %9849 = vmatpush3.bf16.msra.mxu0 %v10279_v17  ;;  %v12238_v18 = vsub.s32 %v3057_v37, %v12235_v62 }
 0x2a7   : > { %9850 = vmatprep.subr.bf16.mxu0 %v10281_v24  ;;  %9829 = vmatpush3.bf16.msra.mxu1 %v10282_v52 }
 0x2a8   : > { %9830 = vmatprep.subr.bf16.mxu1 %v10284_v50 }
 0x2aa   : > { %9851 = vmatpush3.bf16.msra.mxu0 %v10283_v21 }
 0x2ab   : > { %9852 = vmatprep.subr.bf16.mxu0 %v10285_v40  ;;  %9831 = vmatpush3.bf16.msra.mxu1 %v10286_v4 }
 0x2ac   : > { %9832 = vmatprep.subr.bf16.mxu1 %v10288_v11 }
 0x2ae   : > { %9853 = vmatpush3.bf16.msra.mxu0 %v10287_v39 }
 0x2af   : > { %9854 = vmatprep.subr.bf16.mxu0 %v10289_v16  ;;  %9833 = vmatpush3.bf16.msra.mxu1 %v10290_v34 }
 0x2b0   : > { %9834 = vmatprep.subr.bf16.mxu1 %v10292_v23 }
 0x2b2   : > { %9855 = vmatpush3.bf16.msra.mxu0 %v10291_v63 }
 0x2b3   : > { %9856 = vmatprep.subr.bf16.mxu0 %v10293_v60  ;;  %9835 = vmatpush3.bf16.msra.mxu1 %v10294_v33 }
 0x2b4   : > { %9836 = vmatprep.subr.bf16.mxu1 %v10296_v57 }
 0x2b6   : > { %9857 = vmatpush3.bf16.msra.mxu0 %v10295_v30 }
 0x2b7   : > { %9858 = vmatprep.subr.bf16.mxu0 %v10297_v58  ;;  %9837 = vmatpush3.bf16.msra.mxu1 %v10298_v51 }
 0x2b8   : > { %9838 = vmatprep.subr.bf16.mxu1 %v10300_v45 }
 0x2ba   : > { %9859 = vmatpush3.bf16.msra.mxu0 %v10299_v44 }
 0x2bb   : > { %9860 = vmatprep.subr.bf16.mxu0 %v10301_v27  ;;  %9839 = vmatpush3.bf16.msra.mxu1 %v10302_v28 }
 0x2bc   : > { %9868 = vmatprep.subr.bf16.mxu1 %v10304_v59 }
 0x2be   : > { %9861 = vmatpush3.bf16.msra.mxu0 %v10303_v7 }
 0x2bf   : > { %9890 = vmatprep.subr.bf16.mxu0 %v10305_v26 }
 0x2f2   : > { %v2826_v5 = vpop.permute.xlu0 %2825 }
 0x2f4   : > { %v2810_v43 = vpop.permute.xlu1 %2809 }
 0x2f5   : > { %v2846_v11 = vsel %vm2844_vm14, %v2835_v29, %v2810_v43 }
 0x2fa   : > { %v2812_v38 = vpop.permute.xlu0 %2811 }
 0x2ff   : > { %v2797_v0 = vpop.permute.xlu1 %2796 }
 0x300   : > { %v2837_v6 = vsel %vm2833_vm11, %v12089_v36, %v2797_v0 }
 0x301   : > { %v2848_v61 = vsel %vm2844_vm14, %v2837_v6, %v2812_v38 }
 0x302   : > { %v12231_v20 = vsel %vm2855_vm12, %v2848_v61, %v2826_v5 }
 0x303   : > { %v3019_v47 = vshll.u32 %v12231_v20, 16  ;;  %v2799_v12 = vpop.permute.xlu0 %2798  ;;  %v3017_v31 = vshrl.u32 %v12231_v20, 16  ;;  %v3033_v13 = vrot.slane %v12231_v20, 1 }
 0x304   : > { %v2839_v42 = vsel %vm2833_vm11, %v12115_v22, %v2799_v12 }
 0x305   : > { %v3021_v10 = vrot.slane %v3019_v47, 1 }
 0x307   : > { %v3022_v54 = vor.u32 %v3021_v10, %v3017_v31  ;;  %v2830_v35 = vpop.permute.xlu0 %2829  ;;  %v2828_v36 = vpop.permute.xlu1 %2827 }
 0x309   : > { %v3139_v32 = vcombine.low %v12231_v20, %v3022_v54  ;;  %v3053_v24 = vcombine.low %v3022_v54, %v3033_v13 }
 0x30b   : > { %v2816_v49 = vpop.permute.xlu0 %2815  ;;  %v2814_v48 = vpop.permute.xlu1 %2813  ;;  %v12251_v21 = vrot.slane %v3139_v32, %v12238_v18  ;;  %v3075_v63 = vrot.slane %v3053_v24, %v12238_v18 }
 0x30c   : > { %v2850_v56 = vsel %vm2844_vm14, %v2839_v42, %v2814_v48 }
 0x30d   : > { %v2861_v46 = vsel %vm2855_vm12, %v2850_v56, %v2828_v36 }
 0x30e   : > { %v3025_v17 = vshll.u32 %v2861_v46, 16  ;;  %v12248_v53 = vrot.slane %v2861_v46, 1  ;;  %v3140_v52 = vcombine.low %v3033_v13, %v2861_v46  ;;  %v3023_v40 = vshrl.u32 %v2861_v46, 16 }
 0x30f   : > { %v2803_v22 = vpop.permute.xlu0 %2802  ;;  %v2801_v50 = vpop.permute.xlu1 %2800 }
 0x310   : > { %v3027_v4 = vrot.slane %v3025_v17, 1  ;;  %v12255_v39 = vrot.slane %v12248_v53, %v12238_v18  ;;  %v12258_v19 = vrot.slane %v3140_v52, %v12238_v18  ;;  %v2841_v16 = vsel %vm2833_vm11, %v12127_v41, %v2801_v50 }
 0x311   : > { %v2843_v57 = vsel %vm2833_vm11, %v12124_v8, %v2803_v22  ;;  %v2852_v41 = vsel %vm2844_vm14, %v2841_v16, %v2816_v49 }
 0x312   : > { %v3028_v34 = vor.u32 %v3027_v4, %v3023_v40  ;;  %v3124_v23 = vcombine.high %v12255_v39, %v12255_v39  ;;  %v3171_v60 = vcombine.low %v12251_v21, %v12258_v19  ;;  %v3131_v33 = vrot.slane %v12255_v39, %v12238_v18 }
 0x313   : > { %v3172_v30 = vcombine.high %v12251_v21, %v12258_v19  ;;  %v2818_v58 = vpop.permute.xlu0 %2817  ;;  %v2824_v51 = vpop.permute.xlu1 %2823  ;;  %v2863_v28 = vsel %vm2855_vm12, %v2852_v41, %v2830_v35 }
 0x314   : > { %v3054_v44 = vcombine.low %v2861_v46, %v3028_v34  ;;  %v12276_v45 = vrot.slane %v3124_v23, %v12238_v18  ;;  %v3141_v27 = vcombine.low %v3028_v34, %v12248_v53  ;;  %v3035_v7 = vshrl.u32 %v2863_v28, 16 }
 0x315   : > { %v3037_v59 = vshll.u32 %v2863_v28, 16  ;;  %v3042_v26 = vrot.slane %v2863_v28, 1  ;;  %v3227_v15 = vcombine.low %v12248_v53, %v2863_v28  ;;  %v2854_v43 = vsel %vm2844_vm14, %v2843_v57, %v2818_v58 }
 0x316   : > { %v12282_v5 = vrot.slane %v3054_v44, %v12238_v18  ;;  %v3163_v8 = vrot.slane %v3141_v27, %v12238_v18  ;;  %v2857_v38 = vsel %vm2855_vm12, %v2846_v11, %v2824_v51  ;;  %v3181_v58 = vrot.slane %v3171_v60, %v12238_v18 }
 0x317   : > { %v3039_v0 = vrot.slane %v3037_v59, 1  ;;  %v3211_v6 = vrot.slane %v3042_v26, %v12238_v18  ;;  %v3011_v61 = vshrl.u32 %v2857_v38, 16  ;;  %v3013_v55 = vshll.u32 %v2857_v38, 16  ;;  %v2832_v25 = vpop.permute.xlu1 %2831 }
 0x318   : > { %v3032_v14 = vrot.slane %v2857_v38, 1  ;;  %v2865_v47 = vsel %vm2855_vm12, %v2854_v43, %v2832_v25  ;;  %v3085_v12 = vcombine.low %v3075_v63, %v12282_v5  ;;  %v3086_v31 = vcombine.high %v3075_v63, %v12282_v5 }
 0x319   : > { %v3040_v10 = vor.u32 %v3039_v0, %v3035_v7  ;;  %v3212_v37 = vcombine.high %v3211_v6, %v3211_v6  ;;  %v3219_v54 = vrot.slane %v3211_v6, %v12238_v18  ;;  %v3015_v35 = vrot.slane %v3013_v55, 1 }
 0x31a   : > { %v3052_v36 = vcombine.low %v3032_v14, %v12231_v20  ;;  %v3043_v32 = vshrl.u32 %v2865_v47, 16  ;;  %v3045_v42 = vshll.u32 %v2865_v47, 16  ;;  %v3050_v49 = vrot.slane %v2865_v47, 1 }
 0x31b   : > { %v3142_v48 = vcombine.low %v2863_v28, %v3040_v10  ;;  %v3016_v56 = vor.u32 %v3015_v35, %v3011_v61  ;;  %v3226_v13 = vrot.slane %v3212_v37, %v12238_v18  ;;  %v3228_v29 = vcombine.low %v3040_v10, %v3042_v26 }
 0x31c   : > { %v3068_v46 = vrot.slane %v3052_v36, %v12238_v18  ;;  %v3047_v17 = vrot.slane %v3045_v42, 1  ;;  %v3291_v53 = vrot.slane %v3050_v49, %v12238_v18  ;;  %v3316_v24 = vunpack.i.h.s16 %v3219_v54 }
 0x31d   : > { %v3170_v52 = vrot.slane %v3142_v48, %v12238_v18  ;;  %v3051_v21 = vcombine.low %v2857_v38, %v3016_v56  ;;  %v3243_v22 = vrot.slane %v3228_v29, %v12238_v18  ;;  %v3107_v20 = vrot.slane %v3085_v12, %v12238_v18 }
 0x31e   : > { %v3048_v50 = vor.u32 %v3047_v17, %v3043_v32  ;;  %v3292_v40 = vcombine.high %v3291_v53, %v3291_v53  ;;  %v3299_v4 = vrot.slane %v3291_v53, %v12238_v18  ;;  %v9557_v19 = vpack.i.b16 %v3226_v13, %v3316_v24 }
 0x31f   : > { %v3061_v11 = vrot.slane %v3051_v21, %v12238_v18  ;;  %v3114_v16 = vrot.slane %v3086_v31, %v12238_v18  ;;  %v3173_v34 = vcombine.low %v3163_v8, %v3170_v52  ;;  %v3174_v63 = vcombine.high %v3163_v8, %v3170_v52 }
 0x320   : > { %v3229_v23 = vcombine.low %v2865_v47, %v3048_v50  ;;  %v3306_v57 = vrot.slane %v3292_v40, %v12238_v18  ;;  %v3459_v41 = vcombine.low %v9557_v19, %v3299_v4  ;;  %v3188_v27 = vrot.slane %v3172_v30, %v12238_v18 }
 0x321   : > { %v3083_v51 = vcombine.low %v3061_v11, %v3068_v46  ;;  %v3084_v44 = vcombine.high %v3061_v11, %v3068_v46  ;;  %v3195_v28 = vrot.slane %v3173_v34, %v12238_v18  ;;  %v3202_v26 = vrot.slane %v3174_v63, %v12238_v18 }
 0x322   : > { %v3250_v7 = vrot.slane %v3229_v23, %v12238_v18  ;;  %v3324_v59 = vunpack.i.l.s16 %v3306_v57  ;;  %v3236_v43 = vrot.slane %v3227_v15, %v12238_v18  ;;  %v9555_v60 = vpack.i.b16 %v3219_v54, %v12276_v45 }
 0x323   : > { %v3100_v8 = vrot.slane %v3084_v44, %v12238_v18  ;;  %v3093_v38 = vrot.slane %v3083_v51, %v12238_v18  ;;  %v3203_v0 = vcombine.low %v3181_v58, %v3195_v28  ;;  %v3204_v55 = vcombine.low %v3188_v27, %v3202_v26  ;;  %v10306_v26 = vld [vmem:[%s14411_s2 + $0x100] sm:$0xff]  }
 0x324   : > { %v3253_v6 = vcombine.low %v3243_v22, %v3250_v7  ;;  %v3254_v61 = vcombine.high %v3243_v22, %v3250_v7  ;;  %v3251_v30 = vcombine.low %v12282_v5, %v3236_v43  ;;  %v3252_v47 = vcombine.high %v12282_v5, %v3236_v43  ;;  %v10307_v43 = vld [vmem:[%s14411_s2 + $0x180] sm:$0xff]  }
 0x325   : > { %v3115_v25 = vcombine.low %v3093_v38, %v3107_v20  ;;  %v3116_v14 = vcombine.low %v3100_v8, %v3114_v16  ;;  %v3315_v12 = vunpack.i.h.s16 %v3203_v0  ;;  %v3458_v45 = vcombine.low %v3131_v33, %v9555_v60 }
 0x326   : > { %v3275_v31 = vrot.slane %v3253_v6, %v12238_v18  ;;  %v3261_v15 = vrot.slane %v3251_v30, %v12238_v18  ;;  %v3282_v10 = vrot.slane %v3254_v61, %v12238_v18  ;;  %v3268_v37 = vrot.slane %v3252_v47, %v12238_v18  ;;  %v10308_v6 = vld [vmem:[%s14411_s2 + $0x148] sm:$0xff]   ;;  %v10312_v47 = vld [vmem:[%s14411_s2 + $0x150] sm:$0xff]  }
 0x327   : > { %v9554_v54 = vpack.i.b16 %v3203_v0, %v3116_v14  ;;  %v9556_v35 = vpack.i.b16 %v3204_v55, %v3315_v12  ;;  %v3473_v36 = vrot.slane %v3459_v41, %v12238_v18  ;;  %v3466_v5 = vrot.slane %v3458_v45, %v12238_v18  ;;  %v10309_v61 = vld [vmem:[%s14411_s2 + $0x1c8] sm:$0xff]   ;;  %v10313_v12 = vld [vmem:[%s14411_s2 + $0x1d0] sm:$0xff]   ;;  %v10317_v45 = vld [vmem:[%s14411_s2 + $0x1d8] sm:$0xff]  }
 0x328   : > { %v3283_v32 = vcombine.low %v3261_v15, %v3275_v31  ;;  %v3480_v42 = vrot.slane %v3324_v59, %v12238_v18  ;;  %v3284_v49 = vcombine.low %v3268_v37, %v3282_v10  ;;  %v10311_v14 = vld [vmem:[%s14411_s2 + $0x188] sm:$0xff]   ;;  %v10314_v31 = vld [vmem:[%s14411_s2 + $0x110] sm:$0xff]   ;;  %v10316_v10 = vld [vmem:[%s14411_s2 + $0x158] sm:$0xff]  }
 0x329   : > { %v9558_v48 = vcombine.low %v3093_v38, %v9554_v54  ;;  %v9559_v56 = vcombine.low %v9556_v35, %v3261_v15  ;;  %v3342_v13 = vcombine.high %v3115_v25, %v9554_v54  ;;  %v3481_v46 = vcombine.low %v3466_v5, %v3473_v36  ;;  %v10310_v25 = vld [vmem:[%s14411_s2 + $0x108] sm:$0xff]   ;;  %v10315_v15 = vld [vmem:[%s14411_s2 + $0x190] sm:$0xff]   ;;  %v10318_v37 = vld [vmem:[%s14411_s2 + $0x118] sm:$0xff]  }
 0x32a   : > { %v3344_v29 = vcombine.high %v9556_v35, %v3283_v32  ;;  %v3495_v39 = vrot.slane %v3480_v42, %v12238_v18  ;;  %v3323_v33 = vunpack.i.l.s16 %v3284_v49  ;;  %v10319_v54 = vld [vmem:[%s14411_s2 + $0x198] sm:$0xff]   ;;  %v10320_v35 = vld [vmem:[%s14411_s2 + $0x160] sm:$0xff]   ;;  %v10324_v42 = vld [vmem:[%s14411_s2 + $0x168] sm:$0xff]  }
 0x32b   : > { %v3352_v17 = vrot.slane %v9558_v48, %v12238_v18  ;;  %v3366_v53 = vrot.slane %v9559_v56, %v12238_v18  ;;  %v3359_v24 = vrot.slane %v3342_v13, %v12238_v18  ;;  %v3488_v21 = vrot.slane %v3481_v46, %v12238_v18  ;;  %v10321_v36 = vld [vmem:[%s14411_s2 + $0x1e0] sm:$0xff]   ;;  %v10325_v49 = vld [vmem:[%s14411_s2 + $0x1e8] sm:$0xff]   ;;  %v10328_v13 = vld [vmem:[%s14411_s2 + $0x170] sm:$0xff]  }
 0x32c   : > { %v3373_v52 = vrot.slane %v3344_v29, %v12238_v18  ;;  %v3345_v22 = vcombine.high %v3323_v33, %v3323_v33  ;;  %v3380_v20 = vrot.slane %v3323_v33, %v12238_v18  ;;  %v10322_v32 = vld [vmem:[%s14411_s2 + $0x120] sm:$0xff]   ;;  %v10326_v48 = vld [vmem:[%s14411_s2 + $0x128] sm:$0xff]   ;;  %v10329_v29 = vld [vmem:[%s14411_s2 + $0x1f0] sm:$0xff]  }
 0x32d   : > { %v3389_v50 = vcombine.high %v3352_v17, %v3366_v53  ;;  %v3388_v40 = vcombine.low %v3352_v17, %v3366_v53  ;;  %v12331_v11 = vcombine.low %v3488_v21, %v3495_v39  ;;  %v10323_v5 = vld [vmem:[%s14411_s2 + $0x1a0] sm:$0xff]   ;;  %v10327_v56 = vld [vmem:[%s14411_s2 + $0x1a8] sm:$0xff]   ;;  %v10330_v46 = vld [vmem:[%s14411_s2 + $0x130] sm:$0xff]   ;;  %v10547_v21 = vmov 0.0  }
 0x32e   : > { %v3391_v4 = vcombine.high %v3359_v24, %v3373_v52  ;;  %v3390_v19 = vcombine.low %v3359_v24, %v3373_v52  ;;  %v3392_v16 = vcombine.high %v3380_v20, %v3380_v20  ;;  %v3428_v63 = vrot.slane %v3380_v20, %v12238_v18  ;;  %v10331_v39 = vld [vmem:[%s14411_s2 + $0x1b0] sm:$0xff]   ;;  %v10332_v33 = vld [vmem:[%s14411_s2 + $0x178] sm:$0xff]   ;;  %v10336_v52 = vld [vmem:[%s14411_s2 + $0x200] sm:$0xff]  }
 0x32f   : > { %v3400_v34 = vrot.slane %v3388_v40, %v12238_v18  ;;  %v3387_v23 = vrot.slane %v3345_v22, %v12238_v18  ;;  %v3414_v41 = vrot.slane %v3389_v50, %v12238_v18  ;;  %v10333_v17 = vld [vmem:[%s14411_s2 + $0x1f8] sm:$0xff]   ;;  %v10337_v22 = vld [vmem:[%s14411_s2 + $0x208] sm:$0xff]   ;;  %v10338_v20 = vld [vmem:[%s14411_s2 + $0x210] sm:$0xff]  }
 0x330   : > { %v12337_v57 = vrot.slane %v3390_v19, %v12238_v18  ;;  %v3442_v58 = vrot.slane %v3392_v16, %v12238_v18  ;;  %v3421_v8 = vrot.slane %v3391_v4, %v12238_v18  ;;  %v10334_v53 = vld [vmem:[%s14411_s2 + $0x138] sm:$0xff]   ;;  %v10340_v40 = vld [vmem:[%s14411_s2 + $0x220] sm:$0xff]   ;;  %v10341_v4 = vld [vmem:[%s14411_s2 + $0x228] sm:$0xff]  }
 0x331   : > { %v3450_v51 = vcombine.low %v3400_v34, %v3428_v63  ;;  %v3451_v44 = vcombine.high %v3400_v34, %v3428_v63  ;;  %v3393_v27 = vcombine.high %v3387_v23, %v3387_v23  ;;  %v12342_v28 = vrot.slane %v3387_v23, %v12238_v18  ;;  %v10335_v24 = vld [vmem:[%s14411_s2 + $0x1b8] sm:$0xff]   ;;  %v10342_v19 = vld [vmem:[%s14411_s2 + $0x230] sm:$0xff]   ;;  %v10344_v34 = vld [vmem:[%s14412_s3 + $0x40] sm:$0xff]  }
 0x332   : > { %v3454_v7 = vcombine.low %v3414_v41, %v3442_v58  ;;  %v3455_v59 = vcombine.high %v3414_v41, %v3442_v58  ;;  %v10339_v50 = vld [vmem:[%s14411_s2 + $0x218] sm:$0xff]   ;;  %v10345_v63 = vld [vmem:[%s14412_s3] sm:$0xff]   ;;  %v10346_v23 = vld [vmem:[%s14412_s3 + $0x48] sm:$0xff]  }
 0x333   : > { %v3449_v38 = vrot.slane %v3393_v27, %v12238_v18  ;;  %v3452_v0 = vcombine.low %v12337_v57, %v12342_v28  ;;  %v3453_v60 = vcombine.high %v12337_v57, %v12342_v28  ;;  %v10343_v16 = vld [vmem:[%s14411_s2 + $0x238] sm:$0xff]   ;;  %v10348_v57 = vld [vmem:[%s14412_s3 + $0xc0] sm:$0xff]   ;;  %v10352_v41 = vld [vmem:[%s14412_s3 + $0xc8] sm:$0xff]  }
 0x334   : > { %3970 = vmatprep.mubr.bf16.mxu1 %v3454_v7  ;;  %4011 = vmatprep.mubr.bf16.mxu0 %v3455_v59  ;;  %v10347_v58 = vld [vmem:[%s14412_s3 + $0x8] sm:$0xff]   ;;  %v10356_v27 = vld [vmem:[%s14412_s3 + $0xd0] sm:$0xff]   ;;  %v10354_v7 = vld [vmem:[%s14412_s3 + $0x58] sm:$0xff]  }
 0x335   : > { %3971 = vmatmul.mubr.bf16.vlgmr.msra.gmra.mrb[0].mxu1 %v3450_v51  ;;  %4012 = vmatmul.mubr.bf16.vlgmr.msra.gmra.mrb[8].mxu0 %v3451_v44  ;;  %v3456_v55 = vcombine.low %v3421_v8, %v3449_v38  ;;  %v3457_v30 = vcombine.high %v3421_v8, %v3449_v38  ;;  %v10350_v51 = vld [vmem:[%s14412_s3 + $0x50] sm:$0xff]   ;;  %v10353_v44 = vld [vmem:[%s14412_s3 + $0x88] sm:$0xff]   ;;  %v10358_v8 = vld [vmem:[%s14412_s3 + $0x60] sm:$0xff]  }
 0x336   : > { %9869 = vmatpush3.bf16.msra.mxu1 %v10306_v26  ;;  %9891 = vmatpush3.bf16.msra.mxu0 %v10307_v43  ;;  %v10351_v28 = vld [vmem:[%s14412_s3 + $0x10] sm:$0xff]   ;;  %v10360_v26 = vld [vmem:[%s14412_s3 + $0xd8] sm:$0xff]  }
 0x337   : > { %4052 = vmatprep.mubr.bf16.mxu1 %v3456_v55  ;;  %4093 = vmatprep.mubr.bf16.mxu0 %v3457_v30  ;;  %v10357_v59 = vld [vmem:[%s14412_s3 + $0x90] sm:$0xff]   ;;  %v10355_v43 = vld [vmem:[%s14412_s3 + $0x18] sm:$0xff]   ;;  %v10368_v55 = vld [vmem:[%s14412_s3 + $0xe8] sm:$0xff]  }
 0x338   : > { %9870 = vmatprep.subr.bf16.mxu1 %v10308_v6  ;;  %9892 = vmatprep.subr.bf16.mxu0 %v10309_v61  ;;  %v10361_v38 = vld [vmem:[%s14412_s3 + $0x98] sm:$0xff]   ;;  %v10362_v6 = vld [vmem:[%s14412_s3 + $0x68] sm:$0xff]   ;;  %v10365_v61 = vld [vmem:[%s14412_s3 + $0xa0] sm:$0xff]  }
 0x339   : > { %v10363_v30 = vld [vmem:[%s14412_s3 + $0x28] sm:$0xff]  }
 0x33a   : > { %9871 = vmatpush3.bf16.msra.mxu1 %v10310_v25  ;;  %9893 = vmatpush3.bf16.msra.mxu0 %v10311_v14  ;;  %v10366_v25 = vld [vmem:[%s14412_s3 + $0x70] sm:$0xff]   ;;  %v10369_v14 = vld [vmem:[%s14412_s3 + $0xa8] sm:$0xff]  }
 0x33b   : > { %9872 = vmatprep.subr.bf16.mxu1 %v10312_v47  ;;  %9894 = vmatprep.subr.bf16.mxu0 %v10313_v12  ;;  %v10372_v47 = vld [vmem:[%s14412_s3 + $0xf0] sm:$0xff]  }
 0x33c   : > { %v10367_v12 = vld [vmem:[%s14412_s3 + $0x30] sm:$0xff]  }
 0x33e   : > { %9873 = vmatpush3.bf16.msra.mxu1 %v10314_v31  ;;  %9895 = vmatpush3.bf16.msra.mxu0 %v10315_v15  ;;  %v10370_v31 = vld [vmem:[%s14412_s3 + $0x78] sm:$0xff]   ;;  %v10373_v15 = vld [vmem:[%s14412_s3 + $0xb0] sm:$0xff]  }
 0x33f   : > { %9874 = vmatprep.subr.bf16.mxu1 %v10316_v10  ;;  %9896 = vmatprep.subr.bf16.mxu0 %v10317_v45  ;;  %v10371_v10 = vld [vmem:[%s14412_s3 + $0x38] sm:$0xff]  }
 0x342   : > { %9875 = vmatpush3.bf16.msra.mxu1 %v10318_v37  ;;  %9897 = vmatpush3.bf16.msra.mxu0 %v10319_v54  ;;  %v9553_v54 = vld [vmem:[%s14417_s8] ss:$0 sm:$0xff] }
 0x343   : > { %9876 = vmatprep.subr.bf16.mxu1 %v10320_v35  ;;  %9898 = vmatprep.subr.bf16.mxu0 %v10321_v36 }
 0x346   : > { %9877 = vmatpush3.bf16.msra.mxu1 %v10322_v32  ;;  %9899 = vmatpush3.bf16.msra.mxu0 %v10323_v5 }
 0x347   : > { %9878 = vmatprep.subr.bf16.mxu1 %v10324_v42  ;;  %9900 = vmatprep.subr.bf16.mxu0 %v10325_v49 }
 0x34a   : > { %9879 = vmatpush3.bf16.msra.mxu1 %v10326_v48  ;;  %9901 = vmatpush3.bf16.msra.mxu0 %v10327_v56 }
 0x34b   : > { %9880 = vmatprep.subr.bf16.mxu1 %v10328_v13  ;;  %9902 = vmatprep.subr.bf16.mxu0 %v10329_v29 }
 0x34e   : > { %9881 = vmatpush3.bf16.msra.mxu1 %v10330_v46  ;;  %9903 = vmatpush3.bf16.msra.mxu0 %v10331_v39 }
 0x34f   : > { %9882 = vmatprep.subr.bf16.mxu1 %v10332_v33  ;;  %9904 = vmatprep.subr.bf16.mxu0 %v10333_v17 }
 0x352   : > { %9883 = vmatpush3.bf16.msra.mxu1 %v10334_v53  ;;  %9905 = vmatpush3.bf16.msra.mxu0 %v10335_v24 }
 0x353   : > { %10142 = vmatprep.subr.bf16.mxu1 %v10547_v21  ;;  %9921 = vmatprep.subr.bf16.mxu0 %v10344_v34 }
 0x355   : > { %4053 = vmatmul.mubr.bf16.vlgmr.msra.gmra.mrb[4].mxu1 %v3452_v0  ;;  %4094 = vmatmul.mubr.bf16.vlgmr.msra.gmra.mrb[12].mxu0 %v3453_v60  ;;  %v10364_v0 = vld [vmem:[%s14412_s3 + $0xe0] sm:$0xff]  }
 0x356   : > { %10143 = vmatpush3.bf16.msra.mxu1 %v10336_v52  ;;  %10158 = vmatprep.mubr.msk.bf16.mxu1 %vm10548_vm15, %v10547_v21  ;;  %v10359_v60 = vld [vmem:[%s14412_s3 + $0x20] sm:$0xff]  }
 0x357   : > { %10144 = vmatprep.subr.bf16.mxu1 %v10547_v21  ;;  %9922 = vmatpush3.bf16.msra.mxu0 %v10345_v63 }
 0x358   : > { %9923 = vmatprep.subr.bf16.mxu0 %v10346_v23 }
 0x35a   : > { %10145 = vmatpush3.bf16.msra.mxu1 %v10337_v22 }
 0x35b   : > { %10146 = vmatprep.subr.bf16.mxu1 %v10547_v21  ;;  %9924 = vmatpush3.bf16.msra.mxu0 %v10347_v58 }
 0x35c   : > { %9925 = vmatprep.subr.bf16.mxu0 %v10350_v51 }
 0x35e   : > { %10147 = vmatpush3.bf16.msra.mxu1 %v10338_v20 }
 0x35f   : > { %10148 = vmatprep.subr.bf16.mxu1 %v10547_v21  ;;  %9926 = vmatpush3.bf16.msra.mxu0 %v10351_v28 }
 0x360   : > { %9927 = vmatprep.subr.bf16.mxu0 %v10354_v7 }
 0x362   : > { %10149 = vmatpush3.bf16.msra.mxu1 %v10339_v50 }
 0x363   : > { %10150 = vmatprep.subr.bf16.mxu1 %v10547_v21  ;;  %9928 = vmatpush3.bf16.msra.mxu0 %v10355_v43 }
 0x364   : > { %9929 = vmatprep.subr.bf16.mxu0 %v10358_v8 }
 0x366   : > { %10151 = vmatpush3.bf16.msra.mxu1 %v10340_v40 }
 0x367   : > { %10152 = vmatprep.subr.bf16.mxu1 %v10547_v21  ;;  %9930 = vmatpush3.bf16.msra.mxu0 %v10359_v60 }
 0x368   : > { %9931 = vmatprep.subr.bf16.mxu0 %v10362_v6 }
 0x36a   : > { %10153 = vmatpush3.bf16.msra.mxu1 %v10341_v4 }
 0x36b   : > { %10154 = vmatprep.subr.bf16.mxu1 %v10547_v21  ;;  %9932 = vmatpush3.bf16.msra.mxu0 %v10363_v30 }
 0x36c   : > { %9933 = vmatprep.subr.bf16.mxu0 %v10366_v25 }
 0x36e   : > { %10155 = vmatpush3.bf16.msra.mxu1 %v10342_v19 }
 0x36f   : > { %10156 = vmatprep.subr.bf16.mxu1 %v10547_v21  ;;  %9934 = vmatpush3.bf16.msra.mxu0 %v10367_v12 }
 0x370   : > { %9935 = vmatprep.subr.bf16.mxu0 %v10370_v31 }
 0x372   : > { %10157 = vmatpush3.bf16.msra.mxu1 %v10343_v16 }
 0x373   : > { %9943 = vmatprep.subr.bf16.mxu1 %v10348_v57  ;;  %9936 = vmatpush3.bf16.msra.mxu0 %v10371_v10 }
 0x374   : > { %10162 = vmatprep.subr.bf16.mxu0 %v10547_v21 }
 0x375   : > { %10159 = vmatmul.mubr.bf16.vlgmr.msra.gmra.mrb[8].mxu1 %v12331_v11  ;;  %v10349_v11 = vld [vmem:[%s14412_s3 + $0x80] sm:$0xff]  }
 0x376   : > { %9944 = vmatpush3.bf16.msra.mxu1 %v10349_v11 }
 0x377   : > { %9945 = vmatprep.subr.bf16.mxu1 %v10352_v41 }
 0x37a   : > { %9946 = vmatpush3.bf16.msra.mxu1 %v10353_v44 }
 0x37b   : > { %9947 = vmatprep.subr.bf16.mxu1 %v10356_v27 }
 0x37e   : > { %9948 = vmatpush3.bf16.msra.mxu1 %v10357_v59 }
 0x37f   : > { %9949 = vmatprep.subr.bf16.mxu1 %v10360_v26 }
 0x382   : > { %9950 = vmatpush3.bf16.msra.mxu1 %v10361_v38 }
 0x383   : > { %9951 = vmatprep.subr.bf16.mxu1 %v10364_v0 }
 0x386   : > { %9952 = vmatpush3.bf16.msra.mxu1 %v10365_v61 }
 0x387   : > { %9953 = vmatprep.subr.bf16.mxu1 %v10368_v55 }
 0x38a   : > { %9954 = vmatpush3.bf16.msra.mxu1 %v10369_v14 }
 0x38b   : > { %9955 = vmatprep.subr.bf16.mxu1 %v10372_v47 }
 0x38e   : > { %9956 = vmatpush3.bf16.msra.mxu1 %v10373_v15  ;;  %v10374_v15 = vld [vmem:[%s14412_s3 + $0xf8] sm:$0xff]  }
 0x38f   : > { %9957 = vmatprep.subr.bf16.mxu1 %v10374_v15  ;;  %v10400_v15 = vld [vmem:[%s14413_s4 + $0x68] sm:$0xff]  }
 0x408   : > { %v9840_v45 = vpop.f32.mrb[0].mxu1  ;;  %v9862_v37 = vpop.f32.mrb[8].mxu0 }
 0x409   : > { %v9841_v35 = vpop.f32.mrb[1].mxu1  ;;  %v9863_v36 = vpop.f32.mrb[9].mxu0 }
 0x40a   : > { %v9842_v32 = vadd.f32 %v9841_v35, %v9840_v45  ;;  %v9864_v5 = vadd.f32 %v9863_v36, %v9862_v37  ;;  %v9843_v42 = vpop.f32.mrb[2].mxu1  ;;  %v9865_v49 = vpop.f32.mrb[10].mxu0  ;;  %v10376_v35 = vld [vmem:[%s14412_s3 + $0xb8] sm:$0xff]  }
 0x40b   : > { %v9844_v48 = vpop.f32.mrb[3].mxu1  ;;  %v9866_v56 = vpop.f32.mrb[11].mxu0  ;;  %9958 = vmatpush3.bf16.msra.mxu1 %v10376_v35  ;;  %v10405_v35 = vld [vmem:[%s14413_s4 + $0xf0] sm:$0xff]  }
 0x40c   : > { %v3973_v13 = vadd.f32 %v9842_v32, %v9553_v54  ;;  %v9845_v29 = vadd.f32 %v9844_v48, %v9843_v42  ;;  %v9867_v46 = vadd.f32 %v9866_v56, %v9865_v49 }
 0x40e   : > { %v4014_v39 = vadd.f32 %v9864_v5, %v3973_v13  ;;  %v3976_v33 = vadd.f32 %v9845_v29, %v9553_v54 }
 0x410   : > { %v4017_v17 = vadd.f32 %v9867_v46, %v3976_v33 }
 0x428   : > { %v9884_v53 = vpop.f32.mrb[4].mxu1  ;;  %v9906_v24 = vpop.f32.mrb[12].mxu0 }
 0x429   : > { %v9885_v52 = vpop.f32.mrb[5].mxu1  ;;  %v9907_v22 = vpop.f32.mrb[13].mxu0 }
 0x42a   : > { %v9886_v20 = vadd.f32 %v9885_v52, %v9884_v53  ;;  %v9908_v50 = vadd.f32 %v9907_v22, %v9906_v24  ;;  %v9887_v40 = vpop.f32.mrb[6].mxu1  ;;  %v9909_v4 = vpop.f32.mrb[14].mxu0 }
 0x42b   : > { %v9888_v19 = vpop.f32.mrb[7].mxu1  ;;  %v9910_v16 = vpop.f32.mrb[15].mxu0 }
 0x42c   : > { %v4055_v34 = vadd.f32 %v9886_v20, %v4014_v39  ;;  %v9889_v63 = vadd.f32 %v9888_v19, %v9887_v40  ;;  %v9911_v23 = vadd.f32 %v9910_v16, %v9909_v4  ;;  %v10375_v40 = vld [vmem:[%s14412_s3 + $0x100] sm:$0xff]  }
 0x42e   : > { %v4058_v57 = vadd.f32 %v9889_v63, %v4017_v17  ;;  %v4096_v11 = vadd.f32 %v9908_v50, %v4055_v34 }
 0x430   : > { %v4099_v41 = vadd.f32 %v9911_v23, %v4058_v57  ;;  %v10377_v23 = vld [vmem:[%s14412_s3 + $0x108] sm:$0xff]  }
 0x448   : > { %v4136_v58 = vpop.f32.mrb[8].mxu1 }
 0x449   : > { %v4137_v51 = vadd.f32 %v4136_v58, %v4096_v11  ;;  %v10160_v44 = vpop.f32.mrb[9].mxu1  ;;  %v10379_v58 = vld [vmem:[%s14412_s3 + $0x118] sm:$0xff]  }
 0x44a   : > { %v4139_v27 = vpop.f32.mrb[10].mxu1  ;;  %v10380_v44 = vld [vmem:[%s14413_s4 + $0x40] sm:$0xff]  }
 0x44b   : > { %v4143_v28 = vmax.f32 %v4137_v51, 0.0  ;;  %v4140_v7 = vadd.f32 %v4139_v27, %v4099_v41  ;;  %v10161_v59 = vpop.f32.mrb[11].mxu1  ;;  %v10378_v41 = vld [vmem:[%s14412_s3 + $0x110] sm:$0xff]   ;;  %v10381_v27 = vld [vmem:[%s14413_s4 + $0xc0] sm:$0xff]  }
 0x44c   : > { %v10384_v59 = vld [vmem:[%s14413_s4 + $0x48] sm:$0xff]   ;;  %9992 = vmatprep.subr.bf16.mxu1 %v10381_v27 }
 0x44d   : > { %v4147_v26 = vcombine.high %v4143_v28, %v4143_v28  ;;  %v4154_v43 = vrot.slane %v4143_v28, %v12238_v18  ;;  %v4144_v8 = vmax.f32 %v4140_v7, 0.0  ;;  %v10382_v28 = vld [vmem:[%s14413_s4] sm:$0xff]  }
 0x44e   : > { %v10383_v7 = vld [vmem:[%s14413_s4 + $0x80] sm:$0xff]  }
 0x44f   : > { %v4161_v38 = vrot.slane %v4147_v26, %v12238_v18  ;;  %v4162_v0 = vcombine.high %v4154_v43, %v4154_v43  ;;  %v4170_v60 = vrot.slane %v4154_v43, %v12238_v18  ;;  %v4202_v6 = vrot.slane %v4144_v8, %v12238_v18  ;;  %v10385_v26 = vld [vmem:[%s14413_s4 + $0xc8] sm:$0xff]  }
 0x450   : > { %v10386_v43 = vld [vmem:[%s14413_s4 + $0x8] sm:$0xff]  }
 0x451   : > { %v4163_v61 = vcombine.high %v4161_v38, %v4161_v38  ;;  %v4184_v55 = vrot.slane %v4162_v0, %v12238_v18  ;;  %v4192_v30 = vcombine.high %v4170_v60, %v4170_v60  ;;  %v4209_v25 = vrot.slane %v4202_v6, %v12238_v18  ;;  %v10387_v8 = vld [vmem:[%s14413_s4 + $0x88] sm:$0xff]   ;;  %v10389_v0 = vld [vmem:[%s14413_s4 + $0xd0] sm:$0xff]  }
 0x452   : > { %v4177_v14 = vrot.slane %v4161_v38, %v12238_v18  ;;  %v10388_v38 = vld [vmem:[%s14413_s4 + $0x50] sm:$0xff]  }
 0x453   : > { %v4191_v47 = vrot.slane %v4163_v61, %v12238_v18  ;;  %v4194_v12 = vcombine.high %v4184_v55, %v4184_v55  ;;  %v4210_v31 = vcombine.low %v4170_v60, %v4184_v55  ;;  %v4224_v45 = vrot.slane %v4192_v30, %v12238_v18  ;;  %v10390_v60 = vld [vmem:[%s14413_s4 + $0x10] sm:$0xff]   ;;  %v10392_v61 = vld [vmem:[%s14413_s4 + $0x58] sm:$0xff]  }
 0x454   : > { %v4270_v36 = vrot.slane %v4209_v25, %v12238_v18  ;;  %v10391_v6 = vld [vmem:[%s14413_s4 + $0x90] sm:$0xff]   ;;  %v10393_v55 = vld [vmem:[%s14413_s4 + $0xd8] sm:$0xff]  }
 0x455   : > { %v4217_v10 = vrot.slane %v4210_v31, %v12238_v18  ;;  %v4233_v37 = vcombine.low %v4194_v12, %v4177_v14  ;;  %v9632_v54 = vcombine.high %v4177_v14, %v4191_v47  ;;  %v4247_v49 = vrot.slane %v4191_v47, %v12238_v18  ;;  %v10394_v30 = vld [vmem:[%s14413_s4 + $0x18] sm:$0xff]   ;;  %v10396_v14 = vld [vmem:[%s14413_s4 + $0x60] sm:$0xff]  }
 0x456   : > { %v10395_v25 = vld [vmem:[%s14413_s4 + $0x98] sm:$0xff]   ;;  %v10397_v47 = vld [vmem:[%s14413_s4 + $0xe0] sm:$0xff]  }
 0x457   : > { %v4263_v32 = vrot.slane %v9632_v54, %v12238_v18  ;;  %v4225_v5 = vcombine.low %v4217_v10, %v4224_v45  ;;  %v4240_v42 = vrot.slane %v4233_v37, %v12238_v18  ;;  %v10398_v12 = vld [vmem:[%s14413_s4 + $0x20] sm:$0xff]   ;;  %v10401_v10 = vld [vmem:[%s14413_s4 + $0xe8] sm:$0xff]   ;;  %v10404_v54 = vld [vmem:[%s14413_s4 + $0x70] sm:$0xff]  }
 0x458   : > { %v10399_v31 = vld [vmem:[%s14413_s4 + $0xa0] sm:$0xff]   ;;  %v10402_v45 = vld [vmem:[%s14413_s4 + $0x28] sm:$0xff]  }
 0x459   : > { %v4271_v48 = vcombine.low %v4263_v32, %v4270_v36  ;;  %v4232_v56 = vrot.slane %v4225_v5, %v12238_v18  ;;  %v4248_v13 = vcombine.low %v4240_v42, %v4247_v49  ;;  %v10403_v37 = vld [vmem:[%s14413_s4 + $0xa8] sm:$0xff]   ;;  %v10406_v36 = vld [vmem:[%s14413_s4 + $0x30] sm:$0xff]   ;;  %v10408_v5 = vld [vmem:[%s14413_s4 + $0x78] sm:$0xff]  }
 0x45a   : > { %v10407_v32 = vld [vmem:[%s14413_s4 + $0xb0] sm:$0xff]   ;;  %v10409_v42 = vld [vmem:[%s14413_s4 + $0xf8] sm:$0xff]  }
 0x45b   : > { %v4282_v29 = vpack.c.bf16 %v4232_v56, %v4232_v56  ;;  %v4255_v46 = vrot.slane %v4248_v13, %v12238_v18  ;;  %v4278_v39 = vrot.slane %v4271_v48, %v12238_v18  ;;  %v10410_v49 = vld [vmem:[%s14413_s4 + $0x38] sm:$0xff]   ;;  %v10412_v56 = vld [vmem:[%s14413_s4 + $0x140] sm:$0xff]  }
 0x45c   : > { %v10411_v48 = vld [vmem:[%s14413_s4 + $0xb8] sm:$0xff]   ;;  %v10413_v13 = vld [vmem:[%s14413_s4 + $0x1c0] sm:$0xff]  }
 0x45d   : > { %v4359_v33 = vshrl.u32 %v4282_v29, 16  ;;  %v4283_v17 = vpack.c.bf16 %v4255_v46, %v4255_v46  ;;  %v4284_v53 = vpack.c.bf16 %v4278_v39, %v4278_v39  ;;  %v4364_v22 = vrot.slane %v4282_v29, 1 }
 0x45e   : > { %v4740_v39 = vsel %vm707_vm0, 0, %v10630_v1 }
 0x45f   : > { %4361 = vrot.lane.b32.xlu1 %v4359_v33, %s10545_s17  ;;  %4366 = vrot.lane.b32.xlu0 %v4283_v17, %s10545_s17  ;;  %v4375_v24 = vshrl.u32 %v4284_v53, 16  ;;  %v4371_v52 = vrot.slane %v4283_v17, 1  ;;  %v4369_v16 = vshrl.u32 %v4283_v17, 16  ;;  %v4380_v51 = vrot.slane %v4284_v53, 1 }
 0x463   : > { %4377 = vrot.lane.b32.xlu0 %v4375_v24, %s10545_s17  ;;  %4372 = vrot.lane.b32.xlu1 %v4371_v52, %s10545_s17 }
 0x4d1   : > { %v4362_v20 = vpop.permute.xlu1 %4361  ;;  %v4367_v50 = vpop.permute.xlu0 %4366 }
 0x4d2   : > { %v4382_v4 = vsel %vm2844_vm14, %v4282_v29, %v4362_v20  ;;  %v4386_v19 = vsel %vm2844_vm14, %v4364_v22, %v4367_v50  ;;  %v4745_v22 = vsel %vm10654_vm9, %v4740_v39, 0 }
 0x4d3   : > { %4646 = vmatprep.mubr.bf16.mxu0 %v4386_v19 }
 0x4d4   : > { %4647 = vmatmul.mubr.bf16.vlgmr.msra.gmra.mrb[16].mxu0 %v4382_v4 }
 0x4d5   : > { %10163 = vmatpush3.bf16.msra.mxu0 %v10375_v40  ;;  %v4378_v34 = vpop.permute.xlu0 %4377  ;;  %v4373_v63 = vpop.permute.xlu1 %4372  ;;  %10170 = vmatprep.mubr.msk.bf16.mxu0 %vm10548_vm15, %v10547_v21 }
 0x4d6   : > { %v4390_v57 = vsel %vm2844_vm14, %v4369_v16, %v4373_v63  ;;  %v4393_v11 = vsel %vm2844_vm14, %v4284_v53, %v4378_v34  ;;  %10164 = vmatprep.subr.bf16.mxu0 %v10547_v21  ;;  %v4357_v53 = vld [vmem:[%s14418_s9] sm:$0x1]  ;;  %v4895_v16 = vshll.u32 %v4745_v22, 16  ;;  %v4893_v63 = vshrl.u32 %v4745_v22, 16 }
 0x4d7   : > { %4686 = vmatprep.mubr.bf16.mxu1 %v4393_v11 }
 0x4d8   : > { %4687 = vmatmul.mubr.bf16.vlgmr.msra.gmra.mrb[12].mxu1 %v4390_v57  ;;  %v4897_v1 = vrot.slane %v4895_v16, 1 }
 0x4d9   : > { %10165 = vmatpush3.bf16.msra.mxu0 %v10377_v23  ;;  %9993 = vmatpush3.bf16.msra.mxu1 %v10383_v7 }
 0x4da   : > { %10166 = vmatprep.subr.bf16.mxu0 %v10547_v21  ;;  %9994 = vmatprep.subr.bf16.mxu1 %v10385_v26  ;;  %v4898_v23 = vor.u32 %v4897_v1, %v4893_v63 }
 0x4dd   : > { %10167 = vmatpush3.bf16.msra.mxu0 %v10378_v41  ;;  %9995 = vmatpush3.bf16.msra.mxu1 %v10387_v8 }
 0x4de   : > { %10168 = vmatprep.subr.bf16.mxu0 %v10547_v21  ;;  %9996 = vmatprep.subr.bf16.mxu1 %v10389_v0 }
 0x4e1   : > { %10169 = vmatpush3.bf16.msra.mxu0 %v10379_v58  ;;  %9997 = vmatpush3.bf16.msra.mxu1 %v10391_v6 }
 0x4e2   : > { %9970 = vmatprep.subr.bf16.mxu0 %v10380_v44  ;;  %9998 = vmatprep.subr.bf16.mxu1 %v10393_v55  ;;  %v12733_v44 = vrot.slane %v4745_v22, 1 }
 0x4e4   : > { %10171 = vmatmul.mubr.msk.bf16.vlgmr.msra.gmra.mrb[20].mxu0 %vm2844_vm14, %v4380_v51  ;;  %v4912_v26 = vcombine.low %v4898_v23, %v12733_v44 }
 0x4e5   : > { %9971 = vmatpush3.bf16.msra.mxu0 %v10382_v28  ;;  %9999 = vmatpush3.bf16.msra.mxu1 %v10395_v25  ;;  %v4910_v28 = vcombine.low %v4745_v22, %v4898_v23 }
 0x4e6   : > { %9972 = vmatprep.subr.bf16.mxu0 %v10384_v59  ;;  %10000 = vmatprep.subr.bf16.mxu1 %v10397_v47  ;;  %v4911_v59 = vcombine.low %v12733_v44, %v4745_v22  ;;  %v4934_v55 = vrot.slane %v4912_v26, %v12238_v18 }
 0x4e7   : > { %v4920_v8 = vrot.slane %v4910_v28, %v12238_v18 }
 0x4e9   : > { %9973 = vmatpush3.bf16.msra.mxu0 %v10386_v43  ;;  %10001 = vmatpush3.bf16.msra.mxu1 %v10399_v31 }
 0x4ea   : > { %9974 = vmatprep.subr.bf16.mxu0 %v10388_v38  ;;  %10002 = vmatprep.subr.bf16.mxu1 %v10401_v10 }
 0x4ed   : > { %9975 = vmatpush3.bf16.msra.mxu0 %v10390_v60  ;;  %10003 = vmatpush3.bf16.msra.mxu1 %v10403_v37  ;;  %v5080_v37 = vcombine.low %v4934_v55, %v4920_v8 }
 0x4ee   : > { %9976 = vmatprep.subr.bf16.mxu0 %v10392_v61  ;;  %10004 = vmatprep.subr.bf16.mxu1 %v10405_v35  ;;  %v4927_v61 = vrot.slane %v4911_v59, %v12238_v18 }
 0x4f0   : > { %v4943_v10 = vcombine.high %v4920_v8, %v4927_v61 }
 0x4f1   : > { %9977 = vmatpush3.bf16.msra.mxu0 %v10394_v30  ;;  %10005 = vmatpush3.bf16.msra.mxu1 %v10407_v32 }
 0x4f2   : > { %9978 = vmatprep.subr.bf16.mxu0 %v10396_v14  ;;  %10006 = vmatprep.subr.bf16.mxu1 %v10409_v42 }
 0x4f5   : > { %9979 = vmatpush3.bf16.msra.mxu0 %v10398_v12  ;;  %10007 = vmatpush3.bf16.msra.mxu1 %v10411_v48 }
 0x4f6   : > { %9980 = vmatprep.subr.bf16.mxu0 %v10400_v15  ;;  %10036 = vmatprep.subr.bf16.mxu1 %v10413_v13  ;;  %v4942_v15 = vcombine.low %v4920_v8, %v4927_v61 }
 0x4f8   : > { %v4952_v42 = vrot.slane %v4942_v15, %v12238_v18 }
 0x4f9   : > { %9981 = vmatpush3.bf16.msra.mxu0 %v10402_v45  ;;  %v5081_v45 = vcombine.high %v4934_v55, %v4920_v8 }
 0x4fa   : > { %9982 = vmatprep.subr.bf16.mxu0 %v10404_v54 }
 0x4fb   : > { %v5109_v48 = vrot.slane %v5081_v45, %v12238_v18 }
 0x4fd   : > { %9983 = vmatpush3.bf16.msra.mxu0 %v10406_v36 }
 0x4fe   : > { %9984 = vmatprep.subr.bf16.mxu0 %v10408_v5 }
 0x501   : > { %9985 = vmatpush3.bf16.msra.mxu0 %v10410_v49  ;;  %v4959_v49 = vrot.slane %v4943_v10, %v12238_v18 }
 0x502   : > { %10014 = vmatprep.subr.bf16.mxu0 %v10412_v56  ;;  %v5102_v56 = vrot.slane %v5080_v37, %v12238_v18 }
 0x5a7   : > { %v9937_v29 = vpop.f32.mrb[16].mxu0 }
 0x5a8   : > { %v9938_v46 = vpop.f32.mrb[17].mxu0 }
 0x5a9   : > { %v9939_v33 = vadd.f32 %v9938_v46, %v9937_v29  ;;  %v9940_v17 = vpop.f32.mrb[18].mxu0 }
 0x5aa   : > { %v9941_v24 = vpop.f32.mrb[19].mxu0 }
 0x5ab   : > { %v9959_v52 = vpop.f32.mrb[12].mxu1  ;;  %v4649_v50 = vadd.f32 %v9939_v33, %v4357_v53 }
 0x5ac   : > { %v9960_v20 = vpop.f32.mrb[13].mxu1 }
 0x5ad   : > { %v9961_v40 = vadd.f32 %v9960_v20, %v9959_v52  ;;  %v9962_v4 = vpop.f32.mrb[14].mxu1 }
 0x5ae   : > { %v9963_v19 = vpop.f32.mrb[15].mxu1 }
 0x5af   : > { %v4689_v34 = vadd.f32 %v9961_v40, %v4649_v50 }
 0x5b7   : > { %v4728_v57 = vpop.f32.mrb[20].mxu0 }
 0x5b8   : > { %v4729_v11 = vadd.f32 %v4728_v57, %v4689_v34  ;;  %v10172_v41 = vpop.f32.mrb[21].mxu0 }
 0x5b9   : > { %v4731_v58 = vpop.f32.mrb[22].mxu0 }
 0x5ba   : > { %v4734_v51 = vpack.c.bf16 %v4729_v11, %v4729_v11  ;;  %v10173_v27 = vpop.f32.mrb[23].mxu0 }
 0x5bc   : > { %v4738_v7 = vrot.slane %v4734_v51, 7 }
 0x5be   : > { %v4743_v43 = vsel %vm707_vm0, 0, %v4738_v7 }
 0x5bf   : > { %v4746_v38 = vsel %vm10654_vm9, %v4743_v43, 0 }
 0x5c0   : > { %v4902_v0 = vshll.u32 %v4746_v38, 16  ;;  %v12741_v60 = vrot.slane %v4746_v38, 1  ;;  %v4998_v6 = vcombine.low %v12733_v44, %v4746_v38  ;;  %v4900_v30 = vshrl.u32 %v4746_v38, 16 }
 0x5c2   : > { %v4904_v25 = vrot.slane %v4902_v0, 1  ;;  %v5006_v14 = vrot.slane %v4998_v6, %v12238_v18  ;;  %v5070_v47 = vcombine.low %v12741_v60, %v4745_v22 }
 0x5c4   : > { %v4905_v12 = vor.u32 %v4904_v25, %v4900_v30  ;;  %v5014_v31 = vcombine.low %v4920_v8, %v5006_v14  ;;  %v5015_v9 = vcombine.high %v4920_v8, %v5006_v14  ;;  %v5077_v5 = vrot.slane %v5070_v47, %v12238_v18 }
 0x5c6   : > { %v4913_v54 = vcombine.low %v4746_v38, %v4905_v12  ;;  %v4999_v35 = vcombine.low %v4905_v12, %v12741_v60  ;;  %v5024_v33 = vrot.slane %v5014_v31, %v12238_v18  ;;  %v5031_v17 = vrot.slane %v5015_v9, %v12238_v18 }
 0x5c8   : > { %v4941_v36 = vrot.slane %v4913_v54, %v12238_v18  ;;  %v5013_v32 = vrot.slane %v4999_v35, %v12238_v18 }
 0x5ca   : > { %v5016_v13 = vcombine.low %v5013_v32, %v4920_v8  ;;  %v5017_v29 = vcombine.high %v5013_v32, %v4920_v8  ;;  %v4945_v46 = vcombine.high %v4934_v55, %v4941_v36  ;;  %v5078_v39 = vcombine.low %v4941_v36, %v5077_v5 }
 0x5cb   : > { %v5079_v53 = vcombine.high %v4941_v36, %v5077_v5  ;;  %v4944_v24 = vcombine.low %v4934_v55, %v4941_v36 }
 0x5cc   : > { %v4973_v52 = vrot.slane %v4945_v46, %v12238_v18  ;;  %v5038_v22 = vrot.slane %v5016_v13, %v12238_v18  ;;  %v5045_v20 = vrot.slane %v5017_v29, %v12238_v18  ;;  %v5088_v50 = vrot.slane %v5078_v39, %v12238_v18  ;;  %v10416_v46 = vld [vmem:[%s14413_s4 + $0x148] sm:$0xff]  }
 0x5cd   : > { %v5095_v40 = vrot.slane %v5079_v53, %v12238_v18  ;;  %v4966_v4 = vrot.slane %v4944_v24, %v12238_v18  ;;  %v10417_v39 = vld [vmem:[%s14413_s4 + $0x1c8] sm:$0xff]   ;;  %v10420_v53 = vld [vmem:[%s14413_s4 + $0x150] sm:$0xff]  }
 0x5ce   : > { %v4975_v19 = vcombine.low %v4959_v49, %v4973_v52  ;;  %v5046_v16 = vcombine.low %v5024_v33, %v5038_v22  ;;  %v5047_v34 = vcombine.low %v5031_v17, %v5045_v20  ;;  %v5110_v63 = vcombine.low %v5088_v50, %v5102_v56  ;;  %v10415_v49 = vld [vmem:[%s14413_s4 + $0x180] sm:$0xff]   ;;  %v10418_v33 = vld [vmem:[%s14413_s4 + $0x108] sm:$0xff]   ;;  %v10421_v24 = vld [vmem:[%s14413_s4 + $0x1d0] sm:$0xff]  }
 0x5cf   : > { %v5111_v1 = vcombine.low %v5095_v40, %v5109_v48  ;;  %v4974_v23 = vcombine.low %v4952_v42, %v4966_v4  ;;  %v10419_v17 = vld [vmem:[%s14413_s4 + $0x188] sm:$0xff]   ;;  %v10422_v52 = vld [vmem:[%s14413_s4 + $0x110] sm:$0xff]   ;;  %v10424_v20 = vld [vmem:[%s14413_s4 + $0x158] sm:$0xff]  }
 0x5d0   : > { %v5120_v57 = vunpack.i.h.s16 %v5046_v16  ;;  %v9671_v11 = vpack.i.b16 %v5046_v16, %v4975_v19  ;;  %v10423_v22 = vld [vmem:[%s14413_s4 + $0x190] sm:$0xff]   ;;  %v10426_v40 = vld [vmem:[%s14413_s4 + $0x118] sm:$0xff]   ;;  %v10428_v19 = vld [vmem:[%s14413_s4 + $0x160] sm:$0xff]  }
 0x5d1   : > { %v5126_v41 = vunpack.i.l.s16 %v5111_v1  ;;  %v10427_v4 = vld [vmem:[%s14413_s4 + $0x198] sm:$0xff]   ;;  %v10429_v16 = vld [vmem:[%s14413_s4 + $0x1e0] sm:$0xff]   ;;  %v10432_v1 = vld [vmem:[%s14413_s4 + $0x168] sm:$0xff]  }
 0x5d2   : > { %v9673_v58 = vpack.i.b16 %v5047_v34, %v5120_v57  ;;  %v9675_v51 = vcombine.low %v4952_v42, %v9671_v11  ;;  %v5144_v27 = vcombine.high %v4974_v23, %v9671_v11  ;;  %v10414_v42 = vld [vmem:[%s14413_s4 + $0x100] sm:$0xff]   ;;  %v10433_v23 = vld [vmem:[%s14413_s4 + $0x1e8] sm:$0xff]  }
 0x5d3   : > { %v5182_v28 = vrot.slane %v5126_v41, %v12238_v18  ;;  %v5147_v7 = vcombine.high %v5126_v41, %v5126_v41  ;;  %v10430_v34 = vld [vmem:[%s14413_s4 + $0x120] sm:$0xff]   ;;  %v10434_v57 = vld [vmem:[%s14413_s4 + $0x128] sm:$0xff]   ;;  %v10436_v41 = vld [vmem:[%s14413_s4 + $0x170] sm:$0xff]  }
 0x5d4   : > { %v9676_v59 = vcombine.low %v9673_v58, %v5088_v50  ;;  %v5146_v26 = vcombine.high %v9673_v58, %v5110_v63  ;;  %v5154_v38 = vrot.slane %v9675_v51, %v12238_v18  ;;  %v5161_v6 = vrot.slane %v5144_v27, %v12238_v18  ;;  %v10425_v50 = vld [vmem:[%s14413_s4 + $0x1d8] sm:$0xff]   ;;  %v10431_v63 = vld [vmem:[%s14413_s4 + $0x1a0] sm:$0xff]   ;;  %v10435_v11 = vld [vmem:[%s14413_s4 + $0x1a8] sm:$0xff]  }
 0x5d5   : > { %v5194_v43 = vcombine.high %v5182_v28, %v5182_v28  ;;  %v5189_v8 = vrot.slane %v5147_v7, %v12238_v18  ;;  %v5230_v31 = vrot.slane %v5182_v28, %v12238_v18  ;;  %v10437_v58 = vld [vmem:[%s14413_s4 + $0x1f0] sm:$0xff]   ;;  %v10440_v28 = vld [vmem:[%s14413_s4 + $0x178] sm:$0xff]  }
 0x5d6   : > { %v5168_v0 = vrot.slane %v9676_v59, %v12238_v18  ;;  %v5175_v61 = vrot.slane %v5146_v26, %v12238_v18  ;;  %v10438_v51 = vld [vmem:[%s14413_s4 + $0x130] sm:$0xff]   ;;  %v10441_v7 = vld [vmem:[%s14413_s4 + $0x1f8] sm:$0xff]  }
 0x5d7   : > { %v5195_v55 = vcombine.high %v5189_v8, %v5189_v8  ;;  %v5244_v12 = vrot.slane %v5194_v43, %v12238_v18  ;;  %v12780_v54 = vrot.slane %v5189_v8, %v12238_v18  ;;  %v10439_v27 = vld [vmem:[%s14413_s4 + $0x1b0] sm:$0xff]   ;;  %v10442_v59 = vld [vmem:[%s14413_s4 + $0x138] sm:$0xff]   ;;  %v10444_v43 = vld [vmem:[%s14413_s4 + $0x200] sm:$0xff]   ;;  %v4982_v8 = vrot.slane %v12741_v60, %v12238_v18 }
 0x5d8   : > { %v5191_v30 = vcombine.high %v5154_v38, %v5168_v0  ;;  %v5190_v25 = vcombine.low %v5154_v38, %v5168_v0  ;;  %v5193_v14 = vcombine.high %v5161_v6, %v5175_v61  ;;  %v5192_v47 = vcombine.low %v5161_v6, %v5175_v61  ;;  %v10443_v26 = vld [vmem:[%s14413_s4 + $0x1b8] sm:$0xff]   ;;  %v10445_v0 = vld [vmem:[%s14413_s4 + $0x208] sm:$0xff]   ;;  %v10446_v61 = vld [vmem:[%s14413_s4 + $0x210] sm:$0xff]  }
 0x5d9   : > { %v5251_v37 = vrot.slane %v5195_v55, %v12238_v18  ;;  %v5054_v38 = vrot.slane %v12733_v44, %v12238_v18  ;;  %v4983_v60 = vcombine.high %v4982_v8, %v4982_v8 }
 0x5da   : > { %v5216_v15 = vrot.slane %v5191_v30, %v12238_v18  ;;  %v5202_v9 = vrot.slane %v5190_v25, %v12238_v18  ;;  %v5223_v10 = vrot.slane %v5193_v14, %v12238_v18  ;;  %v12776_v45 = vrot.slane %v5192_v47, %v12238_v18  ;;  %v10447_v14 = vld [vmem:[%s14413_s4 + $0x218] sm:$0xff]  }
 0x5db   : > { %v5055_v44 = vcombine.high %v5054_v38, %v5054_v38  ;;  %v5062_v6 = vrot.slane %v5054_v38, %v12238_v18  ;;  %v4997_v55 = vrot.slane %v4983_v60, %v12238_v18 }
 0x5dc   : > { %v5256_v35 = vcombine.low %v5216_v15, %v5244_v12  ;;  %v5257_v36 = vcombine.high %v5216_v15, %v5244_v12  ;;  %v5252_v32 = vcombine.low %v5202_v9, %v5230_v31  ;;  %v5253_v5 = vcombine.high %v5202_v9, %v5230_v31  ;;  %v10448_v15 = vld [vmem:[%s14413_s4 + $0x220] sm:$0xff]  }
 0x5dd   : > { %v5258_v48 = vcombine.low %v5223_v10, %v5251_v37  ;;  %v5259_v56 = vcombine.high %v5223_v10, %v5251_v37  ;;  %v5254_v13 = vcombine.low %v12776_v45, %v12780_v54  ;;  %v5255_v29 = vcombine.high %v12776_v45, %v12780_v54  ;;  %v10449_v45 = vld [vmem:[%s14413_s4 + $0x228] sm:$0xff]  }
 0x5de   : > { %5772 = vmatprep.mubr.bf16.mxu0 %v5256_v35  ;;  %5813 = vmatprep.mubr.bf16.mxu1 %v5257_v36  ;;  %v5069_v30 = vrot.slane %v5055_v44, %v12238_v18  ;;  %v5121_v25 = vunpack.i.h.s16 %v5062_v6  ;;  %v9672_v47 = vpack.i.b16 %v5062_v6, %v4997_v55  ;;  %v4990_v31 = vrot.slane %v4982_v8, %v12238_v18  ;;  %v10450_v36 = vld [vmem:[%s14413_s4 + $0x230] sm:$0xff]  }
 0x5df   : > { %5773 = vmatmul.mubr.bf16.vlgmr.msra.gmra.mrb[24].mxu0 %v5252_v32  ;;  %5814 = vmatmul.mubr.bf16.vlgmr.msra.gmra.mrb[16].mxu1 %v5253_v5 }
 0x5e0   : > { %10015 = vmatpush3.bf16.msra.mxu0 %v10414_v42  ;;  %10037 = vmatpush3.bf16.msra.mxu1 %v10415_v49  ;;  %v9674_v12 = vpack.i.b16 %v5069_v30, %v5121_v25  ;;  %v5260_v9 = vcombine.low %v4990_v31, %v9672_v47  ;;  %v5123_v37 = vunpack.i.l.s16 %v5069_v30  ;;  %v10451_v42 = vld [vmem:[%s14413_s4 + $0x238] sm:$0xff]  }
 0x5e1   : > { %5854 = vmatprep.mubr.bf16.mxu0 %v5258_v48  ;;  %5895 = vmatprep.mubr.bf16.mxu1 %v5259_v56 }
 0x5e2   : > { %10016 = vmatprep.subr.bf16.mxu0 %v10416_v46  ;;  %10038 = vmatprep.subr.bf16.mxu1 %v10417_v39  ;;  %v5261_v10 = vcombine.low %v9674_v12, %v5062_v6  ;;  %v5268_v54 = vrot.slane %v5260_v9, %v12238_v18  ;;  %v5282_v32 = vrot.slane %v5123_v37, %v12238_v18 }
 0x5e4   : > { %10017 = vmatpush3.bf16.msra.mxu0 %v10418_v33  ;;  %10039 = vmatpush3.bf16.msra.mxu1 %v10419_v17  ;;  %v5275_v35 = vrot.slane %v5261_v10, %v12238_v18  ;;  %v5297_v48 = vrot.slane %v5282_v32, %v12238_v18 }
 0x5e5   : > { %10018 = vmatprep.subr.bf16.mxu0 %v10420_v53  ;;  %10040 = vmatprep.subr.bf16.mxu1 %v10421_v24  ;;  %v10453_v53 = vld [vmem:[%s14414_s5 + $0x80] sm:$0xff]   ;;  %v10454_v24 = vld [vmem:[%s14414_s5 + $0xc8] sm:$0xff]  }
 0x5e6   : > { %v5283_v5 = vcombine.low %v5268_v54, %v5275_v35 }
 0x5e8   : > { %10019 = vmatpush3.bf16.msra.mxu0 %v10422_v52  ;;  %10041 = vmatpush3.bf16.msra.mxu1 %v10423_v22  ;;  %v5290_v49 = vrot.slane %v5283_v5, %v12238_v18  ;;  %v10455_v52 = vld [vmem:[%s14414_s5 + $0x88] sm:$0xff]   ;;  %v10456_v22 = vld [vmem:[%s14414_s5 + $0xd0] sm:$0xff]  }
 0x5e9   : > { %10020 = vmatprep.subr.bf16.mxu0 %v10424_v20  ;;  %10042 = vmatprep.subr.bf16.mxu1 %v10425_v50 }
 0x5ea   : > { %v5298_v56 = vcombine.low %v5290_v49, %v5297_v48 }
 0x5ec   : > { %10021 = vmatpush3.bf16.msra.mxu0 %v10426_v40  ;;  %10043 = vmatpush3.bf16.msra.mxu1 %v10427_v4  ;;  %v9670_v40 = vld [vmem:[%s14419_s10] ss:$0 sm:$0xff] }
 0x5ed   : > { %10022 = vmatprep.subr.bf16.mxu0 %v10428_v19  ;;  %10044 = vmatprep.subr.bf16.mxu1 %v10429_v16 }
 0x5f0   : > { %10023 = vmatpush3.bf16.msra.mxu0 %v10430_v34  ;;  %10045 = vmatpush3.bf16.msra.mxu1 %v10431_v63 }
 0x5f1   : > { %10024 = vmatprep.subr.bf16.mxu0 %v10432_v1  ;;  %10046 = vmatprep.subr.bf16.mxu1 %v10433_v23 }
 0x5f4   : > { %10025 = vmatpush3.bf16.msra.mxu0 %v10434_v57  ;;  %10047 = vmatpush3.bf16.msra.mxu1 %v10435_v11 }
 0x5f5   : > { %10026 = vmatprep.subr.bf16.mxu0 %v10436_v41  ;;  %10048 = vmatprep.subr.bf16.mxu1 %v10437_v58 }
 0x5f8   : > { %10027 = vmatpush3.bf16.msra.mxu0 %v10438_v51  ;;  %10049 = vmatpush3.bf16.msra.mxu1 %v10439_v27 }
 0x5f9   : > { %10028 = vmatprep.subr.bf16.mxu0 %v10440_v28  ;;  %10050 = vmatprep.subr.bf16.mxu1 %v10441_v7 }
 0x5fc   : > { %10029 = vmatpush3.bf16.msra.mxu0 %v10442_v59  ;;  %10051 = vmatpush3.bf16.msra.mxu1 %v10443_v26 }
 0x5fd   : > { %10174 = vmatprep.subr.bf16.mxu0 %v10547_v21 }
 0x5ff   : > { %5855 = vmatmul.mubr.bf16.vlgmr.msra.gmra.mrb[28].mxu0 %v5254_v13  ;;  %5896 = vmatmul.mubr.bf16.vlgmr.msra.gmra.mrb[20].mxu1 %v5255_v29  ;;  %v12931_v13 = vsel %vm1119_vm3, %v10640_v3, 0  ;;  %v10452_v3 = vld [vmem:[%s14414_s5 + $0xc0] sm:$0xff]  }
 0x600   : > { %10175 = vmatpush3.bf16.msra.mxu0 %v10444_v43  ;;  %10190 = vmatprep.mubr.msk.bf16.mxu0 %vm10548_vm15, %v10547_v21  ;;  %v6194_v29 = vshrl.u32 %v12931_v13, 16  ;;  %v6196_v46 = vshll.u32 %v12931_v13, 16  ;;  %v12940_v17 = vrot.slane %v12931_v13, 1 }
 0x601   : > { %10176 = vmatprep.subr.bf16.mxu0 %v10547_v21 }
 0x602   : > { %v6198_v39 = vrot.slane %v6196_v46, 1 }
 0x604   : > { %10177 = vmatpush3.bf16.msra.mxu0 %v10445_v0  ;;  %v12935_v33 = vor.u32 %v6198_v39, %v6194_v29 }
 0x605   : > { %10178 = vmatprep.subr.bf16.mxu0 %v10547_v21 }
 0x606   : > { %6218 = vrot.lane.b32.xlu0 %v12935_v33, %s10545_s17 }
 0x608   : > { %10179 = vmatpush3.bf16.msra.mxu0 %v10446_v61 }
 0x609   : > { %10180 = vmatprep.subr.bf16.mxu0 %v10547_v21 }
 0x60a   : > { %6248 = vrot.lane.b32.xlu0 %v12940_v17, %s10545_s17 }
 0x60c   : > { %10181 = vmatpush3.bf16.msra.mxu0 %v10447_v14 }
 0x60d   : > { %10182 = vmatprep.subr.bf16.mxu0 %v10547_v21 }
 0x610   : > { %10183 = vmatpush3.bf16.msra.mxu0 %v10448_v15 }
 0x611   : > { %10184 = vmatprep.subr.bf16.mxu0 %v10547_v21 }
 0x614   : > { %10185 = vmatpush3.bf16.msra.mxu0 %v10449_v45 }
 0x615   : > { %10186 = vmatprep.subr.bf16.mxu0 %v10547_v21 }
 0x618   : > { %10187 = vmatpush3.bf16.msra.mxu0 %v10450_v36 }
 0x619   : > { %10188 = vmatprep.subr.bf16.mxu0 %v10547_v21 }
 0x61c   : > { %10189 = vmatpush3.bf16.msra.mxu0 %v10451_v42 }
 0x61d   : > { %10089 = vmatprep.subr.bf16.mxu0 %v10452_v3 }
 0x61f   : > { %10191 = vmatmul.mubr.bf16.vlgmr.msra.gmra.mrb[32].mxu0 %v5298_v56 }
 0x620   : > { %10090 = vmatpush3.bf16.msra.mxu0 %v10453_v53 }
 0x621   : > { %10091 = vmatprep.subr.bf16.mxu0 %v10454_v24 }
 0x624   : > { %10092 = vmatpush3.bf16.msra.mxu0 %v10455_v52 }
 0x625   : > { %10093 = vmatprep.subr.bf16.mxu0 %v10456_v22 }
 0x6b2   : > { %v9986_v20 = vpop.f32.mrb[24].mxu0  ;;  %v10008_v50 = vpop.f32.mrb[16].mxu1 }
 0x6b3   : > { %v9987_v4 = vpop.f32.mrb[25].mxu0  ;;  %v10009_v19 = vpop.f32.mrb[17].mxu1 }
 0x6b4   : > { %v9988_v16 = vadd.f32 %v9987_v4, %v9986_v20  ;;  %v10010_v34 = vadd.f32 %v10009_v19, %v10008_v50  ;;  %v9989_v63 = vpop.f32.mrb[26].mxu0  ;;  %v10011_v1 = vpop.f32.mrb[18].mxu1 }
 0x6b5   : > { %v9990_v23 = vpop.f32.mrb[27].mxu0  ;;  %v10012_v57 = vpop.f32.mrb[19].mxu1 }
 0x6b6   : > { %v5775_v11 = vadd.f32 %v9988_v16, %v9670_v40  ;;  %v9991_v41 = vadd.f32 %v9990_v23, %v9989_v63  ;;  %v10013_v58 = vadd.f32 %v10012_v57, %v10011_v1  ;;  %v10457_v57 = vld [vmem:[%s14414_s5 + $0x40] sm:$0xff]  }
 0x6b7   : > { %10067 = vmatprep.subr.bf16.mxu1 %v10457_v57  ;;  %v10477_v57 = vld [vmem:[%s14414_s5 + $0x68] sm:$0xff]  }
 0x6b8   : > { %v5816_v51 = vadd.f32 %v10010_v34, %v5775_v11  ;;  %v5778_v27 = vadd.f32 %v9991_v41, %v9670_v40  ;;  %v10458_v11 = vld [vmem:[%s14414_s5 + $0x90] sm:$0xff]   ;;  %v10459_v41 = vld [vmem:[%s14414_s5] sm:$0xff]  }
 0x6b9   : > { %10094 = vmatpush3.bf16.msra.mxu0 %v10458_v11  ;;  %10068 = vmatpush3.bf16.msra.mxu1 %v10459_v41  ;;  %v10478_v11 = vld [vmem:[%s14414_s5 + $0xb8] sm:$0xff]   ;;  %v10479_v41 = vld [vmem:[%s14414_s5 + $0x28] sm:$0xff]  }
 0x6ba   : > { %v5819_v28 = vadd.f32 %v10013_v58, %v5778_v27 }
 0x6d2   : > { %v10030_v7 = vpop.f32.mrb[28].mxu0  ;;  %v10052_v59 = vpop.f32.mrb[20].mxu1 }
 0x6d3   : > { %v10031_v26 = vpop.f32.mrb[29].mxu0  ;;  %v10053_v43 = vpop.f32.mrb[21].mxu1 }
 0x6d4   : > { %v10032_v8 = vadd.f32 %v10031_v26, %v10030_v7  ;;  %v10054_v38 = vadd.f32 %v10053_v43, %v10052_v59  ;;  %v10033_v0 = vpop.f32.mrb[30].mxu0  ;;  %v10055_v60 = vpop.f32.mrb[22].mxu1 }
 0x6d5   : > { %v10034_v44 = vpop.f32.mrb[31].mxu0  ;;  %v10056_v6 = vpop.f32.mrb[23].mxu1 }
 0x6d6   : > { %v5857_v61 = vadd.f32 %v10032_v8, %v5816_v51  ;;  %v10035_v55 = vadd.f32 %v10034_v44, %v10033_v0  ;;  %v10057_v30 = vadd.f32 %v10056_v6, %v10055_v60 }
 0x6d8   : > { %v5860_v25 = vadd.f32 %v10035_v55, %v5819_v28  ;;  %v5898_v14 = vadd.f32 %v10054_v38, %v5857_v61  ;;  %v10460_v28 = vld [vmem:[%s14414_s5 + $0xd8] sm:$0xff]  }
 0x6d9   : > { %10095 = vmatprep.subr.bf16.mxu0 %v10460_v28  ;;  %v10485_v28 = vld [vmem:[%s14414_s5 + $0x38] sm:$0xff]  }
 0x6da   : > { %v5901_v47 = vadd.f32 %v10057_v30, %v5860_v25 }
 0x6f2   : > { %v5938_v12 = vpop.f32.mrb[32].mxu0 }
 0x6f3   : > { %v5939_v31 = vadd.f32 %v5938_v12, %v5898_v14  ;;  %v10192_v15 = vpop.f32.mrb[33].mxu0  ;;  %v10462_v12 = vld [vmem:[%s14414_s5 + $0x98] sm:$0xff]  }
 0x6f4   : > { %v5941_v9 = vpop.f32.mrb[34].mxu0  ;;  %10096 = vmatpush3.bf16.msra.mxu0 %v10462_v12 }
 0x6f5   : > { %v5945_v10 = vmax.f32 %v5939_v31, 0.0  ;;  %v5942_v45 = vadd.f32 %v5941_v9, %v5901_v47  ;;  %v10193_v37 = vpop.f32.mrb[35].mxu0  ;;  %v10461_v47 = vld [vmem:[%s14414_s5 + $0x48] sm:$0xff]   ;;  %v10464_v9 = vld [vmem:[%s14414_s5 + $0xe0] sm:$0xff]  }
 0x6f6   : > { %v10463_v31 = vld [vmem:[%s14414_s5 + $0x8] sm:$0xff]   ;;  %10069 = vmatprep.subr.bf16.mxu1 %v10461_v47  ;;  %10097 = vmatprep.subr.bf16.mxu0 %v10464_v9 }
 0x6f7   : > { %v5949_v54 = vcombine.high %v5945_v10, %v5945_v10  ;;  %v5956_v35 = vrot.slane %v5945_v10, %v12238_v18  ;;  %v5946_v36 = vmax.f32 %v5942_v45, 0.0  ;;  %v10465_v10 = vld [vmem:[%s14414_s5 + $0x50] sm:$0xff]   ;;  %10070 = vmatpush3.bf16.msra.mxu1 %v10463_v31 }
 0x6f8   : > { %10071 = vmatprep.subr.bf16.mxu1 %v10465_v10 }
 0x6f9   : > { %v5963_v32 = vrot.slane %v5949_v54, %v12238_v18  ;;  %v5964_v5 = vcombine.high %v5956_v35, %v5956_v35  ;;  %v5972_v42 = vrot.slane %v5956_v35, %v12238_v18  ;;  %v6004_v49 = vrot.slane %v5946_v36, %v12238_v18  ;;  %v10466_v35 = vld [vmem:[%s14414_s5 + $0xa0] sm:$0xff]  }
 0x6fa   : > { %10098 = vmatpush3.bf16.msra.mxu0 %v10466_v35 }
 0x6fb   : > { %v5965_v48 = vcombine.high %v5963_v32, %v5963_v32  ;;  %v5986_v56 = vrot.slane %v5964_v5, %v12238_v18  ;;  %v5994_v29 = vcombine.high %v5972_v42, %v5972_v42  ;;  %v6011_v46 = vrot.slane %v6004_v49, %v12238_v18  ;;  %10072 = vmatpush3.bf16.msra.mxu1 %v10467_v2 }
 0x6fc   : > { %v5979_v39 = vrot.slane %v5963_v32, %v12238_v18 }
 0x6fd   : > { %v5993_v3 = vrot.slane %v5965_v48, %v12238_v18  ;;  %v5996_v53 = vcombine.high %v5986_v56, %v5986_v56  ;;  %v6012_v24 = vcombine.low %v5972_v42, %v5986_v56  ;;  %v6026_v22 = vrot.slane %v5994_v29, %v12238_v18  ;;  %v10468_v48 = vld [vmem:[%s14414_s5 + $0xe8] sm:$0xff]  }
 0x6fe   : > { %v6072_v40 = vrot.slane %v6011_v46, %v12238_v18  ;;  %10099 = vmatprep.subr.bf16.mxu0 %v10468_v48 }
 0x6ff   : > { %v6019_v52 = vrot.slane %v6012_v24, %v12238_v18  ;;  %v6035_v20 = vcombine.low %v5996_v53, %v5979_v39  ;;  %v9749_v50 = vcombine.high %v5979_v39, %v5993_v3  ;;  %v6049_v16 = vrot.slane %v5993_v3, %v12238_v18 }
 0x701   : > { %v6027_v4 = vcombine.low %v6019_v52, %v6026_v22  ;;  %v6042_v19 = vrot.slane %v6035_v20, %v12238_v18  ;;  %v6065_v34 = vrot.slane %v9749_v50, %v12238_v18  ;;  %v10469_v52 = vld [vmem:[%s14414_s5 + $0x58] sm:$0xff]   ;;  %v10470_v22 = vld [vmem:[%s14414_s5 + $0xa8] sm:$0xff]   ;;  %v10472_v50 = vld [vmem:[%s14414_s5 + $0xf0] sm:$0xff]  }
 0x702   : > { %v10471_v20 = vld [vmem:[%s14414_s5 + $0x18] sm:$0xff]   ;;  %10073 = vmatprep.subr.bf16.mxu1 %v10469_v52  ;;  %10100 = vmatpush3.bf16.msra.mxu0 %v10470_v22 }
 0x703   : > { %v6034_v63 = vrot.slane %v6027_v4, %v12238_v18  ;;  %v6050_v1 = vcombine.low %v6042_v19, %v6049_v16  ;;  %v6073_v23 = vcombine.low %v6065_v34, %v6072_v40  ;;  %10074 = vmatpush3.bf16.msra.mxu1 %v10471_v20  ;;  %10101 = vmatprep.subr.bf16.mxu0 %v10472_v50  ;;  %v10473_v16 = vld [vmem:[%s14414_s5 + $0x60] sm:$0xff]   ;;  %v10474_v34 = vld [vmem:[%s14414_s5 + $0xb0] sm:$0xff]  }
 0x704   : > { %10075 = vmatprep.subr.bf16.mxu1 %v10473_v16 }
 0x705   : > { %v6057_v58 = vrot.slane %v6050_v1, %v12238_v18  ;;  %v6084_v51 = vpack.c.bf16 %v6034_v63, %v6034_v63  ;;  %v6080_v27 = vrot.slane %v6073_v23, %v12238_v18  ;;  %v10475_v63 = vld [vmem:[%s14414_s5 + $0x20] sm:$0xff]   ;;  %v10476_v1 = vld [vmem:[%s14414_s5 + $0xf8] sm:$0xff]  }
 0x706   : > { %10102 = vmatpush3.bf16.msra.mxu0 %v10474_v34 }
 0x707   : > { %v6085_v7 = vpack.c.bf16 %v6057_v58, %v6057_v58  ;;  %v6088_v59 = vshrl.u32 %v6084_v51, 16  ;;  %v6086_v26 = vpack.c.bf16 %v6080_v27, %v6080_v27  ;;  %v6091_v38 = vshll.u32 %v6084_v51, 16  ;;  %10076 = vmatpush3.bf16.msra.mxu1 %v10475_v63  ;;  %10103 = vmatprep.subr.bf16.mxu0 %v10476_v1  ;;  %v10480_v58 = vld [vmem:[%s14414_s5 + $0x70] sm:$0xff]   ;;  %v10483_v27 = vld [vmem:[%s14414_s5 + $0x78] sm:$0xff]  }
 0x708   : > { %10077 = vmatprep.subr.bf16.mxu1 %v10477_v57  ;;  %v10482_v51 = vld [vmem:[%s14414_s5 + $0x30] sm:$0xff]  }
 0x709   : > { %v6102_v43 = vshrl.u32 %v6086_v26, 16  ;;  %v6090_v8 = vrot.slane %v6088_v59, 7  ;;  %v6095_v0 = vshrl.u32 %v6085_v7, 16  ;;  %v6105_v60 = vshll.u32 %v6086_v26, 16 }
 0x70a   : > { %v6098_v55 = vshll.u32 %v6085_v7, 16  ;;  %10104 = vmatpush3.bf16.msra.mxu0 %v10478_v11  ;;  %v6219_v7 = vpop.permute.xlu0 %6218 }
 0x70b   : > { %v6104_v44 = vrot.slane %v6102_v43, 7  ;;  %v6093_v6 = vor.u32 %v6091_v38, %v6090_v8  ;;  %v6097_v61 = vrot.slane %v6095_v0, 7  ;;  %10078 = vmatpush3.bf16.msra.mxu1 %v10479_v41  ;;  %10194 = vmatprep.subr.bf16.mxu0 %v10547_v21  ;;  %v10549_v43 = vmov 1983009808   ;;  %v10484_v41 = vld [vmem:[%s14414_s5 + $0x108] sm:$0xff]  }
 0x70c   : > { %10079 = vmatprep.subr.bf16.mxu1 %v10480_v58  ;;  %v6297_v8 = vunpack.c.l.s4 %v10549_v43  ;;  %v10486_v43 = vld [vmem:[%s14414_s5 + $0x110] sm:$0xff]  }
 0x70d   : > { %v6111_v30 = vsel %vm10633_vm2, 0, %v6093_v6  ;;  %v6100_v25 = vor.u32 %v6098_v55, %v6097_v61  ;;  %v6107_v14 = vor.u32 %v6105_v60, %v6104_v44  ;;  %v6251_v61 = vsel %vm2844_vm14, %v12931_v13, %v6219_v7 }
 0x70e   : > { %v13003_v15 = vsel %vm1119_vm3, %v6111_v30, 0  ;;  %v6249_v59 = vpop.permute.xlu0 %6248  ;;  %v6298_v44 = vunpack.c.0.s8 %v6297_v8 }
 0x70f   : > { %v6231_v45 = vrot.slane %v13003_v15, 1  ;;  %v6112_v37 = vsel %vm10633_vm2, 0, %v6100_v25  ;;  %v6113_v54 = vsel %vm10633_vm2, 0, %v6107_v14  ;;  %v6202_v5 = vshll.u32 %v13003_v15, 16  ;;  %10080 = vmatpush3.bf16.msra.mxu1 %v10482_v51 }
 0x710   : > { %v13020_v36 = vsel %vm1119_vm3, %v6112_v37, 0  ;;  %v13023_v32 = vsel %vm1119_vm3, %v6113_v54, 0  ;;  %v6200_v24 = vshrl.u32 %v13003_v15, 16  ;;  %10081 = vmatprep.subr.bf16.mxu1 %v10483_v27  ;;  %v6281_v55 = vsel %vm2844_vm14, %v12935_v33, %v6249_v59 }
 0x711   : > { %6242 = vrot.lane.b32.xlu1 %v6231_v45, %s10545_s17  ;;  %v13033_v42 = vrot.slane %v13020_v36, 1  ;;  %v6214_v49 = vshll.u32 %v13023_v32, 16  ;;  %v13040_v56 = vrot.slane %v13023_v32, 1  ;;  %v6212_v29 = vshrl.u32 %v13023_v32, 16 }
 0x712   : > { %v6204_v39 = vrot.slane %v6202_v5, 1  ;;  %v6208_v3 = vshll.u32 %v13020_v36, 16  ;;  %v6206_v19 = vshrl.u32 %v13020_v36, 16  ;;  %v13115_v47 = vsub.s32 %v6298_v44, %v12235_v62 }
 0x713   : > { %6244 = vrot.lane.b32.xlu0 %v13033_v42, %s10545_s17  ;;  %v6216_v46 = vrot.slane %v6214_v49, 1  ;;  %10082 = vmatpush3.bf16.msra.mxu1 %v10485_v28  ;;  %v6367_v12 = vcombine.low %v6281_v55, %v6251_v61 }
 0x714   : > { %v6205_v40 = vor.u32 %v6204_v39, %v6200_v24  ;;  %v6210_v4 = vrot.slane %v6208_v3, 1  ;;  %v6365_v58 = vrot.slane %v12940_v17, %v13115_v47  ;;  %v6317_v51 = vrot.slane %v13033_v42, %v13115_v47 }
 0x715   : > { %6246 = vrot.lane.b32.xlu1 %v13040_v56, %s10545_s17  ;;  %v6217_v53 = vor.u32 %v6216_v46, %v6212_v29  ;;  %v6381_v35 = vrot.slane %v6367_v12, %v13115_v47  ;;  %v6341_v27 = vrot.slane %v13040_v56, %v13115_v47 }
 0x716   : > { %v6211_v23 = vor.u32 %v6210_v4, %v6206_v19 }
 0x717   : > { %6224 = vrot.lane.b32.xlu0 %v6217_v53, %s10545_s17  ;;  %v6425_v8 = vcombine.low %v6317_v51, %v6341_v27 }
 0x719   : > { %6220 = vrot.lane.b32.xlu1 %v6205_v40, %s10545_s17 }
 0x71b   : > { %6234 = vrot.lane.b32.xlu0 %v13003_v15, %s10545_s17 }
 0x71d   : > { %6222 = vrot.lane.b32.xlu1 %v6211_v23, %s10545_s17 }
 0x71f   : > { %6238 = vrot.lane.b32.xlu0 %v13023_v32, %s10545_s17 }
 0x721   : > { %6236 = vrot.lane.b32.xlu1 %v13020_v36, %s10545_s17 }
 0x725   : > { %6240 = vrot.lane.b32.xlu1 %v12931_v13, %s10545_s17 }
 0x783   : > { %v6243_v26 = vpop.permute.xlu1 %6242 }
 0x784   : > { %v6272_v13 = vsel %vm2844_vm14, %v6205_v40, %v6243_v26 }
 0x785   : > { %v6245_v38 = vpop.permute.xlu0 %6244 }
 0x786   : > { %v6275_v9 = vsel %vm2844_vm14, %v6211_v23, %v6245_v38  ;;  %v6433_v38 = vrot.slane %v6425_v8, %v13115_v47 }
 0x787   : > { %v6247_v0 = vpop.permute.xlu1 %6246 }
 0x788   : > { %v6278_v60 = vsel %vm2844_vm14, %v6217_v53, %v6247_v0 }
 0x789   : > { %v6225_v6 = vpop.permute.xlu0 %6224  ;;  %v6343_v30 = vcombine.low %v6278_v60, %v6251_v61 }
 0x78a   : > { %v6257_v14 = vsel %vm2844_vm14, %v13023_v32, %v6225_v6 }
 0x78b   : > { %v6221_v25 = vpop.permute.xlu1 %6220  ;;  %v6357_v10 = vrot.slane %v6343_v30, %v13115_v47  ;;  %v6319_v37 = vcombine.low %v6275_v9, %v6257_v14 }
 0x78c   : > { %v6253_v39 = vsel %vm2844_vm14, %v13003_v15, %v6221_v25 }
 0x78d   : > { %v6235_v31 = vpop.permute.xlu0 %6234  ;;  %v9754_v49 = vcombine.low %v6357_v10, %v6381_v35  ;;  %v6333_v48 = vrot.slane %v6319_v37, %v13115_v47 }
 0x78e   : > { %v6260_v2 = vsel %vm2844_vm14, %v12940_v17, %v6235_v31  ;;  %v6426_v17 = vcombine.low %v6365_v58, %v6365_v58 }
 0x78f   : > { %v6223_v54 = vpop.permute.xlu1 %6222  ;;  %v6294_v53 = vcombine.low %v6251_v61, %v6260_v2  ;;  %v6420_v4 = vrot.slane %v9754_v49, %v13115_v47 }
 0x790   : > { %v6255_v33 = vsel %vm2844_vm14, %v13020_v36, %v6223_v54 }
 0x791   : > { %v6295_v5 = vcombine.low %v6272_v13, %v6255_v33  ;;  %v6239_v32 = vpop.permute.xlu0 %6238  ;;  %v6302_v16 = vrot.slane %v6294_v53, %v13115_v47 }
 0x792   : > { %v6266_v3 = vsel %vm2844_vm14, %v13033_v42, %v6239_v32  ;;  %v10487_v42 = vld [vmem:[%s14414_s5 + $0x118] sm:$0xff]  }
 0x793   : > { %v6309_v29 = vrot.slane %v6295_v5, %v13115_v47  ;;  %v6237_v46 = vpop.permute.xlu1 %6236  ;;  %v6342_v22 = vcombine.low %v6255_v33, %v6266_v3  ;;  %v13175_v3 = vsub.s32 0, %v12235_v62 }
 0x794   : > { %v6263_v36 = vsel %vm2844_vm14, %v6231_v45, %v6237_v46  ;;  %v10481_v45 = vld [vmem:[%s14414_s5 + $0x100] sm:$0xff]  }
 0x795   : > { %v9752_v24 = vcombine.low %v6309_v29, %v6333_v48  ;;  %v6318_v52 = vcombine.low %v6253_v39, %v6263_v36  ;;  %v6350_v1 = vrot.slane %v6342_v22, %v13115_v47 }
 0x797   : > { %v6326_v20 = vrot.slane %v6318_v52, %v13115_v47  ;;  %v6241_v50 = vpop.permute.xlu1 %6240  ;;  %v6406_v40 = vrot.slane %v9752_v24, %v13115_v47 }
 0x798   : > { %v6269_v19 = vsel %vm2844_vm14, %v13040_v56, %v6241_v50  ;;  %v6440_v56 = vrot.slane %v6426_v17, %v13115_v47 }
 0x799   : > { %v6366_v34 = vcombine.low %v6257_v14, %v6269_v19  ;;  %v6424_v15 = vcombine.high %v6406_v40, %v6420_v4  ;;  %v6423_v63 = vcombine.low %v6406_v40, %v6420_v4  ;;  %v9751_v23 = vcombine.low %v6302_v16, %v6326_v20  ;;  %v9750_v14 = vld [vmem:[%s14420_s11] ss:$0 sm:$0xff] }
 0x79a   : > { %v6441_v0 = vcombine.low %v6433_v38, %v6440_v56 }
 0x79b   : > { %v6374_v57 = vrot.slane %v6366_v34, %v13115_v47  ;;  %6738 = vmatprep.mubr.bf16.mxu0 %v6424_v15  ;;  %v6399_v28 = vrot.slane %v9751_v23, %v13115_v47 }
 0x79c   : > { %6739 = vmatmul.mubr.bf16.vlgmr.msra.gmra.mrb[36].mxu0 %v6423_v63 }
 0x79d   : > { %v9753_v11 = vcombine.low %v6350_v1, %v6374_v57  ;;  %10195 = vmatpush3.bf16.msra.mxu0 %v10481_v45  ;;  %10202 = vmatprep.mubr.msk.bf16.mxu0 %vm10548_vm15, %v10547_v21 }
 0x79e   : > { %10196 = vmatprep.subr.bf16.mxu0 %v10547_v21 }
 0x79f   : > { %v6413_v7 = vrot.slane %v9753_v11, %v13115_v47 }
 0x7a1   : > { %10197 = vmatpush3.bf16.msra.mxu0 %v10484_v41  ;;  %v6422_v59 = vcombine.high %v6399_v28, %v6413_v7  ;;  %v6421_v26 = vcombine.low %v6399_v28, %v6413_v7 }
 0x7a2   : > { %10198 = vmatprep.subr.bf16.mxu0 %v10547_v21 }
 0x7a3   : > { %6697 = vmatprep.mubr.bf16.mxu1 %v6422_v59 }
 0x7a4   : > { %6698 = vmatmul.mubr.bf16.vlgmr.msra.gmra.mrb[24].mxu1 %v6421_v26 }
 0x7a5   : > { %10199 = vmatpush3.bf16.msra.mxu0 %v10486_v43 }
 0x7a6   : > { %10200 = vmatprep.subr.bf16.mxu0 %v10547_v21 }
 0x7a9   : > { %10201 = vmatpush3.bf16.msra.mxu0 %v10487_v42 }
 0x7ac   : > { %10203 = vmatmul.mubr.msk.bf16.vlgmr.msra.gmra.mrb[40].mxu0 %vm2844_vm14, %v6441_v0 }
 0x86f   : > { %v10105_v60 = vpop.f32.mrb[36].mxu0 }
 0x870   : > { %v10106_v44 = vpop.f32.mrb[37].mxu0 }
 0x871   : > { %v10107_v6 = vadd.f32 %v10106_v44, %v10105_v60  ;;  %v10108_v61 = vpop.f32.mrb[38].mxu0 }
 0x872   : > { %v10109_v55 = vpop.f32.mrb[39].mxu0 }
 0x873   : > { %v10110_v30 = vadd.f32 %v10109_v55, %v10108_v61 }
 0x877   : > { %v10083_v25 = vpop.f32.mrb[24].mxu1 }
 0x878   : > { %v10084_v12 = vpop.f32.mrb[25].mxu1 }
 0x879   : > { %v10085_v31 = vadd.f32 %v10084_v12, %v10083_v25  ;;  %v10086_v9 = vpop.f32.mrb[26].mxu1 }
 0x87a   : > { %v10087_v10 = vpop.f32.mrb[27].mxu1 }
 0x87b   : > { %v6700_v21 = vadd.f32 %v10085_v31, %v9750_v14  ;;  %v10088_v37 = vadd.f32 %v10087_v10, %v10086_v9 }
 0x87d   : > { %v6703_v54 = vadd.f32 %v10088_v37, %v9750_v14  ;;  %v6741_v13 = vadd.f32 %v10107_v6, %v6700_v21 }
 0x87f   : > { %v6781_v33 = vpop.f32.mrb[40].mxu0  ;;  %v6744_v35 = vadd.f32 %v10110_v30, %v6703_v54 }
 0x880   : > { %v6782_v5 = vadd.f32 %v6781_v33, %v6741_v13  ;;  %v10204_v32 = vpop.f32.mrb[41].mxu0 }
 0x881   : > { %v6784_v2 = vpop.f32.mrb[42].mxu0 }
 0x882   : > { %v6788_v49 = vmax.f32 %v6782_v5, 0.0  ;;  %v6785_v48 = vadd.f32 %v6784_v2, %v6744_v35  ;;  %v10205_v29 = vpop.f32.mrb[43].mxu0 }
 0x884   : > { %v6792_v46 = vcombine.high %v6788_v49, %v6788_v49  ;;  %v6800_v39 = vrot.slane %v6788_v49, %v12238_v18  ;;  %v6789_v52 = vmax.f32 %v6785_v48, 0.0 }
 0x886   : > { %v6801_v36 = vcombine.high %v6800_v39, %v6800_v39  ;;  %v6808_v53 = vrot.slane %v6800_v39, %v12238_v18  ;;  %v6860_v24 = vrot.slane %v6792_v46, %v12238_v18  ;;  %v6920_v4 = vrot.slane %v6789_v52, %v12238_v18 }
 0x887   : > { %v6793_v57 = vcombine.high %v6789_v52, %v6789_v52 }
 0x888   : > { %v6815_v22 = vrot.slane %v6801_v36, %v12238_v18  ;;  %v6825_v20 = vrot.slane %v6808_v53, %v13175_v3  ;;  %v6816_v50 = vcombine.high %v6808_v53, %v6808_v53  ;;  %v6861_v40 = vcombine.high %v6860_v24, %v6860_v24 }
 0x889   : > { %v6868_v62 = vrot.slane %v6860_v24, %v12238_v18  ;;  %v6921_v15 = vcombine.high %v6920_v4, %v6920_v4  ;;  %v6928_v1 = vrot.slane %v6920_v4, %v12238_v18  ;;  %v6980_v27 = vrot.slane %v6793_v57, %v12238_v18 }
 0x88a   : > { %v6829_v19 = vrot.slane %v6815_v22, %v13175_v3  ;;  %v6817_v16 = vcombine.high %v6815_v22, %v6815_v22  ;;  %6838 = vrot.lane.b32.xlu0 %v6825_v20, %s10543_s28  ;;  %v6833_v34 = vrot.slane %v6816_v50, %v13175_v3  ;;  %v6875_v45 = vrot.slane %v6861_v40, %v12238_v18 }
 0x88b   : > { %v6885_v23 = vrot.slane %v6868_v62, %v13175_v3  ;;  %v6935_v11 = vrot.slane %v6921_v15, %v12238_v18  ;;  %v6945_v58 = vrot.slane %v6928_v1, %v13175_v3  ;;  %v6876_v51 = vcombine.high %v6868_v62, %v6868_v62 }
 0x88c   : > { %6840 = vrot.lane.b32.xlu1 %v6829_v19, %s10543_s28  ;;  %v6837_v63 = vrot.slane %v6817_v16, %v13175_v3  ;;  %v6889_v41 = vrot.slane %v6875_v45, %v13175_v3  ;;  %v6877_v7 = vcombine.high %v6875_v45, %v6875_v45  ;;  %v6936_v26 = vcombine.high %v6928_v1, %v6928_v1 }
 0x88d   : > { %v6949_v28 = vrot.slane %v6935_v11, %v13175_v3  ;;  %v6893_v59 = vrot.slane %v6876_v51, %v13175_v3  ;;  %v6981_v43 = vcombine.high %v6980_v27, %v6980_v27  ;;  %v6937_v8 = vcombine.high %v6935_v11, %v6935_v11 }
 0x88e   : > { %6842 = vrot.lane.b32.xlu0 %v6833_v34, %s10543_s28  ;;  %v6897_v17 = vrot.slane %v6877_v7, %v13175_v3  ;;  %v13207_v42 = vrot.slane %v6980_v27, %v12238_v18  ;;  %v6953_v56 = vrot.slane %v6936_v26, %v13175_v3 }
 0x88f   : > { %v6957_v38 = vrot.slane %v6937_v8, %v13175_v3  ;;  %v13212_v0 = vrot.slane %v6981_v43, %v12238_v18 }
 0x890   : > { %6844 = vrot.lane.b32.xlu1 %v6837_v63, %s10543_s28  ;;  %v7005_v60 = vrot.slane %v13207_v42, %v13175_v3  ;;  %v13220_v44 = vcombine.high %v13207_v42, %v13207_v42 }
 0x891   : > { %v7009_v6 = vrot.slane %v13212_v0, %v13175_v3  ;;  %v13226_v61 = vcombine.high %v13212_v0, %v13212_v0 }
 0x892   : > { %6898 = vrot.lane.b32.xlu0 %v6885_v23, %s10543_s28  ;;  %v7013_v55 = vrot.slane %v13220_v44, %v13175_v3 }
 0x893   : > { %v7017_v30 = vrot.slane %v13226_v61, %v13175_v3 }
 0x894   : > { %6900 = vrot.lane.b32.xlu1 %v6889_v41, %s10543_s28 }
 0x896   : > { %6958 = vrot.lane.b32.xlu0 %v6945_v58, %s10543_s28 }
 0x898   : > { %6960 = vrot.lane.b32.xlu1 %v6949_v28, %s10543_s28 }
 0x89a   : > { %6902 = vrot.lane.b32.xlu0 %v6893_v59, %s10543_s28 }
 0x89c   : > { %6904 = vrot.lane.b32.xlu1 %v6897_v17, %s10543_s28 }
 0x89e   : > { %6962 = vrot.lane.b32.xlu0 %v6953_v56, %s10543_s28 }
 0x8a0   : > { %6964 = vrot.lane.b32.xlu1 %v6957_v38, %s10543_s28 }
 0x8a2   : > { %7018 = vrot.lane.b32.xlu0 %v7005_v60, %s10543_s28 }
 0x8a4   : > { %7020 = vrot.lane.b32.xlu1 %v7009_v6, %s10543_s28 }
 0x8a6   : > { %7022 = vrot.lane.b32.xlu0 %v7013_v55, %s10543_s28 }
 0x8a8   : > { %7024 = vrot.lane.b32.xlu1 %v7017_v30, %s10543_s28 }
 0x8fc   : > { %v6839_v25 = vpop.permute.xlu0 %6838 }
 0x8fd   : > { %v6850_v14 = vsel %vm707_vm0, %v6808_v53, %v6839_v25 }
 0x8fe   : > { %v6841_v12 = vpop.permute.xlu1 %6840  ;;  %7050 = vrot.lane.b32.xlu0 %v6850_v14, %s10545_s17 }
 0x8ff   : > { %v6851_v31 = vsel %vm707_vm0, %v6815_v22, %v6841_v12 }
 0x900   : > { %7052 = vrot.lane.b32.xlu1 %v6851_v31, %s10545_s17  ;;  %v6843_v9 = vpop.permute.xlu0 %6842  ;;  %v7082_v53 = vcombine.low %v6850_v14, %v6851_v31 }
 0x901   : > { %v6852_v10 = vsel %vm707_vm0, %v6816_v50, %v6843_v9 }
 0x902   : > { %v6845_v21 = vpop.permute.xlu1 %6844  ;;  %7054 = vrot.lane.b32.xlu0 %v6852_v10, %s10545_s17 }
 0x903   : > { %v6853_v37 = vsel %vm707_vm0, %v6817_v16, %v6845_v21  ;;  %v7090_v16 = vrot.slane %v7082_v53, %v13115_v47 }
 0x904   : > { %7056 = vrot.lane.b32.xlu1 %v6853_v37, %s10545_s17  ;;  %v6899_v54 = vpop.permute.xlu0 %6898  ;;  %v7083_v29 = vcombine.low %v6852_v10, %v6853_v37 }
 0x905   : > { %v6910_v13 = vsel %vm707_vm0, %v6868_v62, %v6899_v54 }
 0x906   : > { %v6901_v33 = vpop.permute.xlu1 %6900  ;;  %7058 = vrot.lane.b32.xlu0 %v6910_v13, %s10545_s17  ;;  %v7097_v20 = vrot.slane %v7083_v29, %v13115_v47  ;;  %v10488_v29 = vld [vmem:[%s14415_s6] sm:$0xff]  }
 0x907   : > { %v6911_v35 = vsel %vm707_vm0, %v6875_v45, %v6901_v33  ;;  %10206 = vmatprep.subr.bf16.mxu1 %v10488_v29 }
 0x908   : > { %7060 = vrot.lane.b32.xlu1 %v6911_v35, %s10545_s17  ;;  %v6959_v5 = vpop.permute.xlu0 %6958  ;;  %v7116_v52 = vcombine.low %v6910_v13, %v6911_v35  ;;  %v7098_v23 = vcombine.low %v7090_v16, %v7097_v20  ;;  %10207 = vmatpush3.bf16.msra.mxu1 %v10488_v29 }
 0x909   : > { %v6970_v32 = vsel %vm707_vm0, %v6928_v1, %v6959_v5 }
 0x90a   : > { %v6961_v2 = vpop.permute.xlu1 %6960  ;;  %7066 = vrot.lane.b32.xlu0 %v6970_v32, %s10545_s17  ;;  %v7124_v34 = vrot.slane %v7116_v52, %v13115_v47  ;;  %v7226_v59 = vpack.c.bf16 %v7098_v23, %v7098_v23  ;;  %v10491_v23 = vld [vmem:[%s14415_s6 + $0x18] sm:$0xff]  }
 0x90b   : > { %v6971_v49 = vsel %vm707_vm0, %v6935_v11, %v6961_v2 }
 0x90c   : > { %7068 = vrot.lane.b32.xlu1 %v6971_v49, %s10545_s17  ;;  %v6903_v48 = vpop.permute.xlu0 %6902  ;;  %v7150_v15 = vcombine.low %v6970_v32, %v6971_v49  ;;  %v7235_v38 = vsel %vm1297_vm7, %v7226_v59, 0 }
 0x90d   : > { %v6912_v46 = vsel %vm707_vm0, %v6876_v51, %v6903_v48  ;;  %v7293_v55 = vshll.u32 %v7235_v38, 16  ;;  %v7291_v12 = vshrl.u32 %v7235_v38, 16 }
 0x90e   : > { %v6905_v39 = vpop.permute.xlu1 %6904  ;;  %7062 = vrot.lane.b32.xlu0 %v6912_v46, %s10545_s17  ;;  %v7158_v58 = vrot.slane %v7150_v15, %v13115_v47 }
 0x90f   : > { %v6913_v36 = vsel %vm707_vm0, %v6877_v7, %v6905_v39  ;;  %v7295_v25 = vrot.slane %v7293_v55, 1 }
 0x910   : > { %v7117_v24 = vcombine.low %v6912_v46, %v6913_v36  ;;  %7064 = vrot.lane.b32.xlu1 %v6913_v36, %s10545_s17  ;;  %v6963_v22 = vpop.permute.xlu0 %6962  ;;  %v10489_v46 = vld [vmem:[%s14415_s6 + $0x8] sm:$0xff]  }
 0x911   : > { %v6972_v50 = vsel %vm707_vm0, %v6936_v26, %v6963_v22  ;;  %v7296_v10 = vor.u32 %v7295_v25, %v7291_v12  ;;  %10208 = vmatprep.subr.bf16.mxu1 %v10489_v46 }
 0x912   : > { %v6965_v40 = vpop.permute.xlu1 %6964  ;;  %v7131_v4 = vrot.slane %v7117_v24, %v13115_v47  ;;  %7070 = vrot.lane.b32.xlu0 %v6972_v50, %s10545_s17  ;;  %10209 = vmatpush3.bf16.msra.mxu1 %v10489_v46 }
 0x913   : > { %v6973_v19 = vsel %vm707_vm0, %v6937_v8, %v6965_v40 }
 0x914   : > { %v7151_v62 = vcombine.low %v6972_v50, %v6973_v19  ;;  %7072 = vrot.lane.b32.xlu1 %v6973_v19, %s10545_s17  ;;  %v7019_v63 = vpop.permute.xlu0 %7018  ;;  %v7132_v41 = vcombine.low %v7124_v34, %v7131_v4  ;;  %v10490_v34 = vld [vmem:[%s14415_s6 + $0x10] sm:$0xff]  }
 0x915   : > { %v7030_v45 = vsel %vm707_vm0, %v13207_v42, %v7019_v63  ;;  %10210 = vmatprep.subr.bf16.mxu1 %v10490_v34 }
 0x916   : > { %v7021_v1 = vpop.permute.xlu1 %7020  ;;  %v7165_v57 = vrot.slane %v7151_v62, %v13115_v47  ;;  %7074 = vrot.lane.b32.xlu0 %v7030_v45, %s10545_s17  ;;  %v7228_v43 = vpack.c.bf16 %v7132_v41, %v7132_v41  ;;  %10211 = vmatpush3.bf16.msra.mxu1 %v10490_v34 }
 0x917   : > { %v7031_v11 = vsel %vm707_vm0, %v13212_v0, %v7021_v1  ;;  %10212 = vmatprep.subr.bf16.mxu1 %v10491_v23 }
 0x918   : > { %7076 = vrot.lane.b32.xlu1 %v7031_v11, %s10545_s17  ;;  %v7023_v51 = vpop.permute.xlu0 %7022  ;;  %v7184_v27 = vcombine.low %v7030_v45, %v7031_v11  ;;  %v7166_v17 = vcombine.low %v7158_v58, %v7165_v57  ;;  %v7239_v0 = vsel %vm1297_vm7, %v7228_v43, 0  ;;  %v10492_v57 = vld [vmem:[%s14415_s6 + $0x20] sm:$0xff]  }
 0x919   : > { %v7032_v28 = vsel %vm707_vm0, %v13220_v44, %v7023_v51  ;;  %v7305_v14 = vshll.u32 %v7239_v0, 16  ;;  %v7303_v21 = vshrl.u32 %v7239_v0, 16 }
 0x91a   : > { %v7025_v7 = vpop.permute.xlu1 %7024  ;;  %7078 = vrot.lane.b32.xlu0 %v7032_v28, %s10545_s17  ;;  %v7192_v42 = vrot.slane %v7184_v27, %v13115_v47  ;;  %v7230_v60 = vpack.c.bf16 %v7166_v17, %v7166_v17  ;;  %10213 = vmatpush3.bf16.msra.mxu1 %v10491_v23 }
 0x91b   : > { %v7033_v26 = vsel %vm707_vm0, %v13226_v61, %v7025_v7  ;;  %v7307_v31 = vrot.slane %v7305_v14, 1  ;;  %10214 = vmatprep.subr.bf16.mxu1 %v10492_v57 }
 0x91c   : > { %v7185_v8 = vcombine.low %v7032_v28, %v7033_v26  ;;  %7080 = vrot.lane.b32.xlu1 %v7033_v26, %s10545_s17  ;;  %v7243_v6 = vsel %vm1297_vm7, %v7230_v60, 0 }
 0x91d   : > { %v7317_v9 = vshll.u32 %v7243_v6, 16  ;;  %v13292_v13 = vor.u32 %v7307_v31, %v7303_v21  ;;  %v7315_v33 = vshrl.u32 %v7243_v6, 16 }
 0x91e   : > { %v7199_v56 = vrot.slane %v7185_v8, %v13115_v47  ;;  %7275 = vrot.lane.b32.xlu0 %v7235_v38, %s10543_s28  ;;  %10215 = vmatpush3.bf16.msra.mxu1 %v10492_v57  ;;  %v10493_v38 = vld [vmem:[%s14415_s6 + $0x28] sm:$0xff]  }
 0x91f   : > { %v7319_v37 = vrot.slane %v7317_v9, 1  ;;  %10216 = vmatprep.subr.bf16.mxu1 %v10493_v38 }
 0x920   : > { %7358 = vrot.lane.b32.xlu1 %v7239_v0, %s10544_s15  ;;  %v7200_v44 = vcombine.low %v7192_v42, %v7199_v56 }
 0x921   : > { %v13296_v5 = vor.u32 %v7319_v37, %v7315_v33  ;;  %v10495_v37 = vld [vmem:[%s14415_s6 + $0x38] sm:$0xff]  }
 0x922   : > { %7279 = vrot.lane.b32.xlu0 %v7239_v0, %s10543_s28  ;;  %v7232_v61 = vpack.c.bf16 %v7200_v44, %v7200_v44  ;;  %10217 = vmatpush3.bf16.msra.mxu1 %v10493_v38 }
 0x924   : > { %7362 = vrot.lane.b32.xlu1 %v7243_v6, %s10544_s15  ;;  %v7247_v30 = vsel %vm1297_vm7, %v7232_v61, 0 }
 0x925   : > { %v7329_v54 = vshll.u32 %v7247_v30, 16  ;;  %v7327_v32 = vshrl.u32 %v7247_v30, 16 }
 0x926   : > { %7283 = vrot.lane.b32.xlu0 %v7243_v6, %s10543_s28 }
 0x927   : > { %v7331_v35 = vrot.slane %v7329_v54, 1 }
 0x928   : > { %7366 = vrot.lane.b32.xlu1 %v7247_v30, %s10544_s15 }
 0x929   : > { %v13300_v2 = vor.u32 %v7331_v35, %v7327_v32 }
 0x92a   : > { %7287 = vrot.lane.b32.xlu0 %v7247_v30, %s10543_s28  ;;  %v10494_v30 = vld [vmem:[%s14415_s6 + $0x30] sm:$0xff]  }
 0x92b   : > { %10218 = vmatprep.subr.bf16.mxu1 %v10494_v30 }
 0x92c   : > { %10219 = vmatpush3.bf16.msra.mxu1 %v10494_v30 }
 0x92d   : > { %10220 = vmatprep.subr.bf16.mxu1 %v10495_v37 }
 0x92e   : > { %7339 = vrot.lane.b32.xlu0 %v7296_v10, %s10545_s17 }
 0x930   : > { %10221 = vmatpush3.bf16.msra.mxu1 %v10495_v37 }
 0x932   : > { %7343 = vrot.lane.b32.xlu0 %v13292_v13, %s10545_s17 }
 0x936   : > { %7347 = vrot.lane.b32.xlu0 %v13296_v5, %s10545_s17 }
 0x93a   : > { %7351 = vrot.lane.b32.xlu0 %v13300_v2, %s10545_s17 }
 0x970   : > { %v7051_v49 = vpop.permute.xlu0 %7050 }
 0x972   : > { %v7053_v48 = vpop.permute.xlu1 %7052 }
 0x973   : > { %v7099_v39 = vcombine.low %v7051_v49, %v7053_v48 }
 0x974   : > { %v7055_v36 = vpop.permute.xlu0 %7054 }
 0x975   : > { %v7107_v52 = vrot.slane %v7099_v39, %v13115_v47 }
 0x976   : > { %v7057_v53 = vpop.permute.xlu1 %7056 }
 0x977   : > { %v7100_v24 = vcombine.low %v7055_v36, %v7057_v53 }
 0x978   : > { %v7059_v20 = vpop.permute.xlu0 %7058 }
 0x979   : > { %v7114_v22 = vrot.slane %v7100_v24, %v13115_v47 }
 0x97a   : > { %v7061_v50 = vpop.permute.xlu1 %7060 }
 0x97b   : > { %v7115_v40 = vcombine.low %v7107_v52, %v7114_v22  ;;  %v7133_v15 = vcombine.low %v7059_v20, %v7061_v50  ;;  %v14498_v20 = vmov 0  }
 0x97c   : > { %v7067_v4 = vpop.permute.xlu0 %7066 }
 0x97d   : > { %v7227_v19 = vpack.c.bf16 %v7115_v40, %v7115_v40  ;;  %v7141_v11 = vrot.slane %v7133_v15, %v13115_v47 }
 0x97e   : > { %v7069_v16 = vpop.permute.xlu1 %7068 }
 0x97f   : > { %v7237_v62 = vsel %vm1297_vm7, %v7227_v19, 0  ;;  %v7167_v41 = vcombine.low %v7067_v4, %v7069_v16 }
 0x980   : > { %7356 = vrot.lane.b32.xlu0 %v7237_v62, %s10544_s15  ;;  %7277 = vrot.lane.b32.xlu1 %v7237_v62, %s10543_s28  ;;  %v7063_v63 = vpop.permute.xlu0 %7062  ;;  %v7299_v12 = vshll.u32 %v7237_v62, 16  ;;  %v7297_v33 = vshrl.u32 %v7237_v62, 16 }
 0x981   : > { %v7175_v59 = vrot.slane %v7167_v41, %v13115_v47 }
 0x982   : > { %v7065_v45 = vpop.permute.xlu1 %7064  ;;  %v7301_v10 = vrot.slane %v7299_v12, 1 }
 0x983   : > { %v7134_v1 = vcombine.low %v7063_v63, %v7065_v45 }
 0x984   : > { %v7071_v51 = vpop.permute.xlu0 %7070  ;;  %v7302_v49 = vor.u32 %v7301_v10, %v7297_v33 }
 0x985   : > { %v7148_v58 = vrot.slane %v7134_v1, %v13115_v47 }
 0x986   : > { %v7073_v27 = vpop.permute.xlu1 %7072 }
 0x987   : > { %v7149_v28 = vcombine.low %v7141_v11, %v7148_v58  ;;  %v7168_v7 = vcombine.low %v7071_v51, %v7073_v27 }
 0x988   : > { %v7075_v43 = vpop.permute.xlu0 %7074 }
 0x989   : > { %v7182_v26 = vrot.slane %v7168_v7, %v13115_v47  ;;  %v7229_v17 = vpack.c.bf16 %v7149_v28, %v7149_v28 }
 0x98a   : > { %v7077_v8 = vpop.permute.xlu1 %7076 }
 0x98b   : > { %v7183_v42 = vcombine.low %v7175_v59, %v7182_v26  ;;  %v7241_v56 = vsel %vm1297_vm7, %v7229_v17, 0  ;;  %v7201_v0 = vcombine.low %v7075_v43, %v7077_v8 }
 0x98c   : > { %7360 = vrot.lane.b32.xlu0 %v7241_v56, %s10544_s15  ;;  %7281 = vrot.lane.b32.xlu1 %v7241_v56, %s10543_s28  ;;  %v7079_v44 = vpop.permute.xlu0 %7078  ;;  %v7311_v21 = vshll.u32 %v7241_v56, 16  ;;  %v7309_v48 = vshrl.u32 %v7241_v56, 16 }
 0x98d   : > { %v7231_v60 = vpack.c.bf16 %v7183_v42, %v7183_v42  ;;  %v7209_v25 = vrot.slane %v7201_v0, %v13115_v47 }
 0x98e   : > { %v7081_v6 = vpop.permute.xlu1 %7080  ;;  %v7313_v35 = vrot.slane %v7311_v21, 1 }
 0x98f   : > { %v7202_v61 = vcombine.low %v7079_v44, %v7081_v6  ;;  %v7245_v55 = vsel %vm1297_vm7, %v7231_v60, 0 }
 0x990   : > { %7364 = vrot.lane.b32.xlu0 %v7245_v55, %s10544_s15  ;;  %7285 = vrot.lane.b32.xlu1 %v7245_v55, %s10543_s28  ;;  %v7323_v32 = vshll.u32 %v7245_v55, 16  ;;  %v7314_v39 = vor.u32 %v7313_v35, %v7309_v48  ;;  %v7321_v36 = vshrl.u32 %v7245_v55, 16  ;;  %v7276_v50 = vpop.permute.xlu0 %7275 }
 0x991   : > { %v7216_v14 = vrot.slane %v7202_v61, %v13115_v47 }
 0x992   : > { %v7325_v29 = vrot.slane %v7323_v32, 1  ;;  %v7359_v19 = vpop.permute.xlu1 %7358 }
 0x993   : > { %v7217_v31 = vcombine.low %v7209_v25, %v7216_v14 }
 0x994   : > { %v7326_v24 = vor.u32 %v7325_v29, %v7321_v36  ;;  %v7280_v40 = vpop.permute.xlu0 %7279 }
 0x995   : > { %v7233_v9 = vpack.c.bf16 %v7217_v31, %v7217_v31 }
 0x996   : > { %v7363_v62 = vpop.permute.xlu1 %7362 }
 0x997   : > { %v7249_v54 = vsel %vm1297_vm7, %v7233_v9, 0 }
 0x998   : > { %7368 = vrot.lane.b32.xlu0 %v7249_v54, %s10544_s15  ;;  %7289 = vrot.lane.b32.xlu1 %v7249_v54, %s10543_s28  ;;  %v7335_v46 = vshll.u32 %v7249_v54, 16  ;;  %v7333_v52 = vshrl.u32 %v7249_v54, 16  ;;  %v7284_v4 = vpop.permute.xlu0 %7283 }
 0x99a   : > { %v7337_v53 = vrot.slane %v7335_v46, 1  ;;  %v7367_v15 = vpop.permute.xlu1 %7366  ;;  %v9792_v46 = vld [vmem:[%s14421_s12] ss:$0 sm:$0xff] }
 0x99c   : > { %7341 = vrot.lane.b32.xlu1 %v7302_v49, %s10545_s17  ;;  %v7338_v22 = vor.u32 %v7337_v53, %v7333_v52  ;;  %v7288_v16 = vpop.permute.xlu0 %7287 }
 0x9a0   : > { %7345 = vrot.lane.b32.xlu1 %v7314_v39, %s10545_s17  ;;  %v7340_v34 = vpop.permute.xlu0 %7339 }
 0x9a1   : > { %v7376_v51 = vsel %vm2833_vm11, %v7276_v50, %v7340_v34 }
 0x9a4   : > { %7349 = vrot.lane.b32.xlu1 %v7326_v24, %s10545_s17  ;;  %v7344_v63 = vpop.permute.xlu0 %7343 }
 0x9a5   : > { %v7382_v43 = vsel %vm2833_vm11, %v7280_v40, %v7344_v63 }
 0x9a8   : > { %7353 = vrot.lane.b32.xlu1 %v7338_v22, %s10545_s17  ;;  %v7348_v1 = vpop.permute.xlu0 %7347  ;;  %s14499_s17 = smov 3  }
 0x9a9   : > { %v7388_v6 = vsel %vm2833_vm11, %v7284_v4, %v7348_v1 }
 0x9ac   : > { %7370 = vrot.lane.b32.xlu1 %v14498_v20, %s10544_s15  ;;  %v7352_v57 = vpop.permute.xlu0 %7351 }
 0x9ad   : > { %v7394_v54 = vsel %vm2833_vm11, %v7288_v16, %v7352_v57 }
 0x9f2   : > { %v7278_v45 = vpop.permute.xlu1 %7277  ;;  %v7357_v41 = vpop.permute.xlu0 %7356 }
 0x9f3   : > { %v7399_v28 = vsel %vm2844_vm14, %v7376_v51, %v7357_v41 }
 0x9f4   : > { %v7415_v17 = vsel %vm2855_vm12, %v7399_v28, %v7302_v49 }
 0x9fe   : > { %v7282_v23 = vpop.permute.xlu1 %7281  ;;  %v7361_v27 = vpop.permute.xlu0 %7360 }
 0x9ff   : > { %v7403_v42 = vsel %vm2844_vm14, %v7382_v43, %v7361_v27 }
 0xa00   : > { %v7419_v61 = vsel %vm2855_vm12, %v7403_v42, %v7314_v39 }
 0xa02   : > { %v7286_v11 = vpop.permute.xlu1 %7285  ;;  %v7365_v0 = vpop.permute.xlu0 %7364 }
 0xa03   : > { %v7407_v30 = vsel %vm2844_vm14, %v7388_v6, %v7365_v0 }
 0xa04   : > { %v7423_v31 = vsel %vm2855_vm12, %v7407_v30, %v7326_v24 }
 0xa0a   : > { %v7290_v58 = vpop.permute.xlu1 %7289  ;;  %v7369_v10 = vpop.permute.xlu0 %7368 }
 0xa0b   : > { %v7411_v33 = vsel %vm2844_vm14, %v7394_v54, %v7369_v10 }
 0xa0c   : > { %v7427_v48 = vsel %vm2855_vm12, %v7411_v33, %v7338_v22 }
 0xa0e   : > { %v7342_v7 = vpop.permute.xlu1 %7341 }
 0xa0f   : > { %v7379_v59 = vsel %vm2833_vm11, %v7278_v45, %v7342_v7 }
 0xa10   : > { %v7401_v26 = vsel %vm2844_vm14, %v7379_v59, %v7359_v19 }
 0xa11   : > { %v7417_v8 = vsel %vm2855_vm12, %v7401_v26, %v13292_v13 }
 0xa12   : > { %v7346_v56 = vpop.permute.xlu1 %7345  ;;  %v9793_v38 = vcombine.low %v7415_v17, %v7417_v8 }
 0xa13   : > { %v7385_v60 = vsel %vm2833_vm11, %v7282_v23, %v7346_v56 }
 0xa14   : > { %v7405_v44 = vsel %vm2844_vm14, %v7385_v60, %v7363_v62  ;;  %10222 = vmatprep.mubr.bf16.mxu1 %v9793_v38 }
 0xa15   : > { %v7421_v55 = vsel %vm2855_vm12, %v7405_v44, %v13296_v5  ;;  %v7372_v5 = vrot.slane %v14498_v20, 1 }
 0xa16   : > { %v9794_v13 = vcombine.low %v7419_v61, %v7421_v55  ;;  %v7350_v25 = vpop.permute.xlu1 %7349 }
 0xa17   : > { %v7391_v14 = vsel %vm2833_vm11, %v7286_v11, %v7350_v25 }
 0xa18   : > { %v7409_v12 = vsel %vm2844_vm14, %v7391_v14, %v7367_v15  ;;  %10223 = vmatmul.mubr.bf16.vlgmr.msra.gmra.mrb[28].mxu1 %v9794_v13 }
 0xa19   : > { %v7425_v9 = vsel %vm2855_vm12, %v7409_v12, %v13300_v2 }
 0xa1a   : > { %v7354_v21 = vpop.permute.xlu1 %7353  ;;  %v9795_v37 = vcombine.low %v7423_v31, %v7425_v9 }
 0xa1b   : > { %v7397_v35 = vsel %vm2833_vm11, %v7290_v58, %v7354_v21 }
 0xa1c   : > { %10226 = vmatprep.mubr.bf16.mxu1 %v9795_v37 }
 0xa1e   : > { %v7371_v32 = vpop.permute.xlu1 %7370 }
 0xa1f   : > { %v7413_v49 = vsel %vm2844_vm14, %v7397_v35, %v7371_v32 }
 0xa20   : > { %v7429_v29 = vsel %vm2855_vm12, %v7413_v49, %v7372_v5 }
 0xa21   : > { %v9796_v2 = vcombine.low %v7427_v48, %v7429_v29 }
 0xa23   : > { %10227 = vmatmul.mubr.bf16.gmra.mrb[32].mxu1 %v9796_v2 }
 0xaeb   : > { %v10224_v39 = vpop.f32.mrb[28].mxu1 }
 0xaec   : > { %v7551_v36 = vadd.f32 %v10224_v39, %v9792_v46  ;;  %v7542_v53 = vpop.f32.mrb[29].mxu1 }
 0xaed   : > { %v7543_v24 = vadd.f32 %v9792_v46, %v7542_v53  ;;  %v10225_v52 = vpop.f32.mrb[30].mxu1 }
 0xaee   : > { %v9807_v20 = vmul.f32 -1.442695, %v7551_v36  ;;  %v7554_v50 = vadd.f32 %v10225_v52, %v9792_v46  ;;  %v7545_v40 = vpop.f32.mrb[31].mxu1 }
 0xaef   : > { %v9805_v4 = vmul.f32 -1.442695, %v7543_v24  ;;  %v7546_v34 = vadd.f32 %v9792_v46, %v7545_v40 }
 0xaf0   : > { %10496 = vpow2.f32 %v9807_v20  ;;  %v9808_v19 = vmul.f32 -1.442695, %v7554_v50 }
 0xaf1   : > { %10498 = vpow2.f32 %v9805_v4  ;;  %v9806_v51 = vmul.f32 -1.442695, %v7546_v34 }
 0xaf2   : > { %10500 = vpow2.f32 %v9808_v19 }
 0xaf6   : > { %v10228_v22 = vpop.f32.mrb[32].mxu1 }
 0xaf7   : > { %v13385_v16 = vadd.f32 %v10228_v22, %v9792_v46  ;;  %v7558_v62 = vpop.f32.mrb[33].mxu1 }
 0xaf8   : > { %v13387_v15 = vadd.f32 %v9792_v46, %v7558_v62  ;;  %v10229_v63 = vpop.f32.mrb[34].mxu1 }
 0xaf9   : > { %v13389_v45 = vadd.f32 %v10229_v63, %v9792_v46  ;;  %v7561_v1 = vpop.f32.mrb[35].mxu1  ;;  %v9811_v50 = vmul.f32 -1.442695, %v13385_v16 }
 0xafa   : > { %v10497_v23 = vpop.eup %10496  ;;  %v13391_v57 = vadd.f32 %v9792_v46, %v7561_v1  ;;  %v9809_v16 = vmul.f32 -1.442695, %v13387_v15 }
 0xafb   : > { %v10499_v11 = vpop.eup %10498  ;;  %v7599_v41 = vadd.f32 1.0, %v10497_v23 }
 0xafc   : > { %v7597_v58 = vadd.f32 1.0, %v10499_v11  ;;  %v10501_v27 = vpop.eup %10500 }
 0xafd   : > { %10502 = vrcp.f32 %v7599_v41  ;;  %v7600_v28 = vadd.f32 1.0, %v10501_v27 }
 0xafe   : > { %10504 = vrcp.f32 %v7597_v58 }
 0xaff   : > { %10506 = vpow2.f32 %v9806_v51 }
 0xb00   : > { %10508 = vrcp.f32 %v7600_v28 }
 0xb07   : > { %v10503_v7 = vpop.eup %10502 }
 0xb08   : > { %v10505_v59 = vpop.eup %10504  ;;  %v7873_v26 = vrot.slane %v10503_v7, %v12238_v18  ;;  %v7866_v8 = vcombine.high %v10503_v7, %v10503_v7 }
 0xb09   : > { %v7629_v43 = vrot.slane %v10505_v59, %v12238_v18  ;;  %v10507_v17 = vpop.eup %10506  ;;  %v7622_v54 = vcombine.high %v10505_v59, %v10505_v59 }
 0xb0a   : > { %v13396_v42 = vrot.slane %v7873_v26, %v12238_v18  ;;  %v7881_v56 = vcombine.high %v7873_v26, %v7873_v26  ;;  %v7598_v6 = vadd.f32 1.0, %v10507_v17  ;;  %v7880_v30 = vrot.slane %v7866_v8, %v12238_v18  ;;  %v10509_v13 = vpop.eup %10508 }
 0xb0b   : > { %v7637_v38 = vcombine.high %v7629_v43, %v7629_v43  ;;  %v13404_v44 = vrot.slane %v7629_v43, %v12238_v18  ;;  %v7995_v10 = vrot.slane %v10509_v13, %v12238_v18  ;;  %v7636_v2 = vrot.slane %v7622_v54, %v12238_v18 }
 0xb0c   : > { %v7926_v0 = vrot.slane %v13396_v42, %v13175_v3  ;;  %v13401_v60 = vrot.slane %v7881_v56, %v12238_v18  ;;  %v13418_v14 = vcombine.high %v13396_v42, %v13396_v42  ;;  %10510 = vrcp.f32 %v7598_v6 }
 0xb0d   : > { %v13410_v55 = vrot.slane %v7637_v38, %v12238_v18  ;;  %v7682_v25 = vrot.slane %v13404_v44, %v13175_v3  ;;  %v7882_v9 = vcombine.high %v7880_v30, %v7880_v30  ;;  %v13432_v37 = vrot.slane %v7880_v30, %v12238_v18 }
 0xb0e   : > { %7955 = vrot.lane.b32.xlu0 %v7926_v0, %s14499_s17  ;;  %v7930_v61 = vrot.slane %v13401_v60, %v13175_v3  ;;  %v13425_v31 = vcombine.high %v13401_v60, %v13401_v60  ;;  %v7934_v21 = vrot.slane %v13418_v14, %v13175_v3  ;;  %v8003_v35 = vcombine.high %v7995_v10, %v7995_v10 }
 0xb0f   : > { %v7686_v12 = vrot.slane %v13410_v55, %v13175_v3  ;;  %v13438_v33 = vrot.slane %v7882_v9, %v12238_v18  ;;  %v7942_v32 = vrot.slane %v13432_v37, %v13175_v3  ;;  %v13444_v49 = vrot.slane %v7995_v10, %v12238_v18 }
 0xb10   : > { %7957 = vrot.lane.b32.xlu1 %v7930_v61, %s14499_s17  ;;  %v7938_v5 = vrot.slane %v13425_v31, %v13175_v3  ;;  %v13450_v29 = vrot.slane %v8003_v35, %v12238_v18  ;;  %v13458_v36 = vcombine.high %v13404_v44, %v13404_v44  ;;  %v13465_v24 = vcombine.high %v13410_v55, %v13410_v55 }
 0xb11   : > { %v7946_v48 = vrot.slane %v13438_v33, %v13175_v3  ;;  %v8048_v39 = vrot.slane %v13444_v49, %v13175_v3  ;;  %v7638_v52 = vcombine.high %v7636_v2, %v7636_v2  ;;  %v13473_v4 = vrot.slane %v7636_v2, %v12238_v18 }
 0xb12   : > { %7711 = vrot.lane.b32.xlu0 %v7682_v25, %s14499_s17  ;;  %v8052_v53 = vrot.slane %v13450_v29, %v13175_v3  ;;  %v7690_v40 = vrot.slane %v13458_v36, %v13175_v3  ;;  %v7694_v19 = vrot.slane %v13465_v24, %v13175_v3  ;;  %10512 = vpow2.f32 %v9811_v50 }
 0xb13   : > { %v13479_v22 = vrot.slane %v7638_v52, %v12238_v18  ;;  %v7698_v34 = vrot.slane %v13473_v4, %v13175_v3  ;;  %v7988_v1 = vcombine.high %v10509_v13, %v10509_v13  ;;  %10514 = vpow2.f32 %v9809_v16 }
 0xb14   : > { %7713 = vrot.lane.b32.xlu1 %v7686_v12, %s14499_s17  ;;  %v13499_v41 = vcombine.high %v13432_v37, %v13432_v37  ;;  %v13506_v51 = vcombine.high %v13438_v33, %v13438_v33  ;;  %v13514_v7 = vcombine.high %v13444_v49, %v13444_v49  ;;  %v13521_v43 = vcombine.high %v13450_v29, %v13450_v29 }
 0xb15   : > { %v7702_v23 = vrot.slane %v13479_v22, %v13175_v3  ;;  %v8002_v27 = vrot.slane %v7988_v1, %v12238_v18  ;;  %v9812_v8 = vmul.f32 -1.442695, %v13389_v45  ;;  %v13541_v25 = vcombine.high %v13473_v4, %v13473_v4 }
 0xb16   : > { %7959 = vrot.lane.b32.xlu0 %v7934_v21, %s14499_s17  ;;  %v10511_v46 = vpop.eup %10510  ;;  %v7950_v28 = vrot.slane %v13499_v41, %v13175_v3  ;;  %v7954_v26 = vrot.slane %v13506_v51, %v13175_v3  ;;  %v8056_v56 = vrot.slane %v13514_v7, %v13175_v3  ;;  %v8060_v30 = vrot.slane %v13521_v43, %v13175_v3 }
 0xb17   : > { %v7751_v20 = vrot.slane %v10511_v46, %v12238_v18  ;;  %v8004_v17 = vcombine.high %v8002_v27, %v8002_v27  ;;  %v13528_v38 = vrot.slane %v8002_v27, %v12238_v18  ;;  %v7744_v61 = vcombine.high %v10511_v46, %v10511_v46 }
 0xb18   : > { %7961 = vrot.lane.b32.xlu1 %v7938_v5, %s14499_s17  ;;  %10516 = vpow2.f32 %v9812_v8  ;;  %v13548_v10 = vcombine.high %v13479_v22, %v13479_v22  ;;  %v7706_v54 = vrot.slane %v13541_v25, %v13175_v3  ;;  %v9810_v2 = vmul.f32 -1.442695, %v13391_v57 }
 0xb19   : > { %v7759_v62 = vcombine.high %v7751_v20, %v7751_v20  ;;  %v13486_v63 = vrot.slane %v7751_v20, %v12238_v18  ;;  %v13534_v13 = vrot.slane %v8004_v17, %v12238_v18  ;;  %v8064_v45 = vrot.slane %v13528_v38, %v13175_v3 }
 0xb1a   : > { %7963 = vrot.lane.b32.xlu0 %v7942_v32, %s14499_s17  ;;  %v7758_v21 = vrot.slane %v7744_v61, %v12238_v18  ;;  %v7710_v35 = vrot.slane %v13548_v10, %v13175_v3 }
 0xb1b   : > { %v13492_v11 = vrot.slane %v7759_v62, %v12238_v18  ;;  %v7804_v15 = vrot.slane %v13486_v63, %v13175_v3  ;;  %v8068_v9 = vrot.slane %v13534_v13, %v13175_v3  ;;  %v13556_v5 = vcombine.high %v13486_v63, %v13486_v63 }
 0xb1c   : > { %7965 = vrot.lane.b32.xlu1 %v7946_v48, %s14499_s17  ;;  %v10513_v59 = vpop.eup %10512  ;;  %v7760_v48 = vcombine.high %v7758_v21, %v7758_v21  ;;  %v13590_v16 = vcombine.high %v13534_v13, %v13534_v13 }
 0xb1d   : > { %v7808_v58 = vrot.slane %v13492_v11, %v13175_v3  ;;  %v7603_v0 = vadd.f32 1.0, %v10513_v59  ;;  %v10515_v6 = vpop.eup %10514  ;;  %v13563_v32 = vcombine.high %v13492_v11, %v13492_v11  ;;  %v7812_v46 = vrot.slane %v13556_v5, %v13175_v3 }
 0xb1e   : > { %8077 = vrot.lane.b32.xlu0 %v8048_v39, %s14499_s17  ;;  %v7601_v12 = vadd.f32 1.0, %v10515_v6  ;;  %v13570_v39 = vrot.slane %v7758_v21, %v12238_v18  ;;  %v13576_v20 = vrot.slane %v7760_v48, %v12238_v18 }
 0xb1f   : > { %10518 = vrcp.f32 %v7603_v0  ;;  %v7816_v52 = vrot.slane %v13563_v32, %v13175_v3 }
 0xb20   : > { %8079 = vrot.lane.b32.xlu1 %v8052_v53, %s14499_s17  ;;  %10520 = vrcp.f32 %v7601_v12  ;;  %v7820_v57 = vrot.slane %v13570_v39, %v13175_v3  ;;  %v7824_v62 = vrot.slane %v13576_v20, %v13175_v3  ;;  %v13605_v27 = vcombine.high %v13576_v20, %v13576_v20 }
 0xb21   : > { %10522 = vpow2.f32 %v9810_v2 }
 0xb22   : > { %7715 = vrot.lane.b32.xlu0 %v7690_v40, %s14499_s17  ;;  %v10517_v53 = vpop.eup %10516  ;;  %v13583_v40 = vcombine.high %v13528_v38, %v13528_v38  ;;  %v7832_v0 = vrot.slane %v13605_v27, %v13175_v3 }
 0xb24   : > { %7717 = vrot.lane.b32.xlu1 %v7694_v19, %s14499_s17  ;;  %v7604_v19 = vadd.f32 1.0, %v10517_v53 }
 0xb26   : > { %7719 = vrot.lane.b32.xlu0 %v7698_v34, %s14499_s17  ;;  %10524 = vrcp.f32 %v7604_v19 }
 0xb28   : > { %7721 = vrot.lane.b32.xlu1 %v7702_v23, %s14499_s17  ;;  %v8072_v23 = vrot.slane %v13583_v40, %v13175_v3 }
 0xb29   : > { %v10519_v50 = vpop.eup %10518 }
 0xb2a   : > { %7833 = vrot.lane.b32.xlu0 %v7804_v15, %s14499_s17  ;;  %v8361_v34 = vrot.slane %v10519_v50, %v12238_v18  ;;  %v10521_v1 = vpop.eup %10520  ;;  %v13598_v15 = vcombine.high %v13570_v39, %v13570_v39 }
 0xb2b   : > { %v8117_v59 = vrot.slane %v10521_v1, %v12238_v18  ;;  %v10523_v8 = vpop.eup %10522 }
 0xb2c   : > { %7835 = vrot.lane.b32.xlu1 %v7808_v58, %s14499_s17  ;;  %v8076_v58 = vrot.slane %v13590_v16, %v13175_v3  ;;  %v13612_v17 = vrot.slane %v8361_v34, %v12238_v18  ;;  %v7602_v12 = vadd.f32 1.0, %v10523_v8 }
 0xb2d   : > { %v8125_v61 = vcombine.high %v8117_v59, %v8117_v59 }
 0xb2e   : > { %7967 = vrot.lane.b32.xlu0 %v7950_v28, %s14499_s17  ;;  %v8369_v28 = vcombine.high %v8361_v34, %v8361_v34  ;;  %v13638_v2 = vcombine.high %v13612_v17, %v13612_v17  ;;  %10526 = vrcp.f32 %v7602_v12 }
 0xb2f   : > { %v13630_v21 = vrot.slane %v8125_v61, %v12238_v18 }
 0xb30   : > { %7969 = vrot.lane.b32.xlu1 %v7954_v26, %s14499_s17  ;;  %v7828_v26 = vrot.slane %v13598_v15, %v13175_v3  ;;  %v13618_v6 = vrot.slane %v8369_v28, %v12238_v18 }
 0xb31   : > { %v13685_v12 = vcombine.high %v13630_v21, %v13630_v21 }
 0xb32   : > { %8081 = vrot.lane.b32.xlu0 %v8056_v56, %s14499_s17  ;;  %v8354_v56 = vcombine.high %v10519_v50, %v10519_v50  ;;  %v13645_v53 = vcombine.high %v13618_v6, %v13618_v6 }
 0xb34   : > { %8083 = vrot.lane.b32.xlu1 %v8060_v30, %s14499_s17  ;;  %v8414_v30 = vrot.slane %v13612_v17, %v13175_v3  ;;  %v8426_v34 = vrot.slane %v13645_v53, %v13175_v3 }
 0xb36   : > { %8085 = vrot.lane.b32.xlu0 %v8064_v45, %s14499_s17  ;;  %v13624_v45 = vrot.slane %v8117_v59, %v12238_v18 }
 0xb38   : > { %8087 = vrot.lane.b32.xlu1 %v8068_v9, %s14499_s17  ;;  %v8418_v9 = vrot.slane %v13618_v6, %v13175_v3  ;;  %v8170_v48 = vrot.slane %v13624_v45, %v13175_v3  ;;  %v13678_v61 = vcombine.high %v13624_v45, %v13624_v45 }
 0xb3a   : > { %7723 = vrot.lane.b32.xlu0 %v7706_v54, %s14499_s17  ;;  %v8368_v54 = vrot.slane %v8354_v56, %v12238_v18 }
 0xb3c   : > { %7725 = vrot.lane.b32.xlu1 %v7710_v35, %s14499_s17  ;;  %v10525_v35 = vpop.eup %10524  ;;  %v13652_v19 = vrot.slane %v8368_v54, %v12238_v18 }
 0xb3d   : > { %v8483_v50 = vrot.slane %v10525_v35, %v12238_v18  ;;  %v10527_v56 = vpop.eup %10526 }
 0xb3e   : > { %7837 = vrot.lane.b32.xlu0 %v7812_v46, %s14499_s17  ;;  %v8174_v46 = vrot.slane %v13630_v21, %v13175_v3  ;;  %v8430_v28 = vrot.slane %v13652_v19, %v13175_v3 }
 0xb3f   : > { %v13664_v59 = vrot.slane %v8483_v50, %v12238_v18 }
 0xb40   : > { %7839 = vrot.lane.b32.xlu1 %v7816_v52, %s14499_s17  ;;  %v8370_v52 = vcombine.high %v8368_v54, %v8368_v54  ;;  %v8239_v54 = vrot.slane %v10527_v56, %v12238_v18 }
 0xb42   : > { %7841 = vrot.lane.b32.xlu0 %v7820_v57, %s14499_s17  ;;  %v8422_v57 = vrot.slane %v13638_v2, %v13175_v3 }
 0xb44   : > { %7843 = vrot.lane.b32.xlu1 %v7824_v62, %s14499_s17  ;;  %v8110_v62 = vcombine.high %v10521_v1, %v10521_v1 }
 0xb46   : > { %8089 = vrot.lane.b32.xlu0 %v8072_v23, %s14499_s17  ;;  %v13658_v23 = vrot.slane %v8370_v52, %v12238_v18  ;;  %v8124_v8 = vrot.slane %v8110_v62, %v12238_v18  ;;  %v8182_v52 = vrot.slane %v13685_v12, %v13175_v3 }
 0xb48   : > { %8091 = vrot.lane.b32.xlu1 %v8076_v58, %s14499_s17  ;;  %v8491_v58 = vcombine.high %v8483_v50, %v8483_v50  ;;  %v8434_v1 = vrot.slane %v13658_v23, %v13175_v3 }
 0xb4a   : > { %7845 = vrot.lane.b32.xlu0 %v7828_v26, %s14499_s17  ;;  %v13670_v26 = vrot.slane %v8491_v58, %v12238_v18  ;;  %v8476_v58 = vcombine.high %v10525_v35, %v10525_v35 }
 0xb4c   : > { %7847 = vrot.lane.b32.xlu1 %v7832_v0, %s14499_s17  ;;  %v8536_v0 = vrot.slane %v13664_v59, %v13175_v3 }
 0xb4e   : > { %8443 = vrot.lane.b32.xlu0 %v8414_v30, %s14499_s17  ;;  %v8540_v30 = vrot.slane %v13670_v26, %v13175_v3 }
 0xb50   : > { %8445 = vrot.lane.b32.xlu1 %v8418_v9, %s14499_s17  ;;  %v8126_v9 = vcombine.high %v8124_v8, %v8124_v8 }
 0xb52   : > { %8199 = vrot.lane.b32.xlu0 %v8170_v48, %s14499_s17  ;;  %v8178_v48 = vrot.slane %v13678_v61, %v13175_v3  ;;  %v13698_v50 = vrot.slane %v8126_v9, %v12238_v18  ;;  %v8490_v9 = vrot.slane %v8476_v58, %v12238_v18 }
 0xb54   : > { %8201 = vrot.lane.b32.xlu1 %v8174_v46, %s14499_s17  ;;  %v13692_v46 = vrot.slane %v8124_v8, %v12238_v18 }
 0xb56   : > { %8447 = vrot.lane.b32.xlu0 %v8422_v57, %s14499_s17  ;;  %v8247_v57 = vcombine.high %v8239_v54, %v8239_v54  ;;  %v8186_v62 = vrot.slane %v13692_v46, %v13175_v3 }
 0xb58   : > { %8449 = vrot.lane.b32.xlu1 %v8426_v34, %s14499_s17  ;;  %v13704_v34 = vrot.slane %v8239_v54, %v12238_v18 }
 0xb5a   : > { %8451 = vrot.lane.b32.xlu0 %v8430_v28, %s14499_s17  ;;  %v8190_v28 = vrot.slane %v13698_v50, %v13175_v3  ;;  %v8292_v8 = vrot.slane %v13704_v34, %v13175_v3 }
 0xb5c   : > { %8453 = vrot.lane.b32.xlu1 %v8434_v1, %s14499_s17  ;;  %v13710_v1 = vrot.slane %v8247_v57, %v12238_v18  ;;  %v13739_v57 = vcombine.high %v13670_v26, %v13670_v26 }
 0xb5e   : > { %8565 = vrot.lane.b32.xlu0 %v8536_v0, %s14499_s17  ;;  %v13717_v0 = vcombine.high %v13652_v19, %v13652_v19  ;;  %v8296_v35 = vrot.slane %v13710_v1, %v13175_v3  ;;  %14503 = vst [vmem:[#allocation5_spill] sm:$0xff] %v13739_v57 }
 0xb60   : > { %8567 = vrot.lane.b32.xlu1 %v8540_v30, %s14499_s17  ;;  %14500 = vst [vmem:[#allocation2_spill] sm:$0xff] %v13717_v0  ;;  %v13724_v30 = vcombine.high %v13658_v23, %v13658_v23  ;;  %v8438_v54 = vrot.slane %v13717_v0, %v13175_v3 }
 0xb62   : > { %8203 = vrot.lane.b32.xlu0 %v8178_v48, %s14499_s17  ;;  %14501 = vst [vmem:[#allocation3_spill] sm:$0xff] %v13724_v30  ;;  %v13732_v48 = vcombine.high %v13664_v59, %v13664_v59 }
 0xb64   : > { %8205 = vrot.lane.b32.xlu1 %v8182_v52, %s14499_s17  ;;  %14502 = vst [vmem:[#allocation4_spill] sm:$0xff] %v13732_v48  ;;  %v8442_v52 = vrot.slane %v13724_v30, %v13175_v3  ;;  %v8544_v58 = vrot.slane %v13732_v48, %v13175_v3  ;;  %v13758_v48 = vcombine.high %v13692_v46, %v13692_v46 }
 0xb66   : > { %8207 = vrot.lane.b32.xlu0 %v8186_v62, %s14499_s17  ;;  %v8492_v62 = vcombine.high %v8490_v9, %v8490_v9  ;;  %14506 = vst [vmem:[#allocation8_spill] sm:$0xff] %v13758_v48 }
 0xb68   : > { %8209 = vrot.lane.b32.xlu1 %v8190_v28, %s14499_s17  ;;  %v13745_v28 = vrot.slane %v8490_v9, %v12238_v18  ;;  %v13765_v9 = vcombine.high %v13698_v50, %v13698_v50 }
 0xb6a   : > { %8321 = vrot.lane.b32.xlu0 %v8292_v8, %s14499_s17  ;;  %14504 = vst [vmem:[#allocation6_spill] sm:$0xff] %v13745_v28  ;;  %v8232_v8 = vcombine.high %v10527_v56, %v10527_v56  ;;  %14507 = vst [vmem:[#allocation9_spill] sm:$0xff] %v13765_v9 }
 0xb6c   : > { %8323 = vrot.lane.b32.xlu1 %v8296_v35, %s14499_s17  ;;  %v8548_v35 = vrot.slane %v13739_v57, %v13175_v3  ;;  %v13780_v57 = vcombine.high %v13710_v1, %v13710_v1 }
 0xb6e   : > { %8455 = vrot.lane.b32.xlu0 %v8438_v54, %s14499_s17  ;;  %v13751_v54 = vrot.slane %v8492_v62, %v12238_v18  ;;  %v8246_v62 = vrot.slane %v8232_v8, %v12238_v18  ;;  %14509 = vst [vmem:[#allocation11_spill] sm:$0xff] %v13780_v57 }
 0xb70   : > { %8457 = vrot.lane.b32.xlu1 %v8442_v52, %s14499_s17  ;;  %14505 = vst [vmem:[#allocation7_spill] sm:$0xff] %v13751_v54  ;;  %v8552_v52 = vrot.slane %v13745_v28, %v13175_v3  ;;  %v8556_v56 = vrot.slane %v13751_v54, %v13175_v3  ;;  %v8248_v30 = vcombine.high %v8246_v62, %v8246_v62 }
 0xb72   : > { %8569 = vrot.lane.b32.xlu0 %v8544_v58, %s14499_s17  ;;  %v8194_v58 = vrot.slane %v13758_v48, %v13175_v3 }
 0xb74   : > { %8571 = vrot.lane.b32.xlu1 %v8548_v35, %s14499_s17  ;;  %v13773_v35 = vcombine.high %v13704_v34, %v13704_v34 }
 0xb76   : > { %8573 = vrot.lane.b32.xlu0 %v8552_v52, %s14499_s17  ;;  %14508 = vst [vmem:[#allocation10_spill] sm:$0xff] %v13773_v35  ;;  %v8198_v52 = vrot.slane %v13765_v9, %v13175_v3  ;;  %v8300_v8 = vrot.slane %v13773_v35, %v13175_v3  ;;  %v13792_v9 = vrot.slane %v8248_v30, %v12238_v18 }
 0xb77   : > { %v13799_v35 = vcombine.high %v13745_v28, %v13745_v28 }
 0xb78   : > { %8575 = vrot.lane.b32.xlu1 %v8556_v56, %s14499_s17  ;;  %v13786_v56 = vrot.slane %v8246_v62, %v12238_v18  ;;  %14511 = vst [vmem:[#allocation13_spill] sm:$0xff] %v13792_v9  ;;  %v13806_v18 = vcombine.high %v13751_v54, %v13751_v54 }
 0xb79   : > { %14512 = vst [vmem:[#allocation14_spill] sm:$0xff] %v13799_v35 }
 0xb7a   : > { %8211 = vrot.lane.b32.xlu0 %v8194_v58, %s14499_s17  ;;  %14510 = vst [vmem:[#allocation12_spill] sm:$0xff] %v13786_v56  ;;  %v8304_v58 = vrot.slane %v13780_v57, %v13175_v3  ;;  %14513 = vst [vmem:[#allocation15_spill] sm:$0xff] %v13806_v18  ;;  %v13817_v28 = vcombine.high %v13786_v56, %v13786_v56 }
 0xb7c   : > { %8213 = vrot.lane.b32.xlu1 %v8198_v52, %s14499_s17  ;;  %v8308_v52 = vrot.slane %v13786_v56, %v13175_v3 }
 0xb7e   : > { %8325 = vrot.lane.b32.xlu0 %v8300_v8, %s14499_s17  ;;  %v8312_v8 = vrot.slane %v13792_v9, %v13175_v3 }
 0xb80   : > { %v7956_v48 = vpop.permute.xlu0 %7955  ;;  %8327 = vrot.lane.b32.xlu1 %v8304_v58, %s14499_s17 }
 0xb81   : > { %v7979_v30 = vsel %vm707_vm0, %v13396_v42, %v7956_v48  ;;  %v8564_v42 = vrot.slane %v13806_v18, %v13175_v3 }
 0xb82   : > { %8329 = vrot.lane.b32.xlu0 %v8308_v52, %s14499_s17  ;;  %v7958_v62 = vpop.permute.xlu1 %7957  ;;  %v8560_v52 = vrot.slane %v13799_v35, %v13175_v3 }
 0xb83   : > { %v7980_v58 = vsel %vm707_vm0, %v13401_v60, %v7958_v62  ;;  %v13824_v60 = vcombine.high %v13792_v9, %v13792_v9 }
 0xb84   : > { %v8925_v57 = vcombine.low %v7979_v30, %v7980_v58  ;;  %v7712_v0 = vpop.permute.xlu0 %7711  ;;  %8331 = vrot.lane.b32.xlu1 %v8312_v8, %s14499_s17 }
 0xb85   : > { %v7735_v48 = vsel %vm707_vm0, %v13404_v44, %v7712_v0  ;;  %v8320_v9 = vrot.slane %v13824_v60, %v13175_v3 }
 0xb86   : > { %8577 = vrot.lane.b32.xlu0 %v8560_v52, %s14499_s17  ;;  %v7714_v54 = vpop.permute.xlu1 %7713  ;;  %v8316_v52 = vrot.slane %v13817_v28, %v13175_v3 }
 0xb87   : > { %v7736_v62 = vsel %vm707_vm0, %v13410_v55, %v7714_v54  ;;  %v13842_v54 = vrot.slane %v8925_v57, %v13115_v47 }
 0xb88   : > { %v8789_v8 = vcombine.low %v7735_v48, %v7736_v62  ;;  %v7960_v35 = vpop.permute.xlu0 %7959  ;;  %8579 = vrot.lane.b32.xlu1 %v8564_v42, %s14499_s17 }
 0xb89   : > { %v7981_v56 = vsel %vm707_vm0, %v13418_v14, %v7960_v35 }
 0xb8a   : > { %8333 = vrot.lane.b32.xlu0 %v8316_v52, %s14499_s17  ;;  %v7962_v18 = vpop.permute.xlu1 %7961 }
 0xb8b   : > { %v7982_v44 = vsel %vm707_vm0, %v13425_v31, %v7962_v18 }
 0xb8c   : > { %v8926_v55 = vcombine.low %v7981_v56, %v7982_v44  ;;  %v7964_v0 = vpop.permute.xlu0 %7963  ;;  %8335 = vrot.lane.b32.xlu1 %v8320_v9, %s14499_s17 }
 0xb8d   : > { %v7983_v3 = vsel %vm707_vm0, %v13432_v37, %v7964_v0 }
 0xb8e   : > { %v13845_v42 = vrot.slane %v8926_v55, %v13115_v47  ;;  %8693 = vrot.lane.b32.xlu0 %v7979_v30, %s14514_s18  ;;  %v7966_v52 = vpop.permute.xlu1 %7965 }
 0xb8f   : > { %v7984_v14 = vsel %vm707_vm0, %v13438_v33, %v7966_v52 }
 0xb90   : > { %v8942_v35 = vcombine.low %v7983_v3, %v7984_v14  ;;  %v8078_v9 = vpop.permute.xlu0 %8077  ;;  %8695 = vrot.lane.b32.xlu1 %v7980_v58, %s14514_s18 }
 0xb91   : > { %v8101_v18 = vsel %vm707_vm0, %v13444_v49, %v8078_v9  ;;  %v13868_v49 = vrot.slane %v8789_v8, %v13115_v47 }
 0xb92   : > { %8661 = vrot.lane.b32.xlu0 %v7735_v48, %s14514_s18  ;;  %v8080_v57 = vpop.permute.xlu1 %8079 }
 0xb93   : > { %v8102_v30 = vsel %vm707_vm0, %v13450_v29, %v8080_v57 }
 0xb94   : > { %v8993_v37 = vcombine.low %v8101_v18, %v8102_v30  ;;  %v7716_v55 = vpop.permute.xlu0 %7715  ;;  %8663 = vrot.lane.b32.xlu1 %v7736_v62, %s14514_s18 }
 0xb95   : > { %v7737_v0 = vsel %vm707_vm0, %v13458_v36, %v7716_v55 }
 0xb96   : > { %8697 = vrot.lane.b32.xlu0 %v7981_v56, %s14514_s18  ;;  %v7718_v33 = vpop.permute.xlu1 %7717 }
 0xb97   : > { %v7738_v58 = vsel %vm707_vm0, %v13465_v24, %v7718_v33 }
 0xb98   : > { %v8790_v48 = vcombine.low %v7737_v0, %v7738_v58  ;;  %v7720_v52 = vpop.permute.xlu0 %7719  ;;  %8699 = vrot.lane.b32.xlu1 %v7982_v44, %s14514_s18 }
 0xb99   : > { %v7739_v62 = vsel %vm707_vm0, %v13473_v4, %v7720_v52 }
 0xb9a   : > { %v13871_v29 = vrot.slane %v8790_v48, %v13115_v47  ;;  %8701 = vrot.lane.b32.xlu0 %v7983_v3, %s14514_s18  ;;  %v7722_v56 = vpop.permute.xlu1 %7721 }
 0xb9b   : > { %v7740_v36 = vsel %vm707_vm0, %v13479_v22, %v7722_v56 }
 0xb9c   : > { %v8805_v24 = vcombine.low %v13868_v49, %v13871_v29  ;;  %v8806_v9 = vcombine.low %v7739_v62, %v7740_v36  ;;  %v7834_v44 = vpop.permute.xlu0 %7833  ;;  %8703 = vrot.lane.b32.xlu1 %v7984_v14, %s14514_s18  ;;  %v14529_v29 = vcombine.low %v13842_v54, %v13845_v42 }
 0xb9d   : > { %v7857_v3 = vsel %vm707_vm0, %v13486_v63, %v7834_v44  ;;  %v13894_v63 = vrot.slane %v8942_v35, %v13115_v47  ;;  %v13908_v35 = vrot.slane %v8993_v37, %v13115_v47 }
 0xb9e   : > { %8709 = vrot.lane.b32.xlu0 %v8101_v18, %s14514_s18  ;;  %v7836_v8 = vpop.permute.xlu1 %7835 }
 0xb9f   : > { %v7858_v57 = vsel %vm707_vm0, %v13492_v11, %v7836_v8 }
 0xba0   : > { %v8857_v4 = vcombine.low %v7857_v3, %v7858_v57  ;;  %v7968_v55 = vpop.permute.xlu0 %7967  ;;  %8711 = vrot.lane.b32.xlu1 %v8102_v30, %s14514_s18 }
 0xba1   : > { %v7985_v33 = vsel %vm707_vm0, %v13499_v41, %v7968_v55 }
 0xba2   : > { %8665 = vrot.lane.b32.xlu0 %v7737_v0, %s14514_s18  ;;  %v7970_v22 = vpop.permute.xlu1 %7969 }
 0xba3   : > { %v7986_v14 = vsel %vm707_vm0, %v13506_v51, %v7970_v22 }
 0xba4   : > { %v8943_v18 = vcombine.low %v7985_v33, %v7986_v14  ;;  %v8082_v48 = vpop.permute.xlu0 %8081  ;;  %8667 = vrot.lane.b32.xlu1 %v7738_v58, %s14514_s18 }
 0xba5   : > { %v8103_v0 = vsel %vm707_vm0, %v13514_v7, %v8082_v48 }
 0xba6   : > { %v13897_v11 = vrot.slane %v8943_v18, %v13115_v47  ;;  %8669 = vrot.lane.b32.xlu0 %v7739_v62, %s14514_s18  ;;  %v8084_v30 = vpop.permute.xlu1 %8083 }
 0xba7   : > { %v8104_v41 = vsel %vm707_vm0, %v13521_v43, %v8084_v30 }
 0xba8   : > { %v8994_v52 = vcombine.low %v8103_v0, %v8104_v41  ;;  %v8086_v58 = vpop.permute.xlu0 %8085  ;;  %8671 = vrot.lane.b32.xlu1 %v7740_v36, %s14514_s18 }
 0xba9   : > { %v8105_v7 = vsel %vm707_vm0, %v13528_v38, %v8086_v58 }
 0xbaa   : > { %v13911_v56 = vrot.slane %v8994_v52, %v13115_v47  ;;  %8677 = vrot.lane.b32.xlu0 %v7857_v3, %s14514_s18  ;;  %v8088_v62 = vpop.permute.xlu1 %8087 }
 0xbab   : > { %v8106_v43 = vsel %vm707_vm0, %v13534_v13, %v8088_v62  ;;  %v13928_v13 = vrot.slane %v8806_v9, %v13115_v47  ;;  %v13942_v9 = vrot.slane %v8857_v4, %v13115_v47 }
 0xbac   : > { %v9010_v8 = vcombine.low %v8105_v7, %v8106_v43  ;;  %v7724_v36 = vpop.permute.xlu0 %7723  ;;  %8679 = vrot.lane.b32.xlu1 %v7858_v57, %s14514_s18  ;;  %v14531_v54 = vcombine.low %v13908_v35, %v13911_v56 }
 0xbad   : > { %v7741_v3 = vsel %vm707_vm0, %v13541_v25, %v7724_v36 }
 0xbae   : > { %8705 = vrot.lane.b32.xlu0 %v7985_v33, %s14514_s18  ;;  %v7726_v37 = vpop.permute.xlu1 %7725 }
 0xbaf   : > { %v7742_v55 = vsel %vm707_vm0, %v13548_v10, %v7726_v37 }
 0xbb0   : > { %v8807_v38 = vcombine.low %v7741_v3, %v7742_v55  ;;  %v7838_v22 = vpop.permute.xlu0 %7837  ;;  %8707 = vrot.lane.b32.xlu1 %v7986_v14, %s14514_s18 }
 0xbb1   : > { %v7859_v33 = vsel %vm707_vm0, %v13556_v5, %v7838_v22 }
 0xbb2   : > { %v13931_v18 = vrot.slane %v8807_v38, %v13115_v47  ;;  %8713 = vrot.lane.b32.xlu0 %v8103_v0, %s14514_s18  ;;  %v7840_v57 = vpop.permute.xlu1 %7839 }
 0xbb3   : > { %v7860_v25 = vsel %vm707_vm0, %v13563_v32, %v7840_v57 }
 0xbb4   : > { %v8822_v10 = vcombine.low %v13928_v13, %v13931_v18  ;;  %v8858_v48 = vcombine.low %v7859_v33, %v7860_v25  ;;  %v7842_v14 = vpop.permute.xlu0 %7841  ;;  %8715 = vrot.lane.b32.xlu1 %v8104_v41, %s14514_s18 }
 0xbb5   : > { %v7861_v5 = vsel %vm707_vm0, %v13570_v39, %v7842_v14 }
 0xbb6   : > { %v13945_v30 = vrot.slane %v8858_v48, %v13115_v47  ;;  %8717 = vrot.lane.b32.xlu0 %v8105_v7, %s14514_s18  ;;  %v7844_v0 = vpop.permute.xlu1 %7843 }
 0xbb7   : > { %v7862_v32 = vsel %vm707_vm0, %v13576_v20, %v7844_v0  ;;  %v13962_v20 = vrot.slane %v9010_v8, %v13115_v47 }
 0xbb8   : > { %v8873_v52 = vcombine.low %v13942_v9, %v13945_v30  ;;  %v8874_v58 = vcombine.low %v7861_v5, %v7862_v32  ;;  %v8090_v41 = vpop.permute.xlu0 %8089  ;;  %8719 = vrot.lane.b32.xlu1 %v8106_v43, %s14514_s18  ;;  %v14530_v9 = vcombine.low %v13894_v63, %v13897_v11 }
 0xbb9   : > { %v8107_v62 = vsel %vm707_vm0, %v13583_v40, %v8090_v41 }
 0xbba   : > { %8673 = vrot.lane.b32.xlu0 %v7741_v3, %s14514_s18  ;;  %v8092_v4 = vpop.permute.xlu1 %8091  ;;  %v13976_v8 = vrot.slane %v8874_v58, %v13115_v47 }
 0xbbb   : > { %v8108_v7 = vsel %vm707_vm0, %v13590_v16, %v8092_v4 }
 0xbbc   : > { %v9011_v39 = vcombine.low %v8107_v62, %v8108_v7  ;;  %v7846_v36 = vpop.permute.xlu0 %7845  ;;  %8675 = vrot.lane.b32.xlu1 %v7742_v55, %s14514_s18 }
 0xbbd   : > { %v7863_v3 = vsel %vm707_vm0, %v13598_v15, %v7846_v36 }
 0xbbe   : > { %v13965_v37 = vrot.slane %v9011_v39, %v13115_v47  ;;  %8681 = vrot.lane.b32.xlu0 %v7859_v33, %s14514_s18  ;;  %v7848_v43 = vpop.permute.xlu1 %7847  ;;  %v14523_v39 = vld [vmem:[#allocation10_spill] sm:$0xff] }
 0xbbf   : > { %v7864_v40 = vsel %vm707_vm0, %v13605_v27, %v7848_v43 }
 0xbc0   : > { %v8875_v38 = vcombine.low %v7863_v3, %v7864_v40  ;;  %v8444_v55 = vpop.permute.xlu0 %8443  ;;  %8683 = vrot.lane.b32.xlu1 %v7860_v25, %s14514_s18 }
 0xbc1   : > { %v8467_v15 = vsel %vm707_vm0, %v13612_v17, %v8444_v55 }
 0xbc2   : > { %v13979_v22 = vrot.slane %v8875_v38, %v13115_v47  ;;  %8685 = vrot.lane.b32.xlu0 %v7861_v5, %s14514_s18  ;;  %v8446_v57 = vpop.permute.xlu1 %8445 }
 0xbc3   : > { %v8468_v27 = vsel %vm707_vm0, %v13618_v6, %v8446_v57  ;;  %v14524_v6 = vld [vmem:[#allocation11_spill] sm:$0xff] }
 0xbc4   : > { %v8890_v33 = vcombine.low %v13976_v8, %v13979_v22  ;;  %v9197_v48 = vcombine.low %v8467_v15, %v8468_v27  ;;  %v8200_v25 = vpop.permute.xlu0 %8199  ;;  %8687 = vrot.lane.b32.xlu1 %v7862_v32, %s14514_s18 }
 0xbc5   : > { %v13992_v0 = vsel %vm707_vm0, %v13624_v45, %v8200_v25 }
 0xbc6   : > { %8721 = vrot.lane.b32.xlu0 %v8107_v62, %s14514_s18  ;;  %v8202_v14 = vpop.permute.xlu1 %8201 }
 0xbc7   : > { %v13996_v17 = vsel %vm707_vm0, %v13630_v21, %v8202_v14  ;;  %v14008_v21 = vrot.slane %v9197_v48, %v13115_v47 }
 0xbc8   : > { %v8448_v5 = vpop.permute.xlu0 %8447  ;;  %8723 = vrot.lane.b32.xlu1 %v8108_v7, %s14514_s18  ;;  %v14533_v35 = vcombine.low %v13992_v0, %v13996_v17 }
 0xbc9   : > { %v8469_v58 = vsel %vm707_vm0, %v13638_v2, %v8448_v5 }
 0xbca   : > { %8689 = vrot.lane.b32.xlu0 %v7863_v3, %s14514_s18  ;;  %v8450_v32 = vpop.permute.xlu1 %8449  ;;  %v9069_v56 = vrot.slane %v14533_v35, %v13115_v47 }
 0xbcb   : > { %v8470_v45 = vsel %vm707_vm0, %v13645_v53, %v8450_v32 }
 0xbcc   : > { %v9198_v41 = vcombine.low %v8469_v58, %v8470_v45  ;;  %v8452_v4 = vpop.permute.xlu0 %8451  ;;  %8691 = vrot.lane.b32.xlu1 %v7864_v40, %s14514_s18 }
 0xbce   : > { %v14011_v62 = vrot.slane %v9198_v41, %v13115_v47  ;;  %8757 = vrot.lane.b32.xlu0 %v8467_v15, %s14514_s18  ;;  %v8454_v7 = vpop.permute.xlu1 %8453 }
 0xbcf   : > { %v14041_v57 = vsel %vm707_vm0, %v13658_v23, %v8454_v7  ;;  %v14516_v7 = vld [vmem:[#allocation3_spill] sm:$0xff] }
 0xbd0   : > { %v8566_v2 = vpop.permute.xlu0 %8565  ;;  %8759 = vrot.lane.b32.xlu1 %v8468_v27, %s14514_s18 }
 0xbd1   : > { %v14021_v36 = vsel %vm707_vm0, %v13664_v59, %v8566_v2  ;;  %v14035_v59 = vsel %vm707_vm0, %v13652_v19, %v8452_v4 }
 0xbd2   : > { %8725 = vrot.lane.b32.xlu0 %v13992_v0, %s14514_s18  ;;  %v8568_v53 = vpop.permute.xlu1 %8567  ;;  %v9214_v13 = vcombine.low %v14035_v59, %v14041_v57 }
 0xbd3   : > { %v14025_v43 = vsel %vm707_vm0, %v13670_v26, %v8568_v53 }
 0xbd4   : > { %v8204_v40 = vpop.permute.xlu0 %8203  ;;  %8727 = vrot.lane.b32.xlu1 %v13996_v17, %s14514_s18  ;;  %v9222_v8 = vrot.slane %v9214_v13, %v13115_v47 }
 0xbd5   : > { %v14051_v19 = vsel %vm707_vm0, %v13678_v61, %v8204_v40 }
 0xbd6   : > { %8761 = vrot.lane.b32.xlu0 %v8469_v58, %s14514_s18  ;;  %v8206_v38 = vpop.permute.xlu1 %8205 }
 0xbd7   : > { %v14057_v25 = vsel %vm707_vm0, %v13685_v12, %v8206_v38 }
 0xbd8   : > { %v8208_v55 = vpop.permute.xlu0 %8207  ;;  %8763 = vrot.lane.b32.xlu1 %v8470_v45, %s14514_s18  ;;  %v9062_v18 = vcombine.low %v14051_v19, %v14057_v25 }
 0xbd9   : > { %v14063_v5 = vsel %vm707_vm0, %v13692_v46, %v8208_v55  ;;  %v14518_v55 = vld [vmem:[#allocation5_spill] sm:$0xff] }
 0xbda   : > { %8765 = vrot.lane.b32.xlu0 %v14035_v59, %s14514_s18  ;;  %v8210_v26 = vpop.permute.xlu1 %8209  ;;  %v9076_v22 = vrot.slane %v9062_v18, %v13115_v47  ;;  %v14532_v59 = vcombine.low %v13962_v20, %v13965_v37 }
 0xbdb   : > { %v14069_v32 = vsel %vm707_vm0, %v13698_v50, %v8210_v26  ;;  %v14515_v50 = vld [vmem:[#allocation2_spill] sm:$0xff] }
 0xbdc   : > { %v8322_v15 = vpop.permute.xlu0 %8321  ;;  %8767 = vrot.lane.b32.xlu1 %v14041_v57, %s14514_s18  ;;  %v9077_v37 = vcombine.low %v9069_v56, %v9076_v22 }
 0xbdd   : > { %v14075_v12 = vsel %vm707_vm0, %v13704_v34, %v8322_v15 }
 0xbde   : > { %8773 = vrot.lane.b32.xlu0 %v14021_v36, %s14514_s18  ;;  %v8324_v27 = vpop.permute.xlu1 %8323 }
 0xbdf   : > { %v14081_v45 = vsel %vm707_vm0, %v13710_v1, %v8324_v27  ;;  %v14517_v1 = vld [vmem:[#allocation4_spill] sm:$0xff]  ;;  %v14519_v27 = vld [vmem:[#allocation6_spill] sm:$0xff] }
 0xbe0   : > { %v8456_v48 = vpop.permute.xlu0 %8455  ;;  %8775 = vrot.lane.b32.xlu1 %v14025_v43, %s14514_s18 }
 0xbe1   : > { %v14087_v4 = vsel %vm707_vm0, %v14515_v50, %v8456_v48 }
 0xbe2   : > { %8729 = vrot.lane.b32.xlu0 %v14051_v19, %s14514_s18  ;;  %v8458_v23 = vpop.permute.xlu1 %8457 }
 0xbe3   : > { %v8474_v2 = vsel %vm707_vm0, %v14516_v7, %v8458_v23 }
 0xbe4   : > { %v8570_v14 = vpop.permute.xlu0 %8569  ;;  %8731 = vrot.lane.b32.xlu1 %v14057_v25, %s14514_s18  ;;  %v9215_v49 = vcombine.low %v14087_v4, %v8474_v2 }
 0xbe5   : > { %v14096_v40 = vsel %vm707_vm0, %v14517_v1, %v8570_v14  ;;  %v14520_v14 = vld [vmem:[#allocation7_spill] sm:$0xff] }
 0xbe6   : > { %8733 = vrot.lane.b32.xlu0 %v14063_v5, %s14514_s18  ;;  %v8572_v61 = vpop.permute.xlu1 %8571  ;;  %v9229_v30 = vrot.slane %v9215_v49, %v13115_v47 }
 0xbe7   : > { %v14102_v26 = vsel %vm707_vm0, %v14518_v55, %v8572_v61  ;;  %v14521_v61 = vld [vmem:[#allocation8_spill] sm:$0xff] }
 0xbe8   : > { %v8574_v58 = vpop.permute.xlu0 %8573  ;;  %8735 = vrot.lane.b32.xlu1 %v14069_v32, %s14514_s18  ;;  %v9266_v63 = vcombine.low %v14096_v40, %v14102_v26  ;;  %v9230_v57 = vcombine.low %v9222_v8, %v9229_v30 }
 0xbe9   : > { %v14108_v48 = vsel %vm707_vm0, %v14519_v27, %v8574_v58  ;;  %v14522_v58 = vld [vmem:[#allocation9_spill] sm:$0xff] }
 0xbea   : > { %8741 = vrot.lane.b32.xlu0 %v14075_v12, %s14514_s18  ;;  %v8576_v46 = vpop.permute.xlu1 %8575  ;;  %v9280_v0 = vrot.slane %v9266_v63, %v13115_v47 }
 0xbeb   : > { %v14114_v50 = vsel %vm707_vm0, %v14520_v14, %v8576_v46 }
 0xbec   : > { %v8212_v41 = vpop.permute.xlu0 %8211  ;;  %8743 = vrot.lane.b32.xlu1 %v14081_v45, %s14514_s18  ;;  %v9282_v17 = vcombine.low %v14108_v48, %v14114_v50 }
 0xbed   : > { %v8229_v1 = vsel %vm707_vm0, %v14521_v61, %v8212_v41 }
 0xbee   : > { %8769 = vrot.lane.b32.xlu0 %v14087_v4, %s14514_s18  ;;  %v8214_v34 = vpop.permute.xlu1 %8213 }
 0xbef   : > { %v8230_v27 = vsel %vm707_vm0, %v14522_v58, %v8214_v34  ;;  %v14525_v34 = vld [vmem:[#allocation12_spill] sm:$0xff] }
 0xbf0   : > { %v8326_v53 = vpop.permute.xlu0 %8325  ;;  %8771 = vrot.lane.b32.xlu1 %v8474_v2, %s14514_s18 }
 0xbf1   : > { %v14126_v46 = vsel %vm707_vm0, %v14523_v39, %v8326_v53  ;;  %v14526_v53 = vld [vmem:[#allocation13_spill] sm:$0xff] }
 0xbf2   : > { %8777 = vrot.lane.b32.xlu0 %v14096_v40, %s14514_s18  ;;  %v8328_v38 = vpop.permute.xlu1 %8327 }
 0xbf3   : > { %v14132_v41 = vsel %vm707_vm0, %v14524_v6, %v8328_v38  ;;  %v14527_v38 = vld [vmem:[#allocation14_spill] sm:$0xff] }
 0xbf4   : > { %v8330_v15 = vpop.permute.xlu0 %8329  ;;  %8779 = vrot.lane.b32.xlu1 %v14102_v26, %s14514_s18  ;;  %v9130_v20 = vcombine.low %v14126_v46, %v14132_v41 }
 0xbf5   : > { %v14140_v58 = vsel %vm707_vm0, %v14525_v34, %v8330_v15  ;;  %v14528_v34 = vld [vmem:[#allocation15_spill] sm:$0xff] }
 0xbf6   : > { %8781 = vrot.lane.b32.xlu0 %v14108_v48, %s14514_s18  ;;  %v8332_v23 = vpop.permute.xlu1 %8331  ;;  %v9144_v48 = vrot.slane %v9130_v20, %v13115_v47 }
 0xbf7   : > { %v14148_v16 = vsel %vm707_vm0, %v14526_v53, %v8332_v23 }
 0xbf8   : > { %v8578_v7 = vpop.permute.xlu0 %8577  ;;  %8783 = vrot.lane.b32.xlu1 %v14114_v50, %s14514_s18 }
 0xbf9   : > { %v8595_v44 = vsel %vm707_vm0, %v14527_v38, %v8578_v7 }
 0xbfa   : > { %8737 = vrot.lane.b32.xlu0 %v8229_v1, %s14514_s18  ;;  %v8580_v55 = vpop.permute.xlu1 %8579 }
 0xbfb   : > { %v8596_v51 = vsel %vm707_vm0, %v14528_v34, %v8580_v55 }
 0xbfc   : > { %v8334_v3 = vpop.permute.xlu0 %8333  ;;  %8739 = vrot.lane.b32.xlu1 %v8230_v27, %s14514_s18  ;;  %v9283_v25 = vcombine.low %v8595_v44, %v8596_v51 }
 0xbfd   : > { %v8351_v23 = vsel %vm707_vm0, %v13817_v28, %v8334_v3 }
 0xbfe   : > { %8745 = vrot.lane.b32.xlu0 %v14126_v46, %s14514_s18  ;;  %v8336_v14 = vpop.permute.xlu1 %8335  ;;  %v9297_v40 = vrot.slane %v9283_v25, %v13115_v47 }
 0xbff   : > { %v8352_v7 = vsel %vm707_vm0, %v13824_v60, %v8336_v14 }
 0xc00   : > { %v14134_v61 = vpop.permute.xlu0 %8693  ;;  %8747 = vrot.lane.b32.xlu1 %v14132_v41, %s14514_s18  ;;  %v9147_v26 = vcombine.low %v8351_v23, %v8352_v7 }
 0xc02   : > { %8749 = vrot.lane.b32.xlu0 %v14140_v58, %s14514_s18  ;;  %v14144_v39 = vpop.permute.xlu1 %8695  ;;  %v9161_v14 = vrot.slane %v9147_v26, %v13115_v47 }
 0xc03   : > { %v8959_v41 = vcombine.low %v14134_v61, %v14144_v39 }
 0xc04   : > { %v14150_v6 = vpop.permute.xlu0 %8661  ;;  %8751 = vrot.lane.b32.xlu1 %v14148_v16, %s14514_s18 }
 0xc05   : > { %v8967_v61 = vrot.slane %v8959_v41, %v13115_v47 }
 0xc06   : > { %8785 = vrot.lane.b32.xlu0 %v8595_v44, %s14514_s18  ;;  %v14157_v15 = vpop.permute.xlu1 %8663  ;;  %v14535_v44 = vcombine.low %v14021_v36, %v14025_v43 }
 0xc07   : > { %v8823_v39 = vcombine.low %v14150_v6, %v14157_v15 }
 0xc08   : > { %v14161_v31 = vpop.permute.xlu0 %8697  ;;  %8787 = vrot.lane.b32.xlu1 %v8596_v51, %s14514_s18  ;;  %v9129_v51 = vcombine.low %v14075_v12, %v14081_v45  ;;  %v9146_v12 = vcombine.low %v14140_v58, %v14148_v16 }
 0xc0a   : > { %8753 = vrot.lane.b32.xlu0 %v8351_v23, %s14514_s18  ;;  %v14167_v53 = vpop.permute.xlu1 %8699  ;;  %v9137_v43 = vrot.slane %v9129_v51, %v13115_v47  ;;  %v9154_v16 = vrot.slane %v9146_v12, %v13115_v47 }
 0xc0b   : > { %v8960_v45 = vcombine.low %v14161_v31, %v14167_v53 }
 0xc0c   : > { %v14171_v38 = vpop.permute.xlu0 %8701  ;;  %8755 = vrot.lane.b32.xlu1 %v8352_v7, %s14514_s18  ;;  %v9145_v7 = vcombine.low %v9137_v43, %v9144_v48 }
 0xc0d   : > { %v8974_v31 = vrot.slane %v8960_v45, %v13115_v47 }
 0xc0e   : > { %9333 = vrot.lane.b32.xlu0 %v8805_v24, %s10550_s19  ;;  %v14178_v55 = vpop.permute.xlu1 %8703 }
 0xc0f   : > { %v8976_v58 = vcombine.low %v14171_v38, %v14178_v55 }
 0xc10   : > { %v14180_v28 = vpop.permute.xlu0 %8709  ;;  %9335 = vrot.lane.b32.xlu1 %v8822_v10, %s10550_s19 }
 0xc11   : > { %v8984_v38 = vrot.slane %v8976_v58, %v13115_v47 }
 0xc12   : > { %9341 = vrot.lane.b32.xlu0 %v8873_v52, %s10550_s19  ;;  %v14190_v60 = vpop.permute.xlu1 %8711  ;;  %v9079_v52 = vcombine.low %v8229_v1, %v8230_v27  ;;  %v9290_v27 = vrot.slane %v9282_v17, %v13115_v47 }
 0xc13   : > { %v9027_v6 = vcombine.low %v14180_v28, %v14190_v60 }
 0xc14   : > { %v14192_v3 = vpop.permute.xlu0 %8665  ;;  %9343 = vrot.lane.b32.xlu1 %v8890_v33, %s10550_s19  ;;  %v9078_v33 = vcombine.low %v14063_v5, %v14069_v32  ;;  %v9093_v19 = vrot.slane %v9079_v52, %v13115_v47  ;;  %v14534_v5 = vcombine.low %v14008_v21, %v14011_v62  ;;  %v9273_v21 = vrot.slane %v14535_v44, %v13115_v47 }
 0xc15   : > { %v9298_v46 = vcombine.low %v9290_v27, %v9297_v40  ;;  %v8831_v52 = vrot.slane %v8823_v39, %v13115_v47  ;;  %v9035_v28 = vrot.slane %v9027_v6, %v13115_v47 }
 0xc16   : > { %9349 = vrot.lane.b32.xlu0 %v14529_v29, %s10550_s19  ;;  %v14203_v24 = vpop.permute.xlu1 %8667  ;;  %v9086_v4 = vrot.slane %v9078_v33, %v13115_v47  ;;  %v9281_v50 = vcombine.low %v9273_v21, %v9280_v0  ;;  %v9162_v29 = vcombine.low %v9154_v16, %v9161_v14 }
 0xc17   : > { %v8824_v53 = vcombine.low %v14192_v3, %v14203_v24 }
 0xc18   : > { %v14209_v10 = vpop.permute.xlu0 %8669  ;;  %9351 = vrot.lane.b32.xlu1 %v14530_v9, %s10550_s19  ;;  %v9094_v62 = vcombine.low %v9086_v4, %v9093_v19  ;;  %v8975_v9 = vcombine.low %v8967_v61, %v8974_v31 }
 0xc19   : > { %v8838_v55 = vrot.slane %v8824_v53, %v13115_v47 }
 0xc1a   : > { %9357 = vrot.lane.b32.xlu0 %v14531_v54, %s10550_s19  ;;  %v14220_v42 = vpop.permute.xlu1 %8671 }
 0xc1b   : > { %v8840_v30 = vcombine.low %v14209_v10, %v14220_v42  ;;  %v8839_v22 = vcombine.low %v8831_v52, %v8838_v55 }
 0xc1c   : > { %v14228_v11 = vpop.permute.xlu0 %8677  ;;  %9359 = vrot.lane.b32.xlu1 %v14532_v59, %s10550_s19 }
 0xc1d   : > { %v8848_v59 = vrot.slane %v8840_v30, %v13115_v47 }
 0xc1e   : > { %9381 = vrot.lane.b32.xlu0 %v14534_v5, %s10550_s19  ;;  %v14243_v32 = vpop.permute.xlu1 %8679 }
 0xc1f   : > { %v8891_v10 = vcombine.low %v14228_v11, %v14243_v32 }
 0xc20   : > { %v8706_v2 = vpop.permute.xlu0 %8705  ;;  %9383 = vrot.lane.b32.xlu1 %v9230_v57, %s10550_s19 }
 0xc21   : > { %v8899_v25 = vrot.slane %v8891_v10, %v13115_v47 }
 0xc22   : > { %9365 = vrot.lane.b32.xlu0 %v9077_v37, %s10550_s19  ;;  %v8708_v1 = vpop.permute.xlu1 %8707 }
 0xc23   : > { %v8977_v34 = vcombine.low %v8706_v2, %v8708_v1 }
 0xc24   : > { %v8714_v36 = vpop.permute.xlu0 %8713  ;;  %9367 = vrot.lane.b32.xlu1 %v9094_v62, %s10550_s19 }
 0xc25   : > { %v8991_v13 = vrot.slane %v8977_v34, %v13115_v47 }
 0xc26   : > { %9389 = vrot.lane.b32.xlu0 %v9281_v50, %s10550_s19  ;;  %v8716_v23 = vpop.permute.xlu1 %8715 }
 0xc27   : > { %v9028_v3 = vcombine.low %v8714_v36, %v8716_v23  ;;  %v8992_v15 = vcombine.low %v8984_v38, %v8991_v13 }
 0xc28   : > { %v8718_v49 = vpop.permute.xlu0 %8717  ;;  %9391 = vrot.lane.b32.xlu1 %v9298_v46, %s10550_s19 }
 0xc29   : > { %v9042_v33 = vrot.slane %v9028_v3, %v13115_v47 }
 0xc2a   : > { %9373 = vrot.lane.b32.xlu0 %v9145_v7, %s10550_s19  ;;  %v8720_v18 = vpop.permute.xlu1 %8719 }
 0xc2b   : > { %v9043_v57 = vcombine.low %v9035_v28, %v9042_v33  ;;  %v9044_v37 = vcombine.low %v8718_v49, %v8720_v18 }
 0xc2c   : > { %v8674_v24 = vpop.permute.xlu0 %8673  ;;  %9375 = vrot.lane.b32.xlu1 %v9162_v29, %s10550_s19 }
 0xc2d   : > { %v9052_v2 = vrot.slane %v9044_v37, %v13115_v47 }
 0xc2e   : > { %9353 = vrot.lane.b32.xlu0 %v8975_v9, %s10550_s19  ;;  %v8676_v54 = vpop.permute.xlu1 %8675 }
 0xc2f   : > { %v8841_v8 = vcombine.low %v8674_v24, %v8676_v54 }
 0xc30   : > { %v8682_v63 = vpop.permute.xlu0 %8681  ;;  %9355 = vrot.lane.b32.xlu1 %v8992_v15, %s10550_s19 }
 0xc31   : > { %v8855_v42 = vrot.slane %v8841_v8, %v13115_v47 }
 0xc32   : > { %9337 = vrot.lane.b32.xlu0 %v8839_v22, %s10550_s19  ;;  %v8684_v60 = vpop.permute.xlu1 %8683 }
 0xc33   : > { %v8856_v35 = vcombine.low %v8848_v59, %v8855_v42  ;;  %v8892_v56 = vcombine.low %v8682_v63, %v8684_v60 }
 0xc34   : > { %v8686_v19 = vpop.permute.xlu0 %8685 }
 0xc35   : > { %v8906_v5 = vrot.slane %v8892_v56, %v13115_v47  ;;  %9339 = vrot.lane.b32.xlu1 %v8856_v35, %s10550_s19 }
 0xc36   : > { %9361 = vrot.lane.b32.xlu0 %v9043_v57, %s10550_s19  ;;  %v8688_v11 = vpop.permute.xlu1 %8687 }
 0xc37   : > { %v8907_v32 = vcombine.low %v8899_v25, %v8906_v5  ;;  %v8908_v51 = vcombine.low %v8686_v19, %v8688_v11 }
 0xc38   : > { %v8722_v20 = vpop.permute.xlu0 %8721 }
 0xc39   : > { %v8916_v1 = vrot.slane %v8908_v51, %v13115_v47 }
 0xc3a   : > { %9345 = vrot.lane.b32.xlu0 %v8907_v32, %s10550_s19  ;;  %v8724_v4 = vpop.permute.xlu1 %8723 }
 0xc3b   : > { %v9045_v0 = vcombine.low %v8722_v20, %v8724_v4 }
 0xc3c   : > { %v8690_v17 = vpop.permute.xlu0 %8689 }
 0xc3d   : > { %v9059_v44 = vrot.slane %v9045_v0, %v13115_v47 }
 0xc3e   : > { %v8692_v21 = vpop.permute.xlu1 %8691 }
 0xc3f   : > { %v9060_v62 = vcombine.low %v9052_v2, %v9059_v44  ;;  %v8909_v40 = vcombine.low %v8690_v17, %v8692_v21 }
 0xc40   : > { %v8758_v26 = vpop.permute.xlu0 %8757 }
 0xc41   : > { %v8923_v48 = vrot.slane %v8909_v40, %v13115_v47  ;;  %9363 = vrot.lane.b32.xlu1 %v9060_v62, %s10550_s19 }
 0xc42   : > { %v8760_v50 = vpop.permute.xlu1 %8759 }
 0xc43   : > { %v8924_v27 = vcombine.low %v8916_v1, %v8923_v48  ;;  %v9231_v43 = vcombine.low %v8758_v26, %v8760_v50 }
 0xc44   : > { %v8726_v12 = vpop.permute.xlu0 %8725 }
 0xc45   : > { %9347 = vrot.lane.b32.xlu1 %v8924_v27, %s10550_s19  ;;  %v9239_v34 = vrot.slane %v9231_v43, %v13115_v47 }
 0xc46   : > { %v8728_v45 = vpop.permute.xlu1 %8727 }
 0xc47   : > { %v9095_v49 = vcombine.low %v8726_v12, %v8728_v45 }
 0xc48   : > { %v8762_v36 = vpop.permute.xlu0 %8761 }
 0xc49   : > { %v9103_v13 = vrot.slane %v9095_v49, %v13115_v47 }
 0xc4a   : > { %v8764_v46 = vpop.permute.xlu1 %8763 }
 0xc4b   : > { %v9232_v14 = vcombine.low %v8762_v36, %v8764_v46 }
 0xc4c   : > { %v8766_v41 = vpop.permute.xlu0 %8765 }
 0xc4d   : > { %v9246_v23 = vrot.slane %v9232_v14, %v13115_v47 }
 0xc4e   : > { %v8768_v7 = vpop.permute.xlu1 %8767 }
 0xc4f   : > { %v9247_v16 = vcombine.low %v9239_v34, %v9246_v23  ;;  %v9248_v30 = vcombine.low %v8766_v41, %v8768_v7 }
 0xc50   : > { %v8774_v31 = vpop.permute.xlu0 %8773 }
 0xc51   : > { %9385 = vrot.lane.b32.xlu0 %v9247_v16, %s10550_s19  ;;  %v9256_v54 = vrot.slane %v9248_v30, %v13115_v47 }
 0xc52   : > { %v8776_v58 = vpop.permute.xlu1 %8775 }
 0xc53   : > { %v9299_v37 = vcombine.low %v8774_v31, %v8776_v58 }
 0xc54   : > { %v8730_v53 = vpop.permute.xlu0 %8729 }
 0xc55   : > { %v9307_v21 = vrot.slane %v9299_v37, %v13115_v47 }
 0xc56   : > { %v8732_v29 = vpop.permute.xlu1 %8731 }
 0xc57   : > { %v9096_v61 = vcombine.low %v8730_v53, %v8732_v29 }
 0xc58   : > { %v8734_v39 = vpop.permute.xlu0 %8733 }
 0xc59   : > { %v9110_v18 = vrot.slane %v9096_v61, %v13115_v47 }
 0xc5a   : > { %v8736_v9 = vpop.permute.xlu1 %8735 }
 0xc5b   : > { %v9111_v38 = vcombine.low %v9103_v13, %v9110_v18  ;;  %v9112_v42 = vcombine.low %v8734_v39, %v8736_v9 }
 0xc5c   : > { %v8742_v55 = vpop.permute.xlu0 %8741 }
 0xc5d   : > { %9369 = vrot.lane.b32.xlu0 %v9111_v38, %s10550_s19  ;;  %v9120_v56 = vrot.slane %v9112_v42, %v13115_v47 }
 0xc5e   : > { %v8744_v3 = vpop.permute.xlu1 %8743 }
 0xc5f   : > { %v9163_v57 = vcombine.low %v8742_v55, %v8744_v3 }
 0xc60   : > { %v8770_v24 = vpop.permute.xlu0 %8769 }
 0xc61   : > { %v9171_v4 = vrot.slane %v9163_v57, %v13115_v47 }
 0xc62   : > { %v8772_v52 = vpop.permute.xlu1 %8771 }
 0xc63   : > { %v9249_v6 = vcombine.low %v8770_v24, %v8772_v52 }
 0xc64   : > { %v8778_v15 = vpop.permute.xlu0 %8777 }
 0xc65   : > { %v9263_v8 = vrot.slane %v9249_v6, %v13115_v47 }
 0xc66   : > { %v8780_v22 = vpop.permute.xlu1 %8779 }
 0xc67   : > { %v9264_v33 = vcombine.low %v9256_v54, %v9263_v8  ;;  %v9300_v5 = vcombine.low %v8778_v15, %v8780_v22 }
 0xc68   : > { %v8782_v63 = vpop.permute.xlu0 %8781 }
 0xc69   : > { %9387 = vrot.lane.b32.xlu1 %v9264_v33, %s10550_s19  ;;  %v9314_v2 = vrot.slane %v9300_v5, %v13115_v47 }
 0xc6a   : > { %v8784_v59 = vpop.permute.xlu1 %8783 }
 0xc6b   : > { %v9315_v40 = vcombine.low %v9307_v21, %v9314_v2  ;;  %v9316_v45 = vcombine.low %v8782_v63, %v8784_v59 }
 0xc6c   : > { %v8738_v10 = vpop.permute.xlu0 %8737 }
 0xc6d   : > { %v9324_v23 = vrot.slane %v9316_v45, %v13115_v47 }
 0xc6e   : > { %v8740_v28 = vpop.permute.xlu1 %8739 }
 0xc6f   : > { %v9113_v60 = vcombine.low %v8738_v10, %v8740_v28 }
 0xc70   : > { %v8746_v35 = vpop.permute.xlu0 %8745 }
 0xc71   : > { %v9127_v19 = vrot.slane %v9113_v60, %v13115_v47 }
 0xc72   : > { %v8748_v25 = vpop.permute.xlu1 %8747 }
 0xc73   : > { %v9128_v11 = vcombine.low %v9120_v56, %v9127_v19  ;;  %v9164_v32 = vcombine.low %v8746_v35, %v8748_v25 }
 0xc74   : > { %v8750_v20 = vpop.permute.xlu0 %8749 }
 0xc75   : > { %v9178_v0 = vrot.slane %v9164_v32, %v13115_v47  ;;  %9371 = vrot.lane.b32.xlu1 %v9128_v11, %s10550_s19 }
 0xc76   : > { %v8752_v17 = vpop.permute.xlu1 %8751 }
 0xc77   : > { %v9179_v51 = vcombine.low %v9171_v4, %v9178_v0  ;;  %v9180_v1 = vcombine.low %v8750_v20, %v8752_v17 }
 0xc78   : > { %v8786_v44 = vpop.permute.xlu0 %8785 }
 0xc79   : > { %9377 = vrot.lane.b32.xlu0 %v9179_v51, %s10550_s19  ;;  %v9188_v36 = vrot.slane %v9180_v1, %v13115_v47 }
 0xc7a   : > { %v8788_v62 = vpop.permute.xlu1 %8787 }
 0xc7b   : > { %v9317_v50 = vcombine.low %v8786_v44, %v8788_v62 }
 0xc7c   : > { %v8754_v26 = vpop.permute.xlu0 %8753 }
 0xc7d   : > { %9393 = vrot.lane.b32.xlu0 %v9315_v40, %s10550_s19  ;;  %v9331_v14 = vrot.slane %v9317_v50, %v13115_v47 }
 0xc7e   : > { %v8756_v48 = vpop.permute.xlu1 %8755 }
 0xc7f   : > { %v9181_v27 = vcombine.low %v8754_v26, %v8756_v48  ;;  %v9332_v16 = vcombine.low %v9324_v23, %v9331_v14 }
 0xc80   : > { %v9334_v12 = vpop.permute.xlu0 %9333 }
 0xc81   : > { %v9195_v43 = vrot.slane %v9181_v27, %v13115_v47  ;;  %9429 = vst.msk [vmem:[%s14334_s22] sm:$0xff] %vm2027_vm13, %v9334_v12 }
 0xc82   : > { %v9336_v46 = vpop.permute.xlu1 %9335 }
 0xc83   : > { %v9196_v41 = vcombine.low %v9188_v36, %v9195_v43  ;;  %9430 = vst.msk [vmem:[%s14334_s22 + $0x8] sm:$0xff] %vm2027_vm13, %v9336_v46 }
 0xc84   : > { %v9342_v34 = vpop.permute.xlu0 %9341 }
 0xc85   : > { %9433 = vst.msk [vmem:[%s14334_s22 + $0x20] sm:$0xff] %vm2027_vm13, %v9342_v34  ;;  %9379 = vrot.lane.b32.xlu1 %v9196_v41, %s10550_s19 }
 0xc86   : > { %v9344_v7 = vpop.permute.xlu1 %9343 }
 0xc87   : > { %9434 = vst.msk [vmem:[%s14334_s22 + $0x28] sm:$0xff] %vm2027_vm13, %v9344_v7 }
 0xc88   : > { %v9350_v31 = vpop.permute.xlu0 %9349 }
 0xc89   : > { %9437 = vst.msk [vmem:[%s14334_s22 + $0x40] sm:$0xff] %vm2027_vm13, %v9350_v31  ;;  %9395 = vrot.lane.b32.xlu1 %v9332_v16, %s10550_s19 }
 0xc8a   : > { %v9352_v58 = vpop.permute.xlu1 %9351 }
 0xc8b   : > { %9438 = vst.msk [vmem:[%s14334_s22 + $0x48] sm:$0xff] %vm2027_vm13, %v9352_v58 }
 0xc8c   : > { %v9358_v47 = vpop.permute.xlu0 %9357 }
 0xc8d   : > { %9441 = vst.msk [vmem:[%s14334_s22 + $0x60] sm:$0xff] %vm2027_vm13, %v9358_v47 }
 0xc8e   : > { %v9360_v53 = vpop.permute.xlu1 %9359 }
 0xc8f   : > { %9442 = vst.msk [vmem:[%s14334_s22 + $0x68] sm:$0xff] %vm2027_vm13, %v9360_v53 }
 0xc90   : > { %v9382_v49 = vpop.permute.xlu0 %9381 }
 0xc91   : > { %9453 = vst.msk [vmem:[%s14334_s22 + $0xc0] sm:$0xff] %vm2027_vm13, %v9382_v49 }
 0xc92   : > { %v9384_v29 = vpop.permute.xlu1 %9383 }
 0xc93   : > { %9454 = vst.msk [vmem:[%s14334_s22 + $0xc8] sm:$0xff] %vm2027_vm13, %v9384_v29 }
 0xc94   : > { %v9366_v61 = vpop.permute.xlu0 %9365 }
 0xc95   : > { %9445 = vst.msk [vmem:[%s14334_s22 + $0x80] sm:$0xff] %vm2027_vm13, %v9366_v61 }
 0xc96   : > { %v9368_v39 = vpop.permute.xlu1 %9367 }
 0xc97   : > { %9446 = vst.msk [vmem:[%s14334_s22 + $0x88] sm:$0xff] %vm2027_vm13, %v9368_v39 }
 0xc98   : > { %v9390_v13 = vpop.permute.xlu0 %9389 }
 0xc99   : > { %9457 = vst.msk [vmem:[%s14334_s22 + $0xe0] sm:$0xff] %vm2027_vm13, %v9390_v13 }
 0xc9a   : > { %v9392_v18 = vpop.permute.xlu1 %9391 }
 0xc9b   : > { %9458 = vst.msk [vmem:[%s14334_s22 + $0xe8] sm:$0xff] %vm2027_vm13, %v9392_v18 }
 0xc9c   : > { %v9374_v9 = vpop.permute.xlu0 %9373 }
 0xc9d   : > { %9449 = vst.msk [vmem:[%s14334_s22 + $0xa0] sm:$0xff] %vm2027_vm13, %v9374_v9 }
 0xc9e   : > { %v9376_v38 = vpop.permute.xlu1 %9375 }
 0xc9f   : > { %9450 = vst.msk [vmem:[%s14334_s22 + $0xa8] sm:$0xff] %vm2027_vm13, %v9376_v38 }
 0xca0   : > { %v9354_v55 = vpop.permute.xlu0 %9353 }
 0xca1   : > { %9439 = vst.msk [vmem:[%s14334_s22 + $0x50] sm:$0xff] %vm2027_vm13, %v9354_v55 }
 0xca2   : > { %v9356_v3 = vpop.permute.xlu1 %9355 }
 0xca3   : > { %9440 = vst.msk [vmem:[%s14334_s22 + $0x58] sm:$0xff] %vm2027_vm13, %v9356_v3 }
 0xca4   : > { %v9338_v24 = vpop.permute.xlu0 %9337 }
 0xca5   : > { %9431 = vst.msk [vmem:[%s14334_s22 + $0x10] sm:$0xff] %vm2027_vm13, %v9338_v24 }
 0xca7   : > { %v9340_v30 = vpop.permute.xlu1 %9339 }
 0xca8   : > { %9432 = vst.msk [vmem:[%s14334_s22 + $0x18] sm:$0xff] %vm2027_vm13, %v9340_v30  ;;  %v9362_v52 = vpop.permute.xlu0 %9361 }
 0xca9   : > { %9443 = vst.msk [vmem:[%s14334_s22 + $0x70] sm:$0xff] %vm2027_vm13, %v9362_v52 }
 0xcac   : > { %v9346_v6 = vpop.permute.xlu0 %9345 }
 0xcad   : > { %9435 = vst.msk [vmem:[%s14334_s22 + $0x30] sm:$0xff] %vm2027_vm13, %v9346_v6 }
 0xcb3   : > { %v9364_v15 = vpop.permute.xlu1 %9363 }
 0xcb4   : > { %9444 = vst.msk [vmem:[%s14334_s22 + $0x78] sm:$0xff] %vm2027_vm13, %v9364_v15 }
 0xcb7   : > { %v9348_v54 = vpop.permute.xlu1 %9347 }
 0xcb8   : > { %9436 = vst.msk [vmem:[%s14334_s22 + $0x38] sm:$0xff] %vm2027_vm13, %v9348_v54 }
 0xcc3   : > { %v9386_v8 = vpop.permute.xlu0 %9385 }
 0xcc4   : > { %9455 = vst.msk [vmem:[%s14334_s22 + $0xd0] sm:$0xff] %vm2027_vm13, %v9386_v8 }
 0xccf   : > { %v9370_v22 = vpop.permute.xlu0 %9369 }
 0xcd0   : > { %9447 = vst.msk [vmem:[%s14334_s22 + $0x90] sm:$0xff] %vm2027_vm13, %v9370_v22 }
 0xcdb   : > { %v9388_v33 = vpop.permute.xlu1 %9387 }
 0xcdc   : > { %9456 = vst.msk [vmem:[%s14334_s22 + $0xd8] sm:$0xff] %vm2027_vm13, %v9388_v33 }
 0xce7   : > { %v9372_v63 = vpop.permute.xlu1 %9371 }
 0xce8   : > { %9448 = vst.msk [vmem:[%s14334_s22 + $0x98] sm:$0xff] %vm2027_vm13, %v9372_v63 }
 0xceb   : > { %v9378_v59 = vpop.permute.xlu0 %9377 }
 0xcec   : > { %9451 = vst.msk [vmem:[%s14334_s22 + $0xb0] sm:$0xff] %vm2027_vm13, %v9378_v59 }
 0xcef   : > { %v9394_v10 = vpop.permute.xlu0 %9393 }
 0xcf0   : > { %9459 = vst.msk [vmem:[%s14334_s22 + $0xf0] sm:$0xff] %vm2027_vm13, %v9394_v10 }
 0xcf7   : > { %v9380_v42 = vpop.permute.xlu1 %9379 }
 0xcf8   : > { %9452 = vst.msk [vmem:[%s14334_s22 + $0xb8] sm:$0xff] %vm2027_vm13, %v9380_v42 }
 0xcfb   : > { %v9396_v28 = vpop.permute.xlu1 %9395 }
 0xcfc   : > { %9460 = vst.msk [vmem:[%s14334_s22 + $0xf8] sm:$0xff] %vm2027_vm13, %v9396_v28 }
 0xcfd PF: > { %s23_s25 = sadd.s32 1, %s10534_s25  }
 0xcfe   : > { %p20_p4 = scmp.ge.s32.totalorder %s23_s25, 4  }
 0xd00   :  { %22 = sbr.rel (!%p20_p4) target bundleno = 1 (0x1), region = 102 }

</bundles_post_ra>
